<compile_context>
chip_gen: v5e
topology: v5e:2x2
jax: 0.10.0
libtpu: 0.0.40
codegen_flags: <defaults>
</compile_context>

<pallas_src>
import functools

import numpy as np
import jax
import jax.numpy as jnp
from jax import lax
from jax.experimental import pallas as pl
from jax.experimental.pallas import tpu as pltpu

CNN_FILTERS = [32, 64, 128]
CNN_KERNEL_SIZES = [5, 3, 3]
CNN_POOL_SIZES = [2, 2, 2]
BN_EPS = 1e-5
HIDDEN = 128
NUM_LSTM_LAYERS = 2

OFF = 8                          # sublane-aligned halo offset for conv pads
_DMA_PREP_IDX = (11, 12, 15, 19)  # prep args staged via manual DMA (pl.ANY)


# ---------------------------------------------------------------------------
# The fused kernel
# ---------------------------------------------------------------------------
def _fused_kernel(
    # inputs ---------------------------------------------------------------
    x_ref,
    in_sc_ref, in_b_ref,
    w1_ref, c1s_ref, c1b_ref,
    w2_ref, c2s_ref, c2b_ref,
    w3_ref, c3s_ref, c3b_ref,
    wih1_hbm, wfused_hbm,
    lb1_ref, lb2_ref,
    wa1_hbm, ba1_ref, wa2_ref, ba2_ref,
    wf1_hbm, f1s_ref, f1b_ref, wf2_ref, f2b_ref,
    # output ---------------------------------------------------------------
    o_ref,
    # VMEM scratch ----------------------------------------------------------
    xp1_ref, xp2_ref, xp3_ref, seq2_ref,
    wih1_v, wfused_v, wa1_v, wf1_v, dma_sem,
    *, hidden, pool_sizes):

    Bp = x_ref.shape[0]                      # batch elements in this program
    H = hidden
    Hc = 4 * H

    # ---- start the LSTM/attention/FC weight DMAs now; they are hidden behind
    #      the conv stages and awaited right before first use. ---------------
    cp_wih1 = pltpu.make_async_copy(wih1_hbm, wih1_v, dma_sem.at[0])
    cp_wfus = pltpu.make_async_copy(wfused_hbm, wfused_v, dma_sem.at[1])
    cp_wa1 = pltpu.make_async_copy(wa1_hbm, wa1_v, dma_sem.at[2])
    cp_wf1 = pltpu.make_async_copy(wf1_hbm, wf1_v, dma_sem.at[3])
    cp_wih1.start()
    cp_wfus.start()
    cp_wa1.start()
    cp_wf1.start()

    # ---- input BatchNorm1d (eval), folded to scale/bias --------------------
    h = x_ref[...] * in_sc_ref[...] + in_b_ref[...]             # (Bp, S, F)

    # ---- conv stages: Conv1d(same) + BN(eval) + ReLU + MaxPool1d -----------
    def conv_stage(h3, xp_ref, w_ref, sc_ref, bc_ref, pool):
        L, Cin = h3.shape[1], h3.shape[2]
        K, Cout = w_ref.shape[0], w_ref.shape[2]
        pad = K // 2
        halo = xp_ref.shape[1] - OFF - L
        # zero only the halo rows; cast the body to bf16 ONCE.
        xp_ref[:, :OFF, :] = jnp.zeros((Bp, OFF, Cin), jnp.bfloat16)
        xp_ref[:, OFF + L:, :] = jnp.zeros((Bp, halo, Cin), jnp.bfloat16)
        xp_ref[:, OFF:OFF + L, :] = h3.astype(jnp.bfloat16)
        acc = jnp.zeros((Bp * L, Cout), jnp.float32)
        for k in range(K):                                      # static taps
            xk = xp_ref[:, OFF - pad + k:OFF - pad + k + L, :]  # (Bp, L, Cin)
            acc = acc + jnp.dot(xk.reshape(Bp * L, Cin), w_ref[k],
                                preferred_element_type=jnp.float32)
        y = jnp.maximum(acc * sc_ref[...] + bc_ref[...], 0.0)   # BN + ReLU
        Lo = L // pool
        y = y.reshape(Bp * Lo, pool, Cout).max(axis=1)          # MaxPool1d
        return y, Lo, Cout

    y, L1, C1 = conv_stage(h, xp1_ref, w1_ref, c1s_ref, c1b_ref, pool_sizes[0])
    y, L2, C2 = conv_stage(y.reshape(Bp, L1, C1), xp2_ref, w2_ref, c2s_ref,
                           c2b_ref, pool_sizes[1])
    y, T, _ = conv_stage(y.reshape(Bp, L2, C2), xp3_ref, w3_ref, c3s_ref,
                         c3b_ref, pool_sizes[2])
    # y: (Bp*T, 128), rows ordered (batch, time)

    # ---- two LSTM layers, wavefront-fused -----------------------------------
    cp_wih1.wait()
    # hoisted layer-1 input projection (off the serial recurrence)
    gx1 = jnp.dot(y.astype(jnp.bfloat16), wih1_v[...],
                  preferred_element_type=jnp.float32).reshape(Bp, T, Hc)
    b1 = lb1_ref[...]
    b2 = lb2_ref[...]

    def gate(g, c):
        i_g = jax.nn.sigmoid(g[:, 0:H])
        f_g = jax.nn.sigmoid(g[:, H:2 * H])
        g_g = jnp.tanh(g[:, 2 * H:3 * H])
        o_g = jax.nn.sigmoid(g[:, 3 * H:4 * H])
        c_n = f_g * c + i_g * g_g
        return o_g * jnp.tanh(c_n), c_n

    zero = jnp.zeros((Bp, H), jnp.float32)
    # prologue: layer-1, t=0 (zero initial state => no recurrent matmul)
    h1, c1 = gate(gx1[:, 0, :] + b1, zero)
    h2, c2 = zero, zero

    cp_wfus.wait()
    wfused = wfused_v[...]                                      # (2H, 8H) bf16

    # main wavefront: fused step s runs layer-1(t=s) and layer-2(t=s-1) with
    # ONE block-diagonal recurrent matmul [h1 | h2] @ [[whh1, wih2],[0, whh2]].
    for s in range(1, T):                                       # static unroll
        op = jnp.concatenate([h1, h2], axis=1).astype(jnp.bfloat16)
        r = jnp.dot(op, wfused, preferred_element_type=jnp.float32)
        g1 = gx1[:, s, :] + b1 + r[:, :Hc]
        g2 = b2 + r[:, Hc:]
        h1_new, c1 = gate(g1, c1)
        h2, c2 = gate(g2, c2)
        seq2_ref[(s - 1) * Bp:s * Bp, :] = h2                   # time-major
        h1 = h1_new
    # epilogue: layer-2, t=T-1
    op = jnp.concatenate([h1, h2], axis=1).astype(jnp.bfloat16)
    r2 = jnp.dot(op, wfused[:, Hc:], preferred_element_type=jnp.float32)
    h2, c2 = gate(b2 + r2, c2)
    seq2_ref[(T - 1) * Bp:T * Bp, :] = h2

    # ---- attention: Linear->Tanh->Linear->Softmax(time)->context -----------
    cp_wa1.wait()
    s2 = seq2_ref[...]                                          # (T*Bp, H)
    a = jnp.tanh(jnp.dot(s2.astype(jnp.bfloat16), wa1_v[...],
                         preferred_element_type=jnp.float32) + ba1_ref[...])
    sc = jnp.sum(a * wa2_ref[...], axis=1, keepdims=True) + ba2_ref[...]
    # softmax over time, vectorized over batch: a global max shift is valid
    # (softmax is shift-invariant per group); per-batch sums via a 0/1
    # selector matmul (rows are time-major: flat row = t*Bp + b).
    e = jnp.exp(sc - jnp.max(sc, keepdims=True))                # (T*Bp, 1)
    row_b = lax.broadcasted_iota(jnp.int32, (Bp, T * Bp), 1) % Bp
    sel = (row_b == lax.broadcasted_iota(jnp.int32, (Bp, T * Bp), 0)
           ).astype(jnp.float32)                                # (Bp, T*Bp)
    denom = jnp.dot(sel, e, preferred_element_type=jnp.float32)      # (Bp, 1)
    num = jnp.dot(sel, e * s2, preferred_element_type=jnp.float32)   # (Bp, H)
    ctx = num / denom

    # ---- fc head: Linear -> BN(eval) -> ReLU -> Linear -> Sigmoid ----------
    cp_wf1.wait()
    f = jnp.dot(ctx.astype(jnp.bfloat16), wf1_v[...],
                preferred_element_type=jnp.float32)
    f = jnp.maximum(f * f1s_ref[...] + f1b_ref[...], 0.0)
    out = jax.nn.sigmoid(jnp.sum(f * wf2_ref[...], axis=1, keepdims=True)
                         + f2b_ref[...])
    o_ref[0, :, :] = out


# ---------------------------------------------------------------------------
# One-time parameter massaging (transposes, BN folds, bf16 casts, LSTM fusion)
# ---------------------------------------------------------------------------
def prepare_params(p):
    assert len(p['lstm']) == NUM_LSTM_LAYERS == 2
    H = HIDDEN
    args = []
    in_sc = p['in_bn_gamma'] / jnp.sqrt(p['in_bn_var'] + BN_EPS)
    args.append(in_sc.reshape(1, -1))                                   # 0
    args.append((p['in_bn_beta'] - p['in_bn_mean'] * in_sc).reshape(1, -1))
    for i in range(len(CNN_FILTERS)):
        w = p['conv_w'][i]                                   # (Cout, Cin, K)
        args.append(jnp.transpose(w, (2, 1, 0)).astype(jnp.bfloat16))
        sc = p['bn_gamma'][i] / jnp.sqrt(p['bn_var'][i] + BN_EPS)
        args.append(sc.reshape(1, -1))
        args.append(((p['conv_b'][i] - p['bn_mean'][i]) * sc
                     + p['bn_beta'][i]).reshape(1, -1))
    l0, l1 = p['lstm'][0], p['lstm'][1]
    wih1 = l0['w_ih'].T                                      # (C3, 4H)
    whh1 = l0['w_hh'].T                                      # (H, 4H)
    wih2 = l1['w_ih'].T                                      # (H, 4H)
    whh2 = l1['w_hh'].T                                      # (H, 4H)
    args.append(wih1.astype(jnp.bfloat16))                   # 11 (DMA)
    wfused = jnp.concatenate(
        [jnp.concatenate([whh1, wih2], axis=1),
         jnp.concatenate([jnp.zeros((H, 4 * H), jnp.float32), whh2], axis=1)],
        axis=0)
    args.append(wfused.astype(jnp.bfloat16))                 # 12 (DMA)
    args.append((l0['b_ih'] + l0['b_hh']).reshape(1, -1))    # 13
    args.append((l1['b_ih'] + l1['b_hh']).reshape(1, -1))    # 14
    args.append(p['att_w1'].T.astype(jnp.bfloat16))          # 15 (DMA)
    args.append(p['att_b1'].reshape(1, -1))                  # 16
    args.append(p['att_w2'].reshape(1, -1))                  # 17
    args.append(p['att_b2'].reshape(1, 1))                   # 18
    args.append(p['fc_w1'].T.astype(jnp.bfloat16))           # 19 (DMA)
    fsc = p['fc_bn_gamma'] / jnp.sqrt(p['fc_bn_var'] + BN_EPS)
    args.append(fsc.reshape(1, -1))                          # 20
    args.append(((p['fc_b1'] - p['fc_bn_mean']) * fsc
                 + p['fc_bn_beta']).reshape(1, -1))          # 21
    args.append(p['fc_w2'].reshape(1, -1))                   # 22
    args.append(p['fc_b2'].reshape(1, 1))                    # 23
    return tuple(args)


# ---------------------------------------------------------------------------
# Wrapper: single fused pallas_call; batch split across TCs only on v7x
# ---------------------------------------------------------------------------
def _num_tensorcores():
    try:
        kind = jax.devices()[0].device_kind.lower()
        if "v7" in kind or "7x" in kind:      # v7x: 2 TensorCores per chip
            return 2
    except Exception:
        pass
    return 1                                   # v5e / v6e: single TensorCore


def model_forward(x, prep):
    B, S, F = x.shape
    H = HIDDEN
    assert S % (CNN_POOL_SIZES[0] * CNN_POOL_SIZES[1] * CNN_POOL_SIZES[2]) == 0
    L1 = S // CNN_POOL_SIZES[0]
    L2 = L1 // CNN_POOL_SIZES[1]
    T = L2 // CNN_POOL_SIZES[2]

    nc = _num_tensorcores()
    if B % nc != 0:
        nc = 1
    Bp = B // nc

    kernel = functools.partial(_fused_kernel, hidden=H,
                               pool_sizes=tuple(CNN_POOL_SIZES))

    dma_idx = set(_DMA_PREP_IDX)
    in_specs = [pl.BlockSpec((Bp, S, F), lambda i: (i, 0, 0))]
    for j, a in enumerate(prep):
        if j in dma_idx:
            in_specs.append(pl.BlockSpec(memory_space=pl.ANY))
        else:
            in_specs.append(
                pl.BlockSpec(a.shape, lambda i, n=a.ndim: (0,) * n))

    out = pl.pallas_call(
        kernel,
        grid=(nc,),
        out_shape=jax.ShapeDtypeStruct((nc, Bp, 1), jnp.float32),
        in_specs=in_specs,
        out_specs=pl.BlockSpec((1, Bp, 1), lambda i: (i, 0, 0)),
        scratch_shapes=[
            pltpu.VMEM((Bp, S + 2 * OFF, F), jnp.bfloat16),        # conv1 halo
            pltpu.VMEM((Bp, L1 + 2 * OFF, CNN_FILTERS[0]), jnp.bfloat16),
            pltpu.VMEM((Bp, L2 + 2 * OFF, CNN_FILTERS[1]), jnp.bfloat16),
            pltpu.VMEM((T * Bp, H), jnp.float32),                  # lstm2 seq
            pltpu.VMEM(prep[11].shape, jnp.bfloat16),              # wih1 stage
            pltpu.VMEM(prep[12].shape, jnp.bfloat16),              # wfused
            pltpu.VMEM(prep[15].shape, jnp.bfloat16),              # wa1
            pltpu.VMEM(prep[19].shape, jnp.bfloat16),              # wf1
            pltpu.SemaphoreType.DMA((4,)),
        ],
        compiler_params=pltpu.CompilerParams(
            dimension_semantics=("parallel",)),
    )(x, *prep)
    return out.reshape(B, 1)


# ---------------------------------------------------------------------------
# Pure-JAX reference for correctness check
# ---------------------------------------------------------------------------
def reference_forward(x, p):
    h = ((x - p['in_bn_mean'])
         * (p['in_bn_gamma'] / jnp.sqrt(p['in_bn_var'] + BN_EPS))
         + p['in_bn_beta'])
    for i in range(len(CNN_FILTERS)):
        w = p['conv_w'][i]
        K = w.shape[2]
        pad = K // 2
        pool = CNN_POOL_SIZES[i]
        B, L, _ = h.shape
        hp = jnp.pad(h, ((0, 0), (pad, pad), (0, 0)))
        out = jnp.zeros((B, L, w.shape[0]), jnp.float32)
        for k in range(K):
            out = out + jnp.einsum('blc,oc->blo', hp[:, k:k + L, :], w[:, :, k])
        out = out + p['conv_b'][i]
        sc = p['bn_gamma'][i] / jnp.sqrt(p['bn_var'][i] + BN_EPS)
        out = (out - p['bn_mean'][i]) * sc + p['bn_beta'][i]
        out = jnp.maximum(out, 0.0)
        h = out.reshape(B, L // pool, pool, -1).max(axis=2)

    seq = h
    H = HIDDEN
    for lp in p['lstm']:
        B, T, _ = seq.shape
        hh = jnp.zeros((B, H), jnp.float32)
        cc = jnp.zeros((B, H), jnp.float32)
        outs = []
        for t in range(T):
            g = (seq[:, t, :] @ lp['w_ih'].T + hh @ lp['w_hh'].T
                 + lp['b_ih'] + lp['b_hh'])
            i_g = jax.nn.sigmoid(g[:, :H])
            f_g = jax.nn.sigmoid(g[:, H:2 * H])
            g_g = jnp.tanh(g[:, 2 * H:3 * H])
            o_g = jax.nn.sigmoid(g[:, 3 * H:])
            cc = f_g * cc + i_g * g_g
            hh = o_g * jnp.tanh(cc)
            outs.append(hh)
        seq = jnp.stack(outs, axis=1)

    a = jnp.tanh(seq @ p['att_w1'].T + p['att_b1'])
    sc = a @ p['att_w2'].T + p['att_b2']
    w = jax.nn.softmax(sc, axis=1)
    ctx = jnp.sum(w * seq, axis=1)
    h1 = ctx @ p['fc_w1'].T + p['fc_b1']
    s1 = p['fc_bn_gamma'] / jnp.sqrt(p['fc_bn_var'] + BN_EPS)
    h1 = (h1 - p['fc_bn_mean']) * s1 + p['fc_bn_beta']
    h1 = jnp.maximum(h1, 0.0)
    return jax.nn.sigmoid(h1 @ p['fc_w2'].T + p['fc_b2'])


# ---------------------------------------------------------------------------
# Deterministic parameter initialization (synthetic; matches module shapes)
# ---------------------------------------------------------------------------
def make_params(key, input_size=9, hidden_size=HIDDEN):
    ks = jax.random.split(key, 64)
    it = iter(ks)

    def nrm(shape, scale=0.1):
        return scale * jax.random.normal(next(it), shape, dtype=jnp.float32)

    p = {}
    F, H = input_size, hidden_size
    p['in_bn_gamma'] = 1.0 + nrm((F,), 0.05)
    p['in_bn_beta'] = nrm((F,), 0.05)
    p['in_bn_mean'] = nrm((F,), 0.05)
    p['in_bn_var'] = 1.0 + jnp.abs(nrm((F,), 0.05))

    p['conv_w'], p['conv_b'] = [], []
    p['bn_gamma'], p['bn_beta'], p['bn_mean'], p['bn_var'] = [], [], [], []
    cin = F
    for cout, k in zip(CNN_FILTERS, CNN_KERNEL_SIZES):
        p['conv_w'].append(nrm((cout, cin, k), 0.1))
        p['conv_b'].append(nrm((cout,), 0.05))
        p['bn_gamma'].append(1.0 + nrm((cout,), 0.05))
        p['bn_beta'].append(nrm((cout,), 0.05))
        p['bn_mean'].append(nrm((cout,), 0.05))
        p['bn_var'].append(1.0 + jnp.abs(nrm((cout,), 0.05)))
        cin = cout

    p['lstm'] = []
    in_sz = CNN_FILTERS[-1]
    for _ in range(NUM_LSTM_LAYERS):
        p['lstm'].append(dict(
            w_ih=nrm((4 * H, in_sz), 0.05),
            w_hh=nrm((4 * H, H), 0.05),
            b_ih=nrm((4 * H,), 0.05),
            b_hh=nrm((4 * H,), 0.05)))
        in_sz = H

    p['att_w1'] = nrm((H, H), 0.05)
    p['att_b1'] = nrm((H,), 0.05)
    p['att_w2'] = nrm((1, H), 0.05)
    p['att_b2'] = nrm((1,), 0.05)

    p['fc_w1'] = nrm((64, H), 0.05)
    p['fc_b1'] = nrm((64,), 0.05)
    p['fc_bn_gamma'] = 1.0 + nrm((64,), 0.05)
    p['fc_bn_beta'] = nrm((64,), 0.05)
    p['fc_bn_mean'] = nrm((64,), 0.05)
    p['fc_bn_var'] = 1.0 + jnp.abs(nrm((64,), 0.05))
    p['fc_w2'] = nrm((1, 64), 0.05)
    p['fc_b2'] = nrm((1,), 0.05)
    return p


if __name__ == "__main__":
    key = jax.random.PRNGKey(0)
    kx, kp = jax.random.split(key)

    B, S, F = 2, 32, 9            # seq=32 survives the 3 pools -> T=4
    x = jax.random.normal(kx, (B, S, F), dtype=jnp.float32)
    params = make_params(kp, input_size=F, hidden_size=HIDDEN)
    prep = prepare_params(params)            # one-time, off the hot path

    out = jax.block_until_ready(model_forward(x, prep))
    ref = reference_forward(x, params)

    assert out.shape == (B, 1), out.shape
    if not np.allclose(np.asarray(out), np.asarray(ref), atol=2e-2, rtol=2e-2):
        raise AssertionError(f"Pallas/ref mismatch:\n{out}\nvs\n{ref}")
    print("KERNEL_OK")
</pallas_src>

<mosaic_0001>
module attributes {stable_mosaic.version = 11 : i64} {
  func.func @_fused_kernel(%arg0: i32, %arg1: memref<2x32x9xf32, #tpu.memory_space<vmem>>, %arg2: memref<1x9xf32, #tpu.memory_space<vmem>>, %arg3: memref<1x9xf32, #tpu.memory_space<vmem>>, %arg4: memref<5x9x32xbf16, #tpu.memory_space<vmem>>, %arg5: memref<1x32xf32, #tpu.memory_space<vmem>>, %arg6: memref<1x32xf32, #tpu.memory_space<vmem>>, %arg7: memref<3x32x64xbf16, #tpu.memory_space<vmem>>, %arg8: memref<1x64xf32, #tpu.memory_space<vmem>>, %arg9: memref<1x64xf32, #tpu.memory_space<vmem>>, %arg10: memref<3x64x128xbf16, #tpu.memory_space<vmem>>, %arg11: memref<1x128xf32, #tpu.memory_space<vmem>>, %arg12: memref<1x128xf32, #tpu.memory_space<vmem>>, %arg13: memref<128x512xbf16, #tpu.memory_space<any>>, %arg14: memref<256x1024xbf16, #tpu.memory_space<any>>, %arg15: memref<1x512xf32, #tpu.memory_space<vmem>>, %arg16: memref<1x512xf32, #tpu.memory_space<vmem>>, %arg17: memref<128x128xbf16, #tpu.memory_space<any>>, %arg18: memref<1x128xf32, #tpu.memory_space<vmem>>, %arg19: memref<1x128xf32, #tpu.memory_space<vmem>>, %arg20: memref<1x1xf32, #tpu.memory_space<vmem>>, %arg21: memref<128x64xbf16, #tpu.memory_space<any>>, %arg22: memref<1x64xf32, #tpu.memory_space<vmem>>, %arg23: memref<1x64xf32, #tpu.memory_space<vmem>>, %arg24: memref<1x64xf32, #tpu.memory_space<vmem>>, %arg25: memref<1x1xf32, #tpu.memory_space<vmem>>, %arg26: memref<1x2x1xf32, #tpu.memory_space<vmem>>, %arg27: memref<2x48x9xbf16, #tpu.memory_space<vmem>>, %arg28: memref<2x32x32xbf16, #tpu.memory_space<vmem>>, %arg29: memref<2x24x64xbf16, #tpu.memory_space<vmem>>, %arg30: memref<8x128xf32, #tpu.memory_space<vmem>>, %arg31: memref<128x512xbf16, #tpu.memory_space<vmem>>, %arg32: memref<256x1024xbf16, #tpu.memory_space<vmem>>, %arg33: memref<128x128xbf16, #tpu.memory_space<vmem>>, %arg34: memref<128x64xbf16, #tpu.memory_space<vmem>>, %arg35: memref<4x!tpu.dma_semaphore, #tpu.memory_space<semaphore_mem>>) attributes {dimension_semantics = [#tpu.dimension_semantics<parallel>], iteration_bounds = array<i64: 1>, scalar_prefetch = 0 : i64, scratch_operands = 9 : i64, tpu.core_type = #tpu.core_type<tc>, window_params = [{transform_indices = @transform_0, window_bounds = array<i64: 2, 32, 9>}, {pipeline_mode = #tpu.pipeline_mode<synchronous>, transform_indices = @transform_1, window_bounds = array<i64: 1, 9>}, {pipeline_mode = #tpu.pipeline_mode<synchronous>, transform_indices = @transform_2, window_bounds = array<i64: 1, 9>}, {pipeline_mode = #tpu.pipeline_mode<synchronous>, transform_indices = @transform_3, window_bounds = array<i64: 5, 9, 32>}, {pipeline_mode = #tpu.pipeline_mode<synchronous>, transform_indices = @transform_4, window_bounds = array<i64: 1, 32>}, {pipeline_mode = #tpu.pipeline_mode<synchronous>, transform_indices = @transform_5, window_bounds = array<i64: 1, 32>}, {pipeline_mode = #tpu.pipeline_mode<synchronous>, transform_indices = @transform_6, window_bounds = array<i64: 3, 32, 64>}, {pipeline_mode = #tpu.pipeline_mode<synchronous>, transform_indices = @transform_7, window_bounds = array<i64: 1, 64>}, {pipeline_mode = #tpu.pipeline_mode<synchronous>, transform_indices = @transform_8, window_bounds = array<i64: 1, 64>}, {pipeline_mode = #tpu.pipeline_mode<synchronous>, transform_indices = @transform_9, window_bounds = array<i64: 3, 64, 128>}, {pipeline_mode = #tpu.pipeline_mode<synchronous>, transform_indices = @transform_10, window_bounds = array<i64: 1, 128>}, {pipeline_mode = #tpu.pipeline_mode<synchronous>, transform_indices = @transform_11, window_bounds = array<i64: 1, 128>}, {}, {}, {pipeline_mode = #tpu.pipeline_mode<synchronous>, transform_indices = @transform_14, window_bounds = array<i64: 1, 512>}, {pipeline_mode = #tpu.pipeline_mode<synchronous>, transform_indices = @transform_15, window_bounds = array<i64: 1, 512>}, {}, {pipeline_mode = #tpu.pipeline_mode<synchronous>, transform_indices = @transform_17, window_bounds = array<i64: 1, 128>}, {pipeline_mode = #tpu.pipeline_mode<synchronous>, transform_indices = @transform_18, window_bounds = array<i64: 1, 128>}, {pipeline_mode = #tpu.pipeline_mode<synchronous>, transform_indices = @transform_19, window_bounds = array<i64: 1, 1>}, {}, {pipeline_mode = #tpu.pipeline_mode<synchronous>, transform_indices = @transform_21, window_bounds = array<i64: 1, 64>}, {pipeline_mode = #tpu.pipeline_mode<synchronous>, transform_indices = @transform_22, window_bounds = array<i64: 1, 64>}, {pipeline_mode = #tpu.pipeline_mode<synchronous>, transform_indices = @transform_23, window_bounds = array<i64: 1, 64>}, {pipeline_mode = #tpu.pipeline_mode<synchronous>, transform_indices = @transform_24, window_bounds = array<i64: 1, 1>}, {transform_indices = @transform_25, window_bounds = array<i64: 1, 2, 1>}]} {
    %c0_i32 = arith.constant 0 : i32
    %0 = tpu.memref_slice %arg35[%c0_i32] : memref<4x!tpu.dma_semaphore, #tpu.memory_space<semaphore_mem>> -> memref<1x!tpu.dma_semaphore, #tpu.memory_space<semaphore_mem>>
    %1 = tpu.memref_squeeze %0 : memref<1x!tpu.dma_semaphore, #tpu.memory_space<semaphore_mem>> -> memref<!tpu.dma_semaphore, #tpu.memory_space<semaphore_mem>>
    tpu.enqueue_dma source(%arg13 : memref<128x512xbf16, #tpu.memory_space<any>>) target(%arg31 : memref<128x512xbf16, #tpu.memory_space<vmem>>) target_semaphore(%1 : memref<!tpu.dma_semaphore, #tpu.memory_space<semaphore_mem>>)
    %c1_i32 = arith.constant 1 : i32
    %2 = tpu.memref_slice %arg35[%c1_i32] : memref<4x!tpu.dma_semaphore, #tpu.memory_space<semaphore_mem>> -> memref<1x!tpu.dma_semaphore, #tpu.memory_space<semaphore_mem>>
    %3 = tpu.memref_squeeze %2 : memref<1x!tpu.dma_semaphore, #tpu.memory_space<semaphore_mem>> -> memref<!tpu.dma_semaphore, #tpu.memory_space<semaphore_mem>>
    tpu.enqueue_dma source(%arg14 : memref<256x1024xbf16, #tpu.memory_space<any>>) target(%arg32 : memref<256x1024xbf16, #tpu.memory_space<vmem>>) target_semaphore(%3 : memref<!tpu.dma_semaphore, #tpu.memory_space<semaphore_mem>>)
    %c2_i32 = arith.constant 2 : i32
    %4 = tpu.memref_slice %arg35[%c2_i32] : memref<4x!tpu.dma_semaphore, #tpu.memory_space<semaphore_mem>> -> memref<1x!tpu.dma_semaphore, #tpu.memory_space<semaphore_mem>>
    %5 = tpu.memref_squeeze %4 : memref<1x!tpu.dma_semaphore, #tpu.memory_space<semaphore_mem>> -> memref<!tpu.dma_semaphore, #tpu.memory_space<semaphore_mem>>
    tpu.enqueue_dma source(%arg17 : memref<128x128xbf16, #tpu.memory_space<any>>) target(%arg33 : memref<128x128xbf16, #tpu.memory_space<vmem>>) target_semaphore(%5 : memref<!tpu.dma_semaphore, #tpu.memory_space<semaphore_mem>>)
    %c3_i32 = arith.constant 3 : i32
    %6 = tpu.memref_slice %arg35[%c3_i32] : memref<4x!tpu.dma_semaphore, #tpu.memory_space<semaphore_mem>> -> memref<1x!tpu.dma_semaphore, #tpu.memory_space<semaphore_mem>>
    %7 = tpu.memref_squeeze %6 : memref<1x!tpu.dma_semaphore, #tpu.memory_space<semaphore_mem>> -> memref<!tpu.dma_semaphore, #tpu.memory_space<semaphore_mem>>
    tpu.enqueue_dma source(%arg21 : memref<128x64xbf16, #tpu.memory_space<any>>) target(%arg34 : memref<128x64xbf16, #tpu.memory_space<vmem>>) target_semaphore(%7 : memref<!tpu.dma_semaphore, #tpu.memory_space<semaphore_mem>>)
    %c0 = arith.constant 0 : index
    %c0_0 = arith.constant 0 : index
    %c0_1 = arith.constant 0 : index
    %8 = vector.load %arg1[%c0, %c0_0, %c0_1] : memref<2x32x9xf32, #tpu.memory_space<vmem>>, vector<2x32x9xf32>
    %c0_2 = arith.constant 0 : index
    %c0_3 = arith.constant 0 : index
    %9 = vector.load %arg2[%c0_2, %c0_3] : memref<1x9xf32, #tpu.memory_space<vmem>>, vector<1x9xf32>
    %10 = vector.shape_cast %9 : vector<1x9xf32> to vector<1x1x9xf32>
    %11 = vector.broadcast %10 : vector<1x1x9xf32> to vector<2x32x9xf32>
    %12 = arith.mulf %8, %11 : vector<2x32x9xf32>
    %c0_4 = arith.constant 0 : index
    %c0_5 = arith.constant 0 : index
    %13 = vector.load %arg3[%c0_4, %c0_5] : memref<1x9xf32, #tpu.memory_space<vmem>>, vector<1x9xf32>
    %14 = vector.shape_cast %13 : vector<1x9xf32> to vector<1x1x9xf32>
    %15 = vector.broadcast %14 : vector<1x1x9xf32> to vector<2x32x9xf32>
    %16 = arith.addf %12, %15 : vector<2x32x9xf32>
    %cst = arith.constant 0.000000e+00 : bf16
    %17 = vector.broadcast %cst : bf16 to vector<2x8x9xbf16>
    %c0_6 = arith.constant 0 : index
    %c0_7 = arith.constant 0 : index
    %c0_8 = arith.constant 0 : index
    %18 = vector.load %arg27[%c0_6, %c0_7, %c0_8] : memref<2x48x9xbf16, #tpu.memory_space<vmem>>, vector<2x8x9xbf16>
    tpu.vector_store %arg27[%c0_6, %c0_7, %c0_8], %17 {strides = array<i32>} : memref<2x48x9xbf16, #tpu.memory_space<vmem>>, vector<2x8x9xbf16>,
    %cst_9 = arith.constant 0.000000e+00 : bf16
    %19 = vector.broadcast %cst_9 : bf16 to vector<2x8x9xbf16>
    %c0_10 = arith.constant 0 : index
    %c40 = arith.constant 40 : index
    %c0_11 = arith.constant 0 : index
    %20 = vector.load %arg27[%c0_10, %c40, %c0_11] : memref<2x48x9xbf16, #tpu.memory_space<vmem>>, vector<2x8x9xbf16>
    tpu.vector_store %arg27[%c0_10, %c40, %c0_11], %19 {strides = array<i32>} : memref<2x48x9xbf16, #tpu.memory_space<vmem>>, vector<2x8x9xbf16>,
    %21 = arith.truncf %16 : vector<2x32x9xf32> to vector<2x32x9xbf16>
    %c0_12 = arith.constant 0 : index
    %c8 = arith.constant 8 : index
    %c0_13 = arith.constant 0 : index
    %22 = vector.load %arg27[%c0_12, %c8, %c0_13] : memref<2x48x9xbf16, #tpu.memory_space<vmem>>, vector<2x32x9xbf16>
    tpu.vector_store %arg27[%c0_12, %c8, %c0_13], %21 {strides = array<i32>} : memref<2x48x9xbf16, #tpu.memory_space<vmem>>, vector<2x32x9xbf16>,
    %cst_14 = arith.constant 0.000000e+00 : f32
    %23 = vector.broadcast %cst_14 : f32 to vector<64x32xf32>
    %c0_15 = arith.constant 0 : index
    %c6 = arith.constant 6 : index
    %c0_16 = arith.constant 0 : index
    %24 = vector.load %arg27[%c0_15, %c6, %c0_16] : memref<2x48x9xbf16, #tpu.memory_space<vmem>>, vector<2x32x9xbf16>
    %25 = vector.shape_cast %24 : vector<2x32x9xbf16> to vector<64x9xbf16>
    %c0_17 = arith.constant 0 : index
    %c0_18 = arith.constant 0 : index
    %c0_19 = arith.constant 0 : index
    %26 = vector.load %arg4[%c0_17, %c0_18, %c0_19] : memref<5x9x32xbf16, #tpu.memory_space<vmem>>, vector<1x9x32xbf16>
    %27 = vector.shape_cast %26 : vector<1x9x32xbf16> to vector<9x32xbf16>
    %cst_20 = arith.constant dense<0.000000e+00> : vector<64x32xf32>
    %28 = tpu.matmul %25, %27, %cst_20 {dimension_numbers = #tpu.dot_dimension_numbers<[1], [0], [0], [1], [0, 0, 1, 1], [], []>} : vector<64x9xbf16>, vector<9x32xbf16>, vector<64x32xf32> -> vector<64x32xf32>
    %29 = arith.addf %23, %28 : vector<64x32xf32>
    %c0_21 = arith.constant 0 : index
    %c7 = arith.constant 7 : index
    %c0_22 = arith.constant 0 : index
    %30 = vector.load %arg27[%c0_21, %c7, %c0_22] : memref<2x48x9xbf16, #tpu.memory_space<vmem>>, vector<2x32x9xbf16>
    %31 = vector.shape_cast %30 : vector<2x32x9xbf16> to vector<64x9xbf16>
    %c1 = arith.constant 1 : index
    %c0_23 = arith.constant 0 : index
    %c0_24 = arith.constant 0 : index
    %32 = vector.load %arg4[%c1, %c0_23, %c0_24] : memref<5x9x32xbf16, #tpu.memory_space<vmem>>, vector<1x9x32xbf16>
    %33 = vector.shape_cast %32 : vector<1x9x32xbf16> to vector<9x32xbf16>
    %cst_25 = arith.constant dense<0.000000e+00> : vector<64x32xf32>
    %34 = tpu.matmul %31, %33, %cst_25 {dimension_numbers = #tpu.dot_dimension_numbers<[1], [0], [0], [1], [0, 0, 1, 1], [], []>} : vector<64x9xbf16>, vector<9x32xbf16>, vector<64x32xf32> -> vector<64x32xf32>
    %35 = arith.addf %29, %34 : vector<64x32xf32>
    %c0_26 = arith.constant 0 : index
    %c8_27 = arith.constant 8 : index
    %c0_28 = arith.constant 0 : index
    %36 = vector.load %arg27[%c0_26, %c8_27, %c0_28] : memref<2x48x9xbf16, #tpu.memory_space<vmem>>, vector<2x32x9xbf16>
    %37 = vector.shape_cast %36 : vector<2x32x9xbf16> to vector<64x9xbf16>
    %c2 = arith.constant 2 : index
    %c0_29 = arith.constant 0 : index
    %c0_30 = arith.constant 0 : index
    %38 = vector.load %arg4[%c2, %c0_29, %c0_30] : memref<5x9x32xbf16, #tpu.memory_space<vmem>>, vector<1x9x32xbf16>
    %39 = vector.shape_cast %38 : vector<1x9x32xbf16> to vector<9x32xbf16>
    %cst_31 = arith.constant dense<0.000000e+00> : vector<64x32xf32>
    %40 = tpu.matmul %37, %39, %cst_31 {dimension_numbers = #tpu.dot_dimension_numbers<[1], [0], [0], [1], [0, 0, 1, 1], [], []>} : vector<64x9xbf16>, vector<9x32xbf16>, vector<64x32xf32> -> vector<64x32xf32>
    %41 = arith.addf %35, %40 : vector<64x32xf32>
    %c0_32 = arith.constant 0 : index
    %c9 = arith.constant 9 : index
    %c0_33 = arith.constant 0 : index
    %42 = vector.load %arg27[%c0_32, %c9, %c0_33] : memref<2x48x9xbf16, #tpu.memory_space<vmem>>, vector<2x32x9xbf16>
    %43 = vector.shape_cast %42 : vector<2x32x9xbf16> to vector<64x9xbf16>
    %c3 = arith.constant 3 : index
    %c0_34 = arith.constant 0 : index
    %c0_35 = arith.constant 0 : index
    %44 = vector.load %arg4[%c3, %c0_34, %c0_35] : memref<5x9x32xbf16, #tpu.memory_space<vmem>>, vector<1x9x32xbf16>
    %45 = vector.shape_cast %44 : vector<1x9x32xbf16> to vector<9x32xbf16>
    %cst_36 = arith.constant dense<0.000000e+00> : vector<64x32xf32>
    %46 = tpu.matmul %43, %45, %cst_36 {dimension_numbers = #tpu.dot_dimension_numbers<[1], [0], [0], [1], [0, 0, 1, 1], [], []>} : vector<64x9xbf16>, vector<9x32xbf16>, vector<64x32xf32> -> vector<64x32xf32>
    %47 = arith.addf %41, %46 : vector<64x32xf32>
    %c0_37 = arith.constant 0 : index
    %c10 = arith.constant 10 : index
    %c0_38 = arith.constant 0 : index
    %48 = vector.load %arg27[%c0_37, %c10, %c0_38] : memref<2x48x9xbf16, #tpu.memory_space<vmem>>, vector<2x32x9xbf16>
    %49 = vector.shape_cast %48 : vector<2x32x9xbf16> to vector<64x9xbf16>
    %c4 = arith.constant 4 : index
    %c0_39 = arith.constant 0 : index
    %c0_40 = arith.constant 0 : index
    %50 = vector.load %arg4[%c4, %c0_39, %c0_40] : memref<5x9x32xbf16, #tpu.memory_space<vmem>>, vector<1x9x32xbf16>
    %51 = vector.shape_cast %50 : vector<1x9x32xbf16> to vector<9x32xbf16>
    %cst_41 = arith.constant dense<0.000000e+00> : vector<64x32xf32>
    %52 = tpu.matmul %49, %51, %cst_41 {dimension_numbers = #tpu.dot_dimension_numbers<[1], [0], [0], [1], [0, 0, 1, 1], [], []>} : vector<64x9xbf16>, vector<9x32xbf16>, vector<64x32xf32> -> vector<64x32xf32>
    %53 = arith.addf %47, %52 : vector<64x32xf32>
    %c0_42 = arith.constant 0 : index
    %c0_43 = arith.constant 0 : index
    %54 = vector.load %arg5[%c0_42, %c0_43] : memref<1x32xf32, #tpu.memory_space<vmem>>, vector<1x32xf32>
    %55 = vector.broadcast %54 : vector<1x32xf32> to vector<64x32xf32>
    %56 = arith.mulf %53, %55 : vector<64x32xf32>
    %c0_44 = arith.constant 0 : index
    %c0_45 = arith.constant 0 : index
    %57 = vector.load %arg6[%c0_44, %c0_45] : memref<1x32xf32, #tpu.memory_space<vmem>>, vector<1x32xf32>
    %58 = vector.broadcast %57 : vector<1x32xf32> to vector<64x32xf32>
    %59 = arith.addf %56, %58 : vector<64x32xf32>
    %cst_46 = arith.constant 0.000000e+00 : f32
    %60 = vector.broadcast %cst_46 : f32 to vector<64x32xf32>
    %61 = arith.maximumf %59, %60 : vector<64x32xf32>
    %62 = vector.shape_cast %61 : vector<64x32xf32> to vector<32x2x32xf32>
    %cst_47 = arith.constant dense<0xFF800000> : vector<32x32xf32>
    %63 = vector.multi_reduction <maximumf>, %62, %cst_47 [1] : vector<32x2x32xf32> to vector<32x32xf32>
    %64 = vector.shape_cast %63 : vector<32x32xf32> to vector<2x16x32xf32>
    %cst_48 = arith.constant 0.000000e+00 : bf16
    %65 = vector.broadcast %cst_48 : bf16 to vector<2x8x32xbf16>
    %c0_49 = arith.constant 0 : index
    %c0_50 = arith.constant 0 : index
    %c0_51 = arith.constant 0 : index
    %66 = vector.load %arg28[%c0_49, %c0_50, %c0_51] : memref<2x32x32xbf16, #tpu.memory_space<vmem>>, vector<2x8x32xbf16>
    tpu.vector_store %arg28[%c0_49, %c0_50, %c0_51], %65 {strides = array<i32>} : memref<2x32x32xbf16, #tpu.memory_space<vmem>>, vector<2x8x32xbf16>,
    %cst_52 = arith.constant 0.000000e+00 : bf16
    %67 = vector.broadcast %cst_52 : bf16 to vector<2x8x32xbf16>
    %c0_53 = arith.constant 0 : index
    %c24 = arith.constant 24 : index
    %c0_54 = arith.constant 0 : index
    %68 = vector.load %arg28[%c0_53, %c24, %c0_54] : memref<2x32x32xbf16, #tpu.memory_space<vmem>>, vector<2x8x32xbf16>
    tpu.vector_store %arg28[%c0_53, %c24, %c0_54], %67 {strides = array<i32>} : memref<2x32x32xbf16, #tpu.memory_space<vmem>>, vector<2x8x32xbf16>,
    %69 = arith.truncf %64 : vector<2x16x32xf32> to vector<2x16x32xbf16>
    %c0_55 = arith.constant 0 : index
    %c8_56 = arith.constant 8 : index
    %c0_57 = arith.constant 0 : index
    %70 = vector.load %arg28[%c0_55, %c8_56, %c0_57] : memref<2x32x32xbf16, #tpu.memory_space<vmem>>, vector<2x16x32xbf16>
    tpu.vector_store %arg28[%c0_55, %c8_56, %c0_57], %69 {strides = array<i32>} : memref<2x32x32xbf16, #tpu.memory_space<vmem>>, vector<2x16x32xbf16>,
    %cst_58 = arith.constant 0.000000e+00 : f32
    %71 = vector.broadcast %cst_58 : f32 to vector<32x64xf32>
    %c0_59 = arith.constant 0 : index
    %c7_60 = arith.constant 7 : index
    %c0_61 = arith.constant 0 : index
    %72 = vector.load %arg28[%c0_59, %c7_60, %c0_61] : memref<2x32x32xbf16, #tpu.memory_space<vmem>>, vector<2x16x32xbf16>
    %73 = vector.shape_cast %72 : vector<2x16x32xbf16> to vector<32x32xbf16>
    %c0_62 = arith.constant 0 : index
    %c0_63 = arith.constant 0 : index
    %c0_64 = arith.constant 0 : index
    %74 = vector.load %arg7[%c0_62, %c0_63, %c0_64] : memref<3x32x64xbf16, #tpu.memory_space<vmem>>, vector<1x32x64xbf16>
    %75 = vector.shape_cast %74 : vector<1x32x64xbf16> to vector<32x64xbf16>
    %cst_65 = arith.constant dense<0.000000e+00> : vector<32x64xf32>
    %76 = tpu.matmul %73, %75, %cst_65 {dimension_numbers = #tpu.dot_dimension_numbers<[1], [0], [0], [1], [0, 0, 1, 1], [], []>} : vector<32x32xbf16>, vector<32x64xbf16>, vector<32x64xf32> -> vector<32x64xf32>
    %77 = arith.addf %71, %76 : vector<32x64xf32>
    %c0_66 = arith.constant 0 : index
    %c8_67 = arith.constant 8 : index
    %c0_68 = arith.constant 0 : index
    %78 = vector.load %arg28[%c0_66, %c8_67, %c0_68] : memref<2x32x32xbf16, #tpu.memory_space<vmem>>, vector<2x16x32xbf16>
    %79 = vector.shape_cast %78 : vector<2x16x32xbf16> to vector<32x32xbf16>
    %c1_69 = arith.constant 1 : index
    %c0_70 = arith.constant 0 : index
    %c0_71 = arith.constant 0 : index
    %80 = vector.load %arg7[%c1_69, %c0_70, %c0_71] : memref<3x32x64xbf16, #tpu.memory_space<vmem>>, vector<1x32x64xbf16>
    %81 = vector.shape_cast %80 : vector<1x32x64xbf16> to vector<32x64xbf16>
    %cst_72 = arith.constant dense<0.000000e+00> : vector<32x64xf32>
    %82 = tpu.matmul %79, %81, %cst_72 {dimension_numbers = #tpu.dot_dimension_numbers<[1], [0], [0], [1], [0, 0, 1, 1], [], []>} : vector<32x32xbf16>, vector<32x64xbf16>, vector<32x64xf32> -> vector<32x64xf32>
    %83 = arith.addf %77, %82 : vector<32x64xf32>
    %c0_73 = arith.constant 0 : index
    %c9_74 = arith.constant 9 : index
    %c0_75 = arith.constant 0 : index
    %84 = vector.load %arg28[%c0_73, %c9_74, %c0_75] : memref<2x32x32xbf16, #tpu.memory_space<vmem>>, vector<2x16x32xbf16>
    %85 = vector.shape_cast %84 : vector<2x16x32xbf16> to vector<32x32xbf16>
    %c2_76 = arith.constant 2 : index
    %c0_77 = arith.constant 0 : index
    %c0_78 = arith.constant 0 : index
    %86 = vector.load %arg7[%c2_76, %c0_77, %c0_78] : memref<3x32x64xbf16, #tpu.memory_space<vmem>>, vector<1x32x64xbf16>
    %87 = vector.shape_cast %86 : vector<1x32x64xbf16> to vector<32x64xbf16>
    %cst_79 = arith.constant dense<0.000000e+00> : vector<32x64xf32>
    %88 = tpu.matmul %85, %87, %cst_79 {dimension_numbers = #tpu.dot_dimension_numbers<[1], [0], [0], [1], [0, 0, 1, 1], [], []>} : vector<32x32xbf16>, vector<32x64xbf16>, vector<32x64xf32> -> vector<32x64xf32>
    %89 = arith.addf %83, %88 : vector<32x64xf32>
    %c0_80 = arith.constant 0 : index
    %c0_81 = arith.constant 0 : index
    %90 = vector.load %arg8[%c0_80, %c0_81] : memref<1x64xf32, #tpu.memory_space<vmem>>, vector<1x64xf32>
    %91 = vector.broadcast %90 : vector<1x64xf32> to vector<32x64xf32>
    %92 = arith.mulf %89, %91 : vector<32x64xf32>
    %c0_82 = arith.constant 0 : index
    %c0_83 = arith.constant 0 : index
    %93 = vector.load %arg9[%c0_82, %c0_83] : memref<1x64xf32, #tpu.memory_space<vmem>>, vector<1x64xf32>
    %94 = vector.broadcast %93 : vector<1x64xf32> to vector<32x64xf32>
    %95 = arith.addf %92, %94 : vector<32x64xf32>
    %cst_84 = arith.constant 0.000000e+00 : f32
    %96 = vector.broadcast %cst_84 : f32 to vector<32x64xf32>
    %97 = arith.maximumf %95, %96 : vector<32x64xf32>
    %98 = vector.shape_cast %97 : vector<32x64xf32> to vector<16x2x64xf32>
    %cst_85 = arith.constant dense<0xFF800000> : vector<16x64xf32>
    %99 = vector.multi_reduction <maximumf>, %98, %cst_85 [1] : vector<16x2x64xf32> to vector<16x64xf32>
    %100 = vector.shape_cast %99 : vector<16x64xf32> to vector<2x8x64xf32>
    %cst_86 = arith.constant 0.000000e+00 : bf16
    %101 = vector.broadcast %cst_86 : bf16 to vector<2x8x64xbf16>
    %c0_87 = arith.constant 0 : index
    %c0_88 = arith.constant 0 : index
    %c0_89 = arith.constant 0 : index
    %102 = vector.load %arg29[%c0_87, %c0_88, %c0_89] : memref<2x24x64xbf16, #tpu.memory_space<vmem>>, vector<2x8x64xbf16>
    tpu.vector_store %arg29[%c0_87, %c0_88, %c0_89], %101 {strides = array<i32>} : memref<2x24x64xbf16, #tpu.memory_space<vmem>>, vector<2x8x64xbf16>,
    %cst_90 = arith.constant 0.000000e+00 : bf16
    %103 = vector.broadcast %cst_90 : bf16 to vector<2x8x64xbf16>
    %c0_91 = arith.constant 0 : index
    %c16 = arith.constant 16 : index
    %c0_92 = arith.constant 0 : index
    %104 = vector.load %arg29[%c0_91, %c16, %c0_92] : memref<2x24x64xbf16, #tpu.memory_space<vmem>>, vector<2x8x64xbf16>
    tpu.vector_store %arg29[%c0_91, %c16, %c0_92], %103 {strides = array<i32>} : memref<2x24x64xbf16, #tpu.memory_space<vmem>>, vector<2x8x64xbf16>,
    %105 = arith.truncf %100 : vector<2x8x64xf32> to vector<2x8x64xbf16>
    %c0_93 = arith.constant 0 : index
    %c8_94 = arith.constant 8 : index
    %c0_95 = arith.constant 0 : index
    %106 = vector.load %arg29[%c0_93, %c8_94, %c0_95] : memref<2x24x64xbf16, #tpu.memory_space<vmem>>, vector<2x8x64xbf16>
    tpu.vector_store %arg29[%c0_93, %c8_94, %c0_95], %105 {strides = array<i32>} : memref<2x24x64xbf16, #tpu.memory_space<vmem>>, vector<2x8x64xbf16>,
    %cst_96 = arith.constant 0.000000e+00 : f32
    %107 = vector.broadcast %cst_96 : f32 to vector<16x128xf32>
    %c0_97 = arith.constant 0 : index
    %c7_98 = arith.constant 7 : index
    %c0_99 = arith.constant 0 : index
    %108 = vector.load %arg29[%c0_97, %c7_98, %c0_99] : memref<2x24x64xbf16, #tpu.memory_space<vmem>>, vector<2x8x64xbf16>
    %109 = vector.shape_cast %108 : vector<2x8x64xbf16> to vector<16x64xbf16>
    %c0_100 = arith.constant 0 : index
    %c0_101 = arith.constant 0 : index
    %c0_102 = arith.constant 0 : index
    %110 = vector.load %arg10[%c0_100, %c0_101, %c0_102] : memref<3x64x128xbf16, #tpu.memory_space<vmem>>, vector<1x64x128xbf16>
    %111 = vector.shape_cast %110 : vector<1x64x128xbf16> to vector<64x128xbf16>
    %cst_103 = arith.constant dense<0.000000e+00> : vector<16x128xf32>
    %112 = tpu.matmul %109, %111, %cst_103 {dimension_numbers = #tpu.dot_dimension_numbers<[1], [0], [0], [1], [0, 0, 1, 1], [], []>} : vector<16x64xbf16>, vector<64x128xbf16>, vector<16x128xf32> -> vector<16x128xf32>
    %113 = arith.addf %107, %112 : vector<16x128xf32>
    %c0_104 = arith.constant 0 : index
    %c8_105 = arith.constant 8 : index
    %c0_106 = arith.constant 0 : index
    %114 = vector.load %arg29[%c0_104, %c8_105, %c0_106] : memref<2x24x64xbf16, #tpu.memory_space<vmem>>, vector<2x8x64xbf16>
    %115 = vector.shape_cast %114 : vector<2x8x64xbf16> to vector<16x64xbf16>
    %c1_107 = arith.constant 1 : index
    %c0_108 = arith.constant 0 : index
    %c0_109 = arith.constant 0 : index
    %116 = vector.load %arg10[%c1_107, %c0_108, %c0_109] : memref<3x64x128xbf16, #tpu.memory_space<vmem>>, vector<1x64x128xbf16>
    %117 = vector.shape_cast %116 : vector<1x64x128xbf16> to vector<64x128xbf16>
    %cst_110 = arith.constant dense<0.000000e+00> : vector<16x128xf32>
    %118 = tpu.matmul %115, %117, %cst_110 {dimension_numbers = #tpu.dot_dimension_numbers<[1], [0], [0], [1], [0, 0, 1, 1], [], []>} : vector<16x64xbf16>, vector<64x128xbf16>, vector<16x128xf32> -> vector<16x128xf32>
    %119 = arith.addf %113, %118 : vector<16x128xf32>
    %c0_111 = arith.constant 0 : index
    %c9_112 = arith.constant 9 : index
    %c0_113 = arith.constant 0 : index
    %120 = vector.load %arg29[%c0_111, %c9_112, %c0_113] : memref<2x24x64xbf16, #tpu.memory_space<vmem>>, vector<2x8x64xbf16>
    %121 = vector.shape_cast %120 : vector<2x8x64xbf16> to vector<16x64xbf16>
    %c2_114 = arith.constant 2 : index
    %c0_115 = arith.constant 0 : index
    %c0_116 = arith.constant 0 : index
    %122 = vector.load %arg10[%c2_114, %c0_115, %c0_116] : memref<3x64x128xbf16, #tpu.memory_space<vmem>>, vector<1x64x128xbf16>
    %123 = vector.shape_cast %122 : vector<1x64x128xbf16> to vector<64x128xbf16>
    %cst_117 = arith.constant dense<0.000000e+00> : vector<16x128xf32>
    %124 = tpu.matmul %121, %123, %cst_117 {dimension_numbers = #tpu.dot_dimension_numbers<[1], [0], [0], [1], [0, 0, 1, 1], [], []>} : vector<16x64xbf16>, vector<64x128xbf16>, vector<16x128xf32> -> vector<16x128xf32>
    %125 = arith.addf %119, %124 : vector<16x128xf32>
    %c0_118 = arith.constant 0 : index
    %c0_119 = arith.constant 0 : index
    %126 = vector.load %arg11[%c0_118, %c0_119] : memref<1x128xf32, #tpu.memory_space<vmem>>, vector<1x128xf32>
    %127 = vector.broadcast %126 : vector<1x128xf32> to vector<16x128xf32>
    %128 = arith.mulf %125, %127 : vector<16x128xf32>
    %c0_120 = arith.constant 0 : index
    %c0_121 = arith.constant 0 : index
    %129 = vector.load %arg12[%c0_120, %c0_121] : memref<1x128xf32, #tpu.memory_space<vmem>>, vector<1x128xf32>
    %130 = vector.broadcast %129 : vector<1x128xf32> to vector<16x128xf32>
    %131 = arith.addf %128, %130 : vector<16x128xf32>
    %cst_122 = arith.constant 0.000000e+00 : f32
    %132 = vector.broadcast %cst_122 : f32 to vector<16x128xf32>
    %133 = arith.maximumf %131, %132 : vector<16x128xf32>
    %134 = vector.shape_cast %133 : vector<16x128xf32> to vector<8x2x128xf32>
    %cst_123 = arith.constant dense<0xFF800000> : vector<8x128xf32>
    %135 = vector.multi_reduction <maximumf>, %134, %cst_123 [1] : vector<8x2x128xf32> to vector<8x128xf32>
    %c0_i32_124 = arith.constant 0 : i32
    %136 = tpu.memref_slice %arg35[%c0_i32_124] : memref<4x!tpu.dma_semaphore, #tpu.memory_space<semaphore_mem>> -> memref<1x!tpu.dma_semaphore, #tpu.memory_space<semaphore_mem>>
    %137 = tpu.memref_squeeze %136 : memref<1x!tpu.dma_semaphore, #tpu.memory_space<semaphore_mem>> -> memref<!tpu.dma_semaphore, #tpu.memory_space<semaphore_mem>>
    tpu.wait_dma2 semaphore(%137 : memref<!tpu.dma_semaphore, #tpu.memory_space<semaphore_mem>>) src(%arg13 : memref<128x512xbf16, #tpu.memory_space<any>>) dst(%arg31 : memref<128x512xbf16, #tpu.memory_space<vmem>>)
    %138 = arith.truncf %135 : vector<8x128xf32> to vector<8x128xbf16>
    %c0_125 = arith.constant 0 : index
    %c0_126 = arith.constant 0 : index
    %139 = vector.load %arg31[%c0_125, %c0_126] : memref<128x512xbf16, #tpu.memory_space<vmem>>, vector<128x512xbf16>
    %cst_127 = arith.constant dense<0.000000e+00> : vector<8x512xf32>
    %140 = tpu.matmul %138, %139, %cst_127 {dimension_numbers = #tpu.dot_dimension_numbers<[1], [0], [0], [1], [0, 0, 1, 1], [], []>} : vector<8x128xbf16>, vector<128x512xbf16>, vector<8x512xf32> -> vector<8x512xf32>
    %141 = vector.shape_cast %140 : vector<8x512xf32> to vector<2x4x512xf32>
    %c0_128 = arith.constant 0 : index
    %c0_129 = arith.constant 0 : index
    %142 = vector.load %arg15[%c0_128, %c0_129] : memref<1x512xf32, #tpu.memory_space<vmem>>, vector<1x512xf32>
    %c0_130 = arith.constant 0 : index
    %c0_131 = arith.constant 0 : index
    %143 = vector.load %arg16[%c0_130, %c0_131] : memref<1x512xf32, #tpu.memory_space<vmem>>, vector<1x512xf32>
    %cst_132 = arith.constant 0.000000e+00 : f32
    %144 = vector.broadcast %cst_132 : f32 to vector<2x128xf32>
    %145 = vector.extract_strided_slice %141 {offsets = [0, 0, 0], sizes = [2, 1, 512], strides = [1, 1, 1]} : vector<2x4x512xf32> to vector<2x1x512xf32>
    %146 = vector.shape_cast %145 : vector<2x1x512xf32> to vector<2x512xf32>
    %147 = vector.broadcast %142 : vector<1x512xf32> to vector<2x512xf32>
    %148 = arith.addf %146, %147 : vector<2x512xf32>
    %149 = vector.extract_strided_slice %148 {offsets = [0, 0], sizes = [2, 128], strides = [1, 1]} : vector<2x512xf32> to vector<2x128xf32>
    %150 = arith.negf %149 : vector<2x128xf32>
    %151 = math.exp %150 : vector<2x128xf32>
    %cst_133 = arith.constant 1.000000e+00 : f32
    %152 = vector.broadcast %cst_133 : f32 to vector<2x128xf32>
    %153 = arith.addf %152, %151 : vector<2x128xf32>
    %154 = arith.divf %152, %153 : vector<2x128xf32>
    %155 = vector.extract_strided_slice %148 {offsets = [0, 128], sizes = [2, 128], strides = [1, 1]} : vector<2x512xf32> to vector<2x128xf32>
    %156 = arith.negf %155 : vector<2x128xf32>
    %157 = math.exp %156 : vector<2x128xf32>
    %cst_134 = arith.constant 1.000000e+00 : f32
    %158 = vector.broadcast %cst_134 : f32 to vector<2x128xf32>
    %159 = arith.addf %158, %157 : vector<2x128xf32>
    %160 = arith.divf %158, %159 : vector<2x128xf32>
    %161 = vector.extract_strided_slice %148 {offsets = [0, 256], sizes = [2, 128], strides = [1, 1]} : vector<2x512xf32> to vector<2x128xf32>
    %162 = math.tanh %161 : vector<2x128xf32>
    %163 = vector.extract_strided_slice %148 {offsets = [0, 384], sizes = [2, 128], strides = [1, 1]} : vector<2x512xf32> to vector<2x128xf32>
    %164 = arith.negf %163 : vector<2x128xf32>
    %165 = math.exp %164 : vector<2x128xf32>
    %cst_135 = arith.constant 1.000000e+00 : f32
    %166 = vector.broadcast %cst_135 : f32 to vector<2x128xf32>
    %167 = arith.addf %166, %165 : vector<2x128xf32>
    %168 = arith.divf %166, %167 : vector<2x128xf32>
    %169 = arith.mulf %160, %144 : vector<2x128xf32>
    %170 = arith.mulf %154, %162 : vector<2x128xf32>
    %171 = arith.addf %169, %170 : vector<2x128xf32>
    %172 = math.tanh %171 : vector<2x128xf32>
    %173 = arith.mulf %168, %172 : vector<2x128xf32>
    %c1_i32_136 = arith.constant 1 : i32
    %174 = tpu.memref_slice %arg35[%c1_i32_136] : memref<4x!tpu.dma_semaphore, #tpu.memory_space<semaphore_mem>> -> memref<1x!tpu.dma_semaphore, #tpu.memory_space<semaphore_mem>>
    %175 = tpu.memref_squeeze %174 : memref<1x!tpu.dma_semaphore, #tpu.memory_space<semaphore_mem>> -> memref<!tpu.dma_semaphore, #tpu.memory_space<semaphore_mem>>
    tpu.wait_dma2 semaphore(%175 : memref<!tpu.dma_semaphore, #tpu.memory_space<semaphore_mem>>) src(%arg14 : memref<256x1024xbf16, #tpu.memory_space<any>>) dst(%arg32 : memref<256x1024xbf16, #tpu.memory_space<vmem>>)
    %c0_137 = arith.constant 0 : index
    %c0_138 = arith.constant 0 : index
    %176 = vector.load %arg32[%c0_137, %c0_138] : memref<256x1024xbf16, #tpu.memory_space<vmem>>, vector<256x1024xbf16>
    %177 = tpu.concatenate %173, %144 in 1 : vector<2x128xf32>, vector<2x128xf32> -> vector<2x256xf32>
    %178 = arith.truncf %177 : vector<2x256xf32> to vector<2x256xbf16>
    %cst_139 = arith.constant dense<0.000000e+00> : vector<2x1024xf32>
    %179 = tpu.matmul %178, %176, %cst_139 {dimension_numbers = #tpu.dot_dimension_numbers<[1], [0], [0], [1], [0, 0, 1, 1], [], []>} : vector<2x256xbf16>, vector<256x1024xbf16>, vector<2x1024xf32> -> vector<2x1024xf32>
    %180 = vector.extract_strided_slice %141 {offsets = [0, 1, 0], sizes = [2, 1, 512], strides = [1, 1, 1]} : vector<2x4x512xf32> to vector<2x1x512xf32>
    %181 = vector.shape_cast %180 : vector<2x1x512xf32> to vector<2x512xf32>
    %182 = vector.broadcast %142 : vector<1x512xf32> to vector<2x512xf32>
    %183 = arith.addf %181, %182 : vector<2x512xf32>
    %184 = vector.extract_strided_slice %179 {offsets = [0, 0], sizes = [2, 512], strides = [1, 1]} : vector<2x1024xf32> to vector<2x512xf32>
    %185 = arith.addf %183, %184 : vector<2x512xf32>
    %186 = vector.extract_strided_slice %179 {offsets = [0, 512], sizes = [2, 512], strides = [1, 1]} : vector<2x1024xf32> to vector<2x512xf32>
    %187 = vector.broadcast %143 : vector<1x512xf32> to vector<2x512xf32>
    %188 = arith.addf %187, %186 : vector<2x512xf32>
    %189 = vector.extract_strided_slice %185 {offsets = [0, 0], sizes = [2, 128], strides = [1, 1]} : vector<2x512xf32> to vector<2x128xf32>
    %190 = arith.negf %189 : vector<2x128xf32>
    %191 = math.exp %190 : vector<2x128xf32>
    %cst_140 = arith.constant 1.000000e+00 : f32
    %192 = vector.broadcast %cst_140 : f32 to vector<2x128xf32>
    %193 = arith.addf %192, %191 : vector<2x128xf32>
    %194 = arith.divf %192, %193 : vector<2x128xf32>
    %195 = vector.extract_strided_slice %185 {offsets = [0, 128], sizes = [2, 128], strides = [1, 1]} : vector<2x512xf32> to vector<2x128xf32>
    %196 = arith.negf %195 : vector<2x128xf32>
    %197 = math.exp %196 : vector<2x128xf32>
    %cst_141 = arith.constant 1.000000e+00 : f32
    %198 = vector.broadcast %cst_141 : f32 to vector<2x128xf32>
    %199 = arith.addf %198, %197 : vector<2x128xf32>
    %200 = arith.divf %198, %199 : vector<2x128xf32>
    %201 = vector.extract_strided_slice %185 {offsets = [0, 256], sizes = [2, 128], strides = [1, 1]} : vector<2x512xf32> to vector<2x128xf32>
    %202 = math.tanh %201 : vector<2x128xf32>
    %203 = vector.extract_strided_slice %185 {offsets = [0, 384], sizes = [2, 128], strides = [1, 1]} : vector<2x512xf32> to vector<2x128xf32>
    %204 = arith.negf %203 : vector<2x128xf32>
    %205 = math.exp %204 : vector<2x128xf32>
    %cst_142 = arith.constant 1.000000e+00 : f32
    %206 = vector.broadcast %cst_142 : f32 to vector<2x128xf32>
    %207 = arith.addf %206, %205 : vector<2x128xf32>
    %208 = arith.divf %206, %207 : vector<2x128xf32>
    %209 = arith.mulf %200, %171 : vector<2x128xf32>
    %210 = arith.mulf %194, %202 : vector<2x128xf32>
    %211 = arith.addf %209, %210 : vector<2x128xf32>
    %212 = math.tanh %211 : vector<2x128xf32>
    %213 = arith.mulf %208, %212 : vector<2x128xf32>
    %214 = vector.extract_strided_slice %188 {offsets = [0, 0], sizes = [2, 128], strides = [1, 1]} : vector<2x512xf32> to vector<2x128xf32>
    %215 = arith.negf %214 : vector<2x128xf32>
    %216 = math.exp %215 : vector<2x128xf32>
    %cst_143 = arith.constant 1.000000e+00 : f32
    %217 = vector.broadcast %cst_143 : f32 to vector<2x128xf32>
    %218 = arith.addf %217, %216 : vector<2x128xf32>
    %219 = arith.divf %217, %218 : vector<2x128xf32>
    %220 = vector.extract_strided_slice %188 {offsets = [0, 128], sizes = [2, 128], strides = [1, 1]} : vector<2x512xf32> to vector<2x128xf32>
    %221 = arith.negf %220 : vector<2x128xf32>
    %222 = math.exp %221 : vector<2x128xf32>
    %cst_144 = arith.constant 1.000000e+00 : f32
    %223 = vector.broadcast %cst_144 : f32 to vector<2x128xf32>
    %224 = arith.addf %223, %222 : vector<2x128xf32>
    %225 = arith.divf %223, %224 : vector<2x128xf32>
    %226 = vector.extract_strided_slice %188 {offsets = [0, 256], sizes = [2, 128], strides = [1, 1]} : vector<2x512xf32> to vector<2x128xf32>
    %227 = math.tanh %226 : vector<2x128xf32>
    %228 = vector.extract_strided_slice %188 {offsets = [0, 384], sizes = [2, 128], strides = [1, 1]} : vector<2x512xf32> to vector<2x128xf32>
    %229 = arith.negf %228 : vector<2x128xf32>
    %230 = math.exp %229 : vector<2x128xf32>
    %cst_145 = arith.constant 1.000000e+00 : f32
    %231 = vector.broadcast %cst_145 : f32 to vector<2x128xf32>
    %232 = arith.addf %231, %230 : vector<2x128xf32>
    %233 = arith.divf %231, %232 : vector<2x128xf32>
    %234 = arith.mulf %225, %144 : vector<2x128xf32>
    %235 = arith.mulf %219, %227 : vector<2x128xf32>
    %236 = arith.addf %234, %235 : vector<2x128xf32>
    %237 = math.tanh %236 : vector<2x128xf32>
    %238 = arith.mulf %233, %237 : vector<2x128xf32>
    %c0_146 = arith.constant 0 : index
    %c0_147 = arith.constant 0 : index
    %239 = vector.load %arg30[%c0_146, %c0_147] : memref<8x128xf32, #tpu.memory_space<vmem>>, vector<2x128xf32>
    tpu.vector_store %arg30[%c0_146, %c0_147], %238 {strides = array<i32>} : memref<8x128xf32, #tpu.memory_space<vmem>>, vector<2x128xf32>,
    %240 = tpu.concatenate %213, %238 in 1 : vector<2x128xf32>, vector<2x128xf32> -> vector<2x256xf32>
    %241 = arith.truncf %240 : vector<2x256xf32> to vector<2x256xbf16>
    %cst_148 = arith.constant dense<0.000000e+00> : vector<2x1024xf32>
    %242 = tpu.matmul %241, %176, %cst_148 {dimension_numbers = #tpu.dot_dimension_numbers<[1], [0], [0], [1], [0, 0, 1, 1], [], []>} : vector<2x256xbf16>, vector<256x1024xbf16>, vector<2x1024xf32> -> vector<2x1024xf32>
    %243 = vector.extract_strided_slice %141 {offsets = [0, 2, 0], sizes = [2, 1, 512], strides = [1, 1, 1]} : vector<2x4x512xf32> to vector<2x1x512xf32>
    %244 = vector.shape_cast %243 : vector<2x1x512xf32> to vector<2x512xf32>
    %245 = vector.broadcast %142 : vector<1x512xf32> to vector<2x512xf32>
    %246 = arith.addf %244, %245 : vector<2x512xf32>
    %247 = vector.extract_strided_slice %242 {offsets = [0, 0], sizes = [2, 512], strides = [1, 1]} : vector<2x1024xf32> to vector<2x512xf32>
    %248 = arith.addf %246, %247 : vector<2x512xf32>
    %249 = vector.extract_strided_slice %242 {offsets = [0, 512], sizes = [2, 512], strides = [1, 1]} : vector<2x1024xf32> to vector<2x512xf32>
    %250 = vector.broadcast %143 : vector<1x512xf32> to vector<2x512xf32>
    %251 = arith.addf %250, %249 : vector<2x512xf32>
    %252 = vector.extract_strided_slice %248 {offsets = [0, 0], sizes = [2, 128], strides = [1, 1]} : vector<2x512xf32> to vector<2x128xf32>
    %253 = arith.negf %252 : vector<2x128xf32>
    %254 = math.exp %253 : vector<2x128xf32>
    %cst_149 = arith.constant 1.000000e+00 : f32
    %255 = vector.broadcast %cst_149 : f32 to vector<2x128xf32>
    %256 = arith.addf %255, %254 : vector<2x128xf32>
    %257 = arith.divf %255, %256 : vector<2x128xf32>
    %258 = vector.extract_strided_slice %248 {offsets = [0, 128], sizes = [2, 128], strides = [1, 1]} : vector<2x512xf32> to vector<2x128xf32>
    %259 = arith.negf %258 : vector<2x128xf32>
    %260 = math.exp %259 : vector<2x128xf32>
    %cst_150 = arith.constant 1.000000e+00 : f32
    %261 = vector.broadcast %cst_150 : f32 to vector<2x128xf32>
    %262 = arith.addf %261, %260 : vector<2x128xf32>
    %263 = arith.divf %261, %262 : vector<2x128xf32>
    %264 = vector.extract_strided_slice %248 {offsets = [0, 256], sizes = [2, 128], strides = [1, 1]} : vector<2x512xf32> to vector<2x128xf32>
    %265 = math.tanh %264 : vector<2x128xf32>
    %266 = vector.extract_strided_slice %248 {offsets = [0, 384], sizes = [2, 128], strides = [1, 1]} : vector<2x512xf32> to vector<2x128xf32>
    %267 = arith.negf %266 : vector<2x128xf32>
    %268 = math.exp %267 : vector<2x128xf32>
    %cst_151 = arith.constant 1.000000e+00 : f32
    %269 = vector.broadcast %cst_151 : f32 to vector<2x128xf32>
    %270 = arith.addf %269, %268 : vector<2x128xf32>
    %271 = arith.divf %269, %270 : vector<2x128xf32>
    %272 = arith.mulf %263, %211 : vector<2x128xf32>
    %273 = arith.mulf %257, %265 : vector<2x128xf32>
    %274 = arith.addf %272, %273 : vector<2x128xf32>
    %275 = math.tanh %274 : vector<2x128xf32>
    %276 = arith.mulf %271, %275 : vector<2x128xf32>
    %277 = vector.extract_strided_slice %251 {offsets = [0, 0], sizes = [2, 128], strides = [1, 1]} : vector<2x512xf32> to vector<2x128xf32>
    %278 = arith.negf %277 : vector<2x128xf32>
    %279 = math.exp %278 : vector<2x128xf32>
    %cst_152 = arith.constant 1.000000e+00 : f32
    %280 = vector.broadcast %cst_152 : f32 to vector<2x128xf32>
    %281 = arith.addf %280, %279 : vector<2x128xf32>
    %282 = arith.divf %280, %281 : vector<2x128xf32>
    %283 = vector.extract_strided_slice %251 {offsets = [0, 128], sizes = [2, 128], strides = [1, 1]} : vector<2x512xf32> to vector<2x128xf32>
    %284 = arith.negf %283 : vector<2x128xf32>
    %285 = math.exp %284 : vector<2x128xf32>
    %cst_153 = arith.constant 1.000000e+00 : f32
    %286 = vector.broadcast %cst_153 : f32 to vector<2x128xf32>
    %287 = arith.addf %286, %285 : vector<2x128xf32>
    %288 = arith.divf %286, %287 : vector<2x128xf32>
    %289 = vector.extract_strided_slice %251 {offsets = [0, 256], sizes = [2, 128], strides = [1, 1]} : vector<2x512xf32> to vector<2x128xf32>
    %290 = math.tanh %289 : vector<2x128xf32>
    %291 = vector.extract_strided_slice %251 {offsets = [0, 384], sizes = [2, 128], strides = [1, 1]} : vector<2x512xf32> to vector<2x128xf32>
    %292 = arith.negf %291 : vector<2x128xf32>
    %293 = math.exp %292 : vector<2x128xf32>
    %cst_154 = arith.constant 1.000000e+00 : f32
    %294 = vector.broadcast %cst_154 : f32 to vector<2x128xf32>
    %295 = arith.addf %294, %293 : vector<2x128xf32>
    %296 = arith.divf %294, %295 : vector<2x128xf32>
    %297 = arith.mulf %288, %236 : vector<2x128xf32>
    %298 = arith.mulf %282, %290 : vector<2x128xf32>
    %299 = arith.addf %297, %298 : vector<2x128xf32>
    %300 = math.tanh %299 : vector<2x128xf32>
    %301 = arith.mulf %296, %300 : vector<2x128xf32>
    %c2_155 = arith.constant 2 : index
    %c0_156 = arith.constant 0 : index
    %302 = vector.load %arg30[%c2_155, %c0_156] : memref<8x128xf32, #tpu.memory_space<vmem>>, vector<2x128xf32>
    tpu.vector_store %arg30[%c2_155, %c0_156], %301 {strides = array<i32>} : memref<8x128xf32, #tpu.memory_space<vmem>>, vector<2x128xf32>,
    %303 = tpu.concatenate %276, %301 in 1 : vector<2x128xf32>, vector<2x128xf32> -> vector<2x256xf32>
    %304 = arith.truncf %303 : vector<2x256xf32> to vector<2x256xbf16>
    %cst_157 = arith.constant dense<0.000000e+00> : vector<2x1024xf32>
    %305 = tpu.matmul %304, %176, %cst_157 {dimension_numbers = #tpu.dot_dimension_numbers<[1], [0], [0], [1], [0, 0, 1, 1], [], []>} : vector<2x256xbf16>, vector<256x1024xbf16>, vector<2x1024xf32> -> vector<2x1024xf32>
    %306 = vector.extract_strided_slice %141 {offsets = [0, 3, 0], sizes = [2, 1, 512], strides = [1, 1, 1]} : vector<2x4x512xf32> to vector<2x1x512xf32>
    %307 = vector.shape_cast %306 : vector<2x1x512xf32> to vector<2x512xf32>
    %308 = vector.broadcast %142 : vector<1x512xf32> to vector<2x512xf32>
    %309 = arith.addf %307, %308 : vector<2x512xf32>
    %310 = vector.extract_strided_slice %305 {offsets = [0, 0], sizes = [2, 512], strides = [1, 1]} : vector<2x1024xf32> to vector<2x512xf32>
    %311 = arith.addf %309, %310 : vector<2x512xf32>
    %312 = vector.extract_strided_slice %305 {offsets = [0, 512], sizes = [2, 512], strides = [1, 1]} : vector<2x1024xf32> to vector<2x512xf32>
    %313 = vector.broadcast %143 : vector<1x512xf32> to vector<2x512xf32>
    %314 = arith.addf %313, %312 : vector<2x512xf32>
    %315 = vector.extract_strided_slice %311 {offsets = [0, 0], sizes = [2, 128], strides = [1, 1]} : vector<2x512xf32> to vector<2x128xf32>
    %316 = arith.negf %315 : vector<2x128xf32>
    %317 = math.exp %316 : vector<2x128xf32>
    %cst_158 = arith.constant 1.000000e+00 : f32
    %318 = vector.broadcast %cst_158 : f32 to vector<2x128xf32>
    %319 = arith.addf %318, %317 : vector<2x128xf32>
    %320 = arith.divf %318, %319 : vector<2x128xf32>
    %321 = vector.extract_strided_slice %311 {offsets = [0, 128], sizes = [2, 128], strides = [1, 1]} : vector<2x512xf32> to vector<2x128xf32>
    %322 = arith.negf %321 : vector<2x128xf32>
    %323 = math.exp %322 : vector<2x128xf32>
    %cst_159 = arith.constant 1.000000e+00 : f32
    %324 = vector.broadcast %cst_159 : f32 to vector<2x128xf32>
    %325 = arith.addf %324, %323 : vector<2x128xf32>
    %326 = arith.divf %324, %325 : vector<2x128xf32>
    %327 = vector.extract_strided_slice %311 {offsets = [0, 256], sizes = [2, 128], strides = [1, 1]} : vector<2x512xf32> to vector<2x128xf32>
    %328 = math.tanh %327 : vector<2x128xf32>
    %329 = vector.extract_strided_slice %311 {offsets = [0, 384], sizes = [2, 128], strides = [1, 1]} : vector<2x512xf32> to vector<2x128xf32>
    %330 = arith.negf %329 : vector<2x128xf32>
    %331 = math.exp %330 : vector<2x128xf32>
    %cst_160 = arith.constant 1.000000e+00 : f32
    %332 = vector.broadcast %cst_160 : f32 to vector<2x128xf32>
    %333 = arith.addf %332, %331 : vector<2x128xf32>
    %334 = arith.divf %332, %333 : vector<2x128xf32>
    %335 = arith.mulf %326, %274 : vector<2x128xf32>
    %336 = arith.mulf %320, %328 : vector<2x128xf32>
    %337 = arith.addf %335, %336 : vector<2x128xf32>
    %338 = math.tanh %337 : vector<2x128xf32>
    %339 = arith.mulf %334, %338 : vector<2x128xf32>
    %340 = vector.extract_strided_slice %314 {offsets = [0, 0], sizes = [2, 128], strides = [1, 1]} : vector<2x512xf32> to vector<2x128xf32>
    %341 = arith.negf %340 : vector<2x128xf32>
    %342 = math.exp %341 : vector<2x128xf32>
    %cst_161 = arith.constant 1.000000e+00 : f32
    %343 = vector.broadcast %cst_161 : f32 to vector<2x128xf32>
    %344 = arith.addf %343, %342 : vector<2x128xf32>
    %345 = arith.divf %343, %344 : vector<2x128xf32>
    %346 = vector.extract_strided_slice %314 {offsets = [0, 128], sizes = [2, 128], strides = [1, 1]} : vector<2x512xf32> to vector<2x128xf32>
    %347 = arith.negf %346 : vector<2x128xf32>
    %348 = math.exp %347 : vector<2x128xf32>
    %cst_162 = arith.constant 1.000000e+00 : f32
    %349 = vector.broadcast %cst_162 : f32 to vector<2x128xf32>
    %350 = arith.addf %349, %348 : vector<2x128xf32>
    %351 = arith.divf %349, %350 : vector<2x128xf32>
    %352 = vector.extract_strided_slice %314 {offsets = [0, 256], sizes = [2, 128], strides = [1, 1]} : vector<2x512xf32> to vector<2x128xf32>
    %353 = math.tanh %352 : vector<2x128xf32>
    %354 = vector.extract_strided_slice %314 {offsets = [0, 384], sizes = [2, 128], strides = [1, 1]} : vector<2x512xf32> to vector<2x128xf32>
    %355 = arith.negf %354 : vector<2x128xf32>
    %356 = math.exp %355 : vector<2x128xf32>
    %cst_163 = arith.constant 1.000000e+00 : f32
    %357 = vector.broadcast %cst_163 : f32 to vector<2x128xf32>
    %358 = arith.addf %357, %356 : vector<2x128xf32>
    %359 = arith.divf %357, %358 : vector<2x128xf32>
    %360 = arith.mulf %351, %299 : vector<2x128xf32>
    %361 = arith.mulf %345, %353 : vector<2x128xf32>
    %362 = arith.addf %360, %361 : vector<2x128xf32>
    %363 = math.tanh %362 : vector<2x128xf32>
    %364 = arith.mulf %359, %363 : vector<2x128xf32>
    %c4_164 = arith.constant 4 : index
    %c0_165 = arith.constant 0 : index
    %365 = vector.load %arg30[%c4_164, %c0_165] : memref<8x128xf32, #tpu.memory_space<vmem>>, vector<2x128xf32>
    tpu.vector_store %arg30[%c4_164, %c0_165], %364 {strides = array<i32>} : memref<8x128xf32, #tpu.memory_space<vmem>>, vector<2x128xf32>,
    %366 = tpu.concatenate %339, %364 in 1 : vector<2x128xf32>, vector<2x128xf32> -> vector<2x256xf32>
    %367 = arith.truncf %366 : vector<2x256xf32> to vector<2x256xbf16>
    %368 = vector.extract_strided_slice %176 {offsets = [0, 512], sizes = [256, 512], strides = [1, 1]} : vector<256x1024xbf16> to vector<256x512xbf16>
    %cst_166 = arith.constant dense<0.000000e+00> : vector<2x512xf32>
    %369 = tpu.matmul %367, %368, %cst_166 {dimension_numbers = #tpu.dot_dimension_numbers<[1], [0], [0], [1], [0, 0, 1, 1], [], []>} : vector<2x256xbf16>, vector<256x512xbf16>, vector<2x512xf32> -> vector<2x512xf32>
    %370 = vector.broadcast %143 : vector<1x512xf32> to vector<2x512xf32>
    %371 = arith.addf %370, %369 : vector<2x512xf32>
    %372 = vector.extract_strided_slice %371 {offsets = [0, 0], sizes = [2, 128], strides = [1, 1]} : vector<2x512xf32> to vector<2x128xf32>
    %373 = arith.negf %372 : vector<2x128xf32>
    %374 = math.exp %373 : vector<2x128xf32>
    %cst_167 = arith.constant 1.000000e+00 : f32
    %375 = vector.broadcast %cst_167 : f32 to vector<2x128xf32>
    %376 = arith.addf %375, %374 : vector<2x128xf32>
    %377 = arith.divf %375, %376 : vector<2x128xf32>
    %378 = vector.extract_strided_slice %371 {offsets = [0, 128], sizes = [2, 128], strides = [1, 1]} : vector<2x512xf32> to vector<2x128xf32>
    %379 = arith.negf %378 : vector<2x128xf32>
    %380 = math.exp %379 : vector<2x128xf32>
    %cst_168 = arith.constant 1.000000e+00 : f32
    %381 = vector.broadcast %cst_168 : f32 to vector<2x128xf32>
    %382 = arith.addf %381, %380 : vector<2x128xf32>
    %383 = arith.divf %381, %382 : vector<2x128xf32>
    %384 = vector.extract_strided_slice %371 {offsets = [0, 256], sizes = [2, 128], strides = [1, 1]} : vector<2x512xf32> to vector<2x128xf32>
    %385 = math.tanh %384 : vector<2x128xf32>
    %386 = vector.extract_strided_slice %371 {offsets = [0, 384], sizes = [2, 128], strides = [1, 1]} : vector<2x512xf32> to vector<2x128xf32>
    %387 = arith.negf %386 : vector<2x128xf32>
    %388 = math.exp %387 : vector<2x128xf32>
    %cst_169 = arith.constant 1.000000e+00 : f32
    %389 = vector.broadcast %cst_169 : f32 to vector<2x128xf32>
    %390 = arith.addf %389, %388 : vector<2x128xf32>
    %391 = arith.divf %389, %390 : vector<2x128xf32>
    %392 = arith.mulf %383, %362 : vector<2x128xf32>
    %393 = arith.mulf %377, %385 : vector<2x128xf32>
    %394 = arith.addf %392, %393 : vector<2x128xf32>
    %395 = math.tanh %394 : vector<2x128xf32>
    %396 = arith.mulf %391, %395 : vector<2x128xf32>
    %c6_170 = arith.constant 6 : index
    %c0_171 = arith.constant 0 : index
    %397 = vector.load %arg30[%c6_170, %c0_171] : memref<8x128xf32, #tpu.memory_space<vmem>>, vector<2x128xf32>
    tpu.vector_store %arg30[%c6_170, %c0_171], %396 {strides = array<i32>} : memref<8x128xf32, #tpu.memory_space<vmem>>, vector<2x128xf32>,
    %c2_i32_172 = arith.constant 2 : i32
    %398 = tpu.memref_slice %arg35[%c2_i32_172] : memref<4x!tpu.dma_semaphore, #tpu.memory_space<semaphore_mem>> -> memref<1x!tpu.dma_semaphore, #tpu.memory_space<semaphore_mem>>
    %399 = tpu.memref_squeeze %398 : memref<1x!tpu.dma_semaphore, #tpu.memory_space<semaphore_mem>> -> memref<!tpu.dma_semaphore, #tpu.memory_space<semaphore_mem>>
    tpu.wait_dma2 semaphore(%399 : memref<!tpu.dma_semaphore, #tpu.memory_space<semaphore_mem>>) src(%arg17 : memref<128x128xbf16, #tpu.memory_space<any>>) dst(%arg33 : memref<128x128xbf16, #tpu.memory_space<vmem>>)
    %c0_173 = arith.constant 0 : index
    %c0_174 = arith.constant 0 : index
    %400 = vector.load %arg30[%c0_173, %c0_174] : memref<8x128xf32, #tpu.memory_space<vmem>>, vector<8x128xf32>
    %401 = arith.truncf %400 : vector<8x128xf32> to vector<8x128xbf16>
    %c0_175 = arith.constant 0 : index
    %c0_176 = arith.constant 0 : index
    %402 = vector.load %arg33[%c0_175, %c0_176] : memref<128x128xbf16, #tpu.memory_space<vmem>>, vector<128x128xbf16>
    %cst_177 = arith.constant dense<0.000000e+00> : vector<8x128xf32>
    %403 = tpu.matmul %401, %402, %cst_177 {dimension_numbers = #tpu.dot_dimension_numbers<[1], [0], [0], [1], [0, 0, 1, 1], [], []>} : vector<8x128xbf16>, vector<128x128xbf16>, vector<8x128xf32> -> vector<8x128xf32>
    %c0_178 = arith.constant 0 : index
    %c0_179 = arith.constant 0 : index
    %404 = vector.load %arg18[%c0_178, %c0_179] : memref<1x128xf32, #tpu.memory_space<vmem>>, vector<1x128xf32>
    %405 = vector.broadcast %404 : vector<1x128xf32> to vector<8x128xf32>
    %406 = arith.addf %403, %405 : vector<8x128xf32>
    %407 = math.tanh %406 : vector<8x128xf32>
    %c0_180 = arith.constant 0 : index
    %c0_181 = arith.constant 0 : index
    %408 = vector.load %arg19[%c0_180, %c0_181] : memref<1x128xf32, #tpu.memory_space<vmem>>, vector<1x128xf32>
    %409 = vector.broadcast %408 : vector<1x128xf32> to vector<8x128xf32>
    %410 = arith.mulf %407, %409 : vector<8x128xf32>
    %cst_182 = arith.constant dense<0.000000e+00> : vector<8xf32>
    %411 = vector.multi_reduction <add>, %410, %cst_182 [1] : vector<8x128xf32> to vector<8xf32>
    %412 = vector.shape_cast %411 : vector<8xf32> to vector<8x1xf32>
    %c0_183 = arith.constant 0 : index
    %c0_184 = arith.constant 0 : index
    %413 = vector.load %arg20[%c0_183, %c0_184] : memref<1x1xf32, #tpu.memory_space<vmem>>, vector<1x1xf32>
    %414 = vector.broadcast %413 : vector<1x1xf32> to vector<8x1xf32>
    %415 = arith.addf %412, %414 : vector<8x1xf32>
    %416 = vector.shape_cast %415 : vector<8x1xf32> to vector<1x8x1xf32>
    %cst_185 = arith.constant dense<0xFF800000> : vector<1xf32>
    %417 = vector.multi_reduction <maximumf>, %416, %cst_185 [1, 2] : vector<1x8x1xf32> to vector<1xf32>
    %418 = vector.shape_cast %417 : vector<1xf32> to vector<1x1x1xf32>
    %419 = vector.extract %418[0, 0, 0] : f32 from vector<1x1x1xf32>
    %420 = vector.broadcast %419 : f32 to vector<1x1xf32>
    %421 = vector.broadcast %420 : vector<1x1xf32> to vector<8x1xf32>
    %422 = arith.subf %415, %421 : vector<8x1xf32>
    %423 = math.exp %422 : vector<8x1xf32>
    %424 = tpu.iota {dimensions = array<i32: 1>} : vector<2x8xi32>
    %c2_i32_186 = arith.constant 2 : i32
    %c0_i32_187 = arith.constant 0 : i32
    %425 = arith.cmpi eq, %c2_i32_186, %c0_i32_187 : i32
    %c1_i32_188 = arith.constant 1 : i32
    %426 = arith.select %425, %c1_i32_188, %c2_i32_186 : i32
    %427 = vector.broadcast %426 : i32 to vector<2x8xi32>
    %428 = arith.remsi %424, %427 : vector<2x8xi32>
    %c0_i32_189 = arith.constant 0 : i32
    %429 = vector.broadcast %c0_i32_189 : i32 to vector<2x8xi32>
    %430 = arith.cmpi ne, %428, %429 : vector<2x8xi32>
    %c0_i32_190 = arith.constant 0 : i32
    %431 = vector.broadcast %c0_i32_190 : i32 to vector<2x8xi32>
    %432 = arith.cmpi slt, %428, %431 : vector<2x8xi32>
    %c0_i32_191 = arith.constant 0 : i32
    %433 = arith.cmpi slt, %426, %c0_i32_191 : i32
    %434 = vector.broadcast %433 : i1 to vector<2x8xi1>
    %435 = vector.broadcast %434 : vector<2x8xi1> to vector<2x8xi1>
    %436 = arith.xori %432, %435 : vector<2x8xi1>
    %437 = arith.andi %436, %430 : vector<2x8xi1>
    %438 = vector.broadcast %426 : i32 to vector<2x8xi32>
    %439 = arith.addi %428, %438 : vector<2x8xi32>
    %440 = arith.select %437, %439, %428 : vector<2x8xi1>, vector<2x8xi32>
    %441 = tpu.iota {dimensions = array<i32: 0>} : vector<2x8xi32>
    %442 = arith.cmpi eq, %440, %441 : vector<2x8xi32>
    %443 = arith.extui %442 : vector<2x8xi1> to vector<2x8xi32>
    %444 = arith.sitofp %443 : vector<2x8xi32> to vector<2x8xf32>
    %cst_192 = arith.constant dense<0.000000e+00> : vector<2x1xf32>
    %445 = tpu.matmul %444, %423, %cst_192 {dimension_numbers = #tpu.dot_dimension_numbers<[1], [0], [0], [1], [0, 0, 1, 1], [], []>} : vector<2x8xf32>, vector<8x1xf32>, vector<2x1xf32> -> vector<2x1xf32>
    %446 = vector.broadcast %423 : vector<8x1xf32> to vector<8x128xf32>
    %447 = arith.mulf %446, %400 : vector<8x128xf32>
    %cst_193 = arith.constant dense<0.000000e+00> : vector<2x128xf32>
    %448 = tpu.matmul %444, %447, %cst_193 {dimension_numbers = #tpu.dot_dimension_numbers<[1], [0], [0], [1], [0, 0, 1, 1], [], []>} : vector<2x8xf32>, vector<8x128xf32>, vector<2x128xf32> -> vector<2x128xf32>
    %449 = vector.broadcast %445 : vector<2x1xf32> to vector<2x128xf32>
    %450 = arith.divf %448, %449 : vector<2x128xf32>
    %c3_i32_194 = arith.constant 3 : i32
    %451 = tpu.memref_slice %arg35[%c3_i32_194] : memref<4x!tpu.dma_semaphore, #tpu.memory_space<semaphore_mem>> -> memref<1x!tpu.dma_semaphore, #tpu.memory_space<semaphore_mem>>
    %452 = tpu.memref_squeeze %451 : memref<1x!tpu.dma_semaphore, #tpu.memory_space<semaphore_mem>> -> memref<!tpu.dma_semaphore, #tpu.memory_space<semaphore_mem>>
    tpu.wait_dma2 semaphore(%452 : memref<!tpu.dma_semaphore, #tpu.memory_space<semaphore_mem>>) src(%arg21 : memref<128x64xbf16, #tpu.memory_space<any>>) dst(%arg34 : memref<128x64xbf16, #tpu.memory_space<vmem>>)
    %453 = arith.truncf %450 : vector<2x128xf32> to vector<2x128xbf16>
    %c0_195 = arith.constant 0 : index
    %c0_196 = arith.constant 0 : index
    %454 = vector.load %arg34[%c0_195, %c0_196] : memref<128x64xbf16, #tpu.memory_space<vmem>>, vector<128x64xbf16>
    %cst_197 = arith.constant dense<0.000000e+00> : vector<2x64xf32>
    %455 = tpu.matmul %453, %454, %cst_197 {dimension_numbers = #tpu.dot_dimension_numbers<[1], [0], [0], [1], [0, 0, 1, 1], [], []>} : vector<2x128xbf16>, vector<128x64xbf16>, vector<2x64xf32> -> vector<2x64xf32>
    %c0_198 = arith.constant 0 : index
    %c0_199 = arith.constant 0 : index
    %456 = vector.load %arg22[%c0_198, %c0_199] : memref<1x64xf32, #tpu.memory_space<vmem>>, vector<1x64xf32>
    %457 = vector.broadcast %456 : vector<1x64xf32> to vector<2x64xf32>
    %458 = arith.mulf %455, %457 : vector<2x64xf32>
    %c0_200 = arith.constant 0 : index
    %c0_201 = arith.constant 0 : index
    %459 = vector.load %arg23[%c0_200, %c0_201] : memref<1x64xf32, #tpu.memory_space<vmem>>, vector<1x64xf32>
    %460 = vector.broadcast %459 : vector<1x64xf32> to vector<2x64xf32>
    %461 = arith.addf %458, %460 : vector<2x64xf32>
    %cst_202 = arith.constant 0.000000e+00 : f32
    %462 = vector.broadcast %cst_202 : f32 to vector<2x64xf32>
    %463 = arith.maximumf %461, %462 : vector<2x64xf32>
    %c0_203 = arith.constant 0 : index
    %c0_204 = arith.constant 0 : index
    %464 = vector.load %arg24[%c0_203, %c0_204] : memref<1x64xf32, #tpu.memory_space<vmem>>, vector<1x64xf32>
    %465 = vector.broadcast %464 : vector<1x64xf32> to vector<2x64xf32>
    %466 = arith.mulf %463, %465 : vector<2x64xf32>
    %cst_205 = arith.constant dense<0.000000e+00> : vector<2xf32>
    %467 = vector.multi_reduction <add>, %466, %cst_205 [1] : vector<2x64xf32> to vector<2xf32>
    %468 = vector.shape_cast %467 : vector<2xf32> to vector<2x1xf32>
    %c0_206 = arith.constant 0 : index
    %c0_207 = arith.constant 0 : index
    %469 = vector.load %arg25[%c0_206, %c0_207] : memref<1x1xf32, #tpu.memory_space<vmem>>, vector<1x1xf32>
    %470 = vector.broadcast %469 : vector<1x1xf32> to vector<2x1xf32>
    %471 = arith.addf %468, %470 : vector<2x1xf32>
    %472 = arith.negf %471 : vector<2x1xf32>
    %473 = math.exp %472 : vector<2x1xf32>
    %cst_208 = arith.constant 1.000000e+00 : f32
    %474 = vector.broadcast %cst_208 : f32 to vector<2x1xf32>
    %475 = arith.addf %474, %473 : vector<2x1xf32>
    %476 = arith.divf %474, %475 : vector<2x1xf32>
    %c0_209 = arith.constant 0 : index
    %c0_210 = arith.constant 0 : index
    %c0_211 = arith.constant 0 : index
    %477 = vector.load %arg26[%c0_209, %c0_210, %c0_211] : memref<1x2x1xf32, #tpu.memory_space<vmem>>, vector<1x2x1xf32>
    %478 = vector.shape_cast %477 : vector<1x2x1xf32> to vector<2x1xf32>
    %479 = vector.shape_cast %476 : vector<2x1xf32> to vector<1x2x1xf32>
    tpu.vector_store %arg26[%c0_209, %c0_210, %c0_211], %479 {strides = array<i32>} : memref<1x2x1xf32, #tpu.memory_space<vmem>>, vector<1x2x1xf32>,
    return
  }
  func.func @transform_0(%arg0: i32) -> (i32, i32, i32) {
    %c0_i32 = arith.constant 0 : i32
    %c0_i32_0 = arith.constant 0 : i32
    %c0_i32_1 = arith.constant 0 : i32
    return %arg0, %c0_i32, %c0_i32_0 : i32, i32, i32
  }
  func.func @transform_1(%arg0: i32) -> (i32, i32) {
    %c0_i32 = arith.constant 0 : i32
    %c0_i32_0 = arith.constant 0 : i32
    %c0_i32_1 = arith.constant 0 : i32
    return %c0_i32, %c0_i32_0 : i32, i32
  }
  func.func @transform_2(%arg0: i32) -> (i32, i32) {
    %c0_i32 = arith.constant 0 : i32
    %c0_i32_0 = arith.constant 0 : i32
    %c0_i32_1 = arith.constant 0 : i32
    return %c0_i32, %c0_i32_0 : i32, i32
  }
  func.func @transform_3(%arg0: i32) -> (i32, i32, i32) {
    %c0_i32 = arith.constant 0 : i32
    %c0_i32_0 = arith.constant 0 : i32
    %c0_i32_1 = arith.constant 0 : i32
    %c0_i32_2 = arith.constant 0 : i32
    return %c0_i32, %c0_i32_0, %c0_i32_1 : i32, i32, i32
  }
  func.func @transform_4(%arg0: i32) -> (i32, i32) {
    %c0_i32 = arith.constant 0 : i32
    %c0_i32_0 = arith.constant 0 : i32
    %c0_i32_1 = arith.constant 0 : i32
    return %c0_i32, %c0_i32_0 : i32, i32
  }
  func.func @transform_5(%arg0: i32) -> (i32, i32) {
    %c0_i32 = arith.constant 0 : i32
    %c0_i32_0 = arith.constant 0 : i32
    %c0_i32_1 = arith.constant 0 : i32
    return %c0_i32, %c0_i32_0 : i32, i32
  }
  func.func @transform_6(%arg0: i32) -> (i32, i32, i32) {
    %c0_i32 = arith.constant 0 : i32
    %c0_i32_0 = arith.constant 0 : i32
    %c0_i32_1 = arith.constant 0 : i32
    %c0_i32_2 = arith.constant 0 : i32
    return %c0_i32, %c0_i32_0, %c0_i32_1 : i32, i32, i32
  }
  func.func @transform_7(%arg0: i32) -> (i32, i32) {
    %c0_i32 = arith.constant 0 : i32
    %c0_i32_0 = arith.constant 0 : i32
    %c0_i32_1 = arith.constant 0 : i32
    return %c0_i32, %c0_i32_0 : i32, i32
  }
  func.func @transform_8(%arg0: i32) -> (i32, i32) {
    %c0_i32 = arith.constant 0 : i32
    %c0_i32_0 = arith.constant 0 : i32
    %c0_i32_1 = arith.constant 0 : i32
    return %c0_i32, %c0_i32_0 : i32, i32
  }
  func.func @transform_9(%arg0: i32) -> (i32, i32, i32) {
    %c0_i32 = arith.constant 0 : i32
    %c0_i32_0 = arith.constant 0 : i32
    %c0_i32_1 = arith.constant 0 : i32
    %c0_i32_2 = arith.constant 0 : i32
    return %c0_i32, %c0_i32_0, %c0_i32_1 : i32, i32, i32
  }
  func.func @transform_10(%arg0: i32) -> (i32, i32) {
    %c0_i32 = arith.constant 0 : i32
    %c0_i32_0 = arith.constant 0 : i32
    %c0_i32_1 = arith.constant 0 : i32
    return %c0_i32, %c0_i32_0 : i32, i32
  }
  func.func @transform_11(%arg0: i32) -> (i32, i32) {
    %c0_i32 = arith.constant 0 : i32
    %c0_i32_0 = arith.constant 0 : i32
    %c0_i32_1 = arith.constant 0 : i32
    return %c0_i32, %c0_i32_0 : i32, i32
  }
  func.func @transform_14(%arg0: i32) -> (i32, i32) {
    %c0_i32 = arith.constant 0 : i32
    %c0_i32_0 = arith.constant 0 : i32
    %c0_i32_1 = arith.constant 0 : i32
    return %c0_i32, %c0_i32_0 : i32, i32
  }
  func.func @transform_15(%arg0: i32) -> (i32, i32) {
    %c0_i32 = arith.constant 0 : i32
    %c0_i32_0 = arith.constant 0 : i32
    %c0_i32_1 = arith.constant 0 : i32
    return %c0_i32, %c0_i32_0 : i32, i32
  }
  func.func @transform_17(%arg0: i32) -> (i32, i32) {
    %c0_i32 = arith.constant 0 : i32
    %c0_i32_0 = arith.constant 0 : i32
    %c0_i32_1 = arith.constant 0 : i32
    return %c0_i32, %c0_i32_0 : i32, i32
  }
  func.func @transform_18(%arg0: i32) -> (i32, i32) {
    %c0_i32 = arith.constant 0 : i32
    %c0_i32_0 = arith.constant 0 : i32
    %c0_i32_1 = arith.constant 0 : i32
    return %c0_i32, %c0_i32_0 : i32, i32
  }
  func.func @transform_19(%arg0: i32) -> (i32, i32) {
    %c0_i32 = arith.constant 0 : i32
    %c0_i32_0 = arith.constant 0 : i32
    %c0_i32_1 = arith.constant 0 : i32
    return %c0_i32, %c0_i32_0 : i32, i32
  }
  func.func @transform_21(%arg0: i32) -> (i32, i32) {
    %c0_i32 = arith.constant 0 : i32
    %c0_i32_0 = arith.constant 0 : i32
    %c0_i32_1 = arith.constant 0 : i32
    return %c0_i32, %c0_i32_0 : i32, i32
  }
  func.func @transform_22(%arg0: i32) -> (i32, i32) {
    %c0_i32 = arith.constant 0 : i32
    %c0_i32_0 = arith.constant 0 : i32
    %c0_i32_1 = arith.constant 0 : i32
    return %c0_i32, %c0_i32_0 : i32, i32
  }
  func.func @transform_23(%arg0: i32) -> (i32, i32) {
    %c0_i32 = arith.constant 0 : i32
    %c0_i32_0 = arith.constant 0 : i32
    %c0_i32_1 = arith.constant 0 : i32
    return %c0_i32, %c0_i32_0 : i32, i32
  }
  func.func @transform_24(%arg0: i32) -> (i32, i32) {
    %c0_i32 = arith.constant 0 : i32
    %c0_i32_0 = arith.constant 0 : i32
    %c0_i32_1 = arith.constant 0 : i32
    return %c0_i32, %c0_i32_0 : i32, i32
  }
  func.func @transform_25(%arg0: i32) -> (i32, i32, i32) {
    %c0_i32 = arith.constant 0 : i32
    %c0_i32_0 = arith.constant 0 : i32
    %c0_i32_1 = arith.constant 0 : i32
    return %arg0, %c0_i32, %c0_i32_0 : i32, i32, i32
  }
}

</mosaic_0001>

<bundles_post_ra>
// kernel: tpu_custom_call.1
= control target key start
LH: loop header
LB: loop body
LE: loop exit
PB: predicated region body
PF: predicated region fallthrough
CT: control target
= control target key end

     0   :  { %s9189_s0 = inlined_call_operand.vmem [shape: f32[2,32,9], index: 0, kind: input, shape index: {}]   ;;  %s9190_s1 = inlined_call_operand.hbm [shape: f32[1,9], index: 1, kind: input, shape index: {}]   ;;  %s9191_s2 = inlined_call_operand.hbm [shape: f32[1,9], index: 2, kind: input, shape index: {}]   ;;  %s9192_s3 = inlined_call_operand.vmem [shape: bf16[5,9,32], index: 3, kind: input, shape index: {}]   ;;  %s9193_s4 = inlined_call_operand.hbm [shape: f32[1,32], index: 4, kind: input, shape index: {}]   ;;  %s9194_s5 = inlined_call_operand.hbm [shape: f32[1,32], index: 5, kind: input, shape index: {}]   ;;  %s9195_s6 = inlined_call_operand.vmem [shape: bf16[3,32,64], index: 6, kind: input, shape index: {}]   ;;  %s9196_s7 = inlined_call_operand.hbm [shape: f32[1,64], index: 7, kind: input, shape index: {}]   ;;  %s9197_s8 = inlined_call_operand.hbm [shape: f32[1,64], index: 8, kind: input, shape index: {}]   ;;  %s9198_s9 = inlined_call_operand.vmem [shape: bf16[3,64,128], index: 9, kind: input, shape index: {}]   ;;  %s9199_s10 = inlined_call_operand.hbm [shape: f32[1,128], index: 10, kind: input, shape index: {}]   ;;  %s9200_s11 = inlined_call_operand.hbm [shape: f32[1,128], index: 11, kind: input, shape index: {}]   ;;  %s9201_s12 = inlined_call_operand.hbm [shape: bf16[128,512], index: 12, kind: input, shape index: {}]   ;;  %s9202_s13 = inlined_call_operand.hbm [shape: bf16[256,1024], index: 13, kind: input, shape index: {}]   ;;  %s9203_s14 = inlined_call_operand.vmem [shape: f32[1,512], index: 14, kind: input, shape index: {}]   ;;  %s9204_s15 = inlined_call_operand.vmem [shape: f32[1,512], index: 15, kind: input, shape index: {}]   ;;  %s9205_s16 = inlined_call_operand.vmem [shape: bf16[128,128], index: 16, kind: input, shape index: {}]   ;;  %s9206_s17 = inlined_call_operand.vmem [shape: f32[1,128], index: 17, kind: input, shape index: {}]   ;;  %s9207_s18 = inlined_call_operand.vmem [shape: f32[1,128], index: 18, kind: input, shape index: {}]   ;;  %s9208_s19 = inlined_call_operand.<no memory space> [shape: f32[1,1], index: 19, kind: input, shape index: {}]   ;;  %s9209_s20 = inlined_call_operand.vmem [shape: bf16[128,64], index: 20, kind: input, shape index: {}]   ;;  %s9210_s21 = inlined_call_operand.vmem [shape: f32[1,64], index: 21, kind: input, shape index: {}]   ;;  %s9211_s22 = inlined_call_operand.vmem [shape: f32[1,64], index: 22, kind: input, shape index: {}]   ;;  %s9212_s23 = inlined_call_operand.vmem [shape: f32[1,64], index: 23, kind: input, shape index: {}]   ;;  %s9213_s25 = inlined_call_operand.vmem [shape: f32[1,2,1], index: 25, kind: output, shape index: {}]   ;;  %s9214_s24 = inlined_call_operand.<no memory space> [shape: f32[1,1], index: 24, kind: input, shape index: {}]  }
   0x1   :  { %9444 = sst [smem:[#allocation156_spill]] %s9189_s0  ;;  %v30_v0 = vstv %s9208_s19  ;;  %v32_v1 = vstv %s9214_s24 }
   0x2   :  { %9445 = sst [smem:[#allocation157_spill]] %s9190_s1  ;;  %31 = vst [vmem:[#allocation11] sm:$0x1] %v30_v0 }
   0x3   :  { %9446 = sst [smem:[#allocation158_spill]] %s9191_s2  ;;  %33 = vst [vmem:[#allocation12] sm:$0x1] %v32_v1 }
   0x4   :  { %9447 = sst [smem:[#allocation159_spill]] %s9192_s3 }
   0x5   :  { %9448 = sst [smem:[#allocation160_spill]] %s9193_s4 }
   0x6   :  { %9449 = sst [smem:[#allocation161_spill]] %s9194_s5 }
   0x7   :  { %9450 = sst [smem:[#allocation162_spill]] %s9195_s6 }
   0x8   :  { %9451 = sst [smem:[#allocation163_spill]] %s9196_s7 }
   0x9   :  { %9452 = sst [smem:[#allocation164_spill]] %s9197_s8 }
   0xa   :  { %9453 = sst [smem:[#allocation165_spill]] %s9198_s9 }
   0xb   :  { %9454 = sst [smem:[#allocation166_spill]] %s9213_s25 }
   0xc   :  { %34 = vsyncpa [#allocation14], 0 }
   0xd   :  { %35 = vsyncpa [#allocation16], 0 }
   0xe   :  { %36 = vsyncpa [#allocation19], 0 }
   0xf   :  { %37 = vsyncpa [#allocation22], 0  ;;  %s9455_s26 = sld [smem:[#allocation158_spill]] }
  0x15   :  { %s57_s1 = sshll.u32 %s9455_s26, 4  ;;  %s58_s1 = int_to_ptr.hbm [resolvable:$true] %s57_s1 }
  0x16   :  { %38 = vsyncpa [#allocation25], 0  ;;  %s7061_s8 = smov [#allocation15]   ;;  %s9456_s28 = sld [smem:[#allocation161_spill]] }
  0x17   :  { %s59_s27 = sshll.u32 %s7061_s8, 4  ;;  %s7062_s24 = smov [#allocation18]   ;;  %s60_s27 = int_to_ptr.vmem [resolvable:$true] %s59_s27 }
  0x18   :  { %62 = dma.hbm_to_vmem [thread:$0]  %s58_s1, 16, %s60_s27, [#allocation16]  }
  0x19   :  { %s83_s5 = sshll.u32 %s7062_s24, 4  ;;  %s9457_s2 = sld [smem:[#allocation164_spill]]  ;;  %s84_s5 = int_to_ptr.vmem [resolvable:$true] %s83_s5 }
  0x1a   :  { %s9458_s3 = sld [smem:[#allocation157_spill]]  ;;  %s7063_s8 = smov [#allocation21]  }
  0x1b   :  { %s107_s25 = sshll.u32 %s7063_s8, 4  ;;  %s7064_s1 = smov [#allocation13]   ;;  %s108_s25 = int_to_ptr.vmem [resolvable:$true] %s107_s25 }
  0x1c   :  { %s81_s9 = sshll.u32 %s9456_s28, 4  ;;  %s48_s27 = sshll.u32 %s7064_s1, 4  ;;  %s82_s9 = int_to_ptr.hbm [resolvable:$true] %s81_s9  ;;  %s49_s27 = int_to_ptr.vmem [resolvable:$true] %s48_s27 }
  0x1d   :  { %86 = dma.hbm_to_vmem [thread:$0]  %s82_s9, 16, %s84_s5, [#allocation19]  }
  0x1e   :  { %s9459_s28 = sld [smem:[#allocation160_spill]]  ;;  %s7066_s7 = smov [#allocation20]  }
  0x1f   :  { %s105_s6 = sshll.u32 %s9457_s2, 4  ;;  %s9460_s5 = sld [smem:[#allocation163_spill]]  ;;  %s106_s6 = int_to_ptr.hbm [resolvable:$true] %s105_s6 }
  0x20   :  { %s46_s26 = sshll.u32 %s9458_s3, 4  ;;  %s7065_s2 = smov [#allocation17]   ;;  %s47_s26 = int_to_ptr.hbm [resolvable:$true] %s46_s26 }
  0x21   :  { %110 = dma.hbm_to_vmem [thread:$0]  %s106_s6, 16, %s108_s25, [#allocation22]  }
  0x22   :  { %51 = dma.hbm_to_vmem [thread:$0]  %s47_s26, 16, %s49_s27, [#allocation14]  }
  0x23   :  { %s72_s30 = sshll.u32 %s7065_s2, 4  ;;  %s96_s25 = sshll.u32 %s7066_s7, 4  ;;  %s73_s30 = int_to_ptr.vmem [resolvable:$true] %s72_s30  ;;  %s97_s25 = int_to_ptr.vmem [resolvable:$true] %s96_s25 }
  0x24   :  { %s70_s24 = sshll.u32 %s9459_s28, 4  ;;  %s118_s8 = sshll.u32 %s9199_s10, 4  ;;  %s71_s24 = int_to_ptr.hbm [resolvable:$true] %s70_s24  ;;  %s119_s8 = int_to_ptr.hbm [resolvable:$true] %s118_s8 }
  0x25   :  { %s94_s29 = sshll.u32 %s9460_s5, 4  ;;  %s129_s27 = sshll.u32 %s9200_s11, 4  ;;  %s95_s29 = int_to_ptr.hbm [resolvable:$true] %s94_s29  ;;  %s130_s27 = int_to_ptr.hbm [resolvable:$true] %s129_s27 }
  0x26   :  { %75 = dma.hbm_to_vmem [thread:$0]  %s71_s24, 16, %s73_s30, [#allocation16]  }
  0x27   :  { %99 = dma.hbm_to_vmem [thread:$0]  %s95_s29, 16, %s97_s25, [#allocation19]  }
  0x28   :  { %s7067_s19 = smov [#allocation23]   ;;  %s7068_s28 = smov [#allocation24]  }
  0x29   :  { %s120_s4 = sshll.u32 %s7067_s19, 4  ;;  %s131_s24 = sshll.u32 %s7068_s28, 4  ;;  %s121_s4 = int_to_ptr.vmem [resolvable:$true] %s120_s4  ;;  %s132_s24 = int_to_ptr.vmem [resolvable:$true] %s131_s24 }
  0x2a   :  { %123 = dma.hbm_to_vmem [thread:$0]  %s119_s8, 16, %s121_s4, [#allocation22]  }
  0x2b   :  { %134 = dma.hbm_to_vmem [thread:$0]  %s130_s27, 16, %s132_s24, [#allocation25]  }
  0x2c   :  { %7043 = dma.done.wait [#allocation14], 16  }
  0x2d   :  { %7044 = vsyncadd [#allocation14], 4294967280 }
  0x2e   :  { %7045 = dma.done.wait [#allocation16], 32  }
  0x2f   :  { %7046 = vsyncadd [#allocation16], 4294967264 }
  0x30   :  { %7047 = dma.done.wait [#allocation19], 32  }
  0x31   :  { %7048 = vsyncadd [#allocation19], 4294967264 }
  0x32   :  { %7049 = dma.done.wait [#allocation22], 32  }
  0x33   :  { %7050 = vsyncadd [#allocation22], 4294967264 }
  0x34   :  { %7051 = dma.done.wait [#allocation25], 16  }
  0x35   :  { %7052 = vsyncadd [#allocation25], 4294967280  ;;  %s193_s0 = sshll.u32 %s9201_s12, 4  ;;  %s7069_s9 = smov [#allocation6]   ;;  %v224_v2 = vld [vmem:[%s9205_s16] sm:$0xff]  ;;  %v226_v3 = vld [vmem:[%s9205_s16 + $0x8] sm:$0xff]  ;;  %s194_s0 = int_to_ptr.hbm [resolvable:$true] %s193_s0 }
  0x36   :  { %s195_s5 = sshll.u32 %s7069_s9, 4  ;;  %s207_s30 = sshll.u32 %s9202_s13, 4  ;;  %v228_v4 = vld [vmem:[%s9205_s16 + $0x10] sm:$0xff]  ;;  %225 = vst [vmem:[#allocation8 + $0x30] sm:$0xff] %v224_v2  ;;  %v230_v5 = vld [vmem:[%s9205_s16 + $0x18] sm:$0xff]  ;;  %v232_v6 = vld [vmem:[%s9205_s16 + $0x20] sm:$0xff]  ;;  %s196_s5 = int_to_ptr.vmem [resolvable:$true] %s195_s5  ;;  %s208_s30 = int_to_ptr.hbm [resolvable:$true] %s207_s30 }
  0x37   :  { %198 = dma.hbm_to_vmem [thread:$0]  %s194_s0, 4096, %s196_s5, [#allocation10]  ;;  %227 = vst [vmem:[#allocation8] sm:$0xff] %v226_v3  ;;  %v234_v7 = vld [vmem:[%s9205_s16 + $0x28] sm:$0xff]  ;;  %v236_v8 = vld [vmem:[%s9205_s16 + $0x30] sm:$0xff]  ;;  %v238_v9 = vld [vmem:[%s9205_s16 + $0x38] sm:$0xff] }
  0x38   :  { %s7070_s7 = smov [#allocation7]   ;;  %229 = vst [vmem:[#allocation8 + $0x18] sm:$0xff] %v228_v4 }
  0x39   :  { %s209_s25 = sshll.u32 %s7070_s7, 4  ;;  %231 = vst [vmem:[#allocation8 + $0x10] sm:$0xff] %v230_v5  ;;  %s210_s25 = int_to_ptr.vmem [resolvable:$true] %s209_s25 }
  0x3a   :  { %212 = dma.hbm_to_vmem [thread:$0]  %s208_s30, 16384, %s210_s25, [#allocation10 + $0x1]  ;;  %233 = vst [vmem:[#allocation8 + $0x8] sm:$0xff] %v232_v6 }
  0x3b   :  { %235 = vst [vmem:[#allocation8 + $0x20] sm:$0xff] %v234_v7 }
  0x3c   :  { %237 = vst [vmem:[#allocation8 + $0x28] sm:$0xff] %v236_v8 }
  0x3d   :  { %239 = vst [vmem:[#allocation8 + $0x38] sm:$0xff] %v238_v9 }
  0x3e   :  { %245 = vsyncadd [#allocation10 + $0x2], 1024  ;;  %v257_v10 = vld [vmem:[%s9209_s20] sm:$0xff]  ;;  %v259_v11 = vld [vmem:[%s9209_s20 + $0x8] sm:$0xff]  ;;  %vm9443_vm0 = vcmask 1043456   ;;  %vm502_vm1 = vcmask 1044480  }
  0x3f   :  { %258 = vst [vmem:[#allocation9] sm:$0xff] %v257_v10  ;;  %v261_v12 = vld [vmem:[%s9209_s20 + $0x10] sm:$0xff]  ;;  %v263_v13 = vld [vmem:[%s9209_s20 + $0x18] sm:$0xff]  ;;  %v265_v14 = vld [vmem:[%s9209_s20 + $0x20] sm:$0xff]  ;;  %s9461_s24 = sld [smem:[#allocation159_spill]]  ;;  %v7071_v20 = vmov 65535  }
  0x40   :  { %260 = vst [vmem:[#allocation9 + $0x18] sm:$0xff] %v259_v11  ;;  %v267_v15 = vld [vmem:[%s9209_s20 + $0x28] sm:$0xff]  ;;  %v269_v16 = vld [vmem:[%s9209_s20 + $0x30] sm:$0xff]  ;;  %v271_v17 = vld [vmem:[%s9209_s20 + $0x38] sm:$0xff]  ;;  %s9462_s0 = sld [smem:[#allocation156_spill]]  ;;  %v503_v21 = vsel %vm9443_vm0, 4294967295, %v7071_v20 }
  0x41   :  { %262 = vst [vmem:[#allocation9 + $0x10] sm:$0xff] %v261_v12  ;;  %v504_v24 = vsel %vm502_vm1, %v503_v21, 0  ;;  %v7302_v26 = vld [vmem:[#allocation13] ss:$0 sm:$0xff]  ;;  %v7304_v27 = vld [vmem:[#allocation15] ss:$0 sm:$0xff] }
  0x42   :  { %264 = vst [vmem:[#allocation9 + $0x20] sm:$0xff] %v263_v13  ;;  %vm311_vm2 = vcmask 68608  }
  0x43   :  { %266 = vst [vmem:[#allocation9 + $0x28] sm:$0xff] %v265_v14 }
  0x44   :  { %268 = vst [vmem:[#allocation9 + $0x8] sm:$0xff] %v267_v15 }
  0x45   :  { %270 = vst [vmem:[#allocation9 + $0x30] sm:$0xff] %v269_v16  ;;  %v5465_v18 = vld [vmem:[%s9461_s24 + $0x10] sm:$0xf]  ;;  %v6368_v22 = vld [vmem:[%s9461_s24 + $0x10] sm:$0x10] }
  0x46   :  { %272 = vst [vmem:[#allocation9 + $0x38] sm:$0xff] %v271_v17  ;;  %v279_v19 = vld [vmem:[%s9462_s0] sm:$0xff]  ;;  %v280_v23 = vld [vmem:[%s9462_s0 + $0x8] sm:$0xff]  ;;  %v5466_v25 = vor.u32 %v6368_v22, %v5465_v18 }
  0x47   :  { %278 = vsyncadd [#allocation10 + $0x3], 1024  ;;  %v291_v29 = vmul.f32 %v7302_v26, %v279_v19  ;;  %v292_v30 = vmul.f32 %v7302_v26, %v280_v23  ;;  %v5431_v31 = vld [vmem:[%s9461_s24 + $0x8] sm:$0xf]  ;;  %v6367_v32 = vld [vmem:[%s9461_s24 + $0x8] sm:$0x10] }
  0x48   :  { %v633_v28 = vand.u32 %v5466_v25, %v504_v24  ;;  %v5439_v33 = vld [vmem:[%s9461_s24] sm:$0xf]  ;;  %v5432_v34 = vor.u32 %v6367_v32, %v5431_v31  ;;  %v6364_v35 = vld [vmem:[%s9461_s24] sm:$0x10]  ;;  %v5475_v36 = vld [vmem:[%s9461_s24 + $0x18] sm:$0xf] }
  0x49   :  { %v6369_v37 = vld [vmem:[%s9461_s24 + $0x18] sm:$0x10]  ;;  %v303_v38 = vadd.f32 %v7304_v27, %v291_v29  ;;  %v304_v39 = vadd.f32 %v7304_v27, %v292_v30  ;;  %v5440_v40 = vor.u32 %v6364_v35, %v5439_v33  ;;  %v5487_v42 = vld [vmem:[%s9461_s24 + $0x20] sm:$0xf]  ;;  %v6370_v43 = vld [vmem:[%s9461_s24 + $0x20] sm:$0x10] }
  0x4a   :  { %642 = vmatpush.bf16.msra.mxu2 %v633_v28  ;;  %v5476_v41 = vor.u32 %v6369_v37, %v5475_v36  ;;  %v281_v44 = vld [vmem:[%s9462_s0 + $0x10] sm:$0xff]  ;;  %v506_v45 = vand.u32 %v5432_v34, %v504_v24  ;;  %v9221_v46 = vmov 0   ;;  %v5488_v47 = vor.u32 %v6370_v43, %v5487_v42  ;;  %v282_v52 = vld [vmem:[%s9462_s0 + $0x18] sm:$0xff]  ;;  %v283_v53 = vld [vmem:[%s9462_s0 + $0x20] sm:$0xff]  ;;  %s9471_s16 = sld [smem:[#allocation162_spill]] }
  0x4b   :  { %312 = vst.msk [vmem:[#allocation2] sm:$0xf] %vm311_vm2, %v9221_v46  ;;  %v316_v48 = vpack.c.bf16 %v303_v38, %v303_v38  ;;  %v317_v49 = vpack.c.bf16 %v304_v39, %v304_v39  ;;  %v567_v50 = vand.u32 %v5440_v40, %v504_v24  ;;  %v293_v55 = vmul.f32 %v7302_v26, %v281_v44  ;;  %v284_v56 = vld [vmem:[%s9462_s0 + $0x28] sm:$0xff]  ;;  %v285_v63 = vld [vmem:[%s9462_s0 + $0x30] sm:$0xff]  ;;  %s9472_s5 = sld [smem:[#allocation165_spill]] }
  0x4c   :  { %v806_v51 = vand.u32 %v5476_v41, %v504_v24  ;;  %313 = vst.msk [vmem:[#allocation2 + $0x18] sm:$0xf] %vm311_vm2, %v9221_v46  ;;  %515 = vmatpush.bf16.msra.mxu0 %v506_v45  ;;  %v919_v54 = vand.u32 %v5488_v47, %v504_v24  ;;  %vm385_vm3 = vsmask.f32 256  ;;  %v294_v57 = vmul.f32 %v7302_v26, %v282_v52 }
  0x4d   :  { %314 = vst.msk [vmem:[#allocation2 + $0x14] sm:$0xf] %vm311_vm2, %v9221_v46  ;;  %576 = vmatpush.bf16.msra.mxu1 %v567_v50  ;;  %v295_v58 = vmul.f32 %v7302_v26, %v283_v53  ;;  %v305_v59 = vadd.f32 %v7304_v27, %v293_v55  ;;  %v296_v60 = vmul.f32 %v7302_v26, %v284_v56  ;;  %vm386_vm4 = vsmask.f32 4368 }
  0x4e   :  { %324 = vst.msk [vmem:[#allocation2 + $0x4] sm:$0xf] %vm311_vm2, %v316_v48  ;;  %815 = vmatpush.bf16.msra.mxu3 %v806_v51  ;;  %v306_v61 = vadd.f32 %v7304_v27, %v294_v57  ;;  %v297_v2 = vmul.f32 %v7302_v26, %v285_v63  ;;  %vm352_vm5 = vcmask 1040384   ;;  %vm9220_vm6 = vcmask 1044484   ;;  %vm7384_vm11 = vmor %vm385_vm3, %vm386_vm4 }
  0x4f   :  { %325 = vst.msk [vmem:[#allocation2 + $0x8] sm:$0xf] %vm311_vm2, %v317_v49  ;;  %v307_v62 = vadd.f32 %v7304_v27, %v295_v58  ;;  %v318_v0 = vpack.c.bf16 %v305_v59, %v305_v59  ;;  %v308_v1 = vadd.f32 %v7304_v27, %v296_v60  ;;  %vm682_vm7 = vsmask.f32 3328  ;;  %vm7372_vm10 = vmor %vm352_vm5, %vm9220_vm6 }
  0x50   :  { %928 = vmatpush.bf16.msrb.mxu0 %v919_v54  ;;  %315 = vst.msk [vmem:[#allocation2 + $0x2c] sm:$0xf] %vm311_vm2, %v9221_v46  ;;  %v319_v4 = vpack.c.bf16 %v306_v61, %v306_v61  ;;  %v309_v6 = vadd.f32 %v7304_v27, %v297_v2  ;;  %vm683_vm8 = vsmask.f32 7440  ;;  %vm488_vm9 = vcmask 72704  }
  0x51   :  { %326 = vst.msk [vmem:[#allocation2 + $0xc] sm:$0xf] %vm311_vm2, %v318_v0  ;;  %v320_v8 = vpack.c.bf16 %v307_v62, %v307_v62  ;;  %v321_v13 = vpack.c.bf16 %v308_v1, %v308_v1  ;;  %vm7406_vm12 = vmor %vm682_vm7, %vm683_vm8  ;;  %vm857_vm13 = vcmask 1042432   ;;  %vm858_vm14 = vcmask 1046532  }
  0x52   :  { %v332_v3 = vld [vmem:[#allocation2] sm:$0x8]  ;;  %327 = vst.msk [vmem:[#allocation2 + $0x10] sm:$0xf] %vm311_vm2, %v319_v4  ;;  %v322_v19 = vpack.c.bf16 %v309_v6, %v309_v6  ;;  %vm7505_vm15 = vmor %vm857_vm13, %vm858_vm14  ;;  %vm1271_vm1 = vcmask 257024   ;;  %vm1372_vm3 = vcmask 1041409  }
  0x53   :  { %v389_v5 = vshrl.u32 %v332_v3, 16  ;;  %v5423_v7 = vrot.slane %v332_v3, 11  ;;  %328 = vst.msk [vmem:[#allocation2 + $0x1c] sm:$0xf] %vm311_vm2, %v320_v8  ;;  %vm1374_vm4 = vcmask 1042434   ;;  %vm1376_vm5 = vcmask 1043459  }
  0x54   :  { %329 = vst.msk [vmem:[#allocation2 + $0x20] sm:$0xf] %vm311_vm2, %v321_v13  ;;  %vm1380_vm7 = vcmask 1045509   ;;  %vm1382_vm8 = vcmask 1046534   ;;  %vm1836_vm13 = vcmask 519168   ;;  %vm9219_vm14 = vcmask 517120  }
  0x55   :  { %v333_v9 = vld [vmem:[#allocation2 + $0x4] sm:$0xf]  ;;  %v5425_v10 = vrot.slane %v389_v5, 11  ;;  %330 = vst.msk [vmem:[#allocation2 + $0x24] sm:$0xf] %vm311_vm2, %v322_v19 }
  0x56   :  { %v672_v12 = vld [vmem:[#allocation2 + $0x4] sm:$0xf]  ;;  %v334_v15 = vld [vmem:[#allocation2 + $0x8] sm:$0xf]  ;;  %v394_v16 = vshrl.u32 %v333_v9, 16  ;;  %v397_v17 = vshll.u32 %v333_v9, 16 }
  0x57   :  { %v6362_v14 = vld [vmem:[#allocation2 + $0x4] sm:$0xff]  ;;  %v357_v18 = vrot.slane %v333_v9, 7  ;;  %v403_v20 = vshrl.u32 %v334_v15, 16  ;;  %v406_v21 = vshll.u32 %v334_v15, 16  ;;  %v360_v22 = vrot.slane %v334_v15, 7 }
  0x58   :  { %v7376_v23 = vld [vmem:[#allocation2 + $0x8] sm:$0xf]  ;;  %v686_v24 = vshrl.u32 %v672_v12, 16  ;;  %5467 = vmatmul.msk.bf16.vlgmr.msra.gmra.mxu2 %vm488_vm9, %v6362_v14  ;;  %v396_v25 = vrot.slane %v394_v16, 7  ;;  %v689_v30 = vshll.u32 %v672_v12, 16 }
  0x59   :  { %v358_v28 = vsel %vm7372_vm10, %v5423_v7, %v357_v18  ;;  %v359_v29 = vrot.slane %v357_v18, 4  ;;  %v7388_v32 = vrot.slane %v403_v20, 7  ;;  %v695_v35 = vshll.u32 %v7376_v23, 16  ;;  %v7394_v39 = vld [vmem:[#allocation2 + $0xc] sm:$0xf] }
  0x5a   :  { %v537_v33 = vunpack.c.l.b16 %v358_v28  ;;  %v688_v34 = vrot.slane %v686_v24, 4  ;;  %v399_v36 = vor.u32 %v397_v17, %v396_v25  ;;  %v401_v37 = vrot.slane %v396_v25, 4  ;;  %v335_v45 = vld [vmem:[#allocation2 + $0xc] sm:$0xf]  ;;  %v383_v50 = vld [vmem:[#allocation2 + $0x10] sm:$0xf] }
  0x5b   :  { %v361_v38 = vsel %vm7372_vm10, %v359_v29, %v360_v22  ;;  %v691_v40 = vrot.slane %v689_v30, 5  ;;  %v408_v41 = vor.u32 %v406_v21, %v7388_v32  ;;  %v697_v43 = vrot.slane %v695_v35, 5  ;;  %v336_v1 = vld [vmem:[#allocation2 + $0x10] sm:$0x7]  ;;  %1272 = vst.msk [vmem:[#allocation3] sm:$0xf] %vm1271_vm1, %v9221_v46 }
  0x5c   :  { %v538_v42 = vunpack.c.l.b16 %v361_v38  ;;  %v699_v44 = vshrl.u32 %v7376_v23, 16  ;;  %v400_v47 = vsel %vm7384_vm11, %v5425_v10, %v399_v36  ;;  %v705_v49 = vshll.u32 %v7394_v39, 16  ;;  %v7414_v10 = vld [vmem:[#allocation2 + $0x14] sm:$0x1]  ;;  %v7417_v15 = vld [vmem:[#allocation2 + $0x10] sm:$0xf] }
  0x5d   :  { %v692_v48 = vor.u32 %v691_v40, %v688_v34  ;;  %v410_v51 = vrot.slane %v7388_v32, 4  ;;  %v409_v52 = vsel %vm7384_vm11, %v401_v37, %v408_v41  ;;  %v471_v53 = vunpack.c.l.b16 %v400_v47  ;;  %v6365_v21 = vld [vmem:[#allocation2 + $0xc] sm:$0xff]  ;;  %v338_v40 = vld [vmem:[#allocation2 + $0x1c] sm:$0xf]  ;;  %1273 = vst.msk [vmem:[#allocation3 + $0x10] sm:$0xf] %vm1271_vm1, %v9221_v46 }
  0x5e   :  { %v545_v54 = vpack.c.b16 %v538_v42, %v537_v33  ;;  %v701_v56 = vrot.slane %v699_v44, 4  ;;  %v472_v57 = vunpack.c.l.b16 %v409_v52  ;;  %v707_v59 = vrot.slane %v705_v49, 5  ;;  %v7435_v42 = vld [vmem:[#allocation2 + $0x20] sm:$0xf]  ;;  %v677_v47 = vld [vmem:[#allocation2 + $0x1c] sm:$0xf] }
  0x5f   :  { %v693_v58 = vrot.slane %v692_v48, 4  ;;  %v412_v60 = vshrl.u32 %v335_v45, 16  ;;  %v415_v62 = vshll.u32 %v335_v45, 16  ;;  %v421_v63 = vshrl.u32 %v383_v50, 16  ;;  %v337_v48 = vld [vmem:[#allocation2 + $0x18] sm:$0x8] }
  0x60   :  { %5441 = vmatmul.msk.bf16.vlgmr.msra.gmra.mxu1 %vm488_vm9, %v545_v54  ;;  %v702_v61 = vor.u32 %v701_v56, %v697_v43  ;;  %v424_v0 = vshll.u32 %v383_v50, 16  ;;  %v479_v2 = vpack.c.b16 %v472_v57, %v471_v53  ;;  %v362_v5 = vrot.slane %v360_v22, 4  ;;  %1274 = vst.msk [vmem:[#allocation3 + $0xc] sm:$0xf] %vm1271_vm1, %v9221_v46 }
  0x61   :  { %v698_v3 = vsel %vm7406_vm12, %v693_v58, %v697_v43  ;;  %v414_v4 = vrot.slane %v412_v60, 7  ;;  %v423_v8 = vrot.slane %v421_v63, 7  ;;  %v363_v9 = vrot.slane %v335_v45, 7  ;;  %1275 = vst.msk [vmem:[#allocation3 + $0x1c] sm:$0xf] %vm1271_vm1, %v9221_v46 }
  0x62   :  { %v703_v6 = vrot.slane %v702_v61, 4  ;;  %v776_v7 = vunpack.c.l.b16 %v698_v3  ;;  %5433 = vmatmul.msk.bf16.vlgmr.msra.gmra.mxu0 %vm488_vm9, %v479_v2  ;;  %v366_v14 = vrot.slane %v336_v1, 7  ;;  %v709_v16 = vshrl.u32 %v7394_v39, 16  ;;  %v7444_v2 = vld [vmem:[#allocation2 + $0x20] sm:$0xf] }
  0x63   :  { %v417_v12 = vor.u32 %v415_v62, %v414_v4  ;;  %v419_v13 = vrot.slane %v414_v4, 4  ;;  %v426_v18 = vor.u32 %v424_v0, %v423_v8  ;;  %v365_v19 = vrot.slane %v363_v9, 4  ;;  %v286_v62 = vld [vmem:[%s9462_s0 + $0x38] sm:$0xff]  ;;  %1837 = vst.msk [vmem:[#allocation4] sm:$0xf] %vm1836_vm13, %v9221_v46 }
  0x64   :  { %v708_v17 = vsel %vm7406_vm12, %v703_v6, %v707_v59  ;;  %v364_v22 = vsel %vm7372_vm10, %v362_v5, %v363_v9  ;;  %v711_v24 = vrot.slane %v709_v16, 4  ;;  %v715_v28 = vshll.u32 %v7417_v15, 16  ;;  %1838 = vst.msk [vmem:[#allocation4 + $0xc] sm:$0xf] %vm1836_vm13, %v9221_v46 }
  0x65   :  { %v777_v20 = vunpack.c.l.b16 %v708_v17  ;;  %v367_v25 = vsel %vm7372_vm10, %v365_v19, %v366_v14  ;;  %v725_v29 = vshll.u32 %v7414_v10, 16  ;;  %v418_v32 = vsel %vm7384_vm11, %v410_v51, %v417_v12  ;;  %1839 = vst.msk [vmem:[#allocation4 + $0x8] sm:$0xf] %vm1836_vm13, %v9221_v46 }
  0x66   :  { %v427_v33 = vsel %vm7384_vm11, %v419_v13, %v426_v18  ;;  %v712_v34 = vor.u32 %v711_v24, %v707_v59  ;;  %v539_v35 = vunpack.c.l.b16 %v364_v22  ;;  %v540_v36 = vunpack.c.l.b16 %v367_v25  ;;  %1840 = vst.msk [vmem:[#allocation4 + $0x14] sm:$0xf] %vm1836_vm13, %v9221_v46 }
  0x67   :  { %v784_v30 = vpack.c.b16 %v777_v20, %v776_v7  ;;  %v717_v37 = vrot.slane %v715_v28, 5  ;;  %v719_v38 = vshrl.u32 %v7417_v15, 16  ;;  %v473_v43 = vunpack.c.l.b16 %v418_v32 }
  0x68   :  { %5468 = vmatmul.msk.bf16.gmra.mxu2 %vm488_vm9, %v6365_v21  ;;  %v713_v41 = vrot.slane %v712_v34, 4  ;;  %v474_v44 = vunpack.c.l.b16 %v427_v33  ;;  %v434_v49 = vshrl.u32 %v338_v40, 16  ;;  %v546_v50 = vpack.c.b16 %v540_v36, %v539_v35  ;;  %v7456_v21 = vld [vmem:[#allocation2 + $0x24] sm:$0xf] }
  0x69   :  { %5477 = vmatmul.msk.bf16.vlgmr.msra.gmra.mxu3 %vm488_vm9, %v784_v30  ;;  %v721_v45 = vrot.slane %v719_v38, 4  ;;  %v727_v52 = vrot.slane %v725_v29, 5  ;;  %v443_v53 = vshrl.u32 %v7435_v42, 16  ;;  %v370_v56 = vrot.slane %v338_v40, 7  ;;  %v6363_v30 = vld [vmem:[#allocation2 + $0x1c] sm:$0xff] }
  0x6a   :  { %v718_v54 = vsel %vm7406_vm12, %v713_v41, %v717_v37  ;;  %v730_v57 = vshrl.u32 %v677_v47, 16  ;;  %v480_v58 = vpack.c.b16 %v474_v44, %v473_v43  ;;  %v429_v60 = vshrl.u32 %v337_v48, 16  ;;  %v340_v41 = vld [vmem:[#allocation2 + $0x24] sm:$0xf] }
  0x6b   :  { %v722_v51 = vor.u32 %v721_v45, %v717_v37  ;;  %v437_v61 = vshll.u32 %v338_v40, 16  ;;  %v436_v63 = vrot.slane %v434_v49, 7  ;;  %v446_v0 = vshll.u32 %v7435_v42, 16 }
  0x6c   :  { %v5424_v1 = vrot.slane %v337_v48, 11  ;;  %v733_v3 = vshll.u32 %v677_v47, 16  ;;  %v778_v5 = vunpack.c.l.b16 %v718_v54  ;;  %v7449_v6 = vrot.slane %v443_v53, 7 }
  0x6d   :  { %v723_v59 = vrot.slane %v722_v51, 4  ;;  %v373_v7 = vrot.slane %v7435_v42, 7  ;;  %v372_v9 = vrot.slane %v370_v56, 4  ;;  %v732_v12 = vrot.slane %v730_v57, 4 }
  0x6e   :  { %v735_v13 = vrot.slane %v733_v3, 5  ;;  %v739_v14 = vshll.u32 %v7444_v2, 16  ;;  %v743_v16 = vshrl.u32 %v7444_v2, 16  ;;  %v298_v17 = vmul.f32 %v7302_v26, %v286_v62 }
  0x6f   :  { %v728_v4 = vsel %vm7406_vm12, %v723_v59, %v727_v52  ;;  %v5426_v18 = vrot.slane %v429_v60, 11  ;;  %v439_v19 = vor.u32 %v437_v61, %v436_v63  ;;  %v441_v20 = vrot.slane %v436_v63, 4 }
  0x70   :  { %5442 = vmatmul.msk.bf16.gmra.mxu1 %vm488_vm9, %v546_v50  ;;  %v779_v8 = vunpack.c.l.b16 %v728_v4  ;;  %v448_v22 = vor.u32 %v446_v0, %v7449_v6  ;;  %v741_v24 = vrot.slane %v739_v14, 5  ;;  %v745_v25 = vrot.slane %v743_v16, 4 }
  0x71   :  { %v310_v28 = vadd.f32 %v7304_v27, %v298_v17  ;;  %v371_v32 = vsel %vm7372_vm10, %v5424_v1, %v370_v56  ;;  %v374_v26 = vsel %vm7372_vm10, %v372_v9, %v373_v7  ;;  %v736_v33 = vor.u32 %v735_v13, %v732_v12  ;;  %v7483_v13 = vld [vmem:[#allocation2 + $0x2c] sm:$0x1] }
  0x72   :  { %5434 = vmatmul.msk.bf16.gmra.mxu0 %vm488_vm9, %v480_v58  ;;  %v785_v29 = vpack.c.b16 %v779_v8, %v778_v5  ;;  %v746_v34 = vor.u32 %v745_v25, %v741_v24  ;;  %v749_v35 = vshll.u32 %v7456_v21, 16  ;;  %v440_v37 = vsel %vm7384_vm11, %v5426_v18, %v439_v19 }
  0x73   :  { %v323_v36 = vpack.c.bf16 %v310_v28, %v310_v28  ;;  %v449_v38 = vsel %vm7384_vm11, %v441_v20, %v448_v22  ;;  %v541_v27 = vunpack.c.l.b16 %v371_v32  ;;  %v542_v40 = vunpack.c.l.b16 %v374_v26 }
  0x74   :  { %v737_v42 = vrot.slane %v736_v33, 4  ;;  %v747_v43 = vrot.slane %v746_v34, 4  ;;  %v751_v44 = vrot.slane %v749_v35, 5  ;;  %v475_v45 = vunpack.c.l.b16 %v440_v37 }
  0x75   :  { %331 = vst.msk [vmem:[#allocation2 + $0x28] sm:$0xf] %vm311_vm2, %v323_v36  ;;  %v476_v47 = vunpack.c.l.b16 %v449_v38  ;;  %v452_v48 = vshrl.u32 %v340_v41, 16  ;;  %v547_v49 = vpack.c.b16 %v542_v40, %v541_v27  ;;  %v376_v50 = vrot.slane %v340_v41, 7 }
  0x76   :  { %v742_v51 = vsel %vm7406_vm12, %v737_v42, %v741_v24  ;;  %v752_v52 = vsel %vm7406_vm12, %v747_v43, %v751_v44  ;;  %v455_v53 = vshll.u32 %v340_v41, 16  ;;  %v753_v54 = vshrl.u32 %v7456_v21, 16 }
  0x77   :  { %v481_v56 = vpack.c.b16 %v476_v47, %v475_v45  ;;  %v454_v58 = vrot.slane %v452_v48, 7  ;;  %v375_v60 = vrot.slane %v373_v7, 4  ;;  %v780_v61 = vunpack.c.l.b16 %v742_v51  ;;  %v845_v45 = vld [vmem:[#allocation2 + $0x4] sm:$0xe] }
  0x78   :  { %5469 = vmatmul.msk.bf16.gmra.mxu2 %vm488_vm9, %v6363_v30  ;;  %v378_v0 = vrot.slane %v376_v50, 4  ;;  %v781_v3 = vunpack.c.l.b16 %v752_v52  ;;  %v755_v12 = vrot.slane %v753_v54, 4  ;;  %v450_v16 = vrot.slane %v7449_v6, 4 }
  0x79   :  { %5478 = vmatmul.msk.bf16.gmra.mxu3 %vm488_vm9, %v785_v29  ;;  %v457_v17 = vor.u32 %v455_v53, %v454_v58  ;;  %v459_v18 = vrot.slane %v454_v58, 4  ;;  %v377_v24 = vsel %vm7372_vm10, %v375_v60, %v376_v50  ;;  %v769_v30 = vshll.u32 %v7483_v13, 16 }
  0x7a   :  { %v786_v20 = vpack.c.b16 %v781_v3, %v780_v61  ;;  %v756_v28 = vor.u32 %v755_v12, %v751_v44  ;;  %v543_v26 = vunpack.c.l.b16 %v377_v24  ;;  %v862_v42 = vrot.slane %v7376_v23, 5 }
  0x7b   :  { %v458_v32 = vsel %vm7384_vm11, %v450_v16, %v457_v17  ;;  %v771_v11 = vrot.slane %v769_v30, 5  ;;  %v5481_v47 = vrot.slane %v845_v45, 9  ;;  %v875_v3 = vrot.slane %v7444_v2, 5 }
  0x7c   :  { %v384_v57 = vld [vmem:[#allocation2 + $0x28] sm:$0xf]  ;;  %v757_v34 = vrot.slane %v756_v28, 4  ;;  %v477_v36 = vunpack.c.l.b16 %v458_v32  ;;  %v864_v48 = vrot.slane %v862_v42, 4  ;;  %vm1046_vm2 = vcmask 254976  }
  0x7d   :  { %v341_v59 = vld [vmem:[#allocation2 + $0x28] sm:$0x7]  ;;  %v461_v62 = vshrl.u32 %v384_v57, 16  ;;  %v464_v63 = vshll.u32 %v384_v57, 16  ;;  %v863_v52 = vsel %vm7505_vm15, %v5481_v47, %v862_v42  ;;  %v868_v57 = vrot.slane %v7417_v15, 5 }
  0x7e   :  { %v7478_v1 = vld [vmem:[#allocation2 + $0x28] sm:$0xf]  ;;  %v379_v4 = vrot.slane %v341_v59, 7  ;;  %v889_v53 = vunpack.c.l.b16 %v863_v52  ;;  %v871_v59 = vrot.slane %v7414_v10, 5  ;;  %v7536_v52 = vld [vmem:[#allocation17] ss:$0 sm:$0xff] }
  0x7f   :  { %v759_v5 = vshll.u32 %v7478_v1, 16  ;;  %v763_v8 = vshrl.u32 %v7478_v1, 16  ;;  %v463_v9 = vrot.slane %v461_v62, 7  ;;  %v6366_v22 = vld [vmem:[#allocation2 + $0x24] sm:$0xff]  ;;  %v870_v58 = vrot.slane %v868_v57, 4 }
  0x80   :  { %5443 = vmatmul.msk.bf16.gmra.mxu1 %vm488_vm9, %v547_v49  ;;  %v380_v25 = vsel %vm7372_vm10, %v378_v0, %v379_v4  ;;  %v865_v49 = vrot.slane %v7394_v39, 5  ;;  %v846_v4 = vld [vmem:[#allocation2 + $0x1c] sm:$0xe]  ;;  %v881_v16 = vrot.slane %v7478_v1, 5  ;;  %vm1500_vm10 = vcmask 261120  }
  0x81   :  { %v761_v7 = vrot.slane %v759_v5, 5  ;;  %v765_v14 = vrot.slane %v763_v8, 4  ;;  %v466_v19 = vor.u32 %v464_v63, %v463_v9  ;;  %v544_v33 = vunpack.c.l.b16 %v380_v25 }
  0x82   :  { %5435 = vmatmul.msk.bf16.gmra.mxu0 %vm488_vm9, %v481_v56  ;;  %v866_v23 = vsel %vm7505_vm15, %v864_v48, %v865_v49  ;;  %v867_v39 = vrot.slane %v865_v49, 4  ;;  %v872_v61 = vsel %vm7505_vm15, %v870_v58, %v871_v59  ;;  %v5482_v15 = vrot.slane %v846_v4, 9 }
  0x83   :  { %v766_v29 = vor.u32 %v765_v14, %v761_v7  ;;  %v467_v6 = vsel %vm7384_vm11, %v459_v18, %v466_v19  ;;  %v548_v38 = vpack.c.b16 %v544_v33, %v543_v26  ;;  %v762_v27 = vsel %vm7406_vm12, %v757_v34, %v761_v7 }
  0x84   :  { %v478_v37 = vunpack.c.l.b16 %v467_v6  ;;  %v782_v43 = vunpack.c.l.b16 %v762_v27  ;;  %v890_v54 = vunpack.c.l.b16 %v866_v23  ;;  %v869_v60 = vsel %vm7505_vm15, %v867_v39, %v868_v57  ;;  %v7538_v57 = vld [vmem:[#allocation18] ss:$0 sm:$0xff] }
  0x85   :  { %v767_v35 = vrot.slane %v766_v29, 4  ;;  %v891_v62 = vunpack.c.l.b16 %v869_v60  ;;  %v892_v63 = vunpack.c.l.b16 %v872_v61  ;;  %v877_v5 = vrot.slane %v875_v3, 4 }
  0x86   :  { %v482_v41 = vpack.c.b16 %v478_v37, %v477_v36  ;;  %v897_v56 = vpack.c.b16 %v890_v54, %v889_v53  ;;  %v878_v8 = vrot.slane %v7456_v21, 5  ;;  %v876_v10 = vsel %vm7505_vm15, %v5482_v15, %v875_v3 }
  0x87   :  { %v772_v40 = vsel %vm7406_vm12, %v767_v35, %v771_v11  ;;  %v898_v0 = vpack.c.b16 %v892_v63, %v891_v62  ;;  %v893_v12 = vunpack.c.l.b16 %v876_v10  ;;  %v883_v17 = vrot.slane %v881_v16, 4 }
  0x88   :  { %5470 = vmatmul.msk.bf16.gmra.mxu2 %vm488_vm9, %v6366_v22  ;;  %v783_v44 = vunpack.c.l.b16 %v772_v40  ;;  %v879_v9 = vsel %vm7505_vm15, %v877_v5, %v878_v8  ;;  %v880_v2 = vrot.slane %v878_v8, 4  ;;  %v884_v18 = vrot.slane %v7483_v13, 5 }
  0x89   :  { %5479 = vmatmul.msk.bf16.gmra.mxu3 %vm488_vm9, %v786_v20  ;;  %v894_v7 = vunpack.c.l.b16 %v879_v9 }
  0x8a   :  { %v787_v50 = vpack.c.b16 %v783_v44, %v782_v43  ;;  %v882_v21 = vsel %vm7505_vm15, %v880_v2, %v881_v16  ;;  %v885_v19 = vsel %vm7505_vm15, %v883_v17, %v884_v18  ;;  %vm1985_vm15 = vcmask 523264  }
  0x8b   :  { %v899_v14 = vpack.c.b16 %v894_v7, %v893_v12  ;;  %v895_v20 = vunpack.c.l.b16 %v882_v21  ;;  %v896_v22 = vunpack.c.l.b16 %v885_v19 }
  0x8d   :  { %v900_v24 = vpack.c.b16 %v896_v22, %v895_v20 }
  0x90   :  { %5444 = vmatmul.msk.bf16.gmra.mxu1 %vm488_vm9, %v548_v38 }
  0x92   :  { %5436 = vmatmul.msk.bf16.gmra.mxu0 %vm488_vm9, %v482_v41 }
  0x99   :  { %5480 = vmatmul.msk.bf16.gmra.mxu3 %vm488_vm9, %v787_v50 }
  0xa2   :  { %5489 = vmatmul.msk.bf16.vlgmr.msrb.gmra.mxu0 %vm488_vm9, %v897_v56 }
  0xb2   :  { %5490 = vmatmul.msk.bf16.gmra.mxu0 %vm488_vm9, %v898_v0 }
  0xc2   :  { %5491 = vmatmul.msk.bf16.gmra.mxu0 %vm488_vm9, %v899_v14 }
  0xd2   :  { %5492 = vmatmul.msk.bf16.gmra.mxu0 %vm488_vm9, %v900_v24  ;;  %vm1384_vm9 = vcmask 1047559  }
  0xdb   :  { %v644_v1 = vpop.f32.mrf.mxu2 }
  0xdd   :  { %v578_v28 = vpop.f32.mrf.mxu1 }
  0xdf   :  { %v517_v25 = vpop.f32.mrf.mxu0 }
  0xe0   :  { %v579_v48 = vadd.f32 %v578_v28, %v517_v25 }
  0xe2   :  { %v664_v50 = vadd.f32 %v644_v1, %v579_v48 }
  0xe3   :  { %v646_v26 = vpop.f32.mrf.mxu2 }
  0xe5   :  { %v580_v30 = vpop.f32.mrf.mxu1 }
  0xe7   :  { %v519_v29 = vpop.f32.mrf.mxu0 }
  0xe8   :  { %v581_v39 = vadd.f32 %v580_v30, %v519_v29 }
  0xea   :  { %v665_v63 = vadd.f32 %v646_v26, %v581_v39 }
  0xeb   :  { %v649_v35 = vpop.f32.mrf.mxu2 }
  0xec   :  { %v817_v32 = vpop.f32.mrf.mxu3 }
  0xed   :  { %v583_v13 = vpop.f32.mrf.mxu1  ;;  %v837_v51 = vadd.f32 %v817_v32, %v664_v50 }
  0xef   :  { %v522_v6 = vpop.f32.mrf.mxu0 }
  0xf0   :  { %v584_v59 = vadd.f32 %v583_v13, %v522_v6 }
  0xf2   :  { %v666_v15 = vadd.f32 %v649_v35, %v584_v59 }
  0xf3   :  { %v651_v38 = vpop.f32.mrf.mxu2 }
  0xf4   :  { %v819_v34 = vpop.f32.mrf.mxu3 }
  0xf5   :  { %v585_v36 = vpop.f32.mrf.mxu1  ;;  %v838_v4 = vadd.f32 %v819_v34, %v665_v63 }
  0xf7   :  { %v524_v33 = vpop.f32.mrf.mxu0 }
  0xf8   :  { %v586_v60 = vadd.f32 %v585_v36, %v524_v33 }
  0xfa   :  { %v667_v5 = vadd.f32 %v651_v38, %v586_v60 }
  0xfb   :  { %v654_v42 = vpop.f32.mrf.mxu2 }
  0xfc   :  { %v822_v37 = vpop.f32.mrf.mxu3 }
  0xfd   :  { %v588_v40 = vpop.f32.mrf.mxu1  ;;  %v839_v16 = vadd.f32 %v822_v37, %v666_v15 }
  0xff   :  { %v527_v11 = vpop.f32.mrf.mxu0 }
 0x100   :  { %v589_v0 = vadd.f32 %v588_v40, %v527_v11 }
 0x102   :  { %v668_v2 = vadd.f32 %v654_v42, %v589_v0 }
 0x103   :  { %v656_v49 = vpop.f32.mrf.mxu2 }
 0x104   :  { %v824_v41 = vpop.f32.mrf.mxu3 }
 0x105   :  { %v590_v44 = vpop.f32.mrf.mxu1  ;;  %v7554_v32 = vadd.f32 %v824_v41, %v667_v5 }
 0x107   :  { %v529_v27 = vpop.f32.mrf.mxu0 }
 0x108   :  { %v591_v8 = vadd.f32 %v590_v44, %v529_v27 }
 0x10a   :  { %v669_v6 = vadd.f32 %v656_v49, %v591_v8 }
 0x10b   :  { %v659_v61 = vpop.f32.mrf.mxu2 }
 0x10c   :  { %v827_v45 = vpop.f32.mrf.mxu3 }
 0x10d   :  { %v593_v23 = vpop.f32.mrf.mxu1  ;;  %v7557_v37 = vadd.f32 %v827_v45, %v668_v2 }
 0x10f   :  { %v532_v43 = vpop.f32.mrf.mxu0 }
 0x110   :  { %v594_v19 = vadd.f32 %v593_v23, %v532_v43 }
 0x112   :  { %v670_v27 = vadd.f32 %v659_v61, %v594_v19 }
 0x113   :  { %v661_v33 = vpop.f32.mrf.mxu2 }
 0x114   :  { %v829_v54 = vpop.f32.mrf.mxu3 }
 0x115   :  { %v595_v17 = vpop.f32.mrf.mxu1  ;;  %v7559_v38 = vadd.f32 %v829_v54, %v669_v6 }
 0x117   :  { %v534_v47 = vpop.f32.mrf.mxu0 }
 0x118   :  { %v596_v26 = vadd.f32 %v595_v17, %v534_v47 }
 0x11a   :  { %v671_v49 = vadd.f32 %v661_v33, %v596_v26 }
 0x11c   :  { %v832_v20 = vpop.f32.mrf.mxu3 }
 0x11d   :  { %v7562_v47 = vadd.f32 %v832_v20, %v670_v27 }
 0x11f   :  { %v930_v53 = vpop.f32.mrf.mxu0 }
 0x120   :  { %v950_v56 = vadd.f32 %v930_v53, %v837_v51 }
 0x122   :  { %v962_v58 = vmul.f32 %v7536_v52, %v950_v56 }
 0x124   :  { %v974_v62 = vadd.f32 %v7538_v57, %v962_v58  ;;  %v834_v0 = vpop.f32.mrf.mxu3 }
 0x125   :  { %v7568_v17 = vadd.f32 %v834_v0, %v671_v49 }
 0x126   :  { %v982_v3 = vmax.f32 %v974_v62, 0.0 }
 0x127   :  { %v932_v10 = vpop.f32.mrf.mxu0 }
 0x128   :  { %v998_v9 = vrot.slane %v982_v3, 2  ;;  %v999_v12 = vrot.slane %v982_v3, 4  ;;  %v1000_v7 = vrot.slane %v982_v3, 6  ;;  %v1047_v14 = vsel %vm1046_vm2, %v982_v3, -inf }
 0x129   :  { %v1048_v18 = vrot.slane %v1047_v14, 4  ;;  %v951_v21 = vadd.f32 %v932_v10, %v838_v4 }
 0x12a   :  { %v1054_v22 = vsel %vm1046_vm2, %v998_v9, -inf  ;;  %v1061_v24 = vsel %vm1046_vm2, %v999_v12, -inf  ;;  %v1068_v25 = vsel %vm1046_vm2, %v1000_v7, -inf }
 0x12b   :  { %v1049_v28 = vmax.f32 %v1047_v14, %v1048_v18  ;;  %v1055_v1 = vrot.slane %v1054_v22, 4  ;;  %v1062_v29 = vrot.slane %v1061_v24, 4  ;;  %v1069_v30 = vrot.slane %v1068_v25, 4 }
 0x12c   :  { %v963_v13 = vmul.f32 %v7536_v52, %v951_v21 }
 0x12d   :  { %v1050_v34 = vrot.slane %v1049_v28, 2  ;;  %v1056_v35 = vmax.f32 %v1054_v22, %v1055_v1  ;;  %v1063_v11 = vmax.f32 %v1061_v24, %v1062_v29  ;;  %v1070_v36 = vmax.f32 %v1068_v25, %v1069_v30 }
 0x12e   :  { %v975_v40 = vadd.f32 %v7538_v57, %v963_v13 }
 0x12f   :  { %v1051_v42 = vmax.f32 %v1049_v28, %v1050_v34  ;;  %v1057_v43 = vrot.slane %v1056_v35, 2  ;;  %v1064_v41 = vrot.slane %v1063_v11, 2  ;;  %v1071_v44 = vrot.slane %v1070_v36, 2  ;;  %v935_v48 = vpop.f32.mrf.mxu0 }
 0x130   :  { %v983_v50 = vmax.f32 %v975_v40, 0.0  ;;  %v952_v51 = vadd.f32 %v935_v48, %v839_v16 }
 0x131   :  { %v1052_v23 = vrot.slane %v1051_v42, 1  ;;  %v1058_v53 = vmax.f32 %v1056_v35, %v1057_v43  ;;  %v1065_v45 = vmax.f32 %v1063_v11, %v1064_v41  ;;  %v1072_v56 = vmax.f32 %v1070_v36, %v1071_v44 }
 0x132   :  { %v1001_v54 = vrot.slane %v983_v50, 2  ;;  %v1002_v39 = vrot.slane %v983_v50, 4  ;;  %v1003_v58 = vrot.slane %v983_v50, 6  ;;  %v1075_v59 = vsel %vm1046_vm2, %v983_v50, -inf }
 0x133   :  { %v1053_v60 = vmax.f32 %v1051_v42, %v1052_v23  ;;  %v1059_v61 = vrot.slane %v1058_v53, 1  ;;  %v1066_v62 = vrot.slane %v1065_v45, 1  ;;  %v1073_v63 = vrot.slane %v1072_v56, 1 }
 0x134   :  { %v1076_v3 = vrot.slane %v1075_v59, 4  ;;  %v1082_v4 = vsel %vm1046_vm2, %v1001_v54, -inf  ;;  %v1089_v15 = vsel %vm1046_vm2, %v1002_v39, -inf  ;;  %v1096_v5 = vsel %vm1046_vm2, %v1003_v58, -inf }
 0x135   :  { %v1060_v8 = vmax.f32 %v1058_v53, %v1059_v61  ;;  %v1067_v10 = vmax.f32 %v1065_v45, %v1066_v62  ;;  %v1074_v9 = vmax.f32 %v1072_v56, %v1073_v63  ;;  %v1276_v12 = vpack.c.bf16 %v1053_v60, %v1053_v60 }
 0x136   :  { %v1077_v7 = vmax.f32 %v1075_v59, %v1076_v3  ;;  %v1083_v14 = vrot.slane %v1082_v4, 4  ;;  %v1090_v16 = vrot.slane %v1089_v15, 4  ;;  %v1097_v2 = vrot.slane %v1096_v5, 4 }
 0x137   :  { %v1277_v18 = vpack.c.bf16 %v1060_v8, %v1060_v8  ;;  %v1278_v21 = vpack.c.bf16 %v1067_v10, %v1067_v10  ;;  %v1279_v19 = vpack.c.bf16 %v1074_v9, %v1074_v9  ;;  %v937_v20 = vpop.f32.mrf.mxu0  ;;  %v1340_v1 = vunpack.c.l.b16 %v1276_v12 }
 0x138   :  { %v1078_v22 = vrot.slane %v1077_v7, 2  ;;  %v1084_v24 = vmax.f32 %v1082_v4, %v1083_v14  ;;  %v1091_v25 = vmax.f32 %v1089_v15, %v1090_v16  ;;  %v1098_v28 = vmax.f32 %v1096_v5, %v1097_v2  ;;  %v6374_v14 = vld [vmem:[%s9471_s16 + $0x8] sm:$0xff] }
 0x139   :  { %v1341_v29 = vunpack.c.l.b16 %v1277_v18  ;;  %v1342_v30 = vunpack.c.l.b16 %v1278_v21  ;;  %v964_v6 = vmul.f32 %v7536_v52, %v952_v51  ;;  %v1343_v35 = vunpack.c.l.b16 %v1279_v19  ;;  %v6378_v16 = vld [vmem:[%s9471_s16 + $0x28] sm:$0xff]  ;;  %1556 = vmatpush.bf16.msrb.mxu2 %v6374_v14 }
 0x13a   :  { %v1079_v26 = vmax.f32 %v1077_v7, %v1078_v22  ;;  %v1085_v13 = vrot.slane %v1084_v24, 2  ;;  %v1092_v33 = vrot.slane %v1091_v25, 2  ;;  %v1099_v34 = vrot.slane %v1098_v28, 2  ;;  %1658 = vmatpush.bf16.msrb.mxu3 %v6378_v16 }
 0x13b   :  { %v1373_v11 = vsel %vm1372_vm3, %v1341_v29, %v1340_v1  ;;  %v976_v36 = vadd.f32 %v7538_v57, %v964_v6  ;;  %v953_v27 = vadd.f32 %v937_v20, %v7554_v32 }
 0x13c   :  { %v1375_v40 = vsel %vm1374_vm4, %v1342_v30, %v1373_v11  ;;  %v1080_v42 = vrot.slane %v1079_v26, 1  ;;  %v1086_v43 = vmax.f32 %v1084_v24, %v1085_v13  ;;  %v1093_v41 = vmax.f32 %v1091_v25, %v1092_v33 }
 0x13d   :  { %v1377_v44 = vsel %vm1376_vm5, %v1343_v35, %v1375_v40  ;;  %v1100_v48 = vmax.f32 %v1098_v28, %v1099_v34  ;;  %v984_v49 = vmax.f32 %v976_v36, 0.0  ;;  %v965_v53 = vmul.f32 %v7536_v52, %v953_v27  ;;  %v6376_v27 = vld [vmem:[%s9471_s16 + $0x18] sm:$0xff] }
 0x13e   :  { %v1081_v50 = vmax.f32 %v1079_v26, %v1080_v42  ;;  %v1087_v51 = vrot.slane %v1086_v43, 1  ;;  %v1094_v23 = vrot.slane %v1093_v41, 1  ;;  %1513 = vmatpush.bf16.msrb.mxu1 %v6376_v27 }
 0x13f   :  { %v1101_v45 = vrot.slane %v1100_v48, 1  ;;  %v1004_v56 = vrot.slane %v984_v49, 2  ;;  %v1005_v54 = vrot.slane %v984_v49, 4  ;;  %v1006_v32 = vrot.slane %v984_v49, 6  ;;  %v940_v39 = vpop.f32.mrf.mxu0 }
 0x140   :  { %v1088_v58 = vmax.f32 %v1086_v43, %v1087_v51  ;;  %v1095_v59 = vmax.f32 %v1093_v41, %v1094_v23  ;;  %v1280_v60 = vpack.c.bf16 %v1081_v50, %v1081_v50  ;;  %v1103_v61 = vsel %vm1046_vm2, %v984_v49, -inf }
 0x141   :  { %v1102_v62 = vmax.f32 %v1100_v48, %v1101_v45  ;;  %v1104_v63 = vrot.slane %v1103_v61, 4  ;;  %v1110_v0 = vsel %vm1046_vm2, %v1004_v56, -inf  ;;  %v1117_v3 = vsel %vm1046_vm2, %v1005_v54, -inf }
 0x142   :  { %v1281_v4 = vpack.c.bf16 %v1088_v58, %v1088_v58  ;;  %v1282_v15 = vpack.c.bf16 %v1095_v59, %v1095_v59  ;;  %v1344_v5 = vunpack.c.l.b16 %v1280_v60  ;;  %v1111_v8 = vrot.slane %v1110_v0, 4 }
 0x143   :  { %v1283_v10 = vpack.c.bf16 %v1102_v62, %v1102_v62  ;;  %v1105_v9 = vmax.f32 %v1103_v61, %v1104_v63  ;;  %v1118_v12 = vrot.slane %v1117_v3, 4  ;;  %v1124_v7 = vsel %vm1046_vm2, %v1006_v32, -inf }
 0x144   :  { %v1345_v2 = vunpack.c.l.b16 %v1281_v4  ;;  %v1346_v18 = vunpack.c.l.b16 %v1282_v15  ;;  %v1379_v21 = vsel %vm9220_vm6, %v1344_v5, %v1377_v44  ;;  %v1112_v19 = vmax.f32 %v1110_v0, %v1111_v8 }
 0x145   :  { %v1347_v20 = vunpack.c.l.b16 %v1283_v10  ;;  %v1106_v22 = vrot.slane %v1105_v9, 2  ;;  %v1119_v24 = vmax.f32 %v1117_v3, %v1118_v12  ;;  %v1125_v25 = vrot.slane %v1124_v7, 4 }
 0x146   :  { %v1381_v28 = vsel %vm1380_vm7, %v1345_v2, %v1379_v21  ;;  %v1113_v1 = vrot.slane %v1112_v19, 2  ;;  %v977_v29 = vadd.f32 %v7538_v57, %v965_v53  ;;  %v954_v30 = vadd.f32 %v940_v39, %v7557_v37 }
 0x147   :  { %v1383_v6 = vsel %vm1382_vm8, %v1346_v18, %v1381_v28  ;;  %v1107_v26 = vmax.f32 %v1105_v9, %v1106_v22  ;;  %v1120_v13 = vrot.slane %v1119_v24, 2  ;;  %v1126_v33 = vmax.f32 %v1124_v7, %v1125_v25  ;;  %v942_v37 = vpop.f32.mrf.mxu0 }
 0x148   :  { %v1385_v34 = vsel %vm1384_vm9, %v1347_v20, %v1383_v6  ;;  %v1114_v35 = vmax.f32 %v1112_v19, %v1113_v1  ;;  %v985_v11 = vmax.f32 %v977_v29, 0.0  ;;  %v966_v36 = vmul.f32 %v7536_v52, %v954_v30 }
 0x149   :  { %v1407_v40 = vpack.c.b16 %v1385_v34, %v1385_v34  ;;  %v1108_v42 = vrot.slane %v1107_v26, 1  ;;  %v1121_v43 = vmax.f32 %v1119_v24, %v1120_v13  ;;  %v1127_v41 = vrot.slane %v1126_v33, 2 }
 0x14a   :  { %v1115_v44 = vrot.slane %v1114_v35, 1  ;;  %v1007_v48 = vrot.slane %v985_v11, 2  ;;  %v1008_v49 = vrot.slane %v985_v11, 4  ;;  %v1009_v50 = vrot.slane %v985_v11, 6 }
 0x14b   :  { %1415 = vst.msk [vmem:[#allocation3 + $0x4] sm:$0xf] %vm1271_vm1, %v1407_v40  ;;  %v1109_v51 = vmax.f32 %v1107_v26, %v1108_v42  ;;  %v1122_v23 = vrot.slane %v1121_v43, 1  ;;  %v1128_v53 = vmax.f32 %v1126_v33, %v1127_v41  ;;  %v1131_v45 = vsel %vm1046_vm2, %v985_v11, -inf }
 0x14c   :  { %v1116_v56 = vmax.f32 %v1114_v35, %v1115_v44  ;;  %v1132_v54 = vrot.slane %v1131_v45, 4  ;;  %v1138_v32 = vsel %vm1046_vm2, %v1007_v48, -inf  ;;  %v1145_v39 = vsel %vm1046_vm2, %v1008_v49, -inf }
 0x14d   :  { %v1123_v58 = vmax.f32 %v1121_v43, %v1122_v23  ;;  %v1129_v59 = vrot.slane %v1128_v53, 1  ;;  %v1284_v60 = vpack.c.bf16 %v1109_v51, %v1109_v51  ;;  %v1139_v61 = vrot.slane %v1138_v32, 4 }
 0x14e   :  { %v1285_v62 = vpack.c.bf16 %v1116_v56, %v1116_v56  ;;  %v1133_v63 = vmax.f32 %v1131_v45, %v1132_v54  ;;  %v1146_v0 = vrot.slane %v1145_v39, 4  ;;  %v1152_v3 = vsel %vm1046_vm2, %v1009_v50, -inf  ;;  %v6375_v56 = vld [vmem:[%s9471_s16 + $0x10] sm:$0xff] }
 0x14f   :  { %v1130_v4 = vmax.f32 %v1128_v53, %v1129_v59  ;;  %v1286_v15 = vpack.c.bf16 %v1123_v58, %v1123_v58  ;;  %v1348_v5 = vunpack.c.l.b16 %v1284_v60  ;;  %v1140_v8 = vmax.f32 %v1138_v32, %v1139_v61  ;;  %v945_v29 = vpop.f32.mrf.mxu0  ;;  %1514 = vmatpush.bf16.msrb.mxu1 %v6375_v56 }
 0x150   :  { %v1349_v10 = vunpack.c.l.b16 %v1285_v62  ;;  %v1134_v9 = vrot.slane %v1133_v63, 2  ;;  %v1147_v12 = vmax.f32 %v1145_v39, %v1146_v0  ;;  %v1153_v7 = vrot.slane %v1152_v3, 4 }
 0x151   :  { %v1287_v14 = vpack.c.bf16 %v1130_v4, %v1130_v4  ;;  %v1350_v16 = vunpack.c.l.b16 %v1286_v15  ;;  %v1141_v2 = vrot.slane %v1140_v8, 2  ;;  %v978_v18 = vadd.f32 %v7538_v57, %v966_v36 }
 0x152   :  { %v1386_v21 = vsel %vm1372_vm3, %v1349_v10, %v1348_v5  ;;  %v1135_v19 = vmax.f32 %v1133_v63, %v1134_v9  ;;  %v1148_v20 = vrot.slane %v1147_v12, 2  ;;  %v1154_v22 = vmax.f32 %v1152_v3, %v1153_v7 }
 0x153   :  { %v1351_v24 = vunpack.c.l.b16 %v1287_v14  ;;  %v1387_v25 = vsel %vm1374_vm4, %v1350_v16, %v1386_v21  ;;  %v1142_v28 = vmax.f32 %v1140_v8, %v1141_v2  ;;  %v986_v1 = vmax.f32 %v978_v18, 0.0 }
 0x154   :  { %v1136_v30 = vrot.slane %v1135_v19, 1  ;;  %v1149_v6 = vmax.f32 %v1147_v12, %v1148_v20  ;;  %v1155_v26 = vrot.slane %v1154_v22, 2  ;;  %v955_v13 = vadd.f32 %v942_v37, %v7559_v38 }
 0x155   :  { %v1388_v33 = vsel %vm1376_vm5, %v1351_v24, %v1387_v25  ;;  %v1143_v34 = vrot.slane %v1142_v28, 1  ;;  %v1010_v35 = vrot.slane %v986_v1, 2  ;;  %v1011_v11 = vrot.slane %v986_v1, 4 }
 0x156   :  { %v1137_v36 = vmax.f32 %v1135_v19, %v1136_v30  ;;  %v1150_v27 = vrot.slane %v1149_v6, 1  ;;  %v1156_v40 = vmax.f32 %v1154_v22, %v1155_v26  ;;  %v1012_v42 = vrot.slane %v986_v1, 6 }
 0x157   :  { %v1144_v43 = vmax.f32 %v1142_v28, %v1143_v34  ;;  %v1159_v41 = vsel %vm1046_vm2, %v986_v1, -inf  ;;  %v1166_v44 = vsel %vm1046_vm2, %v1010_v35, -inf  ;;  %v1173_v48 = vsel %vm1046_vm2, %v1011_v11, -inf  ;;  %v947_v9 = vpop.f32.mrf.mxu0  ;;  %v6373_v11 = vld [vmem:[%s9471_s16] sm:$0xff] }
 0x158   :  { %v1151_v49 = vmax.f32 %v1149_v6, %v1150_v27  ;;  %v1157_v50 = vrot.slane %v1156_v40, 1  ;;  %v1288_v51 = vpack.c.bf16 %v1137_v36, %v1137_v36  ;;  %v1160_v38 = vrot.slane %v1159_v41, 4  ;;  %1557 = vmatpush.bf16.msrb.mxu2 %v6373_v11 }
 0x159   :  { %v1289_v37 = vpack.c.bf16 %v1144_v43, %v1144_v43  ;;  %v1167_v23 = vrot.slane %v1166_v44, 4  ;;  %v1174_v53 = vrot.slane %v1173_v48, 4  ;;  %v1180_v45 = vsel %vm1046_vm2, %v1012_v42, -inf }
 0x15a   :  { %v1158_v54 = vmax.f32 %v1156_v40, %v1157_v50  ;;  %v1290_v32 = vpack.c.bf16 %v1151_v49, %v1151_v49  ;;  %v1352_v39 = vunpack.c.l.b16 %v1288_v51  ;;  %v1161_v58 = vmax.f32 %v1159_v41, %v1160_v38 }
 0x15b   :  { %v1353_v59 = vunpack.c.l.b16 %v1289_v37  ;;  %v1168_v60 = vmax.f32 %v1166_v44, %v1167_v23  ;;  %v1175_v61 = vmax.f32 %v1173_v48, %v1174_v53  ;;  %v1181_v62 = vrot.slane %v1180_v45, 4 }
 0x15c   :  { %v1291_v63 = vpack.c.bf16 %v1158_v54, %v1158_v54  ;;  %v1354_v0 = vunpack.c.l.b16 %v1290_v32  ;;  %v1389_v3 = vsel %vm9220_vm6, %v1352_v39, %v1388_v33  ;;  %v1162_v4 = vrot.slane %v1161_v58, 2 }
 0x15d   :  { %v1390_v15 = vsel %vm1380_vm7, %v1353_v59, %v1389_v3  ;;  %v1169_v5 = vrot.slane %v1168_v60, 2  ;;  %v1176_v8 = vrot.slane %v1175_v61, 2  ;;  %v1182_v10 = vmax.f32 %v1180_v45, %v1181_v62 }
 0x15e   :  { %v1355_v12 = vunpack.c.l.b16 %v1291_v63  ;;  %v1391_v7 = vsel %vm1382_vm8, %v1354_v0, %v1390_v15  ;;  %v1163_v14 = vmax.f32 %v1161_v58, %v1162_v4  ;;  %v967_v16 = vmul.f32 %v7536_v52, %v955_v13 }
 0x15f   :  { %v1170_v2 = vmax.f32 %v1168_v60, %v1169_v5  ;;  %v1177_v18 = vmax.f32 %v1175_v61, %v1176_v8  ;;  %v1183_v21 = vrot.slane %v1182_v10, 2  ;;  %v956_v19 = vadd.f32 %v945_v29, %v7562_v47 }
 0x160   :  { %v1392_v20 = vsel %vm1384_vm9, %v1355_v12, %v1391_v7  ;;  %v1164_v22 = vrot.slane %v1163_v14, 1  ;;  %v979_v24 = vadd.f32 %v7538_v57, %v967_v16  ;;  %v957_v25 = vadd.f32 %v947_v9, %v7568_v17 }
 0x161   :  { %v1408_v28 = vpack.c.b16 %v1392_v20, %v1392_v20  ;;  %v1171_v1 = vrot.slane %v1170_v2, 1  ;;  %v1178_v30 = vrot.slane %v1177_v18, 1  ;;  %v1184_v6 = vmax.f32 %v1182_v10, %v1183_v21 }
 0x162   :  { %v1165_v26 = vmax.f32 %v1163_v14, %v1164_v22  ;;  %v987_v33 = vmax.f32 %v979_v24, 0.0  ;;  %v968_v13 = vmul.f32 %v7536_v52, %v956_v19  ;;  %v969_v34 = vmul.f32 %v7536_v52, %v957_v25  ;;  %v6377_v52 = vld [vmem:[%s9471_s16 + $0x20] sm:$0xff] }
 0x163   :  { %1416 = vst.msk [vmem:[#allocation3 + $0x8] sm:$0xf] %vm1271_vm1, %v1408_v28  ;;  %v1172_v47 = vmax.f32 %v1170_v2, %v1171_v1  ;;  %v1179_v29 = vmax.f32 %v1177_v18, %v1178_v30  ;;  %v1185_v35 = vrot.slane %v1184_v6, 1  ;;  %1659 = vmatpush.bf16.msrb.mxu3 %v6377_v52 }
 0x164   :  { %v1292_v17 = vpack.c.bf16 %v1165_v26, %v1165_v26  ;;  %v1013_v36 = vrot.slane %v987_v33, 2  ;;  %v1014_v27 = vrot.slane %v987_v33, 4  ;;  %v1015_v40 = vrot.slane %v987_v33, 6 }
 0x165   :  { %v1186_v42 = vmax.f32 %v1184_v6, %v1185_v35  ;;  %v1293_v43 = vpack.c.bf16 %v1172_v47, %v1172_v47  ;;  %v1294_v41 = vpack.c.bf16 %v1179_v29, %v1179_v29  ;;  %v1187_v44 = vsel %vm1046_vm2, %v987_v33, -inf }
 0x166   :  { %v1356_v48 = vunpack.c.l.b16 %v1292_v17  ;;  %v1188_v49 = vrot.slane %v1187_v44, 4  ;;  %v1194_v50 = vsel %vm1046_vm2, %v1013_v36, -inf  ;;  %v1201_v51 = vsel %vm1046_vm2, %v1014_v27, -inf }
 0x167   :  { %v1295_v38 = vpack.c.bf16 %v1186_v42, %v1186_v42  ;;  %v1357_v37 = vunpack.c.l.b16 %v1293_v43  ;;  %v1358_v23 = vunpack.c.l.b16 %v1294_v41  ;;  %v1195_v53 = vrot.slane %v1194_v50, 4 }
 0x168   :  { %v1189_v45 = vmax.f32 %v1187_v44, %v1188_v49  ;;  %v1202_v56 = vrot.slane %v1201_v51, 4  ;;  %v1208_v54 = vsel %vm1046_vm2, %v1015_v40, -inf  ;;  %v980_v32 = vadd.f32 %v7538_v57, %v968_v13 }
 0x169   :  { %v1359_v39 = vunpack.c.l.b16 %v1295_v38  ;;  %v1393_v58 = vsel %vm1372_vm3, %v1357_v37, %v1356_v48  ;;  %v1196_v59 = vmax.f32 %v1194_v50, %v1195_v53  ;;  %v1209_v60 = vrot.slane %v1208_v54, 4 }
 0x16a   :  { %v1394_v61 = vsel %vm1374_vm4, %v1358_v23, %v1393_v58  ;;  %v1190_v62 = vrot.slane %v1189_v45, 2  ;;  %v1203_v63 = vmax.f32 %v1201_v51, %v1202_v56  ;;  %v988_v0 = vmax.f32 %v980_v32, 0.0  ;;  %v6371_v3 = vld [vmem:[#allocation3 + $0x4] sm:$0xff] }
 0x16b   :  { %v1395_v4 = vsel %vm1376_vm5, %v1359_v39, %v1394_v61  ;;  %v1197_v15 = vrot.slane %v1196_v59, 2  ;;  %v1210_v5 = vmax.f32 %v1208_v54, %v1209_v60  ;;  %v981_v8 = vadd.f32 %v7538_v57, %v969_v34  ;;  %5515 = vmatmul.msk.bf16.vlgmr.msrb.gmra.mxu1 %vm1500_vm10, %v6371_v3 }
 0x16c   :  { %v1191_v10 = vmax.f32 %v1189_v45, %v1190_v62  ;;  %v1204_v9 = vrot.slane %v1203_v63, 2  ;;  %v1016_v12 = vrot.slane %v988_v0, 2  ;;  %v1017_v7 = vrot.slane %v988_v0, 4  ;;  %v1419_v45 = vld [vmem:[#allocation3] sm:$0x8] }
 0x16d   :  { %v1198_v14 = vmax.f32 %v1196_v59, %v1197_v15  ;;  %v1211_v16 = vrot.slane %v1210_v5, 2  ;;  %v1018_v2 = vrot.slane %v988_v0, 6  ;;  %v1215_v18 = vsel %vm1046_vm2, %v988_v0, -inf }
 0x16e   :  { %v1192_v21 = vrot.slane %v1191_v10, 1  ;;  %v1205_v19 = vmax.f32 %v1203_v63, %v1204_v9  ;;  %v1216_v20 = vrot.slane %v1215_v18, 4  ;;  %v1222_v22 = vsel %vm1046_vm2, %v1016_v12, -inf }
 0x16f   :  { %v1199_v24 = vrot.slane %v1198_v14, 1  ;;  %v1212_v25 = vmax.f32 %v1210_v5, %v1211_v16  ;;  %v1223_v28 = vrot.slane %v1222_v22, 4  ;;  %v1229_v57 = vsel %vm1046_vm2, %v1017_v7, -inf }
 0x170   :  { %v1193_v1 = vmax.f32 %v1191_v10, %v1192_v21  ;;  %v1206_v30 = vrot.slane %v1205_v19, 1  ;;  %v1217_v6 = vmax.f32 %v1215_v18, %v1216_v20  ;;  %v1230_v26 = vrot.slane %v1229_v57, 4 }
 0x171   :  { %v1200_v33 = vmax.f32 %v1198_v14, %v1199_v24  ;;  %v1213_v13 = vrot.slane %v1212_v25, 1  ;;  %v1224_v34 = vmax.f32 %v1222_v22, %v1223_v28  ;;  %v1236_v47 = vsel %vm1046_vm2, %v1018_v2, -inf  ;;  %v1420_v24 = vld [vmem:[#allocation3 + $0x4] sm:$0xf] }
 0x172   :  { %v1207_v29 = vmax.f32 %v1205_v19, %v1206_v30  ;;  %v1296_v35 = vpack.c.bf16 %v1193_v1, %v1193_v1  ;;  %v1218_v11 = vrot.slane %v1217_v6, 2  ;;  %v1231_v17 = vmax.f32 %v1229_v57, %v1230_v26 }
 0x173   :  { %v1214_v36 = vmax.f32 %v1212_v25, %v1213_v13  ;;  %v1297_v27 = vpack.c.bf16 %v1200_v33, %v1200_v33  ;;  %v1225_v40 = vrot.slane %v1224_v34, 2  ;;  %v1237_v42 = vrot.slane %v1236_v47, 4  ;;  %v1421_v33 = vld [vmem:[#allocation3 + $0x8] sm:$0xf] }
 0x174   :  { %v1298_v43 = vpack.c.bf16 %v1207_v29, %v1207_v29  ;;  %v1360_v41 = vunpack.c.l.b16 %v1296_v35  ;;  %v1219_v44 = vmax.f32 %v1217_v6, %v1218_v11  ;;  %v1232_v52 = vrot.slane %v1231_v17, 2 }
 0x175   :  { %v1299_v48 = vpack.c.bf16 %v1214_v36, %v1214_v36  ;;  %v1361_v49 = vunpack.c.l.b16 %v1297_v27  ;;  %v1226_v50 = vmax.f32 %v1224_v34, %v1225_v40  ;;  %v1238_v51 = vmax.f32 %v1236_v47, %v1237_v42 }
 0x176   :  { %v1362_v38 = vunpack.c.l.b16 %v1298_v43  ;;  %v1396_v37 = vsel %vm9220_vm6, %v1360_v41, %v1395_v4  ;;  %v1220_v23 = vrot.slane %v1219_v44, 1  ;;  %v1233_v53 = vmax.f32 %v1231_v17, %v1232_v52  ;;  %v1569_v41 = vld [vmem:[#allocation3 + $0x4] sm:$0xf] }
 0x177   :  { %v1363_v56 = vunpack.c.l.b16 %v1299_v48  ;;  %v1397_v54 = vsel %vm1380_vm7, %v1361_v49, %v1396_v37  ;;  %v1227_v32 = vrot.slane %v1226_v50, 1  ;;  %v1239_v39 = vrot.slane %v1238_v51, 2 }
 0x178   :  { %v1398_v58 = vsel %vm1382_vm8, %v1362_v38, %v1397_v54  ;;  %v1221_v59 = vmax.f32 %v1219_v44, %v1220_v23  ;;  %v1234_v60 = vrot.slane %v1233_v53, 1  ;;  %v989_v61 = vmax.f32 %v981_v8, 0.0 }
 0x179   :  { %v1399_v62 = vsel %vm1384_vm9, %v1363_v56, %v1398_v58  ;;  %v1228_v63 = vmax.f32 %v1226_v50, %v1227_v32  ;;  %v1240_v0 = vmax.f32 %v1238_v51, %v1239_v39  ;;  %v1426_v3 = vshrl.u32 %v1419_v45, 16  ;;  %v1570_v58 = vld [vmem:[#allocation3 + $0x8] sm:$0xf] }
 0x17a   :  { %v1409_v15 = vpack.c.b16 %v1399_v62, %v1399_v62  ;;  %v1235_v4 = vmax.f32 %v1233_v53, %v1234_v60  ;;  %v1300_v5 = vpack.c.bf16 %v1221_v59, %v1221_v59  ;;  %v1019_v10 = vrot.slane %v989_v61, 2 }
 0x17b   :  { %v1241_v9 = vrot.slane %v1240_v0, 1  ;;  %v1301_v12 = vpack.c.bf16 %v1228_v63, %v1228_v63  ;;  %v1020_v7 = vrot.slane %v989_v61, 4  ;;  %v1021_v14 = vrot.slane %v989_v61, 6 }
 0x17c   :  { %1417 = vst.msk [vmem:[#allocation3 + $0x14] sm:$0xf] %vm1271_vm1, %v1409_v15  ;;  %v1302_v16 = vpack.c.bf16 %v1235_v4, %v1235_v4  ;;  %v1364_v2 = vunpack.c.l.b16 %v1300_v5  ;;  %v1243_v18 = vsel %vm1046_vm2, %v989_v61, -inf  ;;  %v1250_v8 = vsel %vm1046_vm2, %v1019_v10, -inf }
 0x17d   :  { %v1242_v21 = vmax.f32 %v1240_v0, %v1241_v9  ;;  %v1365_v19 = vunpack.c.l.b16 %v1301_v12  ;;  %v1244_v20 = vrot.slane %v1243_v18, 4  ;;  %v1251_v22 = vrot.slane %v1250_v8, 4 }
 0x17e   :  { %v1366_v25 = vunpack.c.l.b16 %v1302_v16  ;;  %v1257_v28 = vsel %vm1046_vm2, %v1020_v7, -inf  ;;  %v1264_v57 = vsel %vm1046_vm2, %v1021_v14, -inf  ;;  %v5493_v47 = vrot.slane %v1426_v3, 11 }
 0x17f   :  { %v1303_v1 = vpack.c.bf16 %v1242_v21, %v1242_v21  ;;  %v1400_v30 = vsel %vm1372_vm3, %v1365_v19, %v1364_v2  ;;  %v1245_v6 = vmax.f32 %v1243_v18, %v1244_v20  ;;  %v1252_v26 = vmax.f32 %v1250_v8, %v1251_v22  ;;  %v1571_v2 = vld [vmem:[#allocation3 + $0xc] sm:$0x1] }
 0x180   :  { %v1258_v13 = vrot.slane %v1257_v28, 4  ;;  %v1265_v34 = vrot.slane %v1264_v57, 4  ;;  %v1431_v29 = vshrl.u32 %v1420_v24, 16  ;;  %v1401_v35 = vsel %vm1374_vm4, %v1366_v25, %v1400_v30 }
 0x181   :  { %v1246_v11 = vrot.slane %v1245_v6, 2  ;;  %v1253_v17 = vrot.slane %v1252_v26, 2  ;;  %v1434_v36 = vshll.u32 %v1420_v24, 16  ;;  %v1440_v43 = vshrl.u32 %v1421_v33, 16 }
 0x182   :  { %v1259_v27 = vmax.f32 %v1257_v28, %v1258_v13  ;;  %v1266_v40 = vmax.f32 %v1264_v57, %v1265_v34  ;;  %v1433_v42 = vrot.slane %v1431_v29, 7  ;;  %v1367_v44 = vunpack.c.l.b16 %v1303_v1 }
 0x183   :  { %v1247_v52 = vmax.f32 %v1245_v6, %v1246_v11  ;;  %v1254_v48 = vmax.f32 %v1252_v26, %v1253_v17  ;;  %v1443_v49 = vshll.u32 %v1421_v33, 16  ;;  %v1442_v45 = vrot.slane %v1440_v43, 7  ;;  %v1423_v11 = vld [vmem:[#allocation3 + $0x14] sm:$0xf]  ;;  %v1422_v43 = vld [vmem:[#allocation3 + $0x10] sm:$0x8] }
 0x184   :  { %v1260_v50 = vrot.slane %v1259_v27, 2  ;;  %v1267_v51 = vrot.slane %v1266_v40, 2  ;;  %v1436_v38 = vor.u32 %v1434_v36, %v1433_v42  ;;  %v1438_v37 = vrot.slane %v1433_v42, 4 }
 0x185   :  { %v1248_v23 = vrot.slane %v1247_v52, 1  ;;  %v1255_v53 = vrot.slane %v1254_v48, 1  ;;  %v1576_v56 = vshrl.u32 %v1569_v41, 16  ;;  %v1579_v59 = vshll.u32 %v1569_v41, 16 }
 0x186   :  { %v1261_v54 = vmax.f32 %v1259_v27, %v1260_v50  ;;  %v1268_v32 = vmax.f32 %v1266_v40, %v1267_v51  ;;  %v1437_v39 = vsel %vm7384_vm11, %v5493_v47, %v1436_v38  ;;  %v1445_v62 = vor.u32 %v1443_v49, %v1442_v45  ;;  %v1572_v27 = vld [vmem:[#allocation3 + $0x14] sm:$0xf] }
 0x187   :  { %v1249_v60 = vmax.f32 %v1247_v52, %v1248_v23  ;;  %v1256_v61 = vmax.f32 %v1254_v48, %v1255_v53  ;;  %v1526_v63 = vunpack.c.l.b16 %v1437_v39  ;;  %v1578_v15 = vrot.slane %v1576_v56, 4 }
 0x188   :  { %v1262_v0 = vrot.slane %v1261_v54, 1  ;;  %v1269_v3 = vrot.slane %v1268_v32, 1  ;;  %v1581_v4 = vrot.slane %v1579_v59, 5  ;;  %v1446_v9 = vsel %vm7384_vm11, %v1438_v37, %v1445_v62  ;;  %v1574_v37 = vld [vmem:[#allocation3 + $0x1c] sm:$0x1] }
 0x189   :  { %v1304_v5 = vpack.c.bf16 %v1249_v60, %v1249_v60  ;;  %v1305_v10 = vpack.c.bf16 %v1256_v61, %v1256_v61  ;;  %v1585_v12 = vshll.u32 %v1570_v58, 16  ;;  %v1527_v16 = vunpack.c.l.b16 %v1446_v9 }
 0x18a   :  { %v1263_v7 = vmax.f32 %v1261_v54, %v1262_v0  ;;  %v1270_v14 = vmax.f32 %v1268_v32, %v1269_v3  ;;  %v1582_v18 = vor.u32 %v1581_v4, %v1578_v15  ;;  %v1589_v20 = vshrl.u32 %v1570_v58, 16 }
 0x18b   :  { %v1368_v8 = vunpack.c.l.b16 %v1304_v5  ;;  %v1369_v21 = vunpack.c.l.b16 %v1305_v10  ;;  %v1587_v19 = vrot.slane %v1585_v12, 5  ;;  %v1402_v22 = vsel %vm1376_vm5, %v1367_v44, %v1401_v35 }
 0x18c   :  { %v1306_v24 = vpack.c.bf16 %v1263_v7, %v1263_v7  ;;  %v1307_v25 = vpack.c.bf16 %v1270_v14, %v1270_v14  ;;  %v1530_v28 = vpack.c.b16 %v1527_v16, %v1526_v63  ;;  %v1591_v1 = vrot.slane %v1589_v20, 4 }
 0x18d   :  { %v1403_v57 = vsel %vm9220_vm6, %v1368_v8, %v1402_v22  ;;  %v1595_v30 = vshll.u32 %v1571_v2, 16  ;;  %v1583_v13 = vrot.slane %v1582_v18, 4  ;;  %v1453_v41 = vshrl.u32 %v1423_v11, 16 }
 0x18e   :  { %v1370_v6 = vunpack.c.l.b16 %v1306_v24  ;;  %v1404_v26 = vsel %vm1380_vm7, %v1369_v21, %v1403_v57  ;;  %5525 = vmatmul.msk.bf16.vlgmr.msrb.gmra.mxu2 %vm1500_vm10, %v1530_v28  ;;  %v1371_v33 = vunpack.c.l.b16 %v1307_v25  ;;  %v1592_v34 = vor.u32 %v1591_v1, %v1587_v19 }
 0x18f   :  { %v1597_v47 = vrot.slane %v1595_v30, 5  ;;  %v1588_v17 = vsel %vm7406_vm12, %v1583_v13, %v1587_v19  ;;  %v1600_v48 = vshrl.u32 %v1572_v27, 16  ;;  %v1603_v49 = vshll.u32 %v1572_v27, 16  ;;  %v7683_v30 = vld [vmem:[#allocation20] ss:$0 sm:$0xff] }
 0x190   :  { %v1405_v29 = vsel %vm1382_vm8, %v1370_v6, %v1404_v26  ;;  %v1593_v36 = vrot.slane %v1592_v34, 4  ;;  %v1628_v44 = vunpack.c.l.b16 %v1588_v17  ;;  %v1448_v51 = vshrl.u32 %v1422_v43, 16 }
 0x191   :  { %v1406_v35 = vsel %vm1384_vm9, %v1371_v33, %v1405_v29  ;;  %v1455_v38 = vrot.slane %v1453_v41, 7  ;;  %v1602_v23 = vrot.slane %v1600_v48, 4  ;;  %v1605_v53 = vrot.slane %v1603_v49, 5  ;;  %v7685_v33 = vld [vmem:[#allocation21] ss:$0 sm:$0xff] }
 0x192   :  { %v1410_v40 = vpack.c.b16 %v1406_v35, %v1406_v35  ;;  %v1598_v42 = vsel %vm7406_vm12, %v1593_v36, %v1597_v47  ;;  %v1456_v45 = vshll.u32 %v1423_v11, 16  ;;  %v5494_v56 = vrot.slane %v1448_v51, 11 }
 0x193   :  { %v1629_v52 = vunpack.c.l.b16 %v1598_v42  ;;  %v1619_v59 = vshll.u32 %v1574_v37, 16  ;;  %v1606_v61 = vor.u32 %v1605_v53, %v1602_v23  ;;  %v1460_v5 = vrot.slane %v1455_v38, 4 }
 0x194   :  { %1418 = vst.msk [vmem:[#allocation3 + $0x18] sm:$0xf] %vm1271_vm1, %v1410_v40  ;;  %v1458_v39 = vor.u32 %v1456_v45, %v1455_v38 }
 0x195   :  { %v1632_v50 = vpack.c.b16 %v1629_v52, %v1628_v44  ;;  %v1621_v10 = vrot.slane %v1619_v59, 5  ;;  %v1607_v7 = vrot.slane %v1606_v61, 4 }
 0x196   :  { %v1459_v9 = vsel %vm7384_vm11, %v5494_v56, %v1458_v39 }
 0x197   :  { %5539 = vmatmul.msk.bf16.vlgmr.msrb.gmra.mxu3 %vm1500_vm10, %v1632_v50  ;;  %v1528_v8 = vunpack.c.l.b16 %v1459_v9 }
 0x19b   :  { %v6372_v54 = vld [vmem:[#allocation3 + $0x14] sm:$0xff] }
 0x19c   :  { %v1424_v32 = vld [vmem:[#allocation3 + $0x18] sm:$0xf]  ;;  %5516 = vmatmul.msk.bf16.gmra.mxu1 %vm1500_vm10, %v6372_v54 }
 0x19d   :  { %v1573_v58 = vld [vmem:[#allocation3 + $0x18] sm:$0xf]  ;;  %v1462_v60 = vshrl.u32 %v1424_v32, 16  ;;  %v1465_v3 = vshll.u32 %v1424_v32, 16 }
 0x19e   :  { %v1609_v62 = vshll.u32 %v1573_v58, 16  ;;  %v1613_v63 = vshrl.u32 %v1573_v58, 16 }
 0x19f   :  { %v1464_v0 = vrot.slane %v1462_v60, 7 }
 0x1a0   :  { %v1611_v15 = vrot.slane %v1609_v62, 5  ;;  %v1615_v4 = vrot.slane %v1613_v63, 4 }
 0x1a1   :  { %v1467_v12 = vor.u32 %v1465_v3, %v1464_v0 }
 0x1a2   :  { %v1616_v14 = vor.u32 %v1615_v4, %v1611_v15  ;;  %v1612_v2 = vsel %vm7406_vm12, %v1607_v7, %v1611_v15 }
 0x1a3   :  { %v1468_v16 = vsel %vm7384_vm11, %v1460_v5, %v1467_v12  ;;  %v1630_v22 = vunpack.c.l.b16 %v1612_v2 }
 0x1a4   :  { %v1617_v18 = vrot.slane %v1616_v14, 4  ;;  %v1529_v21 = vunpack.c.l.b16 %v1468_v16 }
 0x1a6   :  { %v1622_v19 = vsel %vm7406_vm12, %v1617_v18, %v1621_v10  ;;  %v1531_v20 = vpack.c.b16 %v1529_v21, %v1528_v8 }
 0x1a7   :  { %v1631_v24 = vunpack.c.l.b16 %v1622_v19 }
 0x1a8   :  { %5526 = vmatmul.msk.bf16.gmra.mxu2 %vm1500_vm10, %v1531_v20 }
 0x1a9   :  { %v1633_v25 = vpack.c.b16 %v1631_v24, %v1630_v22 }
 0x1ab   :  { %5540 = vmatmul.msk.bf16.gmra.mxu3 %vm1500_vm10, %v1633_v25 }
 0x1e8   :  { %v1516_v57 = vpop.f32.mrf.mxu1 }
 0x1f0   :  { %v1518_v47 = vpop.f32.mrf.mxu1 }
 0x211   :  { %v1559_v28 = vpop.f32.mrf.mxu2 }
 0x212   :  { %v1560_v1 = vadd.f32 %v1559_v28, %v1516_v57 }
 0x219   :  { %v1561_v34 = vpop.f32.mrf.mxu2  ;;  %v1521_v61 = vpop.f32.mrf.mxu1 }
 0x21a   :  { %v1661_v6 = vpop.f32.mrf.mxu3  ;;  %v1562_v11 = vadd.f32 %v1561_v34, %v1518_v47 }
 0x21b   :  { %v1671_v26 = vadd.f32 %v1661_v6, %v1560_v1 }
 0x21d   :  { %v1679_v13 = vmul.f32 %v7683_v30, %v1671_v26 }
 0x21f   :  { %v1687_v29 = vadd.f32 %v7685_v33, %v1679_v13 }
 0x221   :  { %v1691_v35 = vmax.f32 %v1687_v29, 0.0 }
 0x222   :  { %v1663_v17 = vpop.f32.mrf.mxu3 }
 0x223   :  { %v1699_v36 = vrot.slane %v1691_v35, 2  ;;  %v1700_v27 = vrot.slane %v1691_v35, 4  ;;  %v1701_v40 = vrot.slane %v1691_v35, 6  ;;  %v1724_v42 = vsel %vm9219_vm14, %v1691_v35, -inf }
 0x224   :  { %v1725_v43 = vrot.slane %v1724_v42, 4  ;;  %v1672_v41 = vadd.f32 %v1663_v17, %v1562_v11 }
 0x225   :  { %v1731_v44 = vsel %vm9219_vm14, %v1699_v36, -inf  ;;  %v1738_v52 = vsel %vm9219_vm14, %v1700_v27, -inf  ;;  %v1745_v48 = vsel %vm9219_vm14, %v1701_v40, -inf }
 0x226   :  { %v1726_v49 = vmax.f32 %v1724_v42, %v1725_v43  ;;  %v1732_v50 = vrot.slane %v1731_v44, 4  ;;  %v1739_v51 = vrot.slane %v1738_v52, 4  ;;  %v1746_v38 = vrot.slane %v1745_v48, 4 }
 0x227   :  { %v1680_v37 = vmul.f32 %v7683_v30, %v1672_v41 }
 0x228   :  { %v1727_v23 = vrot.slane %v1726_v49, 2  ;;  %v1733_v53 = vmax.f32 %v1731_v44, %v1732_v50  ;;  %v1740_v45 = vmax.f32 %v1738_v52, %v1739_v51  ;;  %v1747_v56 = vmax.f32 %v1745_v48, %v1746_v38 }
 0x229   :  { %v1688_v54 = vadd.f32 %v7685_v33, %v1680_v37 }
 0x22a   :  { %v1728_v39 = vmax.f32 %v1726_v49, %v1727_v23  ;;  %v1734_v58 = vrot.slane %v1733_v53, 2  ;;  %v1741_v59 = vrot.slane %v1740_v45, 2  ;;  %v1748_v60 = vrot.slane %v1747_v56, 2  ;;  %v1523_v49 = vpop.f32.mrf.mxu1 }
 0x22b   :  { %v1564_v32 = vpop.f32.mrf.mxu2  ;;  %v1692_v62 = vmax.f32 %v1688_v54, 0.0 }
 0x22c   :  { %v1565_v63 = vadd.f32 %v1564_v32, %v1521_v61  ;;  %v1729_v3 = vrot.slane %v1728_v39, 1  ;;  %v1735_v15 = vmax.f32 %v1733_v53, %v1734_v58  ;;  %v1742_v4 = vmax.f32 %v1740_v45, %v1741_v59 }
 0x22d   :  { %v1749_v5 = vmax.f32 %v1747_v56, %v1748_v60  ;;  %v1702_v10 = vrot.slane %v1692_v62, 2  ;;  %v1703_v9 = vrot.slane %v1692_v62, 4  ;;  %v1704_v12 = vrot.slane %v1692_v62, 6 }
 0x22e   :  { %v1666_v0 = vpop.f32.mrf.mxu3  ;;  %v1752_v7 = vsel %vm9219_vm14, %v1692_v62, -inf  ;;  %v1730_v14 = vmax.f32 %v1728_v39, %v1729_v3  ;;  %v1736_v16 = vrot.slane %v1735_v15, 1  ;;  %v1743_v2 = vrot.slane %v1742_v4, 1 }
 0x22f   :  { %v1750_v18 = vrot.slane %v1749_v5, 1  ;;  %v1753_v8 = vrot.slane %v1752_v7, 4  ;;  %v1759_v21 = vsel %vm9219_vm14, %v1702_v10, -inf  ;;  %v1766_v19 = vsel %vm9219_vm14, %v1703_v9, -inf }
 0x230   :  { %v1773_v20 = vsel %vm9219_vm14, %v1704_v12, -inf  ;;  %v1737_v22 = vmax.f32 %v1735_v15, %v1736_v16  ;;  %v1744_v24 = vmax.f32 %v1742_v4, %v1743_v2  ;;  %v1841_v28 = vpack.c.bf16 %v1730_v14, %v1730_v14 }
 0x231   :  { %v1751_v25 = vmax.f32 %v1749_v5, %v1750_v18  ;;  %v1754_v57 = vmax.f32 %v1752_v7, %v1753_v8  ;;  %v1760_v1 = vrot.slane %v1759_v21, 4  ;;  %v1767_v6 = vrot.slane %v1766_v19, 4 }
 0x232   :  { %v1774_v26 = vrot.slane %v1773_v20, 4  ;;  %v1842_v13 = vpack.c.bf16 %v1737_v22, %v1737_v22  ;;  %v1843_v34 = vpack.c.bf16 %v1744_v24, %v1744_v24  ;;  %v1873_v27 = vunpack.c.l.b16 %v1841_v28  ;;  %v6383_v28 = vld [vmem:[%s9472_s5 + $0x18] sm:$0xff] }
 0x233   :  { %v1844_v47 = vpack.c.bf16 %v1751_v25, %v1751_v25  ;;  %v1755_v29 = vrot.slane %v1754_v57, 2  ;;  %v1761_v11 = vmax.f32 %v1759_v21, %v1760_v1  ;;  %v1768_v35 = vmax.f32 %v1766_v19, %v1767_v6  ;;  %v1566_v36 = vpop.f32.mrf.mxu2  ;;  %v6387_v1 = vld [vmem:[%s9472_s5 + $0x38] sm:$0xff]  ;;  %2037 = vmatpush.bf16.msra.mxu2 %v6383_v28 }
 0x234   :  { %v1775_v17 = vmax.f32 %v1773_v20, %v1774_v26  ;;  %v1874_v40 = vunpack.c.l.b16 %v1842_v13  ;;  %v1875_v42 = vunpack.c.l.b16 %v1843_v34  ;;  %v1673_v43 = vadd.f32 %v1666_v0, %v1565_v63  ;;  %1993 = vmatpush.bf16.msra.mxu1 %v6387_v1 }
 0x235   :  { %v1756_v41 = vmax.f32 %v1754_v57, %v1755_v29  ;;  %v1762_v44 = vrot.slane %v1761_v11, 2  ;;  %v1769_v52 = vrot.slane %v1768_v35, 2  ;;  %v1567_v37 = vadd.f32 %v1566_v36, %v1523_v49  ;;  %v6391_v57 = vld [vmem:[%s9472_s5 + $0x58] sm:$0xff]  ;;  %v6390_v36 = vld [vmem:[%s9472_s5 + $0x50] sm:$0xff] }
 0x236   :  { %v1776_v48 = vrot.slane %v1775_v17, 2  ;;  %v1668_v50 = vpop.f32.mrf.mxu3  ;;  %v1889_v51 = vsel %vm1372_vm3, %v1874_v40, %v1873_v27  ;;  %v1681_v38 = vmul.f32 %v7683_v30, %v1673_v43  ;;  %v1876_v54 = vunpack.c.l.b16 %v1844_v47  ;;  %2122 = vmatpush.bf16.msra.mxu3 %v6391_v57  ;;  %v6386_v43 = vld [vmem:[%s9472_s5 + $0x30] sm:$0xff] }
 0x237   :  { %v1890_v23 = vsel %vm1374_vm4, %v1875_v42, %v1889_v51  ;;  %v1757_v53 = vrot.slane %v1756_v41, 1  ;;  %v1763_v45 = vmax.f32 %v1761_v11, %v1762_v44  ;;  %v1770_v56 = vmax.f32 %v1768_v35, %v1769_v52 }
 0x238   :  { %v1777_v32 = vmax.f32 %v1775_v17, %v1776_v48  ;;  %v1689_v39 = vadd.f32 %v7685_v33, %v1681_v38  ;;  %v1674_v58 = vadd.f32 %v1668_v50, %v1567_v37  ;;  %v1891_v62 = vsel %vm1376_vm5, %v1876_v54, %v1890_v23  ;;  %v6382_v17 = vld [vmem:[%s9472_s5 + $0x10] sm:$0xff]  ;;  %1994 = vmatpush.bf16.msra.mxu1 %v6386_v43 }
 0x239   :  { %v1758_v59 = vmax.f32 %v1756_v41, %v1757_v53  ;;  %v1764_v60 = vrot.slane %v1763_v45, 1  ;;  %v1771_v61 = vrot.slane %v1770_v56, 1  ;;  %2038 = vmatpush.bf16.msra.mxu2 %v6382_v17  ;;  %v6381_v53 = vld [vmem:[%s9472_s5 + $0x8] sm:$0xff] }
 0x23a   :  { %v1778_v63 = vrot.slane %v1777_v32, 1  ;;  %v1693_v0 = vmax.f32 %v1689_v39, 0.0  ;;  %v1682_v5 = vmul.f32 %v7683_v30, %v1674_v58  ;;  %2123 = vmatpush.bf16.msra.mxu3 %v6390_v36  ;;  %v6385_v58 = vld [vmem:[%s9472_s5 + $0x28] sm:$0xff] }
 0x23b   :  { %v1765_v3 = vmax.f32 %v1763_v45, %v1764_v60  ;;  %v1772_v15 = vmax.f32 %v1770_v56, %v1771_v61  ;;  %v1845_v4 = vpack.c.bf16 %v1758_v59, %v1758_v59  ;;  %v6389_v45 = vld [vmem:[%s9472_s5 + $0x48] sm:$0xff] }
 0x23c   :  { %v1779_v10 = vmax.f32 %v1777_v32, %v1778_v63  ;;  %v1705_v9 = vrot.slane %v1693_v0, 2  ;;  %v1706_v12 = vrot.slane %v1693_v0, 4  ;;  %v1707_v7 = vrot.slane %v1693_v0, 6  ;;  %1995 = vmatpush.bf16.msra.mxu1 %v6385_v58 }
 0x23d   :  { %v1846_v14 = vpack.c.bf16 %v1765_v3, %v1765_v3  ;;  %v1847_v16 = vpack.c.bf16 %v1772_v15, %v1772_v15  ;;  %v1877_v2 = vunpack.c.l.b16 %v1845_v4  ;;  %v1780_v18 = vsel %vm9219_vm14, %v1693_v0, -inf  ;;  %2039 = vmatpush.bf16.msra.mxu2 %v6381_v53 }
 0x23e   :  { %v1848_v8 = vpack.c.bf16 %v1779_v10, %v1779_v10  ;;  %v1781_v21 = vrot.slane %v1780_v18, 4  ;;  %v1787_v19 = vsel %vm9219_vm14, %v1705_v9, -inf  ;;  %v1794_v20 = vsel %vm9219_vm14, %v1706_v12, -inf  ;;  %2124 = vmatpush.bf16.msra.mxu3 %v6389_v45  ;;  %v6380_v12 = vld [vmem:[%s9472_s5] sm:$0xff] }
 0x23f   :  { %v1878_v22 = vunpack.c.l.b16 %v1846_v14  ;;  %v1879_v24 = vunpack.c.l.b16 %v1847_v16  ;;  %v1892_v25 = vsel %vm9220_vm6, %v1877_v2, %v1891_v62  ;;  %v1788_v30 = vrot.slane %v1787_v19, 4 }
 0x240   :  { %v1880_v6 = vunpack.c.l.b16 %v1848_v8  ;;  %v1782_v26 = vmax.f32 %v1780_v18, %v1781_v21  ;;  %v1795_v13 = vrot.slane %v1794_v20, 4  ;;  %v1801_v34 = vsel %vm9219_vm14, %v1707_v7, -inf  ;;  %v6388_v7 = vld [vmem:[%s9472_s5 + $0x40] sm:$0xff] }
 0x241   :  { %v1893_v47 = vsel %vm1380_vm7, %v1878_v22, %v1892_v25  ;;  %v1789_v29 = vmax.f32 %v1787_v19, %v1788_v30  ;;  %v1802_v11 = vrot.slane %v1801_v34, 4  ;;  %v1690_v35 = vadd.f32 %v7685_v33, %v1682_v5  ;;  %v6384_v8 = vld [vmem:[%s9472_s5 + $0x20] sm:$0xff]  ;;  %2040 = vmatpush.bf16.msra.mxu2 %v6380_v12 }
 0x242   :  { %v1894_v27 = vsel %vm1382_vm8, %v1879_v24, %v1893_v47  ;;  %v1783_v40 = vrot.slane %v1782_v26, 2  ;;  %v1796_v42 = vmax.f32 %v1794_v20, %v1795_v13  ;;  %2125 = vmatpush.bf16.msra.mxu3 %v6388_v7  ;;  %1996 = vmatpush.bf16.msra.mxu1 %v6384_v8  ;;  %v2050_v8 = vld [vmem:[#allocation4 + $0x14] sm:$0x1] }
 0x243   :  { %v1895_v33 = vsel %vm1384_vm9, %v1880_v6, %v1894_v27  ;;  %v1790_v41 = vrot.slane %v1789_v29, 2  ;;  %v1803_v44 = vmax.f32 %v1801_v34, %v1802_v11  ;;  %v1694_v52 = vmax.f32 %v1690_v35, 0.0 }
 0x244   :  { %v1903_v48 = vpack.c.b16 %v1895_v33, %v1895_v33  ;;  %v1784_v49 = vmax.f32 %v1782_v26, %v1783_v40  ;;  %v1797_v50 = vrot.slane %v1796_v42, 2 }
 0x245   :  { %v1791_v51 = vmax.f32 %v1789_v29, %v1790_v41  ;;  %v1804_v38 = vrot.slane %v1803_v44, 2  ;;  %v1708_v37 = vrot.slane %v1694_v52, 2  ;;  %v1709_v23 = vrot.slane %v1694_v52, 4 }
 0x246   :  { %1907 = vst.msk [vmem:[#allocation4 + $0x4] sm:$0xf] %vm1836_vm13, %v1903_v48  ;;  %v1785_v56 = vrot.slane %v1784_v49, 1  ;;  %v1798_v54 = vmax.f32 %v1796_v42, %v1797_v50  ;;  %v1710_v32 = vrot.slane %v1694_v52, 6  ;;  %v1808_v39 = vsel %vm9219_vm14, %v1694_v52, -inf }
 0x247   :  { %v1792_v59 = vrot.slane %v1791_v51, 1  ;;  %v1805_v60 = vmax.f32 %v1803_v44, %v1804_v38  ;;  %v1809_v61 = vrot.slane %v1808_v39, 4  ;;  %v1815_v62 = vsel %vm9219_vm14, %v1708_v37, -inf }
 0x248   :  { %v1786_v63 = vmax.f32 %v1784_v49, %v1785_v56  ;;  %v1799_v0 = vrot.slane %v1798_v54, 1  ;;  %v1816_v3 = vrot.slane %v1815_v62, 4  ;;  %v1822_v15 = vsel %vm9219_vm14, %v1709_v23, -inf }
 0x249   :  { %v1793_v4 = vmax.f32 %v1791_v51, %v1792_v59  ;;  %v1806_v5 = vrot.slane %v1805_v60, 1  ;;  %v1810_v10 = vmax.f32 %v1808_v39, %v1809_v61  ;;  %v1823_v9 = vrot.slane %v1822_v15, 4 }
 0x24a   :  { %v1800_v14 = vmax.f32 %v1798_v54, %v1799_v0  ;;  %v1849_v16 = vpack.c.bf16 %v1786_v63, %v1786_v63  ;;  %v1817_v2 = vmax.f32 %v1815_v62, %v1816_v3  ;;  %v1829_v18 = vsel %vm9219_vm14, %v1710_v32, -inf  ;;  %v1909_v62 = vld [vmem:[#allocation4] sm:$0x8] }
 0x24b   :  { %v1850_v21 = vpack.c.bf16 %v1793_v4, %v1793_v4  ;;  %v1811_v19 = vrot.slane %v1810_v10, 2  ;;  %v1824_v20 = vmax.f32 %v1822_v15, %v1823_v9  ;;  %v1807_v22 = vmax.f32 %v1805_v60, %v1806_v5  ;;  %v2048_v4 = vld [vmem:[#allocation4 + $0x8] sm:$0x1]  ;;  %v1911_v5 = vld [vmem:[#allocation4 + $0xc] sm:$0x8] }
 0x24c   :  { %v1851_v24 = vpack.c.bf16 %v1800_v14, %v1800_v14  ;;  %v1818_v25 = vrot.slane %v1817_v2, 2  ;;  %v1830_v30 = vrot.slane %v1829_v18, 4  ;;  %v1881_v6 = vunpack.c.l.b16 %v1849_v16 }
 0x24d   :  { %v1882_v28 = vunpack.c.l.b16 %v1850_v21  ;;  %v1812_v57 = vmax.f32 %v1810_v10, %v1811_v19  ;;  %v1825_v1 = vrot.slane %v1824_v20, 2  ;;  %v1852_v11 = vpack.c.bf16 %v1807_v22, %v1807_v22  ;;  %v2047_v58 = vld [vmem:[#allocation4 + $0x4] sm:$0xf] }
 0x24e   :  { %v1819_v26 = vmax.f32 %v1817_v2, %v1818_v25  ;;  %v1831_v13 = vmax.f32 %v1829_v18, %v1830_v30  ;;  %v1883_v34 = vunpack.c.l.b16 %v1851_v24  ;;  %v1910_v60 = vld [vmem:[#allocation4 + $0x4] sm:$0xf]  ;;  %v2052_v63 = vshrl.u32 %v2047_v58, 16 }
 0x24f   :  { %v1813_v47 = vrot.slane %v1812_v57, 1  ;;  %v1826_v29 = vmax.f32 %v1824_v20, %v1825_v1  ;;  %v1896_v35 = vsel %vm1372_vm3, %v1882_v28, %v1881_v6  ;;  %v1884_v52 = vunpack.c.l.b16 %v1852_v11  ;;  %v5553_v7 = vld [vmem:[#allocation4 + $0x4] sm:$0xf] }
 0x250   :  { %v1820_v17 = vrot.slane %v1819_v26, 1  ;;  %v1832_v36 = vrot.slane %v1831_v13, 2  ;;  %v1897_v33 = vsel %vm1374_vm4, %v1883_v34, %v1896_v35  ;;  %v2055_v0 = vshll.u32 %v2047_v58, 16 }
 0x251   :  { %v1814_v27 = vmax.f32 %v1812_v57, %v1813_v47  ;;  %v1827_v40 = vrot.slane %v1826_v29, 1  ;;  %v1898_v38 = vsel %vm1376_vm5, %v1884_v52, %v1897_v33  ;;  %v1919_v3 = vshrl.u32 %v1910_v60, 16 }
 0x252   :  { %v1821_v42 = vmax.f32 %v1819_v26, %v1820_v17  ;;  %v1833_v43 = vmax.f32 %v1831_v13, %v1832_v36  ;;  %v1914_v15 = vshrl.u32 %v1909_v62, 16  ;;  %v2054_v10 = vrot.slane %v2052_v63, 4 }
 0x253   :  { %v1828_v41 = vmax.f32 %v1826_v29, %v1827_v40  ;;  %v1853_v44 = vpack.c.bf16 %v1814_v27, %v1814_v27  ;;  %v2057_v9 = vrot.slane %v2055_v0, 5  ;;  %v1921_v12 = vrot.slane %v1919_v3, 7 }
 0x254   :  { %v1834_v48 = vrot.slane %v1833_v43, 1  ;;  %v1854_v49 = vpack.c.bf16 %v1821_v42, %v1821_v42  ;;  %v2061_v14 = vshll.u32 %v2048_v4, 16  ;;  %v5541_v16 = vrot.slane %v1914_v15, 11 }
 0x255   :  { %v1855_v50 = vpack.c.bf16 %v1828_v41, %v1828_v41  ;;  %v1885_v51 = vunpack.c.l.b16 %v1853_v44  ;;  %v1922_v2 = vshll.u32 %v1910_v60, 16  ;;  %v1927_v18 = vshrl.u32 %v1911_v5, 16 }
 0x256   :  { %v1835_v37 = vmax.f32 %v1833_v43, %v1834_v48  ;;  %v1886_v23 = vunpack.c.l.b16 %v1854_v49  ;;  %v2058_v22 = vor.u32 %v2057_v9, %v2054_v10  ;;  %v2075_v1 = vshll.u32 %v2050_v8, 16 }
 0x257   :  { %v1887_v53 = vunpack.c.l.b16 %v1855_v50  ;;  %v1899_v45 = vsel %vm9220_vm6, %v1885_v51, %v1898_v38  ;;  %v1924_v25 = vor.u32 %v1922_v2, %v1921_v12  ;;  %v5542_v6 = vrot.slane %v1927_v18, 11 }
 0x258   :  { %v1856_v56 = vpack.c.bf16 %v1835_v37, %v1835_v37  ;;  %v1900_v54 = vsel %vm1380_vm7, %v1886_v23, %v1899_v45  ;;  %v2059_v47 = vrot.slane %v2058_v22, 4  ;;  %v2063_v29 = vrot.slane %v2061_v14, 5  ;;  %v6590_v37 = vld [vmem:[#allocation23] ss:$0 sm:$0xff]  ;;  %v6591_v45 = vld [vmem:[#allocation24] ss:$0 sm:$0xff] }
 0x259   :  { %v1901_v32 = vsel %vm1382_vm8, %v1887_v53, %v1900_v54  ;;  %v1925_v35 = vsel %vm7384_vm11, %v5541_v16, %v1924_v25  ;;  %v2077_v27 = vrot.slane %v2075_v1, 5 }
 0x25a   :  { %v1888_v39 = vunpack.c.l.b16 %v1856_v56  ;;  %v2003_v42 = vunpack.c.l.b16 %v1925_v35  ;;  %v2064_v33 = vsel %vm7406_vm12, %v2059_v47, %v2063_v29 }
 0x25b   :  { %v2088_v48 = vunpack.c.l.b16 %v2064_v33 }
 0x25c   :  { %v1902_v59 = vsel %vm1384_vm9, %v1888_v39, %v1901_v32 }
 0x25d   :  { %v1904_v61 = vpack.c.b16 %v1902_v59, %v1902_v59 }
 0x25f   :  { %1908 = vst.msk [vmem:[#allocation4 + $0x10] sm:$0xf] %vm1836_vm13, %v1904_v61 }
 0x266   :  { %v6379_v21 = vld [vmem:[#allocation4 + $0xc] sm:$0xf0] }
 0x267   :  { %v1912_v19 = vld [vmem:[#allocation4 + $0x10] sm:$0xf]  ;;  %v5554_v24 = vor.u32 %v6379_v21, %v5553_v7 }
 0x268   :  { %v2049_v20 = vld [vmem:[#allocation4 + $0x10] sm:$0xf]  ;;  %v1932_v30 = vshrl.u32 %v1912_v19, 16  ;;  %v1935_v13 = vshll.u32 %v1912_v19, 16 }
 0x269   :  { %v2066_v28 = vshrl.u32 %v2049_v20, 16  ;;  %v2069_v57 = vshll.u32 %v2049_v20, 16  ;;  %5571 = vmatmul.msk.bf16.vlgmr.msra.gmra.mxu1 %vm1985_vm15, %v5554_v24 }
 0x26a   :  { %v1934_v26 = vrot.slane %v1932_v30, 7 }
 0x26b   :  { %v2068_v34 = vrot.slane %v2066_v28, 4  ;;  %v2071_v11 = vrot.slane %v2069_v57, 5 }
 0x26c   :  { %v1937_v17 = vor.u32 %v1935_v13, %v1934_v26 }
 0x26d   :  { %v2072_v36 = vor.u32 %v2071_v11, %v2068_v34 }
 0x26e   :  { %v1938_v40 = vsel %vm7384_vm11, %v5542_v6, %v1937_v17  ;;  %vm2162_vm11 = vcmask 1041408  }
 0x26f   :  { %v2004_v43 = vunpack.c.l.b16 %v1938_v40  ;;  %v2073_v41 = vrot.slane %v2072_v36, 4 }
 0x271   :  { %v2005_v44 = vpack.c.b16 %v2004_v43, %v2003_v42  ;;  %v2078_v52 = vsel %vm7406_vm12, %v2073_v41, %v2077_v27 }
 0x272   :  { %v2089_v49 = vunpack.c.l.b16 %v2078_v52 }
 0x273   :  { %5588 = vmatmul.msk.bf16.vlgmr.msra.gmra.mxu2 %vm1985_vm15, %v2005_v44 }
 0x274   :  { %v2090_v50 = vpack.c.b16 %v2089_v49, %v2088_v48 }
 0x276   :  { %5613 = vmatmul.msk.bf16.vlgmr.msra.gmra.mxu3 %vm1985_vm15, %v2090_v50 }
 0x2e6   :  { %v1998_v51 = vpop.f32.mrf.mxu1 }
 0x2ee   :  { %v2000_v54 = vpop.f32.mrf.mxu1 }
 0x2f6   :  { %v2042_v31 = vpop.f32.mrf.mxu2 }
 0x2f7   :  { %v2043_v38 = vadd.f32 %v2042_v31, %v1998_v51 }
 0x2f9   :  { %v2127_v23 = vpop.f32.mrf.mxu3 }
 0x2fa   :  { %v2132_v53 = vadd.f32 %v2127_v23, %v2043_v38 }
 0x2fc   :  { %v2138_v56 = vmul.f32 %v6590_v37, %v2132_v53 }
 0x2fe   :  { %v2144_v32 = vadd.f32 %v6591_v45, %v2138_v56  ;;  %v2044_v39 = vpop.f32.mrf.mxu2 }
 0x2ff   :  { %v2045_v55 = vadd.f32 %v2044_v39, %v2000_v54 }
 0x300   :  { %v2146_v58 = vmax.f32 %v2144_v32, 0.0 }
 0x301   :  { %v2129_v59 = vpop.f32.mrf.mxu3 }
 0x302   :  { %v2150_v60 = vrot.slane %v2146_v58, 2  ;;  %v2151_v61 = vrot.slane %v2146_v58, 4  ;;  %v2152_v62 = vrot.slane %v2146_v58, 6  ;;  %v2163_v63 = vsel %vm2162_vm11, %v2146_v58, -inf }
 0x303   :  { %v2164_v0 = vrot.slane %v2163_v63, 4  ;;  %v2133_v3 = vadd.f32 %v2129_v59, %v2045_v55 }
 0x304   :  { %v2170_v15 = vsel %vm2162_vm11, %v2150_v60, -inf  ;;  %v2177_v4 = vsel %vm2162_vm11, %v2151_v61, -inf  ;;  %v2184_v5 = vsel %vm2162_vm11, %v2152_v62, -inf }
 0x305   :  { %v2165_v10 = vmax.f32 %v2163_v63, %v2164_v0  ;;  %v2171_v9 = vrot.slane %v2170_v15, 4  ;;  %v2178_v12 = vrot.slane %v2177_v4, 4  ;;  %v2185_v7 = vrot.slane %v2184_v5, 4 }
 0x306   :  { %v2139_v14 = vmul.f32 %v6590_v37, %v2133_v3 }
 0x307   :  { %v2166_v16 = vrot.slane %v2165_v10, 2  ;;  %v2172_v2 = vmax.f32 %v2170_v15, %v2171_v9  ;;  %v2179_v18 = vmax.f32 %v2177_v4, %v2178_v12  ;;  %v2186_v8 = vmax.f32 %v2184_v5, %v2185_v7 }
 0x308   :  { %v2145_v21 = vadd.f32 %v6591_v45, %v2139_v14 }
 0x309   :  { %v2167_v19 = vmax.f32 %v2165_v10, %v2166_v16  ;;  %v2173_v20 = vrot.slane %v2172_v2, 2  ;;  %v2180_v22 = vrot.slane %v2179_v18, 2  ;;  %v2187_v24 = vrot.slane %v2186_v8, 2 }
 0x30a   :  { %v2147_v25 = vmax.f32 %v2145_v21, 0.0 }
 0x30b   :  { %v2168_v30 = vrot.slane %v2167_v19, 1  ;;  %v2174_v28 = vmax.f32 %v2172_v2, %v2173_v20  ;;  %v2181_v57 = vmax.f32 %v2179_v18, %v2180_v22  ;;  %v2188_v1 = vmax.f32 %v2186_v8, %v2187_v24 }
 0x30c   :  { %v2153_v6 = vrot.slane %v2147_v25, 2  ;;  %v2154_v26 = vrot.slane %v2147_v25, 4  ;;  %v2155_v13 = vrot.slane %v2147_v25, 6  ;;  %v2191_v34 = vsel %vm2162_vm11, %v2147_v25, -inf }
 0x30d   :  { %v7787_v47 = vmax.f32 %v2167_v19, %v2168_v30  ;;  %v2175_v29 = vrot.slane %v2174_v28, 1  ;;  %v2182_v11 = vrot.slane %v2181_v57, 1  ;;  %v2189_v35 = vrot.slane %v2188_v1, 1 }
 0x30e   :  { %v2192_v17 = vrot.slane %v2191_v34, 4  ;;  %v2198_v36 = vsel %vm2162_vm11, %v2153_v6, -inf  ;;  %v2205_v27 = vsel %vm2162_vm11, %v2154_v26, -inf  ;;  %v2212_v40 = vsel %vm2162_vm11, %v2155_v13, -inf }
 0x30f   :  { %v2176_v42 = vmax.f32 %v2174_v28, %v2175_v29  ;;  %v7792_v43 = vmax.f32 %v2181_v57, %v2182_v11  ;;  %v7794_v33 = vmax.f32 %v2188_v1, %v2189_v35  ;;  %v2199_v41 = vrot.slane %v2198_v36, 4 }
 0x310   :  { %v2193_v44 = vmax.f32 %v2191_v34, %v2192_v17  ;;  %v2206_v52 = vrot.slane %v2205_v27, 4  ;;  %v2213_v48 = vrot.slane %v2212_v40, 4 }
 0x311   :  { %v2200_v49 = vmax.f32 %v2198_v36, %v2199_v41 }
 0x312   :  { %v2194_v50 = vrot.slane %v2193_v44, 2  ;;  %v2207_v51 = vmax.f32 %v2205_v27, %v2206_v52  ;;  %v2214_v31 = vmax.f32 %v2212_v40, %v2213_v48 }
 0x313   :  { %v2201_v38 = vrot.slane %v2200_v49, 2 }
 0x314   :  { %v2195_v37 = vmax.f32 %v2193_v44, %v2194_v50  ;;  %v2208_v23 = vrot.slane %v2207_v51, 2  ;;  %v2215_v53 = vrot.slane %v2214_v31, 2 }
 0x315   :  { %v2202_v45 = vmax.f32 %v2200_v49, %v2201_v38 }
 0x316   :  { %v2196_v56 = vrot.slane %v2195_v37, 1  ;;  %v2209_v54 = vmax.f32 %v2207_v51, %v2208_v23  ;;  %v2216_v32 = vmax.f32 %v2214_v31, %v2215_v53 }
 0x317   :  { %v2203_v39 = vrot.slane %v2202_v45, 1 }
 0x318   :  { %v7796_v55 = vmax.f32 %v2195_v37, %v2196_v56  ;;  %v2210_v58 = vrot.slane %v2209_v54, 1  ;;  %v2217_v59 = vrot.slane %v2216_v32, 1 }
 0x319   :  { %v7798_v60 = vmax.f32 %v2202_v45, %v2203_v39 }
 0x31a   :  { %v7800_v61 = vmax.f32 %v2209_v54, %v2210_v58  ;;  %v7802_v62 = vmax.f32 %v2216_v32, %v2217_v59 }
 0x31b   :  { %7053 = dma.done.wait [#allocation10], 4096 }
 0x31c   :  { %7054 = vsyncadd [#allocation10], 4294963200  ;;  %v7807_v63 = vld [vmem:[%s9204_s15] sm:$0xf]  ;;  %v5728_v0 = vld [vmem:[#allocation6 + $0xe0] sm:$0xf]  ;;  %v2223_v9 = vpack.c.bf16 %v7787_v47, %v7787_v47  ;;  %v2224_v12 = vpack.c.bf16 %v2176_v42, %v2176_v42  ;;  %v2225_v28 = vpack.c.bf16 %v7792_v43, %v7792_v43  ;;  %v2226_v43 = vpack.c.bf16 %v7794_v33, %v7794_v33 }
 0x31d   :  { %9473 = vst [vmem:[#allocation43_spill] sm:$0xff] %v7807_v63  ;;  %v6422_v3 = vld [vmem:[#allocation6 + $0xec] sm:$0xf0]  ;;  %v6420_v4 = vld [vmem:[#allocation6 + $0xe4] sm:$0xf]  ;;  %v2227_v33 = vpack.c.bf16 %v7796_v55, %v7796_v55 }
 0x31e   :  { %v5729_v15 = vor.u32 %v6422_v3, %v5728_v0  ;;  %v5730_v5 = vld [vmem:[#allocation6 + $0xf0] sm:$0xf0]  ;;  %v5736_v10 = vld [vmem:[#allocation6 + $0xe8] sm:$0xf]  ;;  %v6423_v14 = vld [vmem:[#allocation6 + $0xf4] sm:$0xf0]  ;;  %v2271_v34 = vunpack.c.l.b16 %v2223_v9  ;;  %v2272_v47 = vunpack.c.l.b16 %v2224_v12  ;;  %v2273_v49 = vunpack.c.l.b16 %v2225_v28 }
 0x31f   :  { %v5733_v7 = vor.u32 %v6420_v4, %v5730_v5  ;;  %v6421_v16 = vld [vmem:[#allocation6 + $0xec] sm:$0xf]  ;;  %v5738_v2 = vld [vmem:[#allocation6 + $0xf8] sm:$0xf0]  ;;  %v5737_v18 = vor.u32 %v6423_v14, %v5736_v10  ;;  %v5712_v21 = vld [vmem:[#allocation6 + $0xc0] sm:$0xf]  ;;  %v2274_v32 = vunpack.c.l.b16 %v2226_v43  ;;  %v2228_v9 = vpack.c.bf16 %v7798_v60, %v7798_v60 }
 0x320   :  { %2448 = vmatpush.bf16.msra.mxu0 %v5729_v15  ;;  %v5741_v8 = vor.u32 %v6421_v16, %v5738_v2  ;;  %v6418_v19 = vld [vmem:[#allocation6 + $0xcc] sm:$0xf0]  ;;  %v6416_v20 = vld [vmem:[#allocation6 + $0xc4] sm:$0xf]  ;;  %v5714_v24 = vld [vmem:[#allocation6 + $0xd0] sm:$0xf0]  ;;  %v2279_v23 = vsel %vm1372_vm3, %v2272_v47, %v2271_v34  ;;  %v2275_v14 = vunpack.c.l.b16 %v2227_v33 }
 0x321   :  { %2461 = vmatpush.bf16.msrb.mxu1 %v5733_v7  ;;  %v5713_v22 = vor.u32 %v6418_v19, %v5712_v21  ;;  %v5720_v25 = vld [vmem:[#allocation6 + $0xc8] sm:$0xf]  ;;  %v6419_v30 = vld [vmem:[#allocation6 + $0xd4] sm:$0xf0]  ;;  %2474 = vmatpush.bf16.msrb.mxu2 %v5737_v18  ;;  %v5717_v57 = vor.u32 %v6416_v20, %v5714_v24  ;;  %v6417_v6 = vld [vmem:[#allocation6 + $0xcc] sm:$0xf]  ;;  %v2280_v0 = vsel %vm1374_vm4, %v2273_v49, %v2279_v23 }
 0x322   :  { %2487 = vmatpush.bf16.msrb.mxu3 %v5741_v8  ;;  %v5721_v1 = vor.u32 %v6419_v30, %v5720_v25  ;;  %v5722_v26 = vld [vmem:[#allocation6 + $0xd8] sm:$0xf0]  ;;  %v5696_v13 = vld [vmem:[#allocation6 + $0xa0] sm:$0xf]  ;;  %v6414_v11 = vld [vmem:[#allocation6 + $0xac] sm:$0xf0]  ;;  %v2281_v2 = vsel %vm1376_vm5, %v2274_v32, %v2280_v0  ;;  %v2229_v19 = vpack.c.bf16 %v7800_v61, %v7800_v61  ;;  %v2276_v30 = vunpack.c.l.b16 %v2228_v9 }
 0x323   :  { %v5725_v29 = vor.u32 %v6417_v6, %v5722_v26  ;;  %v6412_v35 = vld [vmem:[#allocation6 + $0xa4] sm:$0xf]  ;;  %v5698_v17 = vld [vmem:[#allocation6 + $0xb0] sm:$0xf0]  ;;  %v5697_v36 = vor.u32 %v6414_v11, %v5696_v13  ;;  %v5704_v27 = vld [vmem:[#allocation6 + $0xa8] sm:$0xf]  ;;  %v2282_v6 = vsel %vm9220_vm6, %v2275_v14, %v2281_v2  ;;  %v2230_v13 = vpack.c.bf16 %v7802_v62, %v7802_v62 }
 0x324   :  { %2449 = vmatpush.bf16.msra.mxu0 %v5713_v22  ;;  %v6415_v40 = vld [vmem:[#allocation6 + $0xb4] sm:$0xf0]  ;;  %v6413_v42 = vld [vmem:[#allocation6 + $0xac] sm:$0xf]  ;;  %v5701_v41 = vor.u32 %v6412_v35, %v5698_v17  ;;  %v5706_v44 = vld [vmem:[#allocation6 + $0xb8] sm:$0xf0] }
 0x325   :  { %2462 = vmatpush.bf16.msrb.mxu1 %v5717_v57  ;;  %v5680_v52 = vld [vmem:[#allocation6 + $0x80] sm:$0xf]  ;;  %v6410_v48 = vld [vmem:[#allocation6 + $0x8c] sm:$0xf0]  ;;  %2475 = vmatpush.bf16.msrb.mxu2 %v5721_v1  ;;  %v5705_v50 = vor.u32 %v6415_v40, %v5704_v27  ;;  %v5709_v51 = vor.u32 %v6413_v42, %v5706_v44  ;;  %v6408_v31 = vld [vmem:[#allocation6 + $0x84] sm:$0xf]  ;;  %v2283_v40 = vsel %vm1380_vm7, %v2276_v30, %v2282_v6  ;;  %v2278_v62 = vunpack.c.l.b16 %v2230_v13 }
 0x326   :  { %2488 = vmatpush.bf16.msrb.mxu3 %v5725_v29  ;;  %v5682_v38 = vld [vmem:[#allocation6 + $0x90] sm:$0xf0]  ;;  %v5688_v37 = vld [vmem:[#allocation6 + $0x88] sm:$0xf]  ;;  %v6411_v53 = vld [vmem:[#allocation6 + $0x94] sm:$0xf0]  ;;  %v5681_v54 = vor.u32 %v6410_v48, %v5680_v52  ;;  %v2277_v29 = vunpack.c.l.b16 %v2229_v19 }
 0x327   :  { %v6409_v45 = vld [vmem:[#allocation6 + $0x8c] sm:$0xf]  ;;  %v5690_v56 = vld [vmem:[#allocation6 + $0x98] sm:$0xf0]  ;;  %v5685_v39 = vor.u32 %v6408_v31, %v5682_v38  ;;  %v5664_v58 = vld [vmem:[#allocation6 + $0x60] sm:$0xf]  ;;  %v5689_v3 = vor.u32 %v6411_v53, %v5688_v37 }
 0x328   :  { %2450 = vmatpush.bf16.msra.mxu0 %v5697_v36  ;;  %v6406_v59 = vld [vmem:[#allocation6 + $0x6c] sm:$0xf0]  ;;  %v5693_v15 = vor.u32 %v6409_v45, %v5690_v56  ;;  %v6404_v4 = vld [vmem:[#allocation6 + $0x64] sm:$0xf]  ;;  %v5666_v5 = vld [vmem:[#allocation6 + $0x70] sm:$0xf0] }
 0x329   :  { %2463 = vmatpush.bf16.msrb.mxu1 %v5701_v41  ;;  %2476 = vmatpush.bf16.msrb.mxu2 %v5705_v50  ;;  %v5672_v10 = vld [vmem:[#allocation6 + $0x68] sm:$0xf]  ;;  %v6407_v55 = vld [vmem:[#allocation6 + $0x74] sm:$0xf0]  ;;  %v6405_v12 = vld [vmem:[#allocation6 + $0x6c] sm:$0xf]  ;;  %v5665_v16 = vor.u32 %v6406_v59, %v5664_v58  ;;  %v5669_v18 = vor.u32 %v6404_v4, %v5666_v5  ;;  %v2284_v50 = vsel %vm1382_vm8, %v2277_v29, %v2283_v40 }
 0x32a   :  { %2489 = vmatpush.bf16.msrb.mxu3 %v5709_v51  ;;  %v5674_v7 = vld [vmem:[#allocation6 + $0x78] sm:$0xf0]  ;;  %v5648_v8 = vld [vmem:[#allocation6 + $0x40] sm:$0xf]  ;;  %v6402_v21 = vld [vmem:[#allocation6 + $0x4c] sm:$0xf0]  ;;  %v5673_v20 = vor.u32 %v6407_v55, %v5672_v10 }
 0x32b   :  { %v5677_v22 = vor.u32 %v6405_v12, %v5674_v7  ;;  %v6400_v60 = vld [vmem:[#allocation6 + $0x44] sm:$0xf]  ;;  %v5650_v24 = vld [vmem:[#allocation6 + $0x50] sm:$0xf0]  ;;  %v5656_v25 = vld [vmem:[#allocation6 + $0x48] sm:$0xf]  ;;  %v5649_v26 = vor.u32 %v6402_v21, %v5648_v8 }
 0x32c   :  { %2451 = vmatpush.bf16.msra.mxu0 %v5681_v54  ;;  %v6403_v28 = vld [vmem:[#allocation6 + $0x54] sm:$0xf0]  ;;  %v6401_v57 = vld [vmem:[#allocation6 + $0x4c] sm:$0xf]  ;;  %v5658_v1 = vld [vmem:[#allocation6 + $0x58] sm:$0xf0]  ;;  %v5653_v61 = vor.u32 %v6400_v60, %v5650_v24  ;;  %v2285_v54 = vsel %vm1384_vm9, %v2278_v62, %v2284_v50 }
 0x32d   :  { %2464 = vmatpush.bf16.msrb.mxu1 %v5685_v39  ;;  %2477 = vmatpush.bf16.msrb.mxu2 %v5689_v3  ;;  %v5632_v34 = vld [vmem:[#allocation6 + $0x20] sm:$0xf]  ;;  %v6398_v47 = vld [vmem:[#allocation6 + $0x2c] sm:$0xf0]  ;;  %v5657_v11 = vor.u32 %v6403_v28, %v5656_v25  ;;  %v5661_v35 = vor.u32 %v6401_v57, %v5658_v1  ;;  %v6396_v17 = vld [vmem:[#allocation6 + $0x24] sm:$0xf]  ;;  %v2286_v59 = vpack.c.b16 %v2285_v54, %v2285_v54 }
 0x32e   :  { %2490 = vmatpush.bf16.msrb.mxu3 %v5693_v15  ;;  %v5634_v36 = vld [vmem:[#allocation6 + $0x30] sm:$0xf0]  ;;  %v5640_v27 = vld [vmem:[#allocation6 + $0x28] sm:$0xf]  ;;  %v6399_v42 = vld [vmem:[#allocation6 + $0x34] sm:$0xf0]  ;;  %v5633_v44 = vor.u32 %v6398_v47, %v5632_v34 }
 0x32f   :  { %v6397_v43 = vld [vmem:[#allocation6 + $0x2c] sm:$0xf]  ;;  %v5642_v41 = vld [vmem:[#allocation6 + $0x38] sm:$0xf0]  ;;  %v5637_v52 = vor.u32 %v6396_v17, %v5634_v36  ;;  %v5616_v48 = vld [vmem:[#allocation6] sm:$0xf]  ;;  %v5641_v51 = vor.u32 %v6399_v42, %v5640_v27 }
 0x330   :  { %2452 = vmatpush.bf16.msra.mxu0 %v5665_v16  ;;  %v6394_v49 = vld [vmem:[#allocation6 + $0xc] sm:$0xf0]  ;;  %v5645_v31 = vor.u32 %v6397_v43, %v5642_v41  ;;  %v6392_v38 = vld [vmem:[#allocation6 + $0x4] sm:$0xf]  ;;  %v5618_v37 = vld [vmem:[#allocation6 + $0x10] sm:$0xf0] }
 0x331   :  { %2465 = vmatpush.bf16.msrb.mxu1 %v5669_v18  ;;  %2478 = vmatpush.bf16.msrb.mxu2 %v5673_v20  ;;  %v5624_v23 = vld [vmem:[#allocation6 + $0x8] sm:$0xf]  ;;  %v6395_v53 = vld [vmem:[#allocation6 + $0x14] sm:$0xf0]  ;;  %v6393_v45 = vld [vmem:[#allocation6 + $0xc] sm:$0xf]  ;;  %v5617_v33 = vor.u32 %v6394_v49, %v5616_v48  ;;  %v5621_v32 = vor.u32 %v6392_v38, %v5618_v37 }
 0x332   :  { %2491 = vmatpush.bf16.msrb.mxu3 %v5677_v22  ;;  %v5626_v56 = vld [vmem:[#allocation6 + $0x18] sm:$0xf0]  ;;  %v5625_v39 = vor.u32 %v6395_v53, %v5624_v23  ;;  %v2516_v0 = vld [vmem:[%s9203_s14] sm:$0xf] }
 0x333   :  { %v5629_v58 = vor.u32 %v6393_v45, %v5626_v56  ;;  %v2520_v3 = vperm.slane %v2516_v0, 1  ;;  %v2519_v15 = vperm.slane %v2516_v0, 0  ;;  %v2522_v9 = vperm.slane %v2516_v0, 3 }
 0x334   :  { %2453 = vmatpush.bf16.msra.mxu0 %v5649_v26  ;;  %v2521_v2 = vperm.slane %v2516_v0, 2 }
 0x335   :  { %2466 = vmatpush.bf16.msrb.mxu1 %v5653_v61  ;;  %2479 = vmatpush.bf16.msrb.mxu2 %v5657_v11  ;;  %v2523_v4 = vrot.slane %v2520_v3, 4  ;;  %v2524_v18 = vrot.slane %v2522_v9, 4 }
 0x336   :  { %2492 = vmatpush.bf16.msrb.mxu3 %v5661_v35 }
 0x337   :  { %v7834_v10 = vsel %vm9443_vm0, %v2519_v15, %v2523_v4  ;;  %v7847_v25 = vsel %vm9443_vm0, %v2521_v2, %v2524_v18 }
 0x338   :  { %2454 = vmatpush.bf16.msra.mxu0 %v5633_v44  ;;  %9474 = vst [vmem:[#allocation44_spill] sm:$0xff] %v7834_v10  ;;  %v2527_v7 = vrot.slane %v7834_v10, 1  ;;  %v2528_v61 = vrot.slane %v7847_v25, 1 }
 0x339   :  { %2467 = vmatpush.bf16.msrb.mxu1 %v5637_v52  ;;  %2480 = vmatpush.bf16.msrb.mxu2 %v5641_v51  ;;  %9477 = vst [vmem:[#allocation47_spill] sm:$0xff] %v7847_v25 }
 0x33a   :  { %2493 = vmatpush.bf16.msrb.mxu3 %v5645_v31 }
 0x33c   :  { %2455 = vmatpush.bf16.msra.mxu0 %v5617_v33 }
 0x33d   :  { %2468 = vmatpush.bf16.msrb.mxu1 %v5621_v32  ;;  %2481 = vmatpush.bf16.msrb.mxu2 %v5625_v39 }
 0x33e   :  { %2494 = vmatpush.bf16.msrb.mxu3 %v5629_v58 }
 0x33f   :  { %2456 = vmatmul.bf16.vlgmr.msra.gmra.mxu0 %v2286_v59 }
 0x340   :  { %2469 = vmatmul.bf16.vlgmr.msrb.gmra.mxu1 %v2286_v59  ;;  %2482 = vmatmul.bf16.vlgmr.msrb.gmra.mxu2 %v2286_v59 }
 0x341   :  { %2495 = vmatmul.bf16.vlgmr.msrb.gmra.mxu3 %v2286_v59 }
 0x3bc   :  { %v2457_v5 = vpop.f32.mrf.mxu0 }
 0x3bd   :  { %v2470_v55 = vpop.f32.mrf.mxu1 }
 0x3be   :  { %v2504_v12 = vrot.slane %v2470_v55, 4 }
 0x3c0   :  { %v7838_v14 = vsel %vm9443_vm0, %v2457_v5, %v2504_v12  ;;  %v2508_v16 = vsel %vm9443_vm0, %v2504_v12, %v2457_v5 }
 0x3c1   :  { %9475 = vst [vmem:[#allocation45_spill] sm:$0xff] %v7838_v14  ;;  %v7841_v8 = vrot.slane %v2508_v16, 4  ;;  %v2533_v21 = vadd.f32 %v7834_v10, %v7838_v14 }
 0x3c3   :  { %9476 = vst [vmem:[#allocation46_spill] sm:$0xff] %v7841_v8  ;;  %v2535_v19 = vadd.f32 %v2527_v7, %v7841_v8  ;;  %v5742_v20 = vmul.f32 -1.442695, %v2533_v21  ;;  %v2577_v22 = vrot.slane %v2533_v21, 4  ;;  %v2483_v60 = vpop.f32.mrf.mxu2 }
 0x3c4   :  { %v2496_v24 = vpop.f32.mrf.mxu3  ;;  %v2459_v1 = vpop.f32.mrf.mxu0 }
 0x3c5   :  { %6592 = vpow2.f32 %v5742_v20  ;;  %v5743_v30 = vmul.f32 -1.442695, %v2535_v19  ;;  %v2578_v28 = vrot.slane %v2535_v19, 4  ;;  %v5744_v57 = vmul.f32 -1.442695, %v2577_v22  ;;  %v2472_v6 = vpop.f32.mrf.mxu1 }
 0x3c6   :  { %v2505_v26 = vrot.slane %v2496_v24, 4 }
 0x3c7   :  { %6594 = vpow2.f32 %v5743_v30  ;;  %v5745_v13 = vmul.f32 -1.442695, %v2578_v28 }
 0x3c8   :  { %6596 = vpow2.f32 %v5744_v57  ;;  %v7851_v34 = vsel %vm9443_vm0, %v2483_v60, %v2505_v26  ;;  %v2510_v47 = vsel %vm9443_vm0, %v2505_v26, %v2483_v60 }
 0x3c9   :  { %9478 = vst [vmem:[#allocation48_spill] sm:$0xff] %v7851_v34  ;;  %6598 = vpow2.f32 %v5745_v13  ;;  %v7854_v29 = vrot.slane %v2510_v47, 4  ;;  %v2534_v11 = vadd.f32 %v7847_v25, %v7851_v34 }
 0x3cb   :  { %9479 = vst [vmem:[#allocation49_spill] sm:$0xff] %v7854_v29  ;;  %v6593_v35 = vpop.eup %6592  ;;  %v2536_v17 = vadd.f32 %v2528_v61, %v7854_v29  ;;  %v2623_v36 = vrot.slane %v2534_v11, 4  ;;  %v2485_v40 = vpop.f32.mrf.mxu2 }
 0x3cc   :  { %v2543_v27 = vadd.f32 1.0, %v6593_v35  ;;  %v2498_v42 = vpop.f32.mrf.mxu3 }
 0x3cd   :  { %v6595_v43 = vpop.eup %6594  ;;  %v2624_v41 = vrot.slane %v2536_v17, 4  ;;  %v5746_v44 = vmul.f32 -1.442695, %v2623_v36 }
 0x3ce   :  { %v6597_v62 = vpop.eup %6596  ;;  %v2544_v52 = vadd.f32 1.0, %v6595_v43  ;;  %6600 = vrcp.f32 %v2543_v27  ;;  %v2554_v31 = vand.u32 2147483647, %v2543_v27  ;;  %v2556_v38 = vand.u32 2147483648, %v2543_v27 }
 0x3cf   :  { %v6599_v48 = vpop.eup %6598  ;;  %v7859_v49 = vadd.f32 1.0, %v6597_v62  ;;  %6602 = vpow2.f32 %v5746_v44  ;;  %v5747_v51 = vmul.f32 -1.442695, %v2624_v41  ;;  %vm2550_vm12 = vweird.f32 %v2543_v27 }
 0x3d0   :  { %6604 = vrcp.f32 %v2544_v52  ;;  %v7861_v50 = vadd.f32 1.0, %v6599_v48  ;;  %vm7867_vm2 = vcmp.eq.f32.partialorder %v2554_v31, 8.507059e+37  ;;  %vm2565_vm7 = vweird.f32 %v2544_v52 }
 0x3d1   :  { %6606 = vrcp.f32 %v7859_v49  ;;  %vm2594_vm1 = vweird.f32 %v7859_v49  ;;  %v2600_v56 = vand.u32 2147483648, %v7859_v49  ;;  %v2557_v59 = vor.u32 1.1754944e-38, %v2556_v38 }
 0x3d2   :  { %6608 = vrcp.f32 %v7861_v50  ;;  %vm2609_vm8 = vweird.f32 %v7861_v50  ;;  %v2615_v15 = vand.u32 2147483648, %v7861_v50  ;;  %v2569_v4 = vand.u32 2147483647, %v2544_v52 }
 0x3d3   :  { %6610 = vtanh.f32 %v2534_v11  ;;  %v2571_v2 = vand.u32 2147483648, %v2544_v52  ;;  %v2598_v18 = vand.u32 2147483647, %v7859_v49  ;;  %v2613_v30 = vand.u32 2147483647, %v7861_v50 }
 0x3d4   :  { %v6601_v37 = vpop.eup %6600  ;;  %6612 = vpow2.f32 %v5747_v51  ;;  %vm2570_vm6 = vcmp.eq.f32.partialorder %v2569_v4, 8.507059e+37  ;;  %v2601_v61 = vor.u32 1.1754944e-38, %v2600_v56  ;;  %v2616_v40 = vor.u32 1.1754944e-38, %v2615_v15 }
 0x3d5   :  { %v6603_v23 = vpop.eup %6602  ;;  %v2546_v53 = vmul.f32 %v6601_v37, %v2543_v27  ;;  %6614 = vtanh.f32 %v2536_v17  ;;  %vm2551_vm9 = vweird.f32 %v6601_v37  ;;  %v2572_v26 = vor.u32 1.1754944e-38, %v2571_v2 }
 0x3d6   :  { %v6605_v45 = vpop.eup %6604  ;;  %v7871_v54 = vadd.f32 1.0, %v6603_v23  ;;  %vm2552_vm13 = vmor %vm2550_vm12, %vm2551_vm9  ;;  %vm2599_vm9 = vcmp.eq.f32.partialorder %v2598_v18, 8.507059e+37 }
 0x3d7   :  { %v6607_v32 = vpop.eup %6606  ;;  %v2547_v39 = vsub.f32 1.0, %v2546_v53  ;;  %v2561_v58 = vmul.f32 %v6605_v45, %v2544_v52  ;;  %vm2566_vm10 = vweird.f32 %v6605_v45 }
 0x3d8   :  { %v6609_v0 = vpop.eup %6608  ;;  %v2590_v3 = vmul.f32 %v6607_v32, %v7859_v49  ;;  %6616 = vrcp.f32 %v7871_v54  ;;  %vm2595_vm15 = vweird.f32 %v6607_v32  ;;  %vm2567_vm14 = vmor %vm2565_vm7, %vm2566_vm10  ;;  %vm2614_vm10 = vcmp.eq.f32.partialorder %v2613_v30, 8.507059e+37 }
 0x3d9   :  { %v6611_v5 = vpop.eup %6610  ;;  %v2562_v9 = vsub.f32 1.0, %v2561_v58  ;;  %v2605_v55 = vmul.f32 %v6609_v0, %v7861_v50  ;;  %v2548_v12 = vmul.f32 %v6601_v37, %v2547_v39  ;;  %vm2610_vm11 = vweird.f32 %v6609_v0  ;;  %vm2596_vm12 = vmor %vm2594_vm1, %vm2595_vm15 }
 0x3da   :  { %v6613_v7 = vpop.eup %6612  ;;  %v2591_v16 = vsub.f32 1.0, %v2590_v3  ;;  %vm2611_vm7 = vmor %vm2609_vm8, %vm2610_vm11  ;;  %v2646_v53 = vand.u32 2147483648, %v7871_v54  ;;  %v2644_v56 = vand.u32 2147483647, %v7871_v54 }
 0x3db   :  { %v6615_v21 = vpop.eup %6614  ;;  %v2606_v19 = vsub.f32 1.0, %v2605_v55  ;;  %v2549_v20 = vadd.f32 %v6601_v37, %v2548_v12  ;;  %v2563_v22 = vmul.f32 %v6605_v45, %v2562_v9  ;;  %v7879_v60 = vadd.f32 1.0, %v6613_v7 }
 0x3dc   :  { %v2592_v24 = vmul.f32 %v6607_v32, %v2591_v16 }
 0x3dd   :  { %v2607_v28 = vmul.f32 %v6609_v0, %v2606_v19  ;;  %v2553_v57 = vsel %vm2552_vm13, %v6601_v37, %v2549_v20  ;;  %v2564_v1 = vadd.f32 %v6605_v45, %v2563_v22  ;;  %6618 = vrcp.f32 %v7879_v60 }
 0x3de   :  { %v6617_v6 = vpop.eup %6616  ;;  %v2593_v13 = vadd.f32 %v6607_v32, %v2592_v24  ;;  %v2558_v47 = vsel %vm7867_vm2, %v2557_v59, %v2553_v57  ;;  %v2661_v33 = vand.u32 2147483648, %v7879_v60  ;;  %v2659_v39 = vand.u32 2147483647, %v7879_v60 }
 0x3df   :  { %v2568_v11 = vsel %vm2567_vm14, %v6605_v45, %v2564_v1  ;;  %v2608_v35 = vadd.f32 %v6609_v0, %v2607_v28  ;;  %v2636_v17 = vmul.f32 %v6617_v6, %v7871_v54  ;;  %v2667_v52 = vmul.f32 %v6611_v5, %v2558_v47 }
 0x3e0   :  { %v2573_v36 = vsel %vm2570_vm6, %v2572_v26, %v2568_v11  ;;  %v2597_v27 = vsel %vm2596_vm12, %v6607_v32, %v2593_v13  ;;  %vm2641_vm6 = vweird.f32 %v6617_v6  ;;  %vm2640_vm14 = vweird.f32 %v7871_v54 }
 0x3e1   :  { %v2602_v42 = vsel %vm2599_vm9, %v2601_v61, %v2597_v27  ;;  %v2612_v43 = vsel %vm2611_vm7, %v6609_v0, %v2608_v35  ;;  %v2637_v41 = vsub.f32 1.0, %v2636_v17  ;;  %v2668_v31 = vmul.f32 %v6615_v21, %v2573_v36  ;;  %vm2642_vm1 = vmor %vm2640_vm14, %vm2641_vm6 }
 0x3e2   :  { %v2617_v44 = vsel %vm2614_vm10, %v2616_v40, %v2612_v43  ;;  %v2665_v62 = vmul.f32 0.0, %v2602_v42  ;;  %v2647_v59 = vor.u32 1.1754944e-38, %v2646_v53  ;;  %vm2655_vm8 = vweird.f32 %v7879_v60 }
 0x3e3   :  { %v6619_v48 = vpop.eup %6618  ;;  %v2638_v49 = vmul.f32 %v6617_v6, %v2637_v41  ;;  %v2666_v51 = vmul.f32 0.0, %v2617_v44  ;;  %vm2645_vm13 = vcmp.eq.f32.partialorder %v2644_v56, 8.507059e+37  ;;  %v2662_v3 = vor.u32 1.1754944e-38, %v2661_v33 }
 0x3e4   :  { %v2651_v38 = vmul.f32 %v6619_v48, %v7879_v60  ;;  %v7896_v37 = vadd.f32 %v2667_v52, %v2665_v62  ;;  %vm2656_vm2 = vweird.f32 %v6619_v48  ;;  %vm2660_vm11 = vcmp.eq.f32.partialorder %v2659_v39, 8.507059e+37 }
 0x3e5   :  { %v2639_v23 = vadd.f32 %v6617_v6, %v2638_v49  ;;  %v7898_v50 = vadd.f32 %v2668_v31, %v2666_v51  ;;  %vm2657_vm15 = vmor %vm2655_vm8, %vm2656_vm2 }
 0x3e6   :  { %9482 = vst [vmem:[#allocation50_spill] sm:$0xff] %v7896_v37  ;;  %v2652_v45 = vsub.f32 1.0, %v2651_v38  ;;  %6620 = vtanh.f32 %v7896_v37 }
 0x3e7   :  { %9483 = vst [vmem:[#allocation51_spill] sm:$0xff] %v7898_v50  ;;  %6622 = vtanh.f32 %v7898_v50  ;;  %v2643_v58 = vsel %vm2642_vm1, %v6617_v6, %v2639_v23 }
 0x3e8   :  { %v2653_v32 = vmul.f32 %v6619_v48, %v2652_v45  ;;  %v2648_v4 = vsel %vm2645_vm13, %v2647_v59, %v2643_v58 }
 0x3ea   :  { %v2654_v0 = vadd.f32 %v6619_v48, %v2653_v32 }
 0x3ec   :  { %v6621_v15 = vpop.eup %6620  ;;  %v2658_v54 = vsel %vm2657_vm15, %v6619_v48, %v2654_v0 }
 0x3ed   :  { %v6623_v5 = vpop.eup %6622  ;;  %v2663_v9 = vsel %vm2660_vm11, %v2662_v3, %v2658_v54  ;;  %v7908_v55 = vmul.f32 %v6621_v15, %v2648_v4 }
 0x3ee   :  { %v7910_v12 = vmul.f32 %v6623_v5, %v2663_v9 }
 0x3ef   :  { %7055 = dma.done.wait [#allocation10 + $0x1], 16384 }
 0x3f0   :  { %7056 = vsyncadd [#allocation10 + $0x1], 4294950912  ;;  %v5974_v7 = vld [vmem:[#allocation7 + $0x1c0] sm:$0xf]  ;;  %v6480_v19 = vld [vmem:[#allocation7 + $0x1c4] sm:$0xf] }
 0x3f1   :  { %v6484_v16 = vld [vmem:[#allocation7 + $0x1dc] sm:$0xf0]  ;;  %v5976_v20 = vld [vmem:[#allocation7 + $0x1e0] sm:$0xf0]  ;;  %v6533_v46 = vld [vmem:[#allocation7 + $0x364] sm:$0xf0] }
 0x3f2   :  { %v6230_v2 = vld [vmem:[#allocation7 + $0x3c0] sm:$0xf]  ;;  %v7912_v18 = vor.u32 %v6484_v16, %v5974_v7  ;;  %v7916_v60 = vor.u32 %v6480_v19, %v5976_v20  ;;  %v6544_v24 = vld [vmem:[#allocation7 + $0x3c4] sm:$0xf]  ;;  %v9225_v37 = vmov 0.0|0.0  }
 0x3f3   :  { %v6548_v21 = vld [vmem:[#allocation7 + $0x3dc] sm:$0xf0]  ;;  %v6232_v30 = vld [vmem:[#allocation7 + $0x3e0] sm:$0xf0]  ;;  %v6521_v50 = vld [vmem:[#allocation7 + $0x30c] sm:$0xf] }
 0x3f4   :  { %v7914_v22 = vor.u32 %v6548_v21, %v6230_v2  ;;  %v5942_v28 = vld [vmem:[#allocation7 + $0x180] sm:$0xf]  ;;  %3455 = vmatpush.bf16.msrb.mxu0 %v7912_v18  ;;  %v7919_v57 = vor.u32 %v6544_v24, %v6232_v30  ;;  %3481 = vmatpush.bf16.msra.mxu2 %v7916_v60  ;;  %v6472_v47 = vld [vmem:[#allocation7 + $0x184] sm:$0xf]  ;;  %v6144_v34 = vld [vmem:[#allocation7 + $0x328] sm:$0xf0] }
 0x3f5   :  { %v6476_v1 = vld [vmem:[#allocation7 + $0x19c] sm:$0xf0]  ;;  %v5944_v11 = vld [vmem:[#allocation7 + $0x1a0] sm:$0xf0]  ;;  %v8059_v29 = vor.u32 %v6521_v50, %v6144_v34  ;;  %v6517_v25 = vld [vmem:[#allocation7 + $0x2e4] sm:$0xf0] }
 0x3f6   :  { %9484 = vst [vmem:[#allocation52_spill] sm:$0xff] %v7914_v22  ;;  %v6198_v6 = vld [vmem:[#allocation7 + $0x380] sm:$0xf]  ;;  %3468 = vmatpush.bf16.msra.mxu1 %v7914_v22  ;;  %v7923_v13 = vor.u32 %v6476_v1, %v5942_v28  ;;  %v6536_v35 = vld [vmem:[#allocation7 + $0x384] sm:$0xf]  ;;  %3494 = vmatpush.bf16.msra.mxu3 %v7919_v57  ;;  %v7928_v17 = vor.u32 %v6472_v47, %v5944_v11 }
 0x3f7   :  { %9485 = vst [vmem:[#allocation53_spill] sm:$0xff] %v7919_v57  ;;  %v6540_v26 = vld [vmem:[#allocation7 + $0x39c] sm:$0xf0]  ;;  %v6200_v36 = vld [vmem:[#allocation7 + $0x3a0] sm:$0xf0] }
 0x3f8   :  { %v7925_v61 = vor.u32 %v6540_v26, %v6198_v6  ;;  %v5910_v27 = vld [vmem:[#allocation7 + $0x140] sm:$0xf]  ;;  %v7930_v42 = vor.u32 %v6536_v35, %v6200_v36  ;;  %v6464_v44 = vld [vmem:[#allocation7 + $0x144] sm:$0xf]  ;;  %3456 = vmatpush.bf16.msrb.mxu0 %v7923_v13  ;;  %3482 = vmatpush.bf16.msra.mxu2 %v7928_v17  ;;  %9512 = vst [vmem:[#allocation80_spill] sm:$0xff] %v8059_v29 }
 0x3f9   :  { %v6468_v40 = vld [vmem:[#allocation7 + $0x15c] sm:$0xf0]  ;;  %v5912_v52 = vld [vmem:[#allocation7 + $0x160] sm:$0xf0]  ;;  %v6449_v14 = vld [vmem:[#allocation7 + $0xcc] sm:$0xf] }
 0x3fa   :  { %9486 = vst [vmem:[#allocation54_spill] sm:$0xff] %v7925_v61  ;;  %v6166_v43 = vld [vmem:[#allocation7 + $0x340] sm:$0xf]  ;;  %v7933_v62 = vor.u32 %v6468_v40, %v5910_v27  ;;  %v6528_v48 = vld [vmem:[#allocation7 + $0x344] sm:$0xf]  ;;  %3469 = vmatpush.bf16.msra.mxu1 %v7925_v61  ;;  %v7939_v31 = vor.u32 %v6464_v44, %v5912_v52  ;;  %3495 = vmatpush.bf16.msra.mxu3 %v7930_v42 }
 0x3fb   :  { %9487 = vst [vmem:[#allocation55_spill] sm:$0xff] %v7930_v42  ;;  %v6532_v41 = vld [vmem:[#allocation7 + $0x35c] sm:$0xf0]  ;;  %v6168_v49 = vld [vmem:[#allocation7 + $0x360] sm:$0xf0] }
 0x3fc   :  { %v7937_v51 = vor.u32 %v6532_v41, %v6166_v43  ;;  %v5878_v38 = vld [vmem:[#allocation7 + $0x100] sm:$0xf]  ;;  %v7942_v45 = vor.u32 %v6528_v48, %v6168_v49  ;;  %v6456_v33 = vld [vmem:[#allocation7 + $0x104] sm:$0xf]  ;;  %3457 = vmatpush.bf16.msrb.mxu0 %v7933_v62  ;;  %3483 = vmatpush.bf16.msra.mxu2 %v7939_v31  ;;  %v5856_v8 = vld [vmem:[#allocation7 + $0xe8] sm:$0xf0] }
 0x3fd   :  { %v6460_v23 = vld [vmem:[#allocation7 + $0x11c] sm:$0xf0]  ;;  %v5880_v32 = vld [vmem:[#allocation7 + $0x120] sm:$0xf0]  ;;  %v6445_v34 = vld [vmem:[#allocation7 + $0xa4] sm:$0xf0] }
 0x3fe   :  { %9488 = vst [vmem:[#allocation56_spill] sm:$0xff] %v7937_v51  ;;  %v6134_v53 = vld [vmem:[#allocation7 + $0x300] sm:$0xf]  ;;  %v6520_v39 = vld [vmem:[#allocation7 + $0x304] sm:$0xf]  ;;  %v7945_v59 = vor.u32 %v6460_v23, %v5878_v38  ;;  %3470 = vmatpush.bf16.msra.mxu1 %v7937_v51  ;;  %v7951_v3 = vor.u32 %v6456_v33, %v5880_v32  ;;  %3496 = vmatpush.bf16.msra.mxu3 %v7942_v45 }
 0x3ff   :  { %9489 = vst [vmem:[#allocation57_spill] sm:$0xff] %v7942_v45  ;;  %v6524_v56 = vld [vmem:[#allocation7 + $0x31c] sm:$0xf0]  ;;  %v6136_v58 = vld [vmem:[#allocation7 + $0x320] sm:$0xf0] }
 0x400   :  { %v7949_v0 = vor.u32 %v6524_v56, %v6134_v53  ;;  %v5846_v15 = vld [vmem:[#allocation7 + $0xc0] sm:$0xf]  ;;  %v7954_v5 = vor.u32 %v6520_v39, %v6136_v58  ;;  %v6448_v7 = vld [vmem:[#allocation7 + $0xc4] sm:$0xf]  ;;  %3458 = vmatpush.bf16.msrb.mxu0 %v7945_v59  ;;  %3484 = vmatpush.bf16.msra.mxu2 %v7951_v3  ;;  %v6078_v50 = vld [vmem:[#allocation7 + $0x288] sm:$0xf] }
 0x401   :  { %v6452_v4 = vld [vmem:[#allocation7 + $0xdc] sm:$0xf0]  ;;  %v5848_v16 = vld [vmem:[#allocation7 + $0xe0] sm:$0xf0] }
 0x402   :  { %9490 = vst [vmem:[#allocation58_spill] sm:$0xff] %v7949_v0  ;;  %v6102_v54 = vld [vmem:[#allocation7 + $0x2c0] sm:$0xf]  ;;  %v6512_v2 = vld [vmem:[#allocation7 + $0x2c4] sm:$0xf]  ;;  %v7957_v19 = vor.u32 %v6452_v4, %v5846_v15  ;;  %3471 = vmatpush.bf16.msra.mxu1 %v7949_v0  ;;  %v7963_v24 = vor.u32 %v6448_v7, %v5848_v16  ;;  %3497 = vmatpush.bf16.msra.mxu3 %v7954_v5 }
 0x403   :  { %9491 = vst [vmem:[#allocation59_spill] sm:$0xff] %v7954_v5  ;;  %v6516_v9 = vld [vmem:[#allocation7 + $0x2dc] sm:$0xf0]  ;;  %v6104_v21 = vld [vmem:[#allocation7 + $0x2e0] sm:$0xf0] }
 0x404   :  { %v7961_v20 = vor.u32 %v6516_v9, %v6102_v54  ;;  %v5814_v30 = vld [vmem:[#allocation7 + $0x80] sm:$0xf]  ;;  %v7966_v6 = vor.u32 %v6512_v2, %v6104_v21  ;;  %v6440_v47 = vld [vmem:[#allocation7 + $0x84] sm:$0xf]  ;;  %3459 = vmatpush.bf16.msrb.mxu0 %v7957_v19  ;;  %3485 = vmatpush.bf16.msra.mxu2 %v7963_v24 }
 0x405   :  { %v6444_v28 = vld [vmem:[#allocation7 + $0x9c] sm:$0xf0]  ;;  %v5816_v11 = vld [vmem:[#allocation7 + $0xa0] sm:$0xf0] }
 0x406   :  { %9492 = vst [vmem:[#allocation60_spill] sm:$0xff] %v7961_v20  ;;  %v6070_v1 = vld [vmem:[#allocation7 + $0x280] sm:$0xf]  ;;  %v6504_v35 = vld [vmem:[#allocation7 + $0x284] sm:$0xf]  ;;  %v7969_v27 = vor.u32 %v6444_v28, %v5814_v30  ;;  %3472 = vmatpush.bf16.msra.mxu1 %v7961_v20  ;;  %v7975_v43 = vor.u32 %v6440_v47, %v5816_v11  ;;  %3498 = vmatpush.bf16.msra.mxu3 %v7966_v6 }
 0x407   :  { %9493 = vst [vmem:[#allocation61_spill] sm:$0xff] %v7966_v6  ;;  %v6508_v26 = vld [vmem:[#allocation7 + $0x29c] sm:$0xf0]  ;;  %v6072_v36 = vld [vmem:[#allocation7 + $0x2a0] sm:$0xf0] }
 0x408   :  { %v7973_v40 = vor.u32 %v6508_v26, %v6070_v1  ;;  %v5782_v41 = vld [vmem:[#allocation7 + $0x40] sm:$0xf]  ;;  %v7978_v48 = vor.u32 %v6504_v35, %v6072_v36  ;;  %v6432_v38 = vld [vmem:[#allocation7 + $0x44] sm:$0xf]  ;;  %3460 = vmatpush.bf16.msrb.mxu0 %v7969_v27  ;;  %3486 = vmatpush.bf16.msra.mxu2 %v7975_v43  ;;  %v5982_v30 = vld [vmem:[#allocation7 + $0x1c8] sm:$0xf] }
 0x409   :  { %v6436_v44 = vld [vmem:[#allocation7 + $0x5c] sm:$0xf0]  ;;  %v5784_v23 = vld [vmem:[#allocation7 + $0x60] sm:$0xf0]  ;;  %v6485_v28 = vld [vmem:[#allocation7 + $0x1e4] sm:$0xf0] }
 0x40a   :  { %9494 = vst [vmem:[#allocation62_spill] sm:$0xff] %v7973_v40  ;;  %v6038_v52 = vld [vmem:[#allocation7 + $0x240] sm:$0xf]  ;;  %v6496_v53 = vld [vmem:[#allocation7 + $0x244] sm:$0xf]  ;;  %v7981_v33 = vor.u32 %v6436_v44, %v5782_v41  ;;  %3473 = vmatpush.bf16.msra.mxu1 %v7973_v40  ;;  %v7987_v15 = vor.u32 %v6432_v38, %v5784_v23  ;;  %3499 = vmatpush.bf16.msra.mxu3 %v7978_v48 }
 0x40b   :  { %9495 = vst [vmem:[#allocation63_spill] sm:$0xff] %v7978_v48  ;;  %v6500_v49 = vld [vmem:[#allocation7 + $0x25c] sm:$0xf0]  ;;  %v6040_v56 = vld [vmem:[#allocation7 + $0x260] sm:$0xf0]  ;;  %v8004_v38 = vor.u32 %v6485_v28, %v5982_v30  ;;  %v2809_v30 = vperm.slane %v7908_v55, 0 }
 0x40c   :  { %v5750_v32 = vld [vmem:[#allocation7] sm:$0xf]  ;;  %v7985_v58 = vor.u32 %v6500_v49, %v6038_v52  ;;  %v6424_v9 = vld [vmem:[#allocation7 + $0x4] sm:$0xf]  ;;  %v7990_v7 = vor.u32 %v6496_v53, %v6040_v56  ;;  %v6238_v1 = vld [vmem:[#allocation7 + $0x3c8] sm:$0xf]  ;;  %3461 = vmatpush.bf16.msrb.mxu0 %v7981_v33  ;;  %3487 = vmatpush.bf16.msra.mxu2 %v7987_v15 }
 0x40d   :  { %v6428_v39 = vld [vmem:[#allocation7 + $0x1c] sm:$0xf0]  ;;  %v5752_v16 = vld [vmem:[#allocation7 + $0x20] sm:$0xf0]  ;;  %v6549_v47 = vld [vmem:[#allocation7 + $0x3e4] sm:$0xf0] }
 0x40e   :  { %9496 = vst [vmem:[#allocation64_spill] sm:$0xff] %v7985_v58  ;;  %v6006_v4 = vld [vmem:[#allocation7 + $0x200] sm:$0xf]  ;;  %v6488_v2 = vld [vmem:[#allocation7 + $0x204] sm:$0xf]  ;;  %v7993_v26 = vor.u32 %v6428_v39, %v5750_v32  ;;  %3474 = vmatpush.bf16.msra.mxu1 %v7985_v58  ;;  %v7999_v41 = vor.u32 %v6424_v9, %v5752_v16  ;;  %3500 = vmatpush.bf16.msra.mxu3 %v7990_v7  ;;  %v2810_v28 = vperm.slane %v7910_v12, 0 }
 0x40f   :  { %v6492_v54 = vld [vmem:[#allocation7 + $0x21c] sm:$0xf0]  ;;  %9497 = vst [vmem:[#allocation65_spill] sm:$0xff] %v7990_v7  ;;  %v6008_v21 = vld [vmem:[#allocation7 + $0x220] sm:$0xf0]  ;;  %v8006_v23 = vor.u32 %v6549_v47, %v6238_v1 }
 0x410   :  { %v6481_v11 = vld [vmem:[#allocation7 + $0x1cc] sm:$0xf]  ;;  %v7997_v36 = vor.u32 %v6492_v54, %v6006_v4  ;;  %v8002_v49 = vor.u32 %v6488_v2, %v6008_v21  ;;  %v5950_v56 = vld [vmem:[#allocation7 + $0x188] sm:$0xf]  ;;  %3462 = vmatpush.bf16.msrb.mxu0 %v7993_v26  ;;  %3488 = vmatpush.bf16.msra.mxu2 %v7999_v41  ;;  %v2811_v55 = vsel %vm1372_vm3, %v2810_v28, %v2809_v30 }
 0x411   :  { %v5984_v35 = vld [vmem:[#allocation7 + $0x1e8] sm:$0xf0]  ;;  %9500 = vst [vmem:[#allocation68_spill] sm:$0xff] %v8006_v23  ;;  %v6477_v32 = vld [vmem:[#allocation7 + $0x1a4] sm:$0xf0]  ;;  %v8031_v63 = vpack.c.bf16 %v2811_v55, %v2811_v55 }
 0x412   :  { %9498 = vst [vmem:[#allocation66_spill] sm:$0xff] %v7997_v36  ;;  %v6545_v44 = vld [vmem:[#allocation7 + $0x3cc] sm:$0xf]  ;;  %v8008_v53 = vor.u32 %v6481_v11, %v5984_v35  ;;  %v6206_v39 = vld [vmem:[#allocation7 + $0x388] sm:$0xf]  ;;  %3475 = vmatpush.bf16.msra.mxu1 %v7997_v36  ;;  %3501 = vmatpush.bf16.msra.mxu3 %v8002_v49  ;;  %v8019_v1 = vor.u32 %v6477_v32, %v5950_v56 }
 0x413   :  { %v6240_v52 = vld [vmem:[#allocation7 + $0x3e8] sm:$0xf0]  ;;  %9499 = vst [vmem:[#allocation67_spill] sm:$0xff] %v8002_v49  ;;  %v6541_v54 = vld [vmem:[#allocation7 + $0x3a4] sm:$0xf0]  ;;  %3489 = vmatmul.bf16.vlgmr.msra.gmra.mxu2 %v8031_v63  ;;  %3463 = vmatmul.bf16.vlgmr.msrb.gmra.mxu0 %v8031_v63 }
 0x414   :  { %v8011_v4 = vor.u32 %v6545_v44, %v6240_v52  ;;  %v6473_v9 = vld [vmem:[#allocation7 + $0x18c] sm:$0xf]  ;;  %3507 = vmatpush.bf16.msra.mxu0 %v8004_v38  ;;  %3533 = vmatpush.bf16.msrb.mxu2 %v8008_v53  ;;  %v8023_v47 = vor.u32 %v6541_v54, %v6206_v39  ;;  %v5918_v35 = vld [vmem:[#allocation7 + $0x148] sm:$0xf] }
 0x415   :  { %v5952_v16 = vld [vmem:[#allocation7 + $0x1a8] sm:$0xf0]  ;;  %v6469_v44 = vld [vmem:[#allocation7 + $0x164] sm:$0xf0]  ;;  %3476 = vmatmul.bf16.vlgmr.msra.gmra.mxu1 %v9225_v37  ;;  %3502 = vmatmul.bf16.vlgmr.msra.gmra.mxu3 %v9225_v37 }
 0x416   :  { %9501 = vst [vmem:[#allocation69_spill] sm:$0xff] %v8011_v4  ;;  %v6537_v2 = vld [vmem:[#allocation7 + $0x38c] sm:$0xf]  ;;  %3520 = vmatpush.bf16.msrb.mxu1 %v8006_v23  ;;  %v8025_v11 = vor.u32 %v6473_v9, %v5952_v16  ;;  %v6174_v52 = vld [vmem:[#allocation7 + $0x348] sm:$0xf]  ;;  %3546 = vmatpush.bf16.msrb.mxu3 %v8011_v4  ;;  %v8036_v9 = vor.u32 %v6469_v44, %v5918_v35 }
 0x417   :  { %v6208_v21 = vld [vmem:[#allocation7 + $0x3a8] sm:$0xf0]  ;;  %9502 = vst [vmem:[#allocation70_spill] sm:$0xff] %v8023_v47  ;;  %v8041_v16 = vor.u32 %v6533_v46, %v6174_v52  ;;  %v6461_v30 = vld [vmem:[#allocation7 + $0x124] sm:$0xf0] }
 0x418   :  { %9503 = vst [vmem:[#allocation71_spill] sm:$0xff] %v8025_v11  ;;  %v8029_v12 = vor.u32 %v6537_v2, %v6208_v21  ;;  %v6465_v56 = vld [vmem:[#allocation7 + $0x14c] sm:$0xf]  ;;  %3508 = vmatpush.bf16.msra.mxu0 %v8019_v1  ;;  %3534 = vmatpush.bf16.msrb.mxu2 %v8025_v11  ;;  %v5886_v21 = vld [vmem:[#allocation7 + $0x108] sm:$0xf] }
 0x419   :  { %v5920_v32 = vld [vmem:[#allocation7 + $0x168] sm:$0xf0]  ;;  %9505 = vst [vmem:[#allocation73_spill] sm:$0xff] %v8036_v9  ;;  %v6142_v28 = vld [vmem:[#allocation7 + $0x308] sm:$0xf]  ;;  %v8050_v46 = vor.u32 %v6461_v30, %v5886_v21 }
 0x41a   :  { %9504 = vst [vmem:[#allocation72_spill] sm:$0xff] %v8029_v12  ;;  %v6529_v39 = vld [vmem:[#allocation7 + $0x34c] sm:$0xf]  ;;  %3521 = vmatpush.bf16.msrb.mxu1 %v8023_v47  ;;  %v8043_v2 = vor.u32 %v6465_v56, %v5920_v32  ;;  %3547 = vmatpush.bf16.msrb.mxu3 %v8029_v12  ;;  %v6525_v37 = vld [vmem:[#allocation7 + $0x324] sm:$0xf0] }
 0x41b   :  { %v6176_v54 = vld [vmem:[#allocation7 + $0x368] sm:$0xf0]  ;;  %9506 = vst [vmem:[#allocation74_spill] sm:$0xff] %v8041_v16  ;;  %v8054_v52 = vor.u32 %v6525_v37, %v6142_v28  ;;  %v5854_v32 = vld [vmem:[#allocation7 + $0xc8] sm:$0xf]  ;;  %v8068_v28 = vor.u32 %v6449_v14, %v5856_v8 }
 0x41c   :  { %9507 = vst [vmem:[#allocation75_spill] sm:$0xff] %v8043_v2  ;;  %v8046_v55 = vor.u32 %v6529_v39, %v6176_v54  ;;  %v6457_v35 = vld [vmem:[#allocation7 + $0x10c] sm:$0xf]  ;;  %3509 = vmatpush.bf16.msra.mxu0 %v8036_v9  ;;  %3535 = vmatpush.bf16.msrb.mxu2 %v8043_v2  ;;  %v6453_v39 = vld [vmem:[#allocation7 + $0xe4] sm:$0xf0] }
 0x41d   :  { %v5888_v44 = vld [vmem:[#allocation7 + $0x128] sm:$0xf0]  ;;  %9509 = vst [vmem:[#allocation77_spill] sm:$0xff] %v8050_v46  ;;  %v6110_v54 = vld [vmem:[#allocation7 + $0x2c8] sm:$0xf]  ;;  %v8062_v10 = vor.u32 %v6453_v39, %v5854_v32 }
 0x41e   :  { %9508 = vst [vmem:[#allocation76_spill] sm:$0xff] %v8046_v55  ;;  %3522 = vmatpush.bf16.msrb.mxu1 %v8041_v16  ;;  %v8056_v56 = vor.u32 %v6457_v35, %v5888_v44  ;;  %3548 = vmatpush.bf16.msrb.mxu3 %v8046_v55  ;;  %v6513_v21 = vld [vmem:[#allocation7 + $0x2cc] sm:$0xf]  ;;  %v8066_v37 = vor.u32 %v6517_v25, %v6110_v54  ;;  %v5822_v35 = vld [vmem:[#allocation7 + $0x88] sm:$0xf] }
 0x41f   :  { %9510 = vst [vmem:[#allocation78_spill] sm:$0xff] %v8054_v52  ;;  %v6112_v30 = vld [vmem:[#allocation7 + $0x2e8] sm:$0xf0]  ;;  %v6509_v55 = vld [vmem:[#allocation7 + $0x2a4] sm:$0xf0] }
 0x420   :  { %9511 = vst [vmem:[#allocation79_spill] sm:$0xff] %v8056_v56  ;;  %3510 = vmatpush.bf16.msra.mxu0 %v8050_v46  ;;  %3536 = vmatpush.bf16.msrb.mxu2 %v8056_v56  ;;  %v8071_v44 = vor.u32 %v6513_v21, %v6112_v30  ;;  %v6441_v16 = vld [vmem:[#allocation7 + $0x8c] sm:$0xf]  ;;  %v8078_v14 = vor.u32 %v6509_v55, %v6078_v50  ;;  %v5790_v25 = vld [vmem:[#allocation7 + $0x48] sm:$0xf] }
 0x421   :  { %9513 = vst [vmem:[#allocation81_spill] sm:$0xff] %v8062_v10  ;;  %v5824_v46 = vld [vmem:[#allocation7 + $0xa8] sm:$0xf0]  ;;  %v6437_v54 = vld [vmem:[#allocation7 + $0x64] sm:$0xf0] }
 0x422   :  { %3523 = vmatpush.bf16.msrb.mxu1 %v8054_v52  ;;  %9514 = vst [vmem:[#allocation82_spill] sm:$0xff] %v8066_v37  ;;  %3549 = vmatpush.bf16.msrb.mxu3 %v8059_v29  ;;  %v6505_v32 = vld [vmem:[#allocation7 + $0x28c] sm:$0xf]  ;;  %v8074_v52 = vor.u32 %v6445_v34, %v5822_v35  ;;  %v8080_v8 = vor.u32 %v6441_v16, %v5824_v46  ;;  %v6046_v21 = vld [vmem:[#allocation7 + $0x248] sm:$0xf] }
 0x423   :  { %9515 = vst [vmem:[#allocation83_spill] sm:$0xff] %v8068_v28  ;;  %v6080_v39 = vld [vmem:[#allocation7 + $0x2a8] sm:$0xf0]  ;;  %v6501_v29 = vld [vmem:[#allocation7 + $0x264] sm:$0xf0] }
 0x424   :  { %9516 = vst [vmem:[#allocation84_spill] sm:$0xff] %v8071_v44  ;;  %3511 = vmatpush.bf16.msra.mxu0 %v8062_v10  ;;  %3537 = vmatpush.bf16.msrb.mxu2 %v8068_v28  ;;  %v8083_v30 = vor.u32 %v6505_v32, %v6080_v39  ;;  %v6433_v56 = vld [vmem:[#allocation7 + $0x4c] sm:$0xf]  ;;  %v5758_v55 = vld [vmem:[#allocation7 + $0x8] sm:$0xf]  ;;  %v8090_v16 = vor.u32 %v6501_v29, %v6046_v21 }
 0x425   :  { %9517 = vst [vmem:[#allocation85_spill] sm:$0xff] %v8074_v52  ;;  %v5792_v10 = vld [vmem:[#allocation7 + $0x68] sm:$0xf0]  ;;  %v6429_v50 = vld [vmem:[#allocation7 + $0x24] sm:$0xf0] }
 0x426   :  { %3524 = vmatpush.bf16.msrb.mxu1 %v8066_v37  ;;  %9518 = vst [vmem:[#allocation86_spill] sm:$0xff] %v8078_v14  ;;  %3550 = vmatpush.bf16.msrb.mxu3 %v8071_v44  ;;  %v6497_v35 = vld [vmem:[#allocation7 + $0x24c] sm:$0xf]  ;;  %v8086_v37 = vor.u32 %v6437_v54, %v5790_v25  ;;  %v8092_v46 = vor.u32 %v6433_v56, %v5792_v10  ;;  %v6014_v32 = vld [vmem:[#allocation7 + $0x208] sm:$0xf] }
 0x427   :  { %9519 = vst [vmem:[#allocation87_spill] sm:$0xff] %v8080_v8  ;;  %v6048_v34 = vld [vmem:[#allocation7 + $0x268] sm:$0xf0]  ;;  %v6493_v39 = vld [vmem:[#allocation7 + $0x224] sm:$0xf0] }
 0x428   :  { %9520 = vst [vmem:[#allocation88_spill] sm:$0xff] %v8083_v30  ;;  %3512 = vmatpush.bf16.msra.mxu0 %v8074_v52  ;;  %3538 = vmatpush.bf16.msrb.mxu2 %v8080_v8  ;;  %v6425_v44 = vld [vmem:[#allocation7 + $0xc] sm:$0xf]  ;;  %v8095_v28 = vor.u32 %v6497_v35, %v6048_v34  ;;  %v5990_v2 = vld [vmem:[#allocation7 + $0x1d0] sm:$0xf]  ;;  %v8102_v21 = vor.u32 %v6493_v39, %v6014_v32 }
 0x429   :  { %9521 = vst [vmem:[#allocation89_spill] sm:$0xff] %v8086_v37  ;;  %v5760_v52 = vld [vmem:[#allocation7 + $0x28] sm:$0xf0]  ;;  %v6486_v12 = vld [vmem:[#allocation7 + $0x1ec] sm:$0xf0] }
 0x42a   :  { %3525 = vmatpush.bf16.msrb.mxu1 %v8078_v14  ;;  %9522 = vst [vmem:[#allocation90_spill] sm:$0xff] %v8090_v16  ;;  %3551 = vmatpush.bf16.msrb.mxu3 %v8083_v30  ;;  %v6489_v25 = vld [vmem:[#allocation7 + $0x20c] sm:$0xf]  ;;  %v6246_v9 = vld [vmem:[#allocation7 + $0x3d0] sm:$0xf]  ;;  %v8098_v14 = vor.u32 %v6429_v50, %v5758_v55  ;;  %v8104_v35 = vor.u32 %v6425_v44, %v5760_v52 }
 0x42b   :  { %9523 = vst [vmem:[#allocation91_spill] sm:$0xff] %v8092_v46  ;;  %v6016_v54 = vld [vmem:[#allocation7 + $0x228] sm:$0xf0]  ;;  %v6550_v29 = vld [vmem:[#allocation7 + $0x3ec] sm:$0xf0] }
 0x42c   :  { %9524 = vst [vmem:[#allocation92_spill] sm:$0xff] %v8095_v28  ;;  %3513 = vmatpush.bf16.msra.mxu0 %v8086_v37  ;;  %v6482_v10 = vld [vmem:[#allocation7 + $0x1d4] sm:$0xf]  ;;  %3539 = vmatpush.bf16.msrb.mxu2 %v8092_v46  ;;  %v8107_v8 = vor.u32 %v6489_v25, %v6016_v54  ;;  %v8109_v37 = vor.u32 %v6486_v12, %v5990_v2  ;;  %v5958_v47 = vld [vmem:[#allocation7 + $0x190] sm:$0xf] }
 0x42d   :  { %9525 = vst [vmem:[#allocation93_spill] sm:$0xff] %v8098_v14  ;;  %v5992_v56 = vld [vmem:[#allocation7 + $0x1f0] sm:$0xf0]  ;;  %v8111_v55 = vor.u32 %v6550_v29, %v6246_v9  ;;  %v6214_v11 = vld [vmem:[#allocation7 + $0x390] sm:$0xf] }
 0x42e   :  { %3526 = vmatpush.bf16.msrb.mxu1 %v8090_v16  ;;  %9526 = vst [vmem:[#allocation94_spill] sm:$0xff] %v8102_v21  ;;  %v6546_v34 = vld [vmem:[#allocation7 + $0x3d4] sm:$0xf]  ;;  %3552 = vmatpush.bf16.msrb.mxu3 %v8095_v28  ;;  %v8113_v50 = vor.u32 %v6482_v10, %v5992_v56  ;;  %v6478_v16 = vld [vmem:[#allocation7 + $0x1ac] sm:$0xf0] }
 0x42f   :  { %9527 = vst [vmem:[#allocation95_spill] sm:$0xff] %v8104_v35  ;;  %v6248_v30 = vld [vmem:[#allocation7 + $0x3f0] sm:$0xf0]  ;;  %v6542_v52 = vld [vmem:[#allocation7 + $0x3ac] sm:$0xf0]  ;;  %v8122_v9 = vor.u32 %v6478_v16, %v5958_v47 }
 0x430   :  { %9528 = vst [vmem:[#allocation96_spill] sm:$0xff] %v8107_v8  ;;  %3514 = vmatpush.bf16.msra.mxu0 %v8098_v14  ;;  %v8116_v32 = vor.u32 %v6546_v34, %v6248_v30  ;;  %v6474_v44 = vld [vmem:[#allocation7 + $0x194] sm:$0xf]  ;;  %3540 = vmatpush.bf16.msrb.mxu2 %v8104_v35  ;;  %v8126_v30 = vor.u32 %v6542_v52, %v6214_v11  ;;  %v5926_v54 = vld [vmem:[#allocation7 + $0x150] sm:$0xf] }
 0x431   :  { %9529 = vst [vmem:[#allocation97_spill] sm:$0xff] %v8109_v37  ;;  %v5960_v39 = vld [vmem:[#allocation7 + $0x1b0] sm:$0xf0]  ;;  %v6470_v29 = vld [vmem:[#allocation7 + $0x16c] sm:$0xf0] }
 0x432   :  { %9530 = vst [vmem:[#allocation98_spill] sm:$0xff] %v8111_v55  ;;  %3527 = vmatpush.bf16.msrb.mxu1 %v8102_v21  ;;  %v6538_v12 = vld [vmem:[#allocation7 + $0x394] sm:$0xf]  ;;  %3553 = vmatpush.bf16.msrb.mxu3 %v8107_v8  ;;  %v8128_v25 = vor.u32 %v6474_v44, %v5960_v39  ;;  %v6182_v10 = vld [vmem:[#allocation7 + $0x350] sm:$0xf]  ;;  %v8137_v11 = vor.u32 %v6470_v29, %v5926_v54 }
 0x433   :  { %9531 = vst [vmem:[#allocation99_spill] sm:$0xff] %v8113_v50  ;;  %v6216_v2 = vld [vmem:[#allocation7 + $0x3b0] sm:$0xf0]  ;;  %3541 = vmatmul.bf16.vlgmr.msrb.gmra.mxu2 %v8031_v63  ;;  %v6534_v34 = vld [vmem:[#allocation7 + $0x36c] sm:$0xf0]  ;;  %3515 = vmatmul.bf16.vlgmr.msra.gmra.mxu0 %v8031_v63 }
 0x434   :  { %9532 = vst [vmem:[#allocation100_spill] sm:$0xff] %v8116_v32  ;;  %3559 = vmatpush.bf16.msrb.mxu0 %v8109_v37  ;;  %3585 = vmatpush.bf16.msra.mxu2 %v8113_v50  ;;  %v8132_v56 = vor.u32 %v6538_v12, %v6216_v2  ;;  %v6466_v47 = vld [vmem:[#allocation7 + $0x154] sm:$0xf]  ;;  %v9537_v37 = vmov 0.0|0.0   ;;  %v8142_v52 = vor.u32 %v6534_v34, %v6182_v10  ;;  %v5894_v39 = vld [vmem:[#allocation7 + $0x110] sm:$0xf] }
 0x435   :  { %9533 = vst [vmem:[#allocation101_spill] sm:$0xff] %v8122_v9  ;;  %v5928_v16 = vld [vmem:[#allocation7 + $0x170] sm:$0xf0]  ;;  %3554 = vmatmul.bf16.vlgmr.msrb.gmra.mxu3 %v9537_v37  ;;  %3528 = vmatmul.bf16.vlgmr.msrb.gmra.mxu1 %v9537_v37  ;;  %v6462_v12 = vld [vmem:[#allocation7 + $0x12c] sm:$0xf0] }
 0x436   :  { %3572 = vmatpush.bf16.msra.mxu1 %v8111_v55  ;;  %9534 = vst [vmem:[#allocation102_spill] sm:$0xff] %v8126_v30  ;;  %3598 = vmatpush.bf16.msra.mxu3 %v8116_v32  ;;  %v6530_v55 = vld [vmem:[#allocation7 + $0x354] sm:$0xf]  ;;  %v8144_v44 = vor.u32 %v6466_v47, %v5928_v16  ;;  %v6150_v2 = vld [vmem:[#allocation7 + $0x310] sm:$0xf] }
 0x437   :  { %9535 = vst [vmem:[#allocation103_spill] sm:$0xff] %v8128_v25  ;;  %v6184_v50 = vld [vmem:[#allocation7 + $0x370] sm:$0xf0]  ;;  %v5862_v47 = vld [vmem:[#allocation7 + $0xd0] sm:$0xf] }
 0x438   :  { %9536 = vst [vmem:[#allocation104_spill] sm:$0xff] %v8132_v56  ;;  %3560 = vmatpush.bf16.msrb.mxu0 %v8122_v9  ;;  %3586 = vmatpush.bf16.msra.mxu2 %v8128_v25  ;;  %v8147_v32 = vor.u32 %v6530_v55, %v6184_v50  ;;  %v6526_v9 = vld [vmem:[#allocation7 + $0x32c] sm:$0xf0]  ;;  %v6458_v54 = vld [vmem:[#allocation7 + $0x114] sm:$0xf] }
 0x439   :  { %9538 = vst [vmem:[#allocation105_spill] sm:$0xff] %v8137_v11  ;;  %v5896_v29 = vld [vmem:[#allocation7 + $0x130] sm:$0xf0]  ;;  %v8154_v10 = vor.u32 %v6526_v9, %v6150_v2  ;;  %v6454_v55 = vld [vmem:[#allocation7 + $0xec] sm:$0xf0] }
 0x43a   :  { %3573 = vmatpush.bf16.msra.mxu1 %v8126_v30  ;;  %9539 = vst [vmem:[#allocation106_spill] sm:$0xff] %v8142_v52  ;;  %3599 = vmatpush.bf16.msra.mxu3 %v8132_v56  ;;  %v6522_v8 = vld [vmem:[#allocation7 + $0x314] sm:$0xf]  ;;  %v8150_v30 = vor.u32 %v6462_v12, %v5894_v39  ;;  %v8156_v34 = vor.u32 %v6458_v54, %v5896_v29  ;;  %v6118_v50 = vld [vmem:[#allocation7 + $0x2d0] sm:$0xf] }
 0x43b   :  { %9540 = vst [vmem:[#allocation107_spill] sm:$0xff] %v8144_v44  ;;  %v6152_v21 = vld [vmem:[#allocation7 + $0x330] sm:$0xf0]  ;;  %v6518_v56 = vld [vmem:[#allocation7 + $0x2ec] sm:$0xf0] }
 0x43c   :  { %9541 = vst [vmem:[#allocation108_spill] sm:$0xff] %v8147_v32  ;;  %3561 = vmatpush.bf16.msrb.mxu0 %v8137_v11  ;;  %3587 = vmatpush.bf16.msra.mxu2 %v8144_v44  ;;  %v8159_v16 = vor.u32 %v6522_v8, %v6152_v21  ;;  %v6450_v25 = vld [vmem:[#allocation7 + $0xd4] sm:$0xf]  ;;  %v8166_v9 = vor.u32 %v6518_v56, %v6118_v50  ;;  %v5830_v54 = vld [vmem:[#allocation7 + $0x90] sm:$0xf] }
 0x43d   :  { %9542 = vst [vmem:[#allocation109_spill] sm:$0xff] %v8150_v30  ;;  %v5864_v11 = vld [vmem:[#allocation7 + $0xf0] sm:$0xf0]  ;;  %v6446_v8 = vld [vmem:[#allocation7 + $0xac] sm:$0xf0] }
 0x43e   :  { %3574 = vmatpush.bf16.msra.mxu1 %v8142_v52  ;;  %9543 = vst [vmem:[#allocation110_spill] sm:$0xff] %v8154_v10  ;;  %3600 = vmatpush.bf16.msra.mxu3 %v8147_v32  ;;  %v6514_v39 = vld [vmem:[#allocation7 + $0x2d4] sm:$0xf]  ;;  %v8162_v52 = vor.u32 %v6454_v55, %v5862_v47  ;;  %v8168_v2 = vor.u32 %v6450_v25, %v5864_v11  ;;  %v6086_v21 = vld [vmem:[#allocation7 + $0x290] sm:$0xf] }
 0x43f   :  { %9544 = vst [vmem:[#allocation111_spill] sm:$0xff] %v8156_v34  ;;  %v6120_v12 = vld [vmem:[#allocation7 + $0x2f0] sm:$0xf0]  ;;  %v6510_v32 = vld [vmem:[#allocation7 + $0x2ac] sm:$0xf0] }
 0x440   :  { %9545 = vst [vmem:[#allocation112_spill] sm:$0xff] %v8159_v16  ;;  %3562 = vmatpush.bf16.msrb.mxu0 %v8150_v30  ;;  %3588 = vmatpush.bf16.msra.mxu2 %v8156_v34  ;;  %v8171_v29 = vor.u32 %v6514_v39, %v6120_v12  ;;  %v6442_v44 = vld [vmem:[#allocation7 + $0x94] sm:$0xf]  ;;  %v8178_v25 = vor.u32 %v6510_v32, %v6086_v21  ;;  %v5798_v11 = vld [vmem:[#allocation7 + $0x50] sm:$0xf] }
 0x441   :  { %9546 = vst [vmem:[#allocation113_spill] sm:$0xff] %v8162_v52  ;;  %v5832_v30 = vld [vmem:[#allocation7 + $0xb0] sm:$0xf0]  ;;  %v6438_v50 = vld [vmem:[#allocation7 + $0x6c] sm:$0xf0] }
 0x442   :  { %3575 = vmatpush.bf16.msra.mxu1 %v8154_v10  ;;  %9547 = vst [vmem:[#allocation114_spill] sm:$0xff] %v8166_v9  ;;  %3601 = vmatpush.bf16.msra.mxu3 %v8159_v16  ;;  %v6506_v47 = vld [vmem:[#allocation7 + $0x294] sm:$0xf]  ;;  %v8174_v10 = vor.u32 %v6446_v8, %v5830_v54  ;;  %v8180_v56 = vor.u32 %v6442_v44, %v5832_v30  ;;  %v6054_v39 = vld [vmem:[#allocation7 + $0x250] sm:$0xf] }
 0x443   :  { %9548 = vst [vmem:[#allocation115_spill] sm:$0xff] %v8168_v2  ;;  %v6088_v55 = vld [vmem:[#allocation7 + $0x2b0] sm:$0xf0]  ;;  %v6502_v16 = vld [vmem:[#allocation7 + $0x26c] sm:$0xf0] }
 0x444   :  { %9549 = vst [vmem:[#allocation116_spill] sm:$0xff] %v8171_v29  ;;  %3563 = vmatpush.bf16.msrb.mxu0 %v8162_v52  ;;  %3589 = vmatpush.bf16.msra.mxu2 %v8168_v2  ;;  %v8183_v12 = vor.u32 %v6506_v47, %v6088_v55  ;;  %v6434_v34 = vld [vmem:[#allocation7 + $0x54] sm:$0xf]  ;;  %v5766_v32 = vld [vmem:[#allocation7 + $0x10] sm:$0xf]  ;;  %v8190_v30 = vor.u32 %v6502_v16, %v6054_v39 }
 0x445   :  { %9550 = vst [vmem:[#allocation117_spill] sm:$0xff] %v8174_v10  ;;  %v5800_v52 = vld [vmem:[#allocation7 + $0x70] sm:$0xf0]  ;;  %v6430_v21 = vld [vmem:[#allocation7 + $0x2c] sm:$0xf0] }
 0x446   :  { %3576 = vmatpush.bf16.msra.mxu1 %v8166_v9  ;;  %9551 = vst [vmem:[#allocation118_spill] sm:$0xff] %v8178_v25  ;;  %3602 = vmatpush.bf16.msra.mxu3 %v8171_v29  ;;  %v6498_v54 = vld [vmem:[#allocation7 + $0x254] sm:$0xf]  ;;  %v8186_v9 = vor.u32 %v6438_v50, %v5798_v11  ;;  %v8192_v44 = vor.u32 %v6434_v34, %v5800_v52  ;;  %v6022_v47 = vld [vmem:[#allocation7 + $0x210] sm:$0xf] }
 0x447   :  { %9552 = vst [vmem:[#allocation119_spill] sm:$0xff] %v8180_v56  ;;  %v6056_v8 = vld [vmem:[#allocation7 + $0x270] sm:$0xf0]  ;;  %v6494_v55 = vld [vmem:[#allocation7 + $0x22c] sm:$0xf0] }
 0x448   :  { %9553 = vst [vmem:[#allocation120_spill] sm:$0xff] %v8183_v12  ;;  %3564 = vmatpush.bf16.msrb.mxu0 %v8174_v10  ;;  %3590 = vmatpush.bf16.msra.mxu2 %v8180_v56  ;;  %v6426_v29 = vld [vmem:[#allocation7 + $0x14] sm:$0xf]  ;;  %v8195_v2 = vor.u32 %v6498_v54, %v6056_v8  ;;  %v5998_v35 = vld [vmem:[#allocation7 + $0x1d8] sm:$0xf]  ;;  %v8202_v39 = vor.u32 %v6494_v55, %v6022_v47 }
 0x449   :  { %9554 = vst [vmem:[#allocation121_spill] sm:$0xff] %v8186_v9  ;;  %v5768_v10 = vld [vmem:[#allocation7 + $0x30] sm:$0xf0]  ;;  %v6487_v28 = vld [vmem:[#allocation7 + $0x1f4] sm:$0xf0] }
 0x44a   :  { %3577 = vmatpush.bf16.msra.mxu1 %v8178_v25  ;;  %9555 = vst [vmem:[#allocation122_spill] sm:$0xff] %v8190_v30  ;;  %3603 = vmatpush.bf16.msra.mxu3 %v8183_v12  ;;  %v6490_v11 = vld [vmem:[#allocation7 + $0x214] sm:$0xf]  ;;  %v6254_v14 = vld [vmem:[#allocation7 + $0x3d8] sm:$0xf]  ;;  %v8198_v25 = vor.u32 %v6430_v21, %v5766_v32  ;;  %v8204_v54 = vor.u32 %v6426_v29, %v5768_v10 }
 0x44b   :  { %9556 = vst [vmem:[#allocation123_spill] sm:$0xff] %v8195_v2  ;;  %v6024_v50 = vld [vmem:[#allocation7 + $0x230] sm:$0xf0]  ;;  %v6551_v16 = vld [vmem:[#allocation7 + $0x3f4] sm:$0xf0] }
 0x44c   :  { %3565 = vmatpush.bf16.msrb.mxu0 %v8186_v9  ;;  %v6483_v52 = vld [vmem:[#allocation7 + $0x1dc] sm:$0xf]  ;;  %3591 = vmatpush.bf16.msra.mxu2 %v8192_v44  ;;  %9557 = vst [vmem:[#allocation124_spill] sm:$0xff] %v8202_v39  ;;  %v8207_v56 = vor.u32 %v6490_v11, %v6024_v50  ;;  %v8209_v9 = vor.u32 %v6487_v28, %v5998_v35  ;;  %v5966_v46 = vld [vmem:[#allocation7 + $0x198] sm:$0xf] }
 0x44d   :  { %v6000_v34 = vld [vmem:[#allocation7 + $0x1f8] sm:$0xf0]  ;;  %v8211_v32 = vor.u32 %v6551_v16, %v6254_v14  ;;  %v6222_v4 = vld [vmem:[#allocation7 + $0x398] sm:$0xf] }
 0x44e   :  { %3578 = vmatpush.bf16.msra.mxu1 %v8190_v30  ;;  %v6547_v8 = vld [vmem:[#allocation7 + $0x3dc] sm:$0xf]  ;;  %3604 = vmatpush.bf16.msra.mxu3 %v8195_v2  ;;  %9558 = vst [vmem:[#allocation125_spill] sm:$0xff] %v8207_v56  ;;  %v8213_v21 = vor.u32 %v6483_v52, %v6000_v34  ;;  %v6479_v30 = vld [vmem:[#allocation7 + $0x1b4] sm:$0xf0] }
 0x44f   :  { %v6256_v12 = vld [vmem:[#allocation7 + $0x3f8] sm:$0xf0]  ;;  %9559 = vst [vmem:[#allocation126_spill] sm:$0xff] %v8211_v32  ;;  %v6543_v10 = vld [vmem:[#allocation7 + $0x3b4] sm:$0xf0]  ;;  %v8222_v14 = vor.u32 %v6479_v30, %v5966_v46 }
 0x450   :  { %3566 = vmatpush.bf16.msrb.mxu0 %v8198_v25  ;;  %v8216_v47 = vor.u32 %v6547_v8, %v6256_v12  ;;  %v6475_v29 = vld [vmem:[#allocation7 + $0x19c] sm:$0xf]  ;;  %3592 = vmatpush.bf16.msra.mxu2 %v8204_v54  ;;  %v8226_v12 = vor.u32 %v6543_v10, %v6222_v4  ;;  %v5934_v50 = vld [vmem:[#allocation7 + $0x158] sm:$0xf] }
 0x451   :  { %v5968_v55 = vld [vmem:[#allocation7 + $0x1b8] sm:$0xf0]  ;;  %9561 = vst [vmem:[#allocation128_spill] sm:$0xff] %v8222_v14  ;;  %v6471_v16 = vld [vmem:[#allocation7 + $0x174] sm:$0xf0] }
 0x452   :  { %9560 = vst [vmem:[#allocation127_spill] sm:$0xff] %v8216_v47  ;;  %3579 = vmatpush.bf16.msra.mxu1 %v8202_v39  ;;  %v6539_v28 = vld [vmem:[#allocation7 + $0x39c] sm:$0xf]  ;;  %3605 = vmatpush.bf16.msra.mxu3 %v8207_v56  ;;  %v8228_v11 = vor.u32 %v6475_v29, %v5968_v55  ;;  %v6190_v52 = vld [vmem:[#allocation7 + $0x358] sm:$0xf]  ;;  %v8237_v4 = vor.u32 %v6471_v16, %v5934_v50 }
 0x453   :  { %v6224_v35 = vld [vmem:[#allocation7 + $0x3b8] sm:$0xf0]  ;;  %9562 = vst [vmem:[#allocation129_spill] sm:$0xff] %v8226_v12  ;;  %3593 = vmatmul.bf16.vlgmr.msra.gmra.mxu2 %v8031_v63  ;;  %v6535_v8 = vld [vmem:[#allocation7 + $0x374] sm:$0xf0]  ;;  %3567 = vmatmul.bf16.vlgmr.msrb.gmra.mxu0 %v8031_v63 }
 0x454   :  { %3611 = vmatpush.bf16.msra.mxu0 %v8209_v9  ;;  %3637 = vmatpush.bf16.msrb.mxu2 %v8213_v21  ;;  %9563 = vst [vmem:[#allocation130_spill] sm:$0xff] %v8228_v11  ;;  %v8232_v34 = vor.u32 %v6539_v28, %v6224_v35  ;;  %v6467_v46 = vld [vmem:[#allocation7 + $0x15c] sm:$0xf]  ;;  %v8242_v10 = vor.u32 %v6535_v8, %v6190_v52  ;;  %v5902_v55 = vld [vmem:[#allocation7 + $0x118] sm:$0xf] }
 0x455   :  { %v5936_v30 = vld [vmem:[#allocation7 + $0x178] sm:$0xf0]  ;;  %3606 = vmatmul.bf16.vlgmr.msra.gmra.mxu3 %v9537_v37  ;;  %9565 = vst [vmem:[#allocation132_spill] sm:$0xff] %v8237_v4  ;;  %3580 = vmatmul.bf16.vlgmr.msra.gmra.mxu1 %v9537_v37  ;;  %v6463_v28 = vld [vmem:[#allocation7 + $0x134] sm:$0xf0] }
 0x456   :  { %3624 = vmatpush.bf16.msrb.mxu1 %v8211_v32  ;;  %3650 = vmatpush.bf16.msrb.mxu3 %v8216_v47  ;;  %9564 = vst [vmem:[#allocation131_spill] sm:$0xff] %v8232_v34  ;;  %v6531_v32 = vld [vmem:[#allocation7 + $0x35c] sm:$0xf]  ;;  %v8244_v29 = vor.u32 %v6467_v46, %v5936_v30  ;;  %v6158_v35 = vld [vmem:[#allocation7 + $0x318] sm:$0xf] }
 0x457   :  { %v6192_v56 = vld [vmem:[#allocation7 + $0x378] sm:$0xf0]  ;;  %9566 = vst [vmem:[#allocation133_spill] sm:$0xff] %v8242_v10  ;;  %v6527_v39 = vld [vmem:[#allocation7 + $0x334] sm:$0xf0] }
 0x458   :  { %3612 = vmatpush.bf16.msra.mxu0 %v8222_v14  ;;  %3638 = vmatpush.bf16.msrb.mxu2 %v8228_v11  ;;  %9567 = vst [vmem:[#allocation134_spill] sm:$0xff] %v8244_v29  ;;  %v8247_v47 = vor.u32 %v6531_v32, %v6192_v56  ;;  %v6459_v50 = vld [vmem:[#allocation7 + $0x11c] sm:$0xf]  ;;  %v8254_v52 = vor.u32 %v6527_v39, %v6158_v35  ;;  %v5870_v46 = vld [vmem:[#allocation7 + $0xd8] sm:$0xf] }
 0x459   :  { %v5904_v16 = vld [vmem:[#allocation7 + $0x138] sm:$0xf0]  ;;  %v6455_v56 = vld [vmem:[#allocation7 + $0xf4] sm:$0xf0] }
 0x45a   :  { %3625 = vmatpush.bf16.msrb.mxu1 %v8226_v12  ;;  %3651 = vmatpush.bf16.msrb.mxu3 %v8232_v34  ;;  %9568 = vst [vmem:[#allocation135_spill] sm:$0xff] %v8247_v47  ;;  %v6523_v2 = vld [vmem:[#allocation7 + $0x31c] sm:$0xf]  ;;  %v8250_v12 = vor.u32 %v6463_v28, %v5902_v55  ;;  %v8256_v8 = vor.u32 %v6459_v50, %v5904_v16  ;;  %v6126_v32 = vld [vmem:[#allocation7 + $0x2d8] sm:$0xf] }
 0x45b   :  { %v6160_v14 = vld [vmem:[#allocation7 + $0x338] sm:$0xf0]  ;;  %9570 = vst [vmem:[#allocation137_spill] sm:$0xff] %v8254_v52  ;;  %v6519_v34 = vld [vmem:[#allocation7 + $0x2f4] sm:$0xf0] }
 0x45c   :  { %3613 = vmatpush.bf16.msra.mxu0 %v8237_v4  ;;  %9569 = vst [vmem:[#allocation136_spill] sm:$0xff] %v8250_v12  ;;  %3639 = vmatpush.bf16.msrb.mxu2 %v8244_v29  ;;  %v8259_v30 = vor.u32 %v6523_v2, %v6160_v14  ;;  %v6451_v11 = vld [vmem:[#allocation7 + $0xdc] sm:$0xf]  ;;  %v8266_v39 = vor.u32 %v6519_v34, %v6126_v32  ;;  %v5838_v50 = vld [vmem:[#allocation7 + $0x98] sm:$0xf] }
 0x45d   :  { %9571 = vst [vmem:[#allocation138_spill] sm:$0xff] %v8256_v8  ;;  %v5872_v4 = vld [vmem:[#allocation7 + $0xf8] sm:$0xf0]  ;;  %v6447_v2 = vld [vmem:[#allocation7 + $0xb4] sm:$0xf0] }
 0x45e   :  { %3626 = vmatpush.bf16.msrb.mxu1 %v8242_v10  ;;  %3652 = vmatpush.bf16.msrb.mxu3 %v8247_v47  ;;  %9572 = vst [vmem:[#allocation139_spill] sm:$0xff] %v8259_v30  ;;  %v6515_v55 = vld [vmem:[#allocation7 + $0x2dc] sm:$0xf]  ;;  %v8262_v10 = vor.u32 %v6455_v56, %v5870_v46  ;;  %v8268_v35 = vor.u32 %v6451_v11, %v5872_v4  ;;  %v6094_v14 = vld [vmem:[#allocation7 + $0x298] sm:$0xf] }
 0x45f   :  { %v6128_v28 = vld [vmem:[#allocation7 + $0x2f8] sm:$0xf0]  ;;  %9574 = vst [vmem:[#allocation141_spill] sm:$0xff] %v8266_v39  ;;  %v6511_v47 = vld [vmem:[#allocation7 + $0x2b4] sm:$0xf0] }
 0x460   :  { %3614 = vmatpush.bf16.msra.mxu0 %v8250_v12  ;;  %9573 = vst [vmem:[#allocation140_spill] sm:$0xff] %v8262_v10  ;;  %3640 = vmatpush.bf16.msrb.mxu2 %v8256_v8  ;;  %v8271_v16 = vor.u32 %v6515_v55, %v6128_v28  ;;  %v6443_v29 = vld [vmem:[#allocation7 + $0x9c] sm:$0xf]  ;;  %v8278_v11 = vor.u32 %v6511_v47, %v6094_v14  ;;  %v5806_v4 = vld [vmem:[#allocation7 + $0x58] sm:$0xf] }
 0x461   :  { %9575 = vst [vmem:[#allocation142_spill] sm:$0xff] %v8268_v35  ;;  %v5840_v12 = vld [vmem:[#allocation7 + $0xb8] sm:$0xf0]  ;;  %v6439_v32 = vld [vmem:[#allocation7 + $0x74] sm:$0xf0] }
 0x462   :  { %3627 = vmatpush.bf16.msrb.mxu1 %v8254_v52  ;;  %3653 = vmatpush.bf16.msrb.mxu3 %v8259_v30  ;;  %9576 = vst [vmem:[#allocation143_spill] sm:$0xff] %v8271_v16  ;;  %v6507_v46 = vld [vmem:[#allocation7 + $0x29c] sm:$0xf]  ;;  %v8274_v52 = vor.u32 %v6447_v2, %v5838_v50  ;;  %v8280_v34 = vor.u32 %v6443_v29, %v5840_v12  ;;  %v6062_v55 = vld [vmem:[#allocation7 + $0x258] sm:$0xf] }
 0x463   :  { %v6096_v56 = vld [vmem:[#allocation7 + $0x2b8] sm:$0xf0]  ;;  %9578 = vst [vmem:[#allocation145_spill] sm:$0xff] %v8278_v11  ;;  %v6503_v30 = vld [vmem:[#allocation7 + $0x274] sm:$0xf0] }
 0x464   :  { %3615 = vmatpush.bf16.msra.mxu0 %v8262_v10  ;;  %9577 = vst [vmem:[#allocation144_spill] sm:$0xff] %v8274_v52  ;;  %3641 = vmatpush.bf16.msrb.mxu2 %v8268_v35  ;;  %v8283_v28 = vor.u32 %v6507_v46, %v6096_v56  ;;  %v6435_v8 = vld [vmem:[#allocation7 + $0x5c] sm:$0xf]  ;;  %v8290_v47 = vor.u32 %v6503_v30, %v6062_v55  ;;  %v5774_v29 = vld [vmem:[#allocation7 + $0x18] sm:$0xf] }
 0x465   :  { %9579 = vst [vmem:[#allocation146_spill] sm:$0xff] %v8280_v34  ;;  %v5808_v10 = vld [vmem:[#allocation7 + $0x78] sm:$0xf0]  ;;  %v6431_v14 = vld [vmem:[#allocation7 + $0x34] sm:$0xf0] }
 0x466   :  { %3628 = vmatpush.bf16.msrb.mxu1 %v8266_v39  ;;  %3654 = vmatpush.bf16.msrb.mxu3 %v8271_v16  ;;  %9580 = vst [vmem:[#allocation147_spill] sm:$0xff] %v8283_v28  ;;  %v6499_v50 = vld [vmem:[#allocation7 + $0x25c] sm:$0xf]  ;;  %v8286_v39 = vor.u32 %v6439_v32, %v5806_v4  ;;  %v8292_v12 = vor.u32 %v6435_v8, %v5808_v10  ;;  %v6030_v46 = vld [vmem:[#allocation7 + $0x218] sm:$0xf] }
 0x467   :  { %v6064_v2 = vld [vmem:[#allocation7 + $0x278] sm:$0xf0]  ;;  %9582 = vst [vmem:[#allocation149_spill] sm:$0xff] %v8290_v47  ;;  %v6495_v16 = vld [vmem:[#allocation7 + $0x234] sm:$0xf0] }
 0x468   :  { %3616 = vmatpush.bf16.msra.mxu0 %v8274_v52  ;;  %9581 = vst [vmem:[#allocation148_spill] sm:$0xff] %v8286_v39  ;;  %3642 = vmatpush.bf16.msrb.mxu2 %v8280_v34  ;;  %v8295_v56 = vor.u32 %v6499_v50, %v6064_v2  ;;  %v6427_v35 = vld [vmem:[#allocation7 + $0x1c] sm:$0xf]  ;;  %v8302_v10 = vor.u32 %v6495_v16, %v6030_v46  ;;  %v9592_v16 = vld [vmem:[#allocation73_spill] sm:$0xff]  ;;  %v9594_v50 = vld [vmem:[#allocation75_spill] sm:$0xff] }
 0x469   :  { %9583 = vst [vmem:[#allocation150_spill] sm:$0xff] %v8292_v12  ;;  %v5776_v52 = vld [vmem:[#allocation7 + $0x38] sm:$0xf0]  ;;  %v9595_v2 = vld [vmem:[#allocation74_spill] sm:$0xff] }
 0x46a   :  { %3629 = vmatpush.bf16.msrb.mxu1 %v8278_v11  ;;  %3655 = vmatpush.bf16.msrb.mxu3 %v8283_v28  ;;  %9584 = vst [vmem:[#allocation151_spill] sm:$0xff] %v8295_v56  ;;  %v6491_v4 = vld [vmem:[#allocation7 + $0x21c] sm:$0xf]  ;;  %v8298_v11 = vor.u32 %v6431_v14, %v5774_v29  ;;  %v8304_v8 = vor.u32 %v6427_v35, %v5776_v52  ;;  %v9591_v52 = vld [vmem:[#allocation70_spill] sm:$0xff]  ;;  %v9596_v14 = vld [vmem:[#allocation77_spill] sm:$0xff] }
 0x46b   :  { %v6032_v32 = vld [vmem:[#allocation7 + $0x238] sm:$0xf0]  ;;  %9586 = vst [vmem:[#allocation153_spill] sm:$0xff] %v8302_v10 }
 0x46c   :  { %3617 = vmatpush.bf16.msra.mxu0 %v8286_v39  ;;  %9585 = vst [vmem:[#allocation152_spill] sm:$0xff] %v8298_v11  ;;  %3643 = vmatpush.bf16.msrb.mxu2 %v8292_v12  ;;  %v8307_v30 = vor.u32 %v6491_v4, %v6032_v32  ;;  %v9593_v55 = vld [vmem:[#allocation72_spill] sm:$0xff]  ;;  %v9598_v4 = vld [vmem:[#allocation79_spill] sm:$0xff] }
 0x46d   :  { %9587 = vst [vmem:[#allocation154_spill] sm:$0xff] %v8304_v8  ;;  %v9597_v46 = vld [vmem:[#allocation76_spill] sm:$0xff] }
 0x46e   :  { %3630 = vmatpush.bf16.msrb.mxu1 %v8290_v47  ;;  %3656 = vmatpush.bf16.msrb.mxu3 %v8295_v56  ;;  %9588 = vst [vmem:[#allocation155_spill] sm:$0xff] %v8307_v30 }
 0x470   :  { %3618 = vmatpush.bf16.msra.mxu0 %v8298_v11  ;;  %3644 = vmatpush.bf16.msrb.mxu2 %v8304_v8 }
 0x472   :  { %3631 = vmatpush.bf16.msrb.mxu1 %v8302_v10  ;;  %3657 = vmatpush.bf16.msrb.mxu3 %v8307_v30 }
 0x473   :  { %3619 = vmatmul.bf16.vlgmr.msra.gmra.mxu0 %v8031_v63  ;;  %3645 = vmatmul.bf16.vlgmr.msrb.gmra.mxu2 %v8031_v63  ;;  %v9589_v63 = vld [vmem:[#allocation69_spill] sm:$0xff] }
 0x474   :  { %3937 = vmatpush.bf16.msrb.mxu0 %v7912_v18  ;;  %3963 = vmatpush.bf16.msra.mxu2 %v7916_v60 }
 0x475   :  { %3632 = vmatmul.bf16.vlgmr.msrb.gmra.mxu1 %v9537_v37  ;;  %3658 = vmatmul.bf16.vlgmr.msrb.gmra.mxu3 %v9537_v37  ;;  %v9590_v37 = vld [vmem:[#allocation71_spill] sm:$0xff] }
 0x476   :  { %3950 = vmatpush.bf16.msra.mxu1 %v7914_v22  ;;  %3976 = vmatpush.bf16.msra.mxu3 %v7919_v57  ;;  %v9621_v57 = vld [vmem:[#allocation49_spill] sm:$0xff] }
 0x478   :  { %3938 = vmatpush.bf16.msrb.mxu0 %v7923_v13  ;;  %3964 = vmatpush.bf16.msra.mxu2 %v7928_v17 }
 0x47a   :  { %3951 = vmatpush.bf16.msra.mxu1 %v7925_v61  ;;  %3977 = vmatpush.bf16.msra.mxu3 %v7930_v42 }
 0x47c   :  { %3939 = vmatpush.bf16.msrb.mxu0 %v7933_v62  ;;  %3965 = vmatpush.bf16.msra.mxu2 %v7939_v31 }
 0x47e   :  { %3952 = vmatpush.bf16.msra.mxu1 %v7937_v51  ;;  %3978 = vmatpush.bf16.msra.mxu3 %v7942_v45  ;;  %v9608_v45 = vld [vmem:[#allocation84_spill] sm:$0xff] }
 0x480   :  { %3940 = vmatpush.bf16.msrb.mxu0 %v7945_v59  ;;  %3966 = vmatpush.bf16.msra.mxu2 %v7951_v3 }
 0x482   :  { %3953 = vmatpush.bf16.msra.mxu1 %v7949_v0  ;;  %3979 = vmatpush.bf16.msra.mxu3 %v7954_v5  ;;  %v9606_v5 = vld [vmem:[#allocation45_spill] sm:$0xff] }
 0x484   :  { %3941 = vmatpush.bf16.msrb.mxu0 %v7957_v19  ;;  %3967 = vmatpush.bf16.msra.mxu2 %v7963_v24 }
 0x486   :  { %3954 = vmatpush.bf16.msra.mxu1 %v7961_v20  ;;  %3980 = vmatpush.bf16.msra.mxu3 %v7966_v6  ;;  %v9605_v20 = vld [vmem:[#allocation82_spill] sm:$0xff] }
 0x488   :  { %3942 = vmatpush.bf16.msrb.mxu0 %v7969_v27  ;;  %3968 = vmatpush.bf16.msra.mxu2 %v7975_v43 }
 0x48a   :  { %3955 = vmatpush.bf16.msra.mxu1 %v7973_v40  ;;  %3981 = vmatpush.bf16.msra.mxu3 %v7978_v48  ;;  %v9603_v48 = vld [vmem:[#allocation83_spill] sm:$0xff]  ;;  %v9604_v40 = vld [vmem:[#allocation46_spill] sm:$0xff] }
 0x48c   :  { %3943 = vmatpush.bf16.msrb.mxu0 %v7981_v33  ;;  %3969 = vmatpush.bf16.msra.mxu2 %v7987_v15 }
 0x48e   :  { %3956 = vmatpush.bf16.msra.mxu1 %v7985_v58  ;;  %3982 = vmatpush.bf16.msra.mxu3 %v7990_v7  ;;  %v9601_v7 = vld [vmem:[#allocation81_spill] sm:$0xff] }
 0x490   :  { %3944 = vmatpush.bf16.msrb.mxu0 %v7993_v26  ;;  %3970 = vmatpush.bf16.msra.mxu2 %v7999_v41  ;;  %v3464_v29 = vpop.f32.mrf.mxu0 }
 0x492   :  { %3957 = vmatpush.bf16.msra.mxu1 %v7997_v36  ;;  %3983 = vmatpush.bf16.msra.mxu3 %v8002_v49  ;;  %v3477_v35 = vpop.f32.mrf.mxu1 }
 0x494   :  { %3989 = vmatpush.bf16.msra.mxu0 %v8004_v38  ;;  %4015 = vmatpush.bf16.msrb.mxu2 %v8008_v53 }
 0x496   :  { %4002 = vmatpush.bf16.msrb.mxu1 %v8006_v23  ;;  %4028 = vmatpush.bf16.msrb.mxu3 %v9589_v63  ;;  %v9599_v63 = vld [vmem:[#allocation78_spill] sm:$0xff]  ;;  %v9600_v23 = vld [vmem:[#allocation44_spill] sm:$0xff] }
 0x497   :  { %v9409_v49 = vrot.slane %v9600_v23, 7 }
 0x498   :  { %3990 = vmatpush.bf16.msra.mxu0 %v8019_v1  ;;  %4016 = vmatpush.bf16.msrb.mxu2 %v9590_v37  ;;  %v3503_v32 = vpop.f32.mrf.mxu3  ;;  %v3466_v0 = vpop.f32.mrf.mxu0 }
 0x499   :  { %v9612_v0 = vld [vmem:[#allocation88_spill] sm:$0xff] }
 0x49a   :  { %4003 = vmatpush.bf16.msrb.mxu1 %v9591_v52  ;;  %4029 = vmatpush.bf16.msrb.mxu3 %v9593_v55  ;;  %v3490_v52 = vpop.f32.mrf.mxu2  ;;  %v3479_v36 = vpop.f32.mrf.mxu1  ;;  %v9602_v55 = vld [vmem:[#allocation80_spill] sm:$0xff] }
 0x49b   :  { %v3504_v58 = vadd.f32 %v3503_v32, %v3490_v52  ;;  %v9607_v36 = vld [vmem:[#allocation85_spill] sm:$0xff] }
 0x49c   :  { %3991 = vmatpush.bf16.msra.mxu0 %v9592_v16  ;;  %4017 = vmatpush.bf16.msrb.mxu2 %v9594_v50 }
 0x49d   :  { %v3675_v6 = vrot.slane %v3504_v58, 4 }
 0x49e   :  { %4004 = vmatpush.bf16.msrb.mxu1 %v9595_v2  ;;  %4030 = vmatpush.bf16.msrb.mxu3 %v9597_v46  ;;  %v3478_v2 = vadd.f32 %v3477_v35, %v3464_v29  ;;  %v3669_v46 = vadd.f32 %v9600_v23, %v9604_v40  ;;  %v9609_v35 = vld [vmem:[#allocation87_spill] sm:$0xff]  ;;  %v9610_v40 = vld [vmem:[#allocation86_spill] sm:$0xff]  ;;  %v9611_v23 = vld [vmem:[#allocation89_spill] sm:$0xff] }
 0x4a0   :  { %3992 = vmatpush.bf16.msra.mxu0 %v9596_v14  ;;  %4018 = vmatpush.bf16.msrb.mxu2 %v9598_v4  ;;  %v3677_v52 = vsel %vm9443_vm0, %v3478_v2, %v3675_v6 }
 0x4a1   :  { %v3679_v29 = vrot.slane %v3677_v52, 7  ;;  %v3687_v32 = vadd.f32 %v3677_v52, %v3669_v46  ;;  %v9615_v46 = vld [vmem:[#allocation93_spill] sm:$0xff]  ;;  %v9618_v52 = vld [vmem:[#allocation94_spill] sm:$0xff] }
 0x4a2   :  { %4005 = vmatpush.bf16.msrb.mxu1 %v9599_v63  ;;  %4031 = vmatpush.bf16.msrb.mxu3 %v9602_v55  ;;  %v3667_v63 = vadd.f32 %v9409_v49, %v9606_v5  ;;  %v3505_v55 = vpop.f32.mrf.mxu3  ;;  %v3492_v42 = vpop.f32.mrf.mxu2  ;;  %v9613_v49 = vld [vmem:[#allocation91_spill] sm:$0xff] }
 0x4a3   :  { %v3743_v51 = vrot.slane %v3687_v32, 4  ;;  %v9617_v42 = vld [vmem:[#allocation95_spill] sm:$0xff] }
 0x4a4   :  { %3993 = vmatpush.bf16.msra.mxu0 %v9601_v7  ;;  %4019 = vmatpush.bf16.msrb.mxu2 %v9603_v48  ;;  %v3685_v58 = vadd.f32 %v3679_v29, %v3667_v63  ;;  %v9616_v63 = vld [vmem:[#allocation92_spill] sm:$0xff] }
 0x4a5   :  { %v6263_v2 = vmul.f32 -1.442695, %v3743_v51  ;;  %v9622_v48 = vld [vmem:[#allocation48_spill] sm:$0xff] }
 0x4a6   :  { %4006 = vmatpush.bf16.msrb.mxu1 %v9605_v20  ;;  %4032 = vmatpush.bf16.msrb.mxu3 %v9608_v45  ;;  %v6261_v20 = vmul.f32 -1.442695, %v3687_v32  ;;  %v6260_v5 = vmul.f32 -1.442695, %v3685_v58  ;;  %v3742_v6 = vrot.slane %v3685_v58, 4  ;;  %v9614_v45 = vld [vmem:[#allocation90_spill] sm:$0xff] }
 0x4a7   :  { %v9619_v32 = vld [vmem:[#allocation96_spill] sm:$0xff] }
 0x4a8   :  { %3994 = vmatpush.bf16.msra.mxu0 %v9607_v36  ;;  %4020 = vmatpush.bf16.msrb.mxu2 %v9609_v35  ;;  %6624 = vpow2.f32 %v6261_v20  ;;  %v6262_v55 = vmul.f32 -1.442695, %v3742_v6 }
 0x4a9   :  { %6626 = vpow2.f32 %v6260_v5 }
 0x4aa   :  { %4007 = vmatpush.bf16.msrb.mxu1 %v9610_v40  ;;  %4033 = vmatpush.bf16.msrb.mxu3 %v9612_v0  ;;  %6628 = vpow2.f32 %v6263_v2 }
 0x4ab   :  { %6630 = vpow2.f32 %v6262_v55 }
 0x4ac   :  { %3995 = vmatpush.bf16.msra.mxu0 %v9611_v23  ;;  %4021 = vmatpush.bf16.msrb.mxu2 %v9613_v49 }
 0x4ae   :  { %4008 = vmatpush.bf16.msrb.mxu1 %v9614_v45  ;;  %4034 = vmatpush.bf16.msrb.mxu3 %v9616_v63  ;;  %v6625_v29 = vpop.eup %6624 }
 0x4af   :  { %v8388_v20 = vadd.f32 1.0, %v6625_v29  ;;  %v6627_v51 = vpop.eup %6626 }
 0x4b0   :  { %3996 = vmatpush.bf16.msra.mxu0 %v9615_v46  ;;  %4022 = vmatpush.bf16.msrb.mxu2 %v9617_v42  ;;  %v6629_v58 = vpop.eup %6628  ;;  %v8390_v45 = vadd.f32 1.0, %v6627_v51  ;;  %v3516_v55 = vpop.f32.mrf.mxu0  ;;  %v9620_v42 = vld [vmem:[#allocation47_spill] sm:$0xff] }
 0x4b1   :  { %6632 = vrcp.f32 %v8388_v20  ;;  %v6631_v5 = vpop.eup %6630  ;;  %v8393_v6 = vadd.f32 1.0, %v6629_v58  ;;  %v9421_v46 = vrot.slane %v9620_v42, 7  ;;  %v3670_v22 = vadd.f32 %v9620_v42, %v9621_v57 }
 0x4b2   :  { %4009 = vmatpush.bf16.msrb.mxu1 %v9618_v52  ;;  %4035 = vmatpush.bf16.msrb.mxu3 %v9619_v32  ;;  %6634 = vrcp.f32 %v8390_v45  ;;  %v8396_v2 = vadd.f32 1.0, %v6631_v5  ;;  %v3529_v29 = vpop.f32.mrf.mxu1  ;;  %vm3730_vm3 = vweird.f32 %v8388_v20  ;;  %vm3715_vm12 = vweird.f32 %v8390_v45 }
 0x4b3   :  { %6636 = vrcp.f32 %v8393_v6  ;;  %v3530_v49 = vadd.f32 %v3529_v29, %v3516_v55  ;;  %v3668_v7 = vadd.f32 %v9421_v46, %v9622_v48  ;;  %vm3774_vm9 = vweird.f32 %v8393_v6 }
 0x4b4   :  { %6638 = vrcp.f32 %v8396_v2  ;;  %vm3759_vm6 = vweird.f32 %v8396_v2  ;;  %v3765_v42 = vand.u32 2147483648, %v8396_v2 }
 0x4b6   :  { %v3542_v63 = vpop.f32.mrf.mxu2 }
 0x4b7   :  { %v8400_v32 = vpop.eup %6632 }
 0x4b8   :  { %v8402_v52 = vpop.eup %6634  ;;  %v3726_v58 = vmul.f32 %v8400_v32, %v8388_v20  ;;  %v3555_v40 = vpop.f32.mrf.mxu3  ;;  %vm3731_vm7 = vweird.f32 %v8400_v32 }
 0x4b9   :  { %v8404_v51 = vpop.eup %6636  ;;  %v3556_v61 = vadd.f32 %v3555_v40, %v3542_v63  ;;  %v3711_v23 = vmul.f32 %v8402_v52, %v8390_v45  ;;  %v3518_v30 = vpop.f32.mrf.mxu0  ;;  %v3734_v63 = vand.u32 2147483647, %v8388_v20  ;;  %vm8442_vm14 = vmor %vm3730_vm3, %vm3731_vm7  ;;  %vm3716_vm2 = vweird.f32 %v8402_v52 }
 0x4ba   :  { %v8408_v0 = vpop.eup %6638  ;;  %v3770_v5 = vmul.f32 %v8404_v51, %v8393_v6  ;;  %v3727_v10 = vsub.f32 1.0, %v3726_v58  ;;  %v3531_v47 = vpop.f32.mrf.mxu1  ;;  %v3736_v58 = vand.u32 2147483648, %v8388_v20  ;;  %vm3775_vm10 = vweird.f32 %v8404_v51  ;;  %vm8464_vm11 = vmor %vm3715_vm12, %vm3716_vm2 }
 0x4bb   :  { %v3755_v35 = vmul.f32 %v8408_v0, %v8396_v2  ;;  %v3676_v56 = vrot.slane %v3556_v61, 4  ;;  %v3712_v55 = vsub.f32 1.0, %v3711_v23  ;;  %vm8450_vm1 = vmor %vm3774_vm9, %vm3775_vm10  ;;  %vm3760_vm8 = vweird.f32 %v8408_v0 }
 0x4bc   :  { %v3771_v36 = vsub.f32 1.0, %v3770_v5  ;;  %v3728_v61 = vmul.f32 %v8400_v32, %v3727_v10  ;;  %vm8456_vm13 = vcmp.eq.f32.partialorder %v3734_v63, 8.507059e+37  ;;  %vm8477_vm3 = vmor %vm3759_vm6, %vm3760_vm8 }
 0x4bd   :  { %v3678_v40 = vsel %vm9443_vm0, %v3530_v49, %v3676_v56  ;;  %v3756_v57 = vsub.f32 1.0, %v3755_v35  ;;  %v3719_v56 = vand.u32 2147483647, %v8390_v45  ;;  %v3721_v35 = vand.u32 2147483648, %v8390_v45  ;;  %v9633_v45 = vld [vmem:[#allocation51_spill] sm:$0xff] }
 0x4be   :  { %v3680_v29 = vrot.slane %v3678_v40, 7  ;;  %v3688_v30 = vadd.f32 %v3678_v40, %v3670_v22  ;;  %v3772_v5 = vmul.f32 %v8404_v51, %v3771_v36  ;;  %v3544_v47 = vpop.f32.mrf.mxu2  ;;  %v3780_v22 = vand.u32 2147483648, %v8393_v6 }
 0x4bf   :  { %v3713_v10 = vmul.f32 %v8402_v52, %v3712_v55  ;;  %v3778_v40 = vand.u32 2147483647, %v8393_v6  ;;  %vm3720_vm12 = vcmp.eq.f32.partialorder %v3719_v56, 8.507059e+37 }
 0x4c0   :  { %v3686_v49 = vadd.f32 %v3680_v29, %v3668_v7  ;;  %v3557_v23 = vpop.f32.mrf.mxu3  ;;  %v3789_v36 = vrot.slane %v3688_v30, 4  ;;  %v3757_v7 = vmul.f32 %v8408_v0, %v3756_v57  ;;  %v3729_v29 = vadd.f32 %v8400_v32, %v3728_v61 }
 0x4c1   :  { %v3773_v46 = vadd.f32 %v8404_v51, %v3772_v5  ;;  %6640 = vtanh.f32 %v3688_v30  ;;  %v3781_v20 = vor.u32 1.1754944e-38, %v3780_v22  ;;  %v3737_v5 = vor.u32 1.1754944e-38, %v3736_v58 }
 0x4c2   :  { %v3788_v47 = vrot.slane %v3686_v49, 4  ;;  %v6265_v48 = vmul.f32 -1.442695, %v3789_v36  ;;  %v3763_v36 = vand.u32 2147483647, %v8396_v2  ;;  %vm3779_vm15 = vcmp.eq.f32.partialorder %v3778_v40, 8.507059e+37 }
 0x4c3   :  { %v3714_v6 = vadd.f32 %v8402_v52, %v3713_v10  ;;  %v3733_v63 = vsel %vm8442_vm14, %v8400_v32, %v3729_v29  ;;  %v3758_v22 = vadd.f32 %v8408_v0, %v3757_v7  ;;  %v3833_v10 = vrot.slane %v9633_v45, 7 }
 0x4c4   :  { %v6264_v57 = vmul.f32 -1.442695, %v3788_v47  ;;  %6642 = vpow2.f32 %v6265_v48  ;;  %v3777_v48 = vsel %vm8450_vm1, %v8404_v51, %v3773_v46  ;;  %v3766_v47 = vor.u32 1.1754944e-38, %v3765_v42  ;;  %v9634_v42 = vld [vmem:[#allocation50_spill] sm:$0xff] }
 0x4c5   :  { %v3738_v32 = vsel %vm8456_vm13, %v3737_v5, %v3733_v63  ;;  %v3782_v7 = vsel %vm3779_vm15, %v3781_v20, %v3777_v48  ;;  %v3718_v46 = vsel %vm8464_vm11, %v8402_v52, %v3714_v6  ;;  %v3762_v2 = vsel %vm8477_vm3, %v8408_v0, %v3758_v22  ;;  %v9635_v52 = vld [vmem:[#allocation43_spill] sm:$0xff] }
 0x4c6   :  { %6644 = vpow2.f32 %v6264_v57  ;;  %v3722_v57 = vor.u32 1.1754944e-38, %v3721_v35  ;;  %vm3764_vm9 = vcmp.eq.f32.partialorder %v3763_v36, 8.507059e+37  ;;  %v3832_v35 = vrot.slane %v9634_v42, 7 }
 0x4c7   :  { %6646 = vtanh.f32 %v3686_v49  ;;  %v6641_v40 = vpop.eup %6640  ;;  %v3837_v55 = vmul.f32 %v3833_v10, %v3782_v7  ;;  %v3767_v63 = vsel %vm3764_vm9, %v3766_v47, %v3762_v2  ;;  %v8492_v56 = vperm.slane %v9635_v52, 0 }
 0x4c8   :  { %v3839_v61 = vmul.f32 %v6641_v40, %v3738_v32  ;;  %v3723_v20 = vsel %vm3720_vm12, %v3722_v57, %v3718_v46  ;;  %v3836_v6 = vmul.f32 %v3832_v35, %v3767_v63  ;;  %v8497_v45 = vperm.slane %v9635_v52, 1 }
 0x4c9   :  { %9636 = vst [vmem:[#allocation71_spill] sm:$0xff] %v8492_v56 }
 0x4ca   :  { %v6643_v29 = vpop.eup %6642  ;;  %v8494_v0 = vadd.f32 %v3839_v61, %v3837_v55  ;;  %9637 = vst [vmem:[#allocation73_spill] sm:$0xff] %v8497_v45 }
 0x4cb   :  { %v3799_v49 = vadd.f32 1.0, %v6643_v29 }
 0x4cc   :  { %v6645_v51 = vpop.eup %6644 }
 0x4cd   :  { %v3798_v23 = vadd.f32 1.0, %v6645_v51  ;;  %v6647_v5 = vpop.eup %6646  ;;  %6648 = vrcp.f32 %v3799_v49  ;;  %vm3820_vm7 = vweird.f32 %v3799_v49  ;;  %v3824_v29 = vand.u32 2147483647, %v3799_v49 }
 0x4ce   :  { %v3838_v48 = vmul.f32 %v6647_v5, %v3723_v20  ;;  %v3826_v46 = vand.u32 2147483648, %v3799_v49 }
 0x4cf   :  { %6650 = vrcp.f32 %v3798_v23  ;;  %v3811_v42 = vand.u32 2147483648, %v3798_v23  ;;  %vm3805_vm6 = vweird.f32 %v3798_v23  ;;  %v3809_v5 = vand.u32 2147483647, %v3798_v23 }
 0x4d0   :  { %v3568_v30 = vpop.f32.mrf.mxu0  ;;  %v8500_v57 = vadd.f32 %v3838_v48, %v3836_v6  ;;  %6652 = vtanh.f32 %v8494_v0  ;;  %vm3825_vm8 = vcmp.eq.f32.partialorder %v3824_v29, 8.507059e+37 }
 0x4d1   :  { %vm3810_vm13 = vcmp.eq.f32.partialorder %v3809_v5, 8.507059e+37 }
 0x4d2   :  { %v3581_v36 = vpop.f32.mrf.mxu1  ;;  %6654 = vtanh.f32 %v8500_v57 }
 0x4d3   :  { %v3582_v22 = vadd.f32 %v3581_v36, %v3568_v30  ;;  %v6649_v58 = vpop.eup %6648 }
 0x4d4   :  { %v3816_v47 = vmul.f32 %v6649_v58, %v3799_v49  ;;  %vm3821_vm10 = vweird.f32 %v6649_v58 }
 0x4d5   :  { %v3698_v10 = vadd.f32 %v8492_v56, %v3582_v22  ;;  %v6651_v40 = vpop.eup %6650  ;;  %vm8506_vm1 = vmor %vm3820_vm7, %vm3821_vm10  ;;  %v3827_v22 = vor.u32 1.1754944e-38, %v3826_v46 }
 0x4d6   :  { %v3594_v32 = vpop.f32.mrf.mxu2  ;;  %v3801_v7 = vmul.f32 %v6651_v40, %v3798_v23  ;;  %v3817_v35 = vsub.f32 1.0, %v3816_v47  ;;  %vm3806_vm14 = vweird.f32 %v6651_v40  ;;  %v3812_v47 = vor.u32 1.1754944e-38, %v3811_v42 }
 0x4d7   :  { %v6266_v51 = vmul.f32 -1.442695, %v3698_v10  ;;  %v6653_v10 = vpop.eup %6652  ;;  %vm3807_vm2 = vmor %vm3805_vm6, %vm3806_vm14 }
 0x4d8   :  { %v3607_v2 = vpop.f32.mrf.mxu3  ;;  %v3802_v61 = vsub.f32 1.0, %v3801_v7  ;;  %v3570_v20 = vpop.f32.mrf.mxu0  ;;  %v3818_v63 = vmul.f32 %v6649_v58, %v3817_v35 }
 0x4d9   :  { %v3608_v55 = vadd.f32 %v3607_v2, %v3594_v32  ;;  %6656 = vpow2.f32 %v6266_v51  ;;  %v6655_v20 = vpop.eup %6654 }
 0x4da   :  { %v3583_v6 = vpop.f32.mrf.mxu1  ;;  %v3803_v48 = vmul.f32 %v6651_v40, %v3802_v61  ;;  %v3819_v32 = vadd.f32 %v6649_v58, %v3818_v63 }
 0x4db   :  { %v3699_v30 = vadd.f32 %v8497_v45, %v3608_v55 }
 0x4dc   :  { %v3804_v7 = vadd.f32 %v6651_v40, %v3803_v48  ;;  %v3823_v2 = vsel %vm8506_vm1, %v6649_v58, %v3819_v32  ;;  %v9641_v32 = vld [vmem:[#allocation99_spill] sm:$0xff] }
 0x4dd   :  { %v6267_v23 = vmul.f32 -1.442695, %v3699_v30  ;;  %v3828_v55 = vsel %vm3825_vm8, %v3827_v22, %v3823_v2 }
 0x4de   :  { %v3596_v35 = vpop.f32.mrf.mxu2  ;;  %v3808_v49 = vsel %vm3807_vm2, %v6651_v40, %v3804_v7  ;;  %v3845_v46 = vmul.f32 %v6653_v10, %v3828_v55 }
 0x4df   :  { %6658 = vpow2.f32 %v6267_v23  ;;  %v3813_v6 = vsel %vm3810_vm13, %v3812_v47, %v3808_v49  ;;  %v6657_v51 = vpop.eup %6656  ;;  %v9642_v35 = vld [vmem:[#allocation101_spill] sm:$0xff]  ;;  %v9643_v49 = vld [vmem:[#allocation103_spill] sm:$0xff] }
 0x4e0   :  { %v3609_v61 = vpop.f32.mrf.mxu3  ;;  %v3844_v45 = vmul.f32 %v6655_v20, %v3813_v6  ;;  %v3913_v42 = vperm.slane %v3845_v46, 1  ;;  %v8512_v29 = vadd.f32 1.0, %v6657_v51 }
 0x4e1   :  { %v8533_v61 = vperm.slane %v9635_v52, 3 }
 0x4e2   :  { %v3912_v56 = vperm.slane %v3844_v45, 1  ;;  %6660 = vrcp.f32 %v8512_v29 }
 0x4e4   :  { %v3914_v5 = vsel %vm1374_vm4, %v3913_v42, %v3912_v56  ;;  %v9640_v56 = vld [vmem:[#allocation97_spill] sm:$0xff]  ;;  %v8536_v42 = vperm.slane %v9635_v52, 2  ;;  %vm3855_vm4 = vweird.f32 %v8512_v29 }
 0x4e5   :  { %v6659_v63 = vpop.eup %6658  ;;  %v3919_v30 = vpack.c.bf16 %v3914_v5, %v3914_v5  ;;  %v9646_v52 = vld [vmem:[#allocation109_spill] sm:$0xff] }
 0x4e6   :  { %v8515_v48 = vadd.f32 1.0, %v6659_v63 }
 0x4e7   :  { %v3924_v58 = vshll.u32 %v3919_v30, 16  ;;  %v3922_v40 = vshrl.u32 %v3919_v30, 16 }
 0x4e8   :  { %6662 = vrcp.f32 %v8515_v48  ;;  %v8521_v45 = vpop.eup %6660  ;;  %vm3874_vm11 = vweird.f32 %v8515_v48 }
 0x4e9   :  { %v3926_v36 = vrot.slane %v3924_v58, 1  ;;  %v3851_v7 = vmul.f32 %v8521_v45, %v8512_v29  ;;  %v9644_v58 = vld [vmem:[#allocation105_spill] sm:$0xff]  ;;  %vm3856_vm15 = vweird.f32 %v8521_v45 }
 0x4ea   :  { %vm8552_vm12 = vmor %vm3855_vm4, %vm3856_vm15 }
 0x4eb   :  { %v8519_v22 = vor.u32 %v3926_v36, %v3922_v40  ;;  %v3852_v20 = vsub.f32 1.0, %v3851_v7  ;;  %v9645_v40 = vld [vmem:[#allocation107_spill] sm:$0xff] }
 0x4ed   :  { %3945 = vmatmul.bf16.vlgmr.msrb.gmra.mxu0 %v8519_v22  ;;  %3971 = vmatmul.bf16.vlgmr.msra.gmra.mxu2 %v8519_v22 }
 0x4ee   :  { %4041 = vmatpush.bf16.msrb.mxu0 %v9640_v56  ;;  %4067 = vmatpush.bf16.msra.mxu2 %v9641_v32  ;;  %v6663_v23 = vpop.eup %6662 }
 0x4ef   :  { %v3870_v2 = vmul.f32 %v6663_v23, %v8515_v48  ;;  %vm3875_vm3 = vweird.f32 %v6663_v23 }
 0x4f0   :  { %v3620_v10 = vpop.f32.mrf.mxu0  ;;  %vm3876_vm9 = vmor %vm3874_vm11, %vm3875_vm3 }
 0x4f1   :  { %v3871_v30 = vsub.f32 1.0, %v3870_v2 }
 0x4f2   :  { %v3633_v47 = vpop.f32.mrf.mxu1  ;;  %4042 = vmatpush.bf16.msrb.mxu0 %v9642_v35  ;;  %4068 = vmatpush.bf16.msra.mxu2 %v9643_v49  ;;  %v3853_v49 = vmul.f32 %v8521_v45, %v3852_v20  ;;  %v3859_v20 = vand.u32 2147483647, %v8512_v29 }
 0x4f3   :  { %v3634_v51 = vadd.f32 %v3633_v47, %v3620_v10  ;;  %v3872_v32 = vmul.f32 %v6663_v23, %v3871_v30  ;;  %v9647_v10 = vld [vmem:[#allocation111_spill] sm:$0xff]  ;;  %v3861_v47 = vand.u32 2147483648, %v8512_v29  ;;  %v9650_v30 = vld [vmem:[#allocation113_spill] sm:$0xff] }
 0x4f4   :  { %vm3860_vm7 = vcmp.eq.f32.partialorder %v3859_v20, 8.507059e+37 }
 0x4f5   :  { %v3700_v35 = vadd.f32 %v8536_v42, %v3634_v51  ;;  %v3862_v29 = vor.u32 1.1754944e-38, %v3861_v47 }
 0x4f6   :  { %v3646_v55 = vpop.f32.mrf.mxu2  ;;  %4043 = vmatpush.bf16.msrb.mxu0 %v9644_v58  ;;  %4069 = vmatpush.bf16.msra.mxu2 %v9645_v40 }
 0x4f8   :  { %v3659_v6 = vpop.f32.mrf.mxu3  ;;  %v3622_v46 = vpop.f32.mrf.mxu0 }
 0x4f9   :  { %v3660_v63 = vadd.f32 %v3659_v6, %v3646_v55  ;;  %v3854_v55 = vadd.f32 %v8521_v45, %v3853_v49  ;;  %v3880_v46 = vand.u32 2147483648, %v8515_v48  ;;  %v9651_v49 = vld [vmem:[#allocation115_spill] sm:$0xff] }
 0x4fa   :  { %v3635_v5 = vpop.f32.mrf.mxu1  ;;  %4044 = vmatpush.bf16.msrb.mxu0 %v9646_v52  ;;  %4070 = vmatpush.bf16.msra.mxu2 %v9647_v10  ;;  %v9653_v10 = vld [vmem:[#allocation119_spill] sm:$0xff]  ;;  %v9654_v52 = vld [vmem:[#allocation121_spill] sm:$0xff] }
 0x4fb   :  { %v3701_v36 = vadd.f32 %v8533_v61, %v3660_v63  ;;  %v3873_v63 = vadd.f32 %v6663_v23, %v3872_v32  ;;  %v3878_v5 = vand.u32 2147483647, %v8515_v48 }
 0x4fd   :  { %v6268_v7 = vmul.f32 -1.442695, %v3701_v36  ;;  %3997 = vmatmul.bf16.vlgmr.msra.gmra.mxu0 %v8519_v22  ;;  %4023 = vmatmul.bf16.vlgmr.msrb.gmra.mxu2 %v8519_v22  ;;  %v3858_v36 = vsel %vm8552_vm12, %v8521_v45, %v3854_v55  ;;  %vm3879_vm10 = vcmp.eq.f32.partialorder %v3878_v5, 8.507059e+37 }
 0x4fe   :  { %v3648_v2 = vpop.f32.mrf.mxu2  ;;  %4045 = vmatpush.bf16.msrb.mxu0 %v9650_v30  ;;  %4071 = vmatpush.bf16.msra.mxu2 %v9651_v49  ;;  %v3863_v49 = vsel %vm3860_vm7, %v3862_v29, %v3858_v36 }
 0x4ff   :  { %6664 = vpow2.f32 %v6268_v7  ;;  %v3881_v7 = vor.u32 1.1754944e-38, %v3880_v46  ;;  %v3877_v2 = vsel %vm3876_vm9, %v6663_v23, %v3873_v63 }
 0x500   :  { %v3661_v6 = vpop.f32.mrf.mxu3  ;;  %6666 = vtanh.f32 %v3700_v35 }
 0x501   :  { %v9652_v6 = vld [vmem:[#allocation117_spill] sm:$0xff]  ;;  %v3882_v47 = vsel %vm3879_vm10, %v3881_v7, %v3877_v2  ;;  %v9657_v7 = vld [vmem:[#allocation132_spill] sm:$0xff]  ;;  %v9658_v2 = vld [vmem:[#allocation134_spill] sm:$0xff] }
 0x502   :  { %4046 = vmatpush.bf16.msrb.mxu0 %v9652_v6  ;;  %4072 = vmatpush.bf16.msra.mxu2 %v9653_v10  ;;  %v3904_v45 = vmul.f32 0.0, %v3882_v47 }
 0x505   :  { %v6665_v35 = vpop.eup %6664 }
 0x506   :  { %v3888_v32 = vadd.f32 1.0, %v6665_v35  ;;  %v6667_v30 = vpop.eup %6666  ;;  %4047 = vmatpush.bf16.msrb.mxu0 %v9654_v52  ;;  %4073 = vmatpush.bf16.msra.mxu2 %v8192_v44 }
 0x507   :  { %v3905_v48 = vmul.f32 %v6667_v30, %v3863_v49  ;;  %v9655_v30 = vld [vmem:[#allocation128_spill] sm:$0xff]  ;;  %v9656_v49 = vld [vmem:[#allocation130_spill] sm:$0xff] }
 0x508   :  { %6668 = vrcp.f32 %v3888_v32  ;;  %v3900_v51 = vand.u32 2147483648, %v3888_v32  ;;  %v3898_v5 = vand.u32 2147483647, %v3888_v32  ;;  %vm3894_vm14 = vweird.f32 %v3888_v32 }
 0x509   :  { %v8570_v20 = vadd.f32 %v3905_v48, %v3904_v45 }
 0x50a   :  { %4048 = vmatpush.bf16.msrb.mxu0 %v8198_v25  ;;  %4074 = vmatpush.bf16.msra.mxu2 %v8204_v54  ;;  %v3901_v36 = vor.u32 1.1754944e-38, %v3900_v51  ;;  %vm3899_vm2 = vcmp.eq.f32.partialorder %v3898_v5, 8.507059e+37  ;;  %v9662_v51 = vld [vmem:[#allocation142_spill] sm:$0xff] }
 0x50b   :  { %6670 = vtanh.f32 %v8570_v20 }
 0x50d   :  { %4049 = vmatmul.bf16.vlgmr.msrb.gmra.mxu0 %v8519_v22  ;;  %4075 = vmatmul.bf16.vlgmr.msra.gmra.mxu2 %v8519_v22 }
 0x50e   :  { %v6669_v55 = vpop.eup %6668  ;;  %4093 = vmatpush.bf16.msra.mxu0 %v8209_v9  ;;  %4119 = vmatpush.bf16.msrb.mxu2 %v8213_v21 }
 0x50f   :  { %v3890_v23 = vmul.f32 %v6669_v55, %v3888_v32  ;;  %vm3895_vm6 = vweird.f32 %v6669_v55  ;;  %v9661_v32 = vld [vmem:[#allocation140_spill] sm:$0xff] }
 0x510   :  { %vm3896_vm1 = vmor %vm3894_vm14, %vm3895_vm6 }
 0x511   :  { %v3891_v46 = vsub.f32 1.0, %v3890_v23  ;;  %v6671_v47 = vpop.eup %6670 }
 0x512   :  { %4094 = vmatpush.bf16.msra.mxu0 %v9655_v30  ;;  %4120 = vmatpush.bf16.msrb.mxu2 %v9656_v49  ;;  %v9660_v30 = vld [vmem:[#allocation138_spill] sm:$0xff] }
 0x513   :  { %v3892_v63 = vmul.f32 %v6669_v55, %v3891_v46  ;;  %v9659_v46 = vld [vmem:[#allocation136_spill] sm:$0xff] }
 0x515   :  { %v3893_v29 = vadd.f32 %v6669_v55, %v3892_v63 }
 0x516   :  { %4095 = vmatpush.bf16.msra.mxu0 %v9657_v7  ;;  %4121 = vmatpush.bf16.msrb.mxu2 %v9658_v2  ;;  %v9663_v2 = vld [vmem:[#allocation144_spill] sm:$0xff] }
 0x517   :  { %v3897_v35 = vsel %vm3896_vm1, %v6669_v55, %v3893_v29 }
 0x518   :  { %v3902_v48 = vsel %vm3899_vm2, %v3901_v36, %v3897_v35  ;;  %v9664_v36 = vld [vmem:[#allocation98_spill] sm:$0xff]  ;;  %v9665_v35 = vld [vmem:[#allocation100_spill] sm:$0xff] }
 0x519   :  { %v3908_v45 = vmul.f32 %v6671_v47, %v3902_v48  ;;  %v9667_v47 = vld [vmem:[#allocation104_spill] sm:$0xff]  ;;  %v9668_v48 = vld [vmem:[#allocation106_spill] sm:$0xff] }
 0x51a   :  { %4096 = vmatpush.bf16.msra.mxu0 %v9659_v46  ;;  %4122 = vmatpush.bf16.msrb.mxu2 %v9660_v30 }
 0x51b   :  { %3909 = vst [vmem:[#allocation5] sm:$0x3] %v3908_v45  ;;  %v3917_v23 = vrot.slane %v3908_v45, 7  ;;  %v9669_v45 = vld [vmem:[#allocation108_spill] sm:$0xff] }
 0x51d   :  { %v3920_v49 = vpack.c.bf16 %v3917_v23, %v3917_v23  ;;  %v9670_v23 = vld [vmem:[#allocation110_spill] sm:$0xff] }
 0x51e   :  { %4097 = vmatpush.bf16.msra.mxu0 %v9661_v32  ;;  %4123 = vmatpush.bf16.msrb.mxu2 %v9662_v51 }
 0x51f   :  { %v3931_v63 = vshll.u32 %v3920_v49, 16  ;;  %v3929_v55 = vshrl.u32 %v3920_v49, 16  ;;  %v9666_v49 = vld [vmem:[#allocation102_spill] sm:$0xff] }
 0x521   :  { %v3933_v5 = vrot.slane %v3931_v63, 1  ;;  %v9671_v63 = vld [vmem:[#allocation112_spill] sm:$0xff] }
 0x522   :  { %4098 = vmatpush.bf16.msra.mxu0 %v9663_v2  ;;  %4124 = vmatpush.bf16.msrb.mxu2 %v8280_v34 }
 0x523   :  { %v8587_v29 = vor.u32 %v3933_v5, %v3929_v55  ;;  %v9681_v55 = vld [vmem:[#allocation127_spill] sm:$0xff] }
 0x524   :  { %v9696_v5 = vld [vmem:[#allocation87_spill] sm:$0xff] }
 0x525   :  { %3958 = vmatmul.bf16.vlgmr.msra.gmra.mxu1 %v8587_v29  ;;  %3984 = vmatmul.bf16.vlgmr.msra.gmra.mxu3 %v8587_v29 }
 0x526   :  { %4054 = vmatpush.bf16.msra.mxu1 %v9664_v36  ;;  %4080 = vmatpush.bf16.msra.mxu3 %v9665_v35 }
 0x527   :  { %4099 = vmatpush.bf16.msra.mxu0 %v8286_v39  ;;  %4125 = vmatpush.bf16.msrb.mxu2 %v8292_v12 }
 0x52a   :  { %4055 = vmatpush.bf16.msra.mxu1 %v9666_v49  ;;  %4081 = vmatpush.bf16.msra.mxu3 %v9667_v47 }
 0x52b   :  { %4100 = vmatpush.bf16.msra.mxu0 %v8298_v11  ;;  %4126 = vmatpush.bf16.msrb.mxu2 %v8304_v8 }
 0x52e   :  { %4056 = vmatpush.bf16.msra.mxu1 %v9668_v48  ;;  %4082 = vmatpush.bf16.msra.mxu3 %v9669_v45 }
 0x52f   :  { %4402 = vmatpush.bf16.msrb.mxu0 %v7912_v18  ;;  %4428 = vmatpush.bf16.msra.mxu2 %v7916_v60  ;;  %v9672_v18 = vld [vmem:[#allocation114_spill] sm:$0xff]  ;;  %v9673_v60 = vld [vmem:[#allocation116_spill] sm:$0xff] }
 0x530   :  { %4101 = vmatmul.bf16.vlgmr.msra.gmra.mxu0 %v8519_v22  ;;  %4127 = vmatmul.bf16.vlgmr.msrb.gmra.mxu2 %v8519_v22  ;;  %v9678_v22 = vld [vmem:[#allocation124_spill] sm:$0xff] }
 0x532   :  { %4057 = vmatpush.bf16.msra.mxu1 %v9670_v23  ;;  %4083 = vmatpush.bf16.msra.mxu3 %v9671_v63 }
 0x533   :  { %4403 = vmatpush.bf16.msrb.mxu0 %v7923_v13  ;;  %4429 = vmatpush.bf16.msra.mxu2 %v7928_v17  ;;  %v9674_v13 = vld [vmem:[#allocation118_spill] sm:$0xff]  ;;  %v9675_v17 = vld [vmem:[#allocation120_spill] sm:$0xff] }
 0x535   :  { %4010 = vmatmul.bf16.vlgmr.msrb.gmra.mxu1 %v8587_v29  ;;  %4036 = vmatmul.bf16.vlgmr.msrb.gmra.mxu3 %v8587_v29 }
 0x536   :  { %4058 = vmatpush.bf16.msra.mxu1 %v9672_v18  ;;  %4084 = vmatpush.bf16.msra.mxu3 %v9673_v60 }
 0x537   :  { %4404 = vmatpush.bf16.msrb.mxu0 %v7933_v62  ;;  %4430 = vmatpush.bf16.msra.mxu2 %v7939_v31  ;;  %v9676_v62 = vld [vmem:[#allocation122_spill] sm:$0xff]  ;;  %v9677_v31 = vld [vmem:[#allocation123_spill] sm:$0xff] }
 0x53a   :  { %4059 = vmatpush.bf16.msra.mxu1 %v9674_v13  ;;  %4085 = vmatpush.bf16.msra.mxu3 %v9675_v17 }
 0x53b   :  { %4405 = vmatpush.bf16.msrb.mxu0 %v7945_v59  ;;  %4431 = vmatpush.bf16.msra.mxu2 %v7951_v3  ;;  %v9679_v59 = vld [vmem:[#allocation125_spill] sm:$0xff]  ;;  %v9680_v3 = vld [vmem:[#allocation126_spill] sm:$0xff] }
 0x53e   :  { %4060 = vmatpush.bf16.msra.mxu1 %v9676_v62  ;;  %4086 = vmatpush.bf16.msra.mxu3 %v9677_v31 }
 0x53f   :  { %4406 = vmatpush.bf16.msrb.mxu0 %v7957_v19  ;;  %4432 = vmatpush.bf16.msra.mxu2 %v7963_v24  ;;  %v9682_v19 = vld [vmem:[#allocation129_spill] sm:$0xff]  ;;  %v9683_v24 = vld [vmem:[#allocation131_spill] sm:$0xff] }
 0x542   :  { %4061 = vmatpush.bf16.msra.mxu1 %v9678_v22  ;;  %4087 = vmatpush.bf16.msra.mxu3 %v9679_v59  ;;  %v9737_v59 = vld [vmem:[#allocation46_spill] sm:$0xff] }
 0x543   :  { %4407 = vmatpush.bf16.msrb.mxu0 %v7969_v27  ;;  %4433 = vmatpush.bf16.msra.mxu2 %v7975_v43  ;;  %v9684_v27 = vld [vmem:[#allocation133_spill] sm:$0xff]  ;;  %v9685_v43 = vld [vmem:[#allocation135_spill] sm:$0xff] }
 0x545   :  { %4062 = vmatmul.bf16.vlgmr.msra.gmra.mxu1 %v8587_v29  ;;  %4088 = vmatmul.bf16.vlgmr.msra.gmra.mxu3 %v8587_v29 }
 0x546   :  { %4106 = vmatpush.bf16.msrb.mxu1 %v9680_v3  ;;  %4132 = vmatpush.bf16.msrb.mxu3 %v9681_v55  ;;  %v9736_v3 = vld [vmem:[#allocation45_spill] sm:$0xff] }
 0x547   :  { %4408 = vmatpush.bf16.msrb.mxu0 %v7981_v33  ;;  %4434 = vmatpush.bf16.msra.mxu2 %v7987_v15  ;;  %v9686_v33 = vld [vmem:[#allocation137_spill] sm:$0xff]  ;;  %v9687_v15 = vld [vmem:[#allocation139_spill] sm:$0xff] }
 0x54a   :  { %4107 = vmatpush.bf16.msrb.mxu1 %v9682_v19  ;;  %4133 = vmatpush.bf16.msrb.mxu3 %v9683_v24 }
 0x54b   :  { %4409 = vmatpush.bf16.msrb.mxu0 %v7993_v26  ;;  %4435 = vmatpush.bf16.msra.mxu2 %v7999_v41  ;;  %v9688_v26 = vld [vmem:[#allocation141_spill] sm:$0xff]  ;;  %v9689_v41 = vld [vmem:[#allocation143_spill] sm:$0xff] }
 0x54e   :  { %4108 = vmatpush.bf16.msrb.mxu1 %v9684_v27  ;;  %4134 = vmatpush.bf16.msrb.mxu3 %v9685_v43  ;;  %v9735_v27 = vld [vmem:[#allocation44_spill] sm:$0xff] }
 0x54f   :  { %4454 = vmatpush.bf16.msra.mxu0 %v8004_v38  ;;  %4480 = vmatpush.bf16.msrb.mxu2 %v8008_v53  ;;  %v9690_v38 = vld [vmem:[#allocation145_spill] sm:$0xff]  ;;  %v9433_v24 = vrot.slane %v9735_v27, 6 }
 0x550   :  { %v9691_v53 = vld [vmem:[#allocation81_spill] sm:$0xff] }
 0x552   :  { %4109 = vmatpush.bf16.msrb.mxu1 %v9686_v33  ;;  %4135 = vmatpush.bf16.msrb.mxu3 %v9687_v15  ;;  %v9721_v15 = vld [vmem:[#allocation70_spill] sm:$0xff] }
 0x553   :  { %4455 = vmatpush.bf16.msra.mxu0 %v8019_v1  ;;  %4481 = vmatpush.bf16.msrb.mxu2 %v9590_v37  ;;  %v9692_v1 = vld [vmem:[#allocation83_spill] sm:$0xff]  ;;  %v9693_v37 = vld [vmem:[#allocation149_spill] sm:$0xff]  ;;  %v9727_v33 = vld [vmem:[#allocation82_spill] sm:$0xff] }
 0x556   :  { %4110 = vmatpush.bf16.msrb.mxu1 %v9688_v26  ;;  %4136 = vmatpush.bf16.msrb.mxu3 %v9689_v41  ;;  %v9697_v41 = vld [vmem:[#allocation153_spill] sm:$0xff]  ;;  %v9717_v26 = vld [vmem:[#allocation66_spill] sm:$0xff] }
 0x557   :  { %4456 = vmatpush.bf16.msra.mxu0 %v9592_v16  ;;  %4482 = vmatpush.bf16.msrb.mxu2 %v9594_v50  ;;  %v9694_v16 = vld [vmem:[#allocation151_spill] sm:$0xff]  ;;  %v9695_v50 = vld [vmem:[#allocation85_spill] sm:$0xff] }
 0x55a   :  { %4111 = vmatpush.bf16.msrb.mxu1 %v9690_v38  ;;  %4137 = vmatpush.bf16.msrb.mxu3 %v8283_v28  ;;  %v9700_v38 = vld [vmem:[#allocation53_spill] sm:$0xff] }
 0x55b   :  { %4457 = vmatpush.bf16.msra.mxu0 %v9596_v14  ;;  %4483 = vmatpush.bf16.msrb.mxu2 %v9598_v4  ;;  %v9698_v14 = vld [vmem:[#allocation155_spill] sm:$0xff]  ;;  %v9699_v4 = vld [vmem:[#allocation52_spill] sm:$0xff]  ;;  %v9701_v28 = vld [vmem:[#allocation89_spill] sm:$0xff] }
 0x55e   :  { %4112 = vmatpush.bf16.msrb.mxu1 %v9693_v37  ;;  %4138 = vmatpush.bf16.msrb.mxu3 %v9694_v16  ;;  %v9711_v16 = vld [vmem:[#allocation60_spill] sm:$0xff]  ;;  %v9713_v37 = vld [vmem:[#allocation62_spill] sm:$0xff] }
 0x55f   :  { %4458 = vmatpush.bf16.msra.mxu0 %v9691_v53  ;;  %4484 = vmatpush.bf16.msrb.mxu2 %v9692_v1  ;;  %v9702_v53 = vld [vmem:[#allocation91_spill] sm:$0xff]  ;;  %v9703_v1 = vld [vmem:[#allocation54_spill] sm:$0xff] }
 0x562   :  { %4113 = vmatpush.bf16.msrb.mxu1 %v9697_v41  ;;  %4139 = vmatpush.bf16.msrb.mxu3 %v9698_v14  ;;  %v9706_v41 = vld [vmem:[#allocation95_spill] sm:$0xff]  ;;  %v9707_v14 = vld [vmem:[#allocation56_spill] sm:$0xff] }
 0x563   :  { %4459 = vmatpush.bf16.msra.mxu0 %v9695_v50  ;;  %4485 = vmatpush.bf16.msrb.mxu2 %v9696_v5  ;;  %v9704_v50 = vld [vmem:[#allocation55_spill] sm:$0xff]  ;;  %v9705_v5 = vld [vmem:[#allocation93_spill] sm:$0xff] }
 0x565   :  { %4114 = vmatmul.bf16.vlgmr.msrb.gmra.mxu1 %v8587_v29  ;;  %4140 = vmatmul.bf16.vlgmr.msrb.gmra.mxu3 %v8587_v29  ;;  %v9712_v29 = vld [vmem:[#allocation61_spill] sm:$0xff] }
 0x566   :  { %4415 = vmatpush.bf16.msra.mxu1 %v9699_v4  ;;  %4441 = vmatpush.bf16.msra.mxu3 %v9700_v38  ;;  %v9708_v4 = vld [vmem:[#allocation57_spill] sm:$0xff]  ;;  %v9709_v38 = vld [vmem:[#allocation58_spill] sm:$0xff] }
 0x567   :  { %4460 = vmatpush.bf16.msra.mxu0 %v9701_v28  ;;  %4486 = vmatpush.bf16.msrb.mxu2 %v9702_v53  ;;  %v9710_v28 = vld [vmem:[#allocation59_spill] sm:$0xff] }
 0x56a   :  { %4416 = vmatpush.bf16.msra.mxu1 %v9703_v1  ;;  %4442 = vmatpush.bf16.msra.mxu3 %v9704_v50  ;;  %v3946_v53 = vpop.f32.mrf.mxu0  ;;  %v9714_v50 = vld [vmem:[#allocation63_spill] sm:$0xff] }
 0x56b   :  { %4461 = vmatpush.bf16.msra.mxu0 %v9705_v5  ;;  %4487 = vmatpush.bf16.msrb.mxu2 %v9706_v41  ;;  %v9715_v41 = vld [vmem:[#allocation64_spill] sm:$0xff] }
 0x56e   :  { %4417 = vmatpush.bf16.msra.mxu1 %v9707_v14  ;;  %4443 = vmatpush.bf16.msra.mxu3 %v9708_v4  ;;  %v9716_v14 = vld [vmem:[#allocation65_spill] sm:$0xff] }
 0x570   :  { %v3972_v1 = vpop.f32.mrf.mxu2 }
 0x572   :  { %4418 = vmatpush.bf16.msra.mxu1 %v9709_v38  ;;  %4444 = vmatpush.bf16.msra.mxu3 %v9710_v28  ;;  %v3948_v5 = vpop.f32.mrf.mxu0  ;;  %v9718_v38 = vld [vmem:[#allocation67_spill] sm:$0xff]  ;;  %v9719_v28 = vld [vmem:[#allocation68_spill] sm:$0xff] }
 0x573   :  { %v9723_v5 = vld [vmem:[#allocation74_spill] sm:$0xff] }
 0x576   :  { %4419 = vmatpush.bf16.msra.mxu1 %v9711_v16  ;;  %4445 = vmatpush.bf16.msra.mxu3 %v9712_v29  ;;  %v9720_v16 = vld [vmem:[#allocation69_spill] sm:$0xff] }
 0x578   :  { %v3974_v4 = vpop.f32.mrf.mxu2 }
 0x579   :  { %v9725_v4 = vld [vmem:[#allocation78_spill] sm:$0xff] }
 0x57a   :  { %4420 = vmatpush.bf16.msra.mxu1 %v9713_v37  ;;  %4446 = vmatpush.bf16.msra.mxu3 %v9714_v50  ;;  %v3998_v29 = vpop.f32.mrf.mxu0  ;;  %v9722_v37 = vld [vmem:[#allocation72_spill] sm:$0xff] }
 0x57e   :  { %4421 = vmatpush.bf16.msra.mxu1 %v9715_v41  ;;  %4447 = vmatpush.bf16.msra.mxu3 %v9716_v14  ;;  %v9724_v41 = vld [vmem:[#allocation76_spill] sm:$0xff] }
 0x580   :  { %v4024_v50 = vpop.f32.mrf.mxu2 }
 0x582   :  { %4422 = vmatpush.bf16.msra.mxu1 %v9717_v26  ;;  %4448 = vmatpush.bf16.msra.mxu3 %v9718_v38  ;;  %v4000_v14 = vpop.f32.mrf.mxu0  ;;  %v9726_v26 = vld [vmem:[#allocation80_spill] sm:$0xff] }
 0x586   :  { %4467 = vmatpush.bf16.msrb.mxu1 %v9719_v28  ;;  %4493 = vmatpush.bf16.msrb.mxu3 %v9720_v16  ;;  %v9728_v28 = vld [vmem:[#allocation84_spill] sm:$0xff] }
 0x588   :  { %v4026_v38 = vpop.f32.mrf.mxu2 }
 0x58a   :  { %4468 = vmatpush.bf16.msrb.mxu1 %v9721_v15  ;;  %4494 = vmatpush.bf16.msrb.mxu3 %v9722_v37  ;;  %v8695_v16 = vpop.f32.mrf.mxu0  ;;  %v9729_v15 = vld [vmem:[#allocation86_spill] sm:$0xff]  ;;  %v9730_v37 = vld [vmem:[#allocation88_spill] sm:$0xff] }
 0x58e   :  { %4469 = vmatpush.bf16.msrb.mxu1 %v9723_v5  ;;  %4495 = vmatpush.bf16.msrb.mxu3 %v9724_v41  ;;  %v9731_v5 = vld [vmem:[#allocation90_spill] sm:$0xff]  ;;  %v9732_v41 = vld [vmem:[#allocation92_spill] sm:$0xff] }
 0x590   :  { %v8699_v43 = vpop.f32.mrf.mxu2 }
 0x592   :  { %4470 = vmatpush.bf16.msrb.mxu1 %v9725_v4  ;;  %4496 = vmatpush.bf16.msrb.mxu3 %v9726_v26  ;;  %v4052_v14 = vpop.f32.mrf.mxu0  ;;  %v9733_v4 = vld [vmem:[#allocation94_spill] sm:$0xff]  ;;  %v9734_v26 = vld [vmem:[#allocation96_spill] sm:$0xff] }
 0x596   :  { %4471 = vmatpush.bf16.msrb.mxu1 %v9727_v33  ;;  %4497 = vmatpush.bf16.msrb.mxu3 %v9728_v28 }
 0x598   :  { %v4078_v33 = vpop.f32.mrf.mxu2 }
 0x59a   :  { %4472 = vmatpush.bf16.msrb.mxu1 %v9729_v15  ;;  %4498 = vmatpush.bf16.msrb.mxu3 %v9730_v37 }
 0x59e   :  { %4473 = vmatpush.bf16.msrb.mxu1 %v9731_v5  ;;  %4499 = vmatpush.bf16.msrb.mxu3 %v9732_v41  ;;  %v4149_v5 = vadd.f32 %v9433_v24, %v9736_v3  ;;  %v9738_v41 = vrot.slane %v9735_v27, 7 }
 0x5a0   :  { %v4151_v14 = vadd.f32 %v9738_v41, %v9737_v59 }
 0x5a2   :  { %4474 = vmatpush.bf16.msrb.mxu1 %v9733_v4  ;;  %4500 = vmatpush.bf16.msrb.mxu3 %v9734_v26  ;;  %v3959_v38 = vpop.f32.mrf.mxu1 }
 0x5a3   :  { %v3960_v55 = vadd.f32 %v3959_v38, %v3946_v53 }
 0x5a8   :  { %v3985_v28 = vpop.f32.mrf.mxu3 }
 0x5a9   :  { %v3986_v19 = vadd.f32 %v3985_v28, %v3972_v1 }
 0x5aa   :  { %v3961_v15 = vpop.f32.mrf.mxu1 }
 0x5ab   :  { %v4157_v37 = vrot.slane %v3986_v19, 4 }
 0x5ad   :  { %v8712_v4 = vpop.f32.mrf.mxu0  ;;  %v4159_v26 = vsel %vm9443_vm0, %v3960_v55, %v4157_v37  ;;  %v9739_v37 = vld [vmem:[#allocation47_spill] sm:$0xff] }
 0x5ae   :  { %v4161_v33 = vrot.slane %v4159_v26, 6  ;;  %v4163_v22 = vrot.slane %v4159_v26, 7  ;;  %v9435_v26 = vrot.slane %v9739_v37, 6 }
 0x5b0   :  { %v4169_v8 = vadd.f32 %v4161_v33, %v4149_v5  ;;  %v4171_v11 = vadd.f32 %v4163_v22, %v4151_v14  ;;  %v3987_v1 = vpop.f32.mrf.mxu3 }
 0x5b2   :  { %v6269_v28 = vmul.f32 -1.442695, %v4169_v8  ;;  %v6270_v53 = vmul.f32 -1.442695, %v4171_v11  ;;  %v4217_v19 = vrot.slane %v4169_v8, 4  ;;  %v4218_v38 = vrot.slane %v4171_v11, 4  ;;  %v4011_v15 = vpop.f32.mrf.mxu1 }
 0x5b3   :  { %v8715_v31 = vpop.f32.mrf.mxu2  ;;  %v4012_v11 = vadd.f32 %v4011_v15, %v3998_v29 }
 0x5b4   :  { %6672 = vpow2.f32 %v6269_v28  ;;  %v6271_v24 = vmul.f32 -1.442695, %v4217_v19  ;;  %v6272_v3 = vmul.f32 -1.442695, %v4218_v38  ;;  %v9740_v19 = vld [vmem:[#allocation48_spill] sm:$0xff]  ;;  %v9742_v38 = vrot.slane %v9739_v37, 7 }
 0x5b5   :  { %v4104_v41 = vpop.f32.mrf.mxu0  ;;  %6674 = vpow2.f32 %v6270_v53 }
 0x5b6   :  { %6676 = vpow2.f32 %v6271_v24  ;;  %v4150_v24 = vadd.f32 %v9435_v26, %v9740_v19 }
 0x5b7   :  { %6678 = vpow2.f32 %v6272_v3 }
 0x5b8   :  { %v4037_v55 = vpop.f32.mrf.mxu3 }
 0x5b9   :  { %v4038_v5 = vadd.f32 %v4037_v55, %v4024_v50  ;;  %v9741_v50 = vld [vmem:[#allocation49_spill] sm:$0xff] }
 0x5ba   :  { %v6673_v22 = vpop.eup %6672  ;;  %v4013_v14 = vpop.f32.mrf.mxu1  ;;  %v4152_v41 = vadd.f32 %v9742_v38, %v9741_v50 }
 0x5bb   :  { %v4130_v33 = vpop.f32.mrf.mxu2  ;;  %v6675_v1 = vpop.eup %6674  ;;  %v8718_v8 = vadd.f32 1.0, %v6673_v22  ;;  %v4158_v59 = vrot.slane %v4038_v5, 4 }
 0x5bc   :  { %v6677_v27 = vpop.eup %6676  ;;  %v8720_v28 = vadd.f32 1.0, %v6675_v1 }
 0x5bd   :  { %v6679_v3 = vpop.eup %6678  ;;  %6680 = vrcp.f32 %v8718_v8  ;;  %v8726_v53 = vadd.f32 1.0, %v6677_v27  ;;  %v4160_v55 = vsel %vm9443_vm0, %v4012_v11, %v4158_v59  ;;  %v4194_v33 = vand.u32 2147483647, %v8718_v8 }
 0x5be   :  { %6682 = vrcp.f32 %v8720_v28  ;;  %v8733_v29 = vadd.f32 1.0, %v6679_v3  ;;  %v4162_v15 = vrot.slane %v4160_v55, 6  ;;  %v4164_v5 = vrot.slane %v4160_v55, 7 }
 0x5bf   :  { %6684 = vrcp.f32 %v8726_v53  ;;  %v4240_v22 = vand.u32 2147483648, %v8726_v53  ;;  %v4196_v3 = vand.u32 2147483648, %v8718_v8  ;;  %vm4190_vm8 = vweird.f32 %v8718_v8 }
 0x5c0   :  { %6686 = vrcp.f32 %v8733_v29  ;;  %v4255_v27 = vand.u32 2147483648, %v8733_v29  ;;  %v4170_v14 = vadd.f32 %v4162_v15, %v4150_v24  ;;  %v4039_v1 = vpop.f32.mrf.mxu3  ;;  %v4172_v55 = vadd.f32 %v4164_v5, %v4152_v41 }
 0x5c1   :  { %v8743_v38 = vor.u32 1.1754944e-38, %v4240_v22  ;;  %v4209_v26 = vand.u32 2147483647, %v8720_v28  ;;  %v4211_v50 = vand.u32 2147483648, %v8720_v28  ;;  %vm4205_vm13 = vweird.f32 %v8720_v28 }
 0x5c2   :  { %v4063_v19 = vpop.f32.mrf.mxu1  ;;  %v8748_v15 = vor.u32 1.1754944e-38, %v4255_v27  ;;  %v4238_v1 = vand.u32 2147483647, %v8726_v53  ;;  %v4253_v11 = vand.u32 2147483647, %v8733_v29  ;;  %vm4234_vm4 = vweird.f32 %v8726_v53 }
 0x5c3   :  { %v6681_v24 = vpop.eup %6680  ;;  %vm8755_vm11 = vcmp.eq.f32.partialorder %v4194_v33, 8.507059e+37  ;;  %v4197_v5 = vor.u32 1.1754944e-38, %v4196_v3  ;;  %6688 = vtanh.f32 %v4170_v14  ;;  %vm4249_vm3 = vweird.f32 %v8733_v29 }
 0x5c4   :  { %v6683_v59 = vpop.eup %6682  ;;  %v4186_v22 = vmul.f32 %v6681_v24, %v8718_v8  ;;  %vm4191_vm15 = vweird.f32 %v6681_v24  ;;  %vm8761_vm9 = vcmp.eq.f32.partialorder %v4209_v26, 8.507059e+37  ;;  %v4212_v12 = vor.u32 1.1754944e-38, %v4211_v50 }
 0x5c5   :  { %v6685_v27 = vpop.eup %6684  ;;  %v4201_v37 = vmul.f32 %v6683_v59, %v8720_v28  ;;  %vm4206_vm12 = vweird.f32 %v6683_v59  ;;  %vm8766_vm10 = vcmp.eq.f32.partialorder %v4238_v1, 8.507059e+37  ;;  %6690 = vtanh.f32 %v4172_v55  ;;  %vm4192_vm1 = vmor %vm4190_vm8, %vm4191_vm15 }
 0x5c6   :  { %v6687_v39 = vpop.eup %6686  ;;  %v4187_v17 = vsub.f32 1.0, %v4186_v22  ;;  %v4230_v33 = vmul.f32 %v6685_v27, %v8726_v53  ;;  %vm4235_vm7 = vweird.f32 %v6685_v27  ;;  %vm8771_vm14 = vcmp.eq.f32.partialorder %v4253_v11, 8.507059e+37  ;;  %v9751_v11 = vld [vmem:[#allocation71_spill] sm:$0xff]  ;;  %vm4207_vm2 = vmor %vm4205_vm13, %vm4206_vm12 }
 0x5c7   :  { %v4202_v3 = vsub.f32 1.0, %v4201_v37  ;;  %v4245_v34 = vmul.f32 %v6687_v39, %v8733_v29  ;;  %vm4250_vm6 = vweird.f32 %v6687_v39  ;;  %v4263_v2 = vrot.slane %v4170_v14, 4  ;;  %vm4236_vm0 = vmor %vm4234_vm4, %vm4235_vm7 }
 0x5c8   :  { %v4231_v50 = vsub.f32 1.0, %v4230_v33  ;;  %v4188_v60 = vmul.f32 %v6681_v24, %v4187_v17  ;;  %v4264_v22 = vrot.slane %v4172_v55, 4  ;;  %v4064_v18 = vadd.f32 %v4063_v19, %v8695_v16  ;;  %v4089_v51 = vpop.f32.mrf.mxu3  ;;  %v9752_v16 = vld [vmem:[#allocation73_spill] sm:$0xff]  ;;  %vm4251_vm8 = vmor %vm4249_vm3, %vm4250_vm6 }
 0x5c9   :  { %v4246_v1 = vsub.f32 1.0, %v4245_v34  ;;  %v4203_v32 = vmul.f32 %v6683_v59, %v4202_v3  ;;  %v6273_v63 = vmul.f32 -1.442695, %v4263_v2  ;;  %v4090_v23 = vadd.f32 %v4089_v51, %v8699_v43  ;;  %v6689_v37 = vpop.eup %6688 }
 0x5ca   :  { %v4232_v30 = vmul.f32 %v6685_v27, %v4231_v50  ;;  %v4189_v46 = vadd.f32 %v6681_v24, %v4188_v60  ;;  %v6274_v45 = vmul.f32 -1.442695, %v4264_v22  ;;  %v4173_v48 = vadd.f32 %v4064_v18, %v9751_v11  ;;  %v4065_v7 = vpop.f32.mrf.mxu1 }
 0x5cb   :  { %v4247_v47 = vmul.f32 %v6687_v39, %v4246_v1  ;;  %v4204_v17 = vadd.f32 %v6683_v59, %v4203_v32  ;;  %6692 = vpow2.f32 %v6273_v63  ;;  %v4174_v34 = vadd.f32 %v4090_v23, %v9752_v16  ;;  %v6691_v19 = vpop.eup %6690 }
 0x5cc   :  { %v4193_v2 = vsel %vm4192_vm1, %v6681_v24, %v4189_v46  ;;  %v4233_v51 = vadd.f32 %v6685_v27, %v4232_v30  ;;  %6694 = vpow2.f32 %v6274_v45  ;;  %v6275_v60 = vmul.f32 -1.442695, %v4173_v48 }
 0x5cd   :  { %v4198_v7 = vsel %vm8755_vm11, %v4197_v5, %v4193_v2  ;;  %v4208_v32 = vsel %vm4207_vm2, %v6683_v59, %v4204_v17  ;;  %v4248_v63 = vadd.f32 %v6687_v39, %v4247_v47  ;;  %v6276_v18 = vmul.f32 -1.442695, %v4174_v34 }
 0x5ce   :  { %v4213_v46 = vsel %vm8761_vm9, %v4212_v12, %v4208_v32  ;;  %v4237_v30 = vsel %vm4236_vm0, %v6685_v27, %v4233_v51  ;;  %v4313_v45 = vmul.f32 %v6689_v37, %v4198_v7  ;;  %6696 = vpow2.f32 %v6275_v60 }
 0x5cf   :  { %v4242_v48 = vsel %vm8766_vm10, %v8743_v38, %v4237_v30  ;;  %v4252_v23 = vsel %vm4251_vm8, %v6687_v39, %v4248_v63  ;;  %v4314_v43 = vmul.f32 %v6691_v19, %v4213_v46  ;;  %6698 = vpow2.f32 %v6276_v18 }
 0x5d0   :  { %v4257_v47 = vsel %vm8771_vm14, %v8748_v15, %v4252_v23  ;;  %v9753_v8 = vrot.slane %v8500_v57, 7  ;;  %v4091_v53 = vpop.f32.mrf.mxu3  ;;  %v9754_v12 = vrot.slane %v8494_v0, 7 }
 0x5d1   :  { %v6693_v62 = vpop.eup %6692 }
 0x5d2   :  { %v4311_v28 = vmul.f32 %v9753_v8, %v4242_v48  ;;  %v4312_v29 = vmul.f32 %v9754_v12, %v4257_v47  ;;  %v6695_v14 = vpop.eup %6694  ;;  %v4273_v59 = vadd.f32 1.0, %v6693_v62 }
 0x5d3   :  { %v4274_v13 = vadd.f32 1.0, %v6695_v14 }
 0x5d4   :  { %v8805_v55 = vadd.f32 %v4313_v45, %v4311_v28  ;;  %v8807_v39 = vadd.f32 %v4314_v43, %v4312_v29  ;;  %v6697_v38 = vpop.eup %6696  ;;  %6700 = vrcp.f32 %v4273_v59  ;;  %v4284_v5 = vand.u32 2147483647, %v4273_v59 }
 0x5d5   :  { %v6699_v24 = vpop.eup %6698  ;;  %6702 = vrcp.f32 %v4274_v13  ;;  %v8809_v15 = vadd.f32 1.0, %v6697_v38  ;;  %v4286_v33 = vand.u32 2147483648, %v4273_v59  ;;  %v4299_v26 = vand.u32 2147483647, %v4274_v13 }
 0x5d6   :  { %v8811_v57 = vadd.f32 1.0, %v6699_v24  ;;  %vm4280_vm0 = vweird.f32 %v4273_v59  ;;  %v4301_v22 = vand.u32 2147483648, %v4274_v13  ;;  %vm8815_vm13 = vcmp.eq.f32.partialorder %v4284_v5, 8.507059e+37 }
 0x5d7   :  { %6704 = vrcp.f32 %v8809_v15  ;;  %vm4295_vm4 = vweird.f32 %v4274_v13  ;;  %v4287_v34 = vor.u32 1.1754944e-38, %v4286_v33  ;;  %vm8821_vm3 = vcmp.eq.f32.partialorder %v4299_v26, 8.507059e+37 }
 0x5d8   :  { %6706 = vrcp.f32 %v8811_v57  ;;  %v4302_v18 = vor.u32 1.1754944e-38, %v4301_v22  ;;  %v4355_v30 = vand.u32 2147483648, %v8811_v57  ;;  %v4334_v43 = vand.u32 2147483647, %v8809_v15 }
 0x5d9   :  { %6708 = vtanh.f32 %v8805_v55  ;;  %v4336_v8 = vand.u32 2147483648, %v8809_v15  ;;  %v4353_v28 = vand.u32 2147483647, %v8811_v57  ;;  %vm4349_vm6 = vweird.f32 %v8811_v57 }
 0x5da   :  { %v6701_v41 = vpop.eup %6700  ;;  %6710 = vtanh.f32 %v8807_v39  ;;  %vm4330_vm14 = vweird.f32 %v8809_v15  ;;  %vm4335_vm8 = vcmp.eq.f32.partialorder %v4334_v43, 8.507059e+37 }
 0x5db   :  { %v6703_v0 = vpop.eup %6702  ;;  %v4276_v27 = vmul.f32 %v6701_v41, %v4273_v59  ;;  %vm4281_vm15 = vweird.f32 %v6701_v41 }
 0x5dc   :  { %v4291_v3 = vmul.f32 %v6703_v0, %v4274_v13  ;;  %vm4296_vm11 = vweird.f32 %v6703_v0  ;;  %vm4282_vm12 = vmor %vm4280_vm0, %vm4281_vm15  ;;  %vm4354_vm0 = vcmp.eq.f32.partialorder %v4353_v28, 8.507059e+37 }
 0x5dd   :  { %v4277_v50 = vsub.f32 1.0, %v4276_v27  ;;  %v6705_v2 = vpop.eup %6704  ;;  %vm4297_vm9 = vmor %vm4295_vm4, %vm4296_vm11  ;;  %vm9813_vm11 = vcmask 1043456  }
 0x5de   :  { %v4292_v37 = vsub.f32 1.0, %v4291_v3  ;;  %v6707_v32 = vpop.eup %6706  ;;  %v4326_v46 = vmul.f32 %v6705_v2, %v8809_v15  ;;  %vm4331_vm7 = vweird.f32 %v6705_v2 }
 0x5df   :  { %v4278_v17 = vmul.f32 %v6701_v41, %v4277_v50  ;;  %v4345_v48 = vmul.f32 %v6707_v32, %v8811_v57  ;;  %v6709_v53 = vpop.eup %6708  ;;  %vm4350_vm10 = vweird.f32 %v6707_v32  ;;  %vm4332_vm1 = vmor %vm4330_vm14, %vm4331_vm7  ;;  %v4337_v50 = vor.u32 1.1754944e-38, %v4336_v8 }
 0x5e0   :  { %v4293_v51 = vmul.f32 %v6703_v0, %v4292_v37  ;;  %v6711_v14 = vpop.eup %6710  ;;  %vm4351_vm2 = vmor %vm4349_vm6, %vm4350_vm10  ;;  %v4356_v37 = vor.u32 1.1754944e-38, %v4355_v30 }
 0x5e1   :  { %v4279_v63 = vadd.f32 %v6701_v41, %v4278_v17  ;;  %v4346_v29 = vsub.f32 1.0, %v4345_v48  ;;  %v9760_v48 = vld [vmem:[#allocation101_spill] sm:$0xff] }
 0x5e2   :  { %v4115_v19 = vpop.f32.mrf.mxu1  ;;  %v4294_v45 = vadd.f32 %v6703_v0, %v4293_v51 }
 0x5e3   :  { %v4116_v7 = vadd.f32 %v4115_v19, %v8712_v4  ;;  %v4283_v47 = vsel %vm4282_vm12, %v6701_v41, %v4279_v63  ;;  %v4327_v4 = vsub.f32 1.0, %v4326_v46  ;;  %v4347_v5 = vmul.f32 %v6707_v32, %v4346_v29  ;;  %v9765_v29 = vld [vmem:[#allocation115_spill] sm:$0xff] }
 0x5e4   :  { %v4288_v62 = vsel %vm8815_vm13, %v4287_v34, %v4283_v47  ;;  %v4298_v12 = vsel %vm4297_vm9, %v6703_v0, %v4294_v45  ;;  %v9762_v47 = vld [vmem:[#allocation109_spill] sm:$0xff] }
 0x5e5   :  { %v4175_v23 = vadd.f32 %v4116_v7, %v8536_v42  ;;  %v4303_v59 = vsel %vm8821_vm3, %v4302_v18, %v4298_v12  ;;  %v4319_v38 = vmul.f32 %v6709_v53, %v4288_v62  ;;  %v4328_v24 = vmul.f32 %v6705_v2, %v4327_v4  ;;  %v9763_v4 = vld [vmem:[#allocation111_spill] sm:$0xff]  ;;  %v9764_v12 = vld [vmem:[#allocation113_spill] sm:$0xff]  ;;  %vm9815_vm3 = vmmov %vm9813_vm11 }
 0x5e6   :  { %v4320_v41 = vmul.f32 %v6711_v14, %v4303_v59  ;;  %v4348_v22 = vadd.f32 %v6707_v32, %v4347_v5 }
 0x5e7   :  { %6712 = vtanh.f32 %v4175_v23  ;;  %v4387_v33 = vperm.slane %v4319_v38, 2  ;;  %v4329_v3 = vadd.f32 %v6705_v2, %v4328_v24  ;;  %v9761_v23 = vld [vmem:[#allocation103_spill] sm:$0xff] }
 0x5e8   :  { %v4141_v13 = vpop.f32.mrf.mxu3  ;;  %v4388_v26 = vperm.slane %v4320_v41, 2  ;;  %v4352_v57 = vsel %vm4351_vm2, %v6707_v32, %v4348_v22  ;;  %v9770_v22 = vld [vmem:[#allocation134_spill] sm:$0xff] }
 0x5e9   :  { %v4142_v27 = vadd.f32 %v4141_v13, %v8715_v31  ;;  %v4333_v17 = vsel %vm4332_vm1, %v6705_v2, %v4329_v3  ;;  %v4357_v15 = vsel %vm4354_vm0, %v4356_v37, %v4352_v57  ;;  %v9759_v2 = vld [vmem:[#allocation99_spill] sm:$0xff]  ;;  %v9766_v3 = vld [vmem:[#allocation128_spill] sm:$0xff] }
 0x5ea   :  { %v4117_v0 = vpop.f32.mrf.mxu1  ;;  %v4389_v31 = vsel %vm1376_vm5, %v4388_v26, %v4387_v33  ;;  %v4338_v19 = vsel %vm4335_vm8, %v4337_v50, %v4333_v17  ;;  %v4379_v63 = vmul.f32 %v4357_v15, %v8570_v20  ;;  %v9768_v26 = vld [vmem:[#allocation104_spill] sm:$0xff] }
 0x5eb   :  { %v4176_v1 = vadd.f32 %v4142_v27, %v8533_v61  ;;  %v4394_v60 = vpack.c.bf16 %v4389_v31, %v4389_v31  ;;  %v9767_v0 = vld [vmem:[#allocation130_spill] sm:$0xff]  ;;  %v9769_v50 = vld [vmem:[#allocation132_spill] sm:$0xff] }
 0x5ec   :  { %v9772_v37 = vld [vmem:[#allocation108_spill] sm:$0xff]  ;;  %v9775_v31 = vld [vmem:[#allocation110_spill] sm:$0xff] }
 0x5ed   :  { %v6713_v34 = vpop.eup %6712  ;;  %v6277_v51 = vmul.f32 -1.442695, %v4176_v1  ;;  %v8845_v18 = vrot.slane %v4394_v60, 1  ;;  %v9771_v1 = vld [vmem:[#allocation106_spill] sm:$0xff]  ;;  %v9773_v17 = vld [vmem:[#allocation136_spill] sm:$0xff] }
 0x5ee   :  { %v4380_v7 = vmul.f32 %v6713_v34, %v4338_v19  ;;  %v9774_v34 = vld [vmem:[#allocation138_spill] sm:$0xff]  ;;  %v9776_v19 = vld [vmem:[#allocation112_spill] sm:$0xff] }
 0x5ef   :  { %6714 = vpow2.f32 %v6277_v51  ;;  %4410 = vmatmul.bf16.vlgmr.msrb.gmra.mxu0 %v8845_v18  ;;  %4436 = vmatmul.bf16.vlgmr.msra.gmra.mxu2 %v8845_v18  ;;  %v9777_v57 = vld [vmem:[#allocation140_spill] sm:$0xff]  ;;  %v9778_v51 = vld [vmem:[#allocation142_spill] sm:$0xff] }
 0x5f0   :  { %v4143_v46 = vpop.f32.mrf.mxu3  ;;  %v8847_v45 = vadd.f32 %v4380_v7, %v4379_v63  ;;  %4506 = vmatpush.bf16.msrb.mxu0 %v9640_v56  ;;  %4532 = vmatpush.bf16.msra.mxu2 %v9759_v2  ;;  %v9779_v60 = vld [vmem:[#allocation114_spill] sm:$0xff]  ;;  %v9780_v15 = vld [vmem:[#allocation116_spill] sm:$0xff] }
 0x5f1   :  { %v9781_v7 = vld [vmem:[#allocation144_spill] sm:$0xff]  ;;  %v9782_v63 = vld [vmem:[#allocation146_spill] sm:$0xff] }
 0x5f2   :  { %v9783_v46 = vld [vmem:[#allocation118_spill] sm:$0xff] }
 0x5f4   :  { %4507 = vmatpush.bf16.msrb.mxu0 %v9760_v48  ;;  %4533 = vmatpush.bf16.msra.mxu2 %v9761_v23 }
 0x5f5   :  { %v6715_v32 = vpop.eup %6714 }
 0x5f6   :  { %v4363_v30 = vadd.f32 1.0, %v6715_v32  ;;  %v9784_v32 = vld [vmem:[#allocation120_spill] sm:$0xff] }
 0x5f8   :  { %6716 = vrcp.f32 %v4363_v30  ;;  %4508 = vmatpush.bf16.msrb.mxu0 %v9644_v58  ;;  %4534 = vmatpush.bf16.msra.mxu2 %v9645_v40  ;;  %v4375_v28 = vand.u32 2147483648, %v4363_v30  ;;  %v4373_v62 = vand.u32 2147483647, %v4363_v30  ;;  %vm4369_vm13 = vweird.f32 %v4363_v30 }
 0x5f9   :  { %6718 = vtanh.f32 %v8847_v45 }
 0x5fa   :  { %v4376_v59 = vor.u32 1.1754944e-38, %v4375_v28  ;;  %vm4374_vm15 = vcmp.eq.f32.partialorder %v4373_v62, 8.507059e+37  ;;  %v9789_v28 = vld [vmem:[#allocation152_spill] sm:$0xff] }
 0x5fb   :  { %v9791_v62 = vld [vmem:[#allocation124_spill] sm:$0xff] }
 0x5fc   :  { %4509 = vmatpush.bf16.msrb.mxu0 %v9762_v47  ;;  %4535 = vmatpush.bf16.msra.mxu2 %v9763_v4 }
 0x5fe   :  { %v6717_v20 = vpop.eup %6716 }
 0x5ff   :  { %v4365_v43 = vmul.f32 %v6717_v20, %v4363_v30  ;;  %4462 = vmatmul.bf16.vlgmr.msra.gmra.mxu0 %v8845_v18  ;;  %4488 = vmatmul.bf16.vlgmr.msrb.gmra.mxu2 %v8845_v18  ;;  %vm4370_vm5 = vweird.f32 %v6717_v20  ;;  %v6719_v24 = vpop.eup %6718  ;;  %v9785_v30 = vld [vmem:[#allocation148_spill] sm:$0xff] }
 0x600   :  { %4510 = vmatpush.bf16.msrb.mxu0 %v9764_v12  ;;  %4536 = vmatpush.bf16.msra.mxu2 %v9765_v29  ;;  %vm4371_vm4 = vmor %vm4369_vm13, %vm4370_vm5 }
 0x601   :  { %v4366_v8 = vsub.f32 1.0, %v4365_v43  ;;  %v9787_v43 = vld [vmem:[#allocation122_spill] sm:$0xff] }
 0x603   :  { %v4367_v53 = vmul.f32 %v6717_v20, %v4366_v8  ;;  %v9788_v8 = vld [vmem:[#allocation123_spill] sm:$0xff] }
 0x604   :  { %4511 = vmatpush.bf16.msrb.mxu0 %v9652_v6  ;;  %4537 = vmatpush.bf16.msra.mxu2 %v9653_v10 }
 0x605   :  { %v4368_v14 = vadd.f32 %v6717_v20, %v4367_v53  ;;  %v9790_v53 = vld [vmem:[#allocation154_spill] sm:$0xff] }
 0x607   :  { %v4372_v38 = vsel %vm4371_vm4, %v6717_v20, %v4368_v14  ;;  %v9786_v20 = vld [vmem:[#allocation150_spill] sm:$0xff]  ;;  %v9792_v14 = vld [vmem:[#allocation125_spill] sm:$0xff] }
 0x608   :  { %v4377_v13 = vsel %vm4374_vm15, %v4376_v59, %v4372_v38  ;;  %4512 = vmatpush.bf16.msrb.mxu0 %v9654_v52  ;;  %4538 = vmatpush.bf16.msra.mxu2 %v8192_v44  ;;  %v9793_v59 = vld [vmem:[#allocation126_spill] sm:$0xff]  ;;  %v9794_v38 = vld [vmem:[#allocation127_spill] sm:$0xff] }
 0x609   :  { %v4383_v41 = vmul.f32 %v6719_v24, %v4377_v13  ;;  %v9798_v24 = vld [vmem:[#allocation135_spill] sm:$0xff]  ;;  %v9801_v13 = vld [vmem:[#allocation141_spill] sm:$0xff] }
 0x60b   :  { %4384 = vst [vmem:[#allocation5 + $0x2] sm:$0x3] %v4383_v41  ;;  %v4392_v5 = vrot.slane %v4383_v41, 6 }
 0x60c   :  { %4513 = vmatpush.bf16.msrb.mxu0 %v8198_v25  ;;  %4539 = vmatpush.bf16.msra.mxu2 %v8204_v54 }
 0x60d   :  { %v4395_v27 = vpack.c.bf16 %v4392_v5, %v4392_v5  ;;  %v9809_v5 = vld [vmem:[#allocation44_spill] sm:$0xff] }
 0x60f   :  { %v8868_v33 = vrot.slane %v4395_v27, 1  ;;  %4514 = vmatmul.bf16.vlgmr.msrb.gmra.mxu0 %v8845_v18  ;;  %4540 = vmatmul.bf16.vlgmr.msra.gmra.mxu2 %v8845_v18  ;;  %v4610_v27 = vrot.slane %v9809_v5, 5 }
 0x610   :  { %4558 = vmatpush.bf16.msra.mxu0 %v8209_v9  ;;  %4584 = vmatpush.bf16.msrb.mxu2 %v8213_v21 }
 0x611   :  { %4423 = vmatmul.bf16.vlgmr.msra.gmra.mxu1 %v8868_v33  ;;  %4449 = vmatmul.bf16.vlgmr.msra.gmra.mxu3 %v8868_v33 }
 0x612   :  { %4519 = vmatpush.bf16.msra.mxu1 %v9664_v36  ;;  %4545 = vmatpush.bf16.msra.mxu3 %v9665_v35 }
 0x614   :  { %4559 = vmatpush.bf16.msra.mxu0 %v9766_v3  ;;  %4585 = vmatpush.bf16.msrb.mxu2 %v9767_v0 }
 0x616   :  { %4520 = vmatpush.bf16.msra.mxu1 %v9666_v49  ;;  %4546 = vmatpush.bf16.msra.mxu3 %v9768_v26 }
 0x618   :  { %4560 = vmatpush.bf16.msra.mxu0 %v9769_v50  ;;  %4586 = vmatpush.bf16.msrb.mxu2 %v9770_v22 }
 0x61a   :  { %4521 = vmatpush.bf16.msra.mxu1 %v9771_v1  ;;  %4547 = vmatpush.bf16.msra.mxu3 %v9772_v37 }
 0x61c   :  { %4561 = vmatpush.bf16.msra.mxu0 %v9773_v17  ;;  %4587 = vmatpush.bf16.msrb.mxu2 %v9774_v34 }
 0x61e   :  { %4522 = vmatpush.bf16.msra.mxu1 %v9775_v31  ;;  %4548 = vmatpush.bf16.msra.mxu3 %v9776_v19 }
 0x620   :  { %4562 = vmatpush.bf16.msra.mxu0 %v9777_v57  ;;  %4588 = vmatpush.bf16.msrb.mxu2 %v9778_v51 }
 0x621   :  { %4475 = vmatmul.bf16.vlgmr.msrb.gmra.mxu1 %v8868_v33  ;;  %4501 = vmatmul.bf16.vlgmr.msrb.gmra.mxu3 %v8868_v33 }
 0x622   :  { %4523 = vmatpush.bf16.msra.mxu1 %v9779_v60  ;;  %4549 = vmatpush.bf16.msra.mxu3 %v9780_v15 }
 0x624   :  { %4563 = vmatpush.bf16.msra.mxu0 %v9781_v7  ;;  %4589 = vmatpush.bf16.msrb.mxu2 %v9782_v63 }
 0x626   :  { %4524 = vmatpush.bf16.msra.mxu1 %v9783_v46  ;;  %4550 = vmatpush.bf16.msra.mxu3 %v9784_v32 }
 0x628   :  { %4564 = vmatpush.bf16.msra.mxu0 %v9785_v30  ;;  %4590 = vmatpush.bf16.msrb.mxu2 %v9786_v20 }
 0x62a   :  { %4525 = vmatpush.bf16.msra.mxu1 %v9787_v43  ;;  %4551 = vmatpush.bf16.msra.mxu3 %v9788_v8 }
 0x62c   :  { %4565 = vmatpush.bf16.msra.mxu0 %v9789_v28  ;;  %4591 = vmatpush.bf16.msrb.mxu2 %v9790_v53 }
 0x62e   :  { %4526 = vmatpush.bf16.msra.mxu1 %v9791_v62  ;;  %4552 = vmatpush.bf16.msra.mxu3 %v9792_v14 }
 0x62f   :  { %4566 = vmatmul.bf16.vlgmr.msra.gmra.mxu0 %v8845_v18  ;;  %4592 = vmatmul.bf16.vlgmr.msrb.gmra.mxu2 %v8845_v18  ;;  %v9797_v18 = vld [vmem:[#allocation133_spill] sm:$0xff] }
 0x630   :  { %4879 = vmatpush.bf16.msrb.mxu0 %v9640_v56  ;;  %4905 = vmatpush.bf16.msra.mxu2 %v9759_v2  ;;  %v9795_v56 = vld [vmem:[#allocation129_spill] sm:$0xff]  ;;  %v9796_v2 = vld [vmem:[#allocation131_spill] sm:$0xff] }
 0x631   :  { %4527 = vmatmul.bf16.vlgmr.msra.gmra.mxu1 %v8868_v33  ;;  %4553 = vmatmul.bf16.vlgmr.msra.gmra.mxu3 %v8868_v33 }
 0x632   :  { %4571 = vmatpush.bf16.msrb.mxu1 %v9793_v59  ;;  %4597 = vmatpush.bf16.msrb.mxu3 %v9794_v38 }
 0x634   :  { %4880 = vmatpush.bf16.msrb.mxu0 %v9760_v48  ;;  %4906 = vmatpush.bf16.msra.mxu2 %v9761_v23  ;;  %v9799_v48 = vld [vmem:[#allocation137_spill] sm:$0xff]  ;;  %v9800_v23 = vld [vmem:[#allocation139_spill] sm:$0xff] }
 0x636   :  { %4572 = vmatpush.bf16.msrb.mxu1 %v9795_v56  ;;  %4598 = vmatpush.bf16.msrb.mxu3 %v9796_v2 }
 0x638   :  { %4881 = vmatpush.bf16.msrb.mxu0 %v9644_v58  ;;  %4907 = vmatpush.bf16.msra.mxu2 %v9645_v40  ;;  %v9802_v58 = vld [vmem:[#allocation143_spill] sm:$0xff]  ;;  %v9803_v40 = vld [vmem:[#allocation145_spill] sm:$0xff] }
 0x63a   :  { %4573 = vmatpush.bf16.msrb.mxu1 %v9797_v18  ;;  %4599 = vmatpush.bf16.msrb.mxu3 %v9798_v24 }
 0x63c   :  { %4882 = vmatpush.bf16.msrb.mxu0 %v9762_v47  ;;  %4908 = vmatpush.bf16.msra.mxu2 %v9763_v4  ;;  %v9804_v47 = vld [vmem:[#allocation147_spill] sm:$0xff]  ;;  %v9805_v4 = vld [vmem:[#allocation149_spill] sm:$0xff] }
 0x63e   :  { %4574 = vmatpush.bf16.msrb.mxu1 %v9799_v48  ;;  %4600 = vmatpush.bf16.msrb.mxu3 %v9800_v23 }
 0x640   :  { %4883 = vmatpush.bf16.msrb.mxu0 %v9764_v12  ;;  %4909 = vmatpush.bf16.msra.mxu2 %v9765_v29  ;;  %v9806_v12 = vld [vmem:[#allocation151_spill] sm:$0xff] }
 0x642   :  { %4575 = vmatpush.bf16.msrb.mxu1 %v9801_v13  ;;  %4601 = vmatpush.bf16.msrb.mxu3 %v9802_v58 }
 0x644   :  { %4884 = vmatpush.bf16.msrb.mxu0 %v9652_v6  ;;  %4910 = vmatpush.bf16.msra.mxu2 %v9653_v10  ;;  %v9807_v10 = vld [vmem:[#allocation153_spill] sm:$0xff]  ;;  %v9808_v6 = vld [vmem:[#allocation155_spill] sm:$0xff] }
 0x646   :  { %4576 = vmatpush.bf16.msrb.mxu1 %v9803_v40  ;;  %4602 = vmatpush.bf16.msrb.mxu3 %v9804_v47 }
 0x648   :  { %4885 = vmatpush.bf16.msrb.mxu0 %v9654_v52  ;;  %4911 = vmatpush.bf16.msra.mxu2 %v8192_v44 }
 0x64a   :  { %4577 = vmatpush.bf16.msrb.mxu1 %v9805_v4  ;;  %4603 = vmatpush.bf16.msrb.mxu3 %v9806_v12 }
 0x64c   :  { %4886 = vmatpush.bf16.msrb.mxu0 %v8198_v25  ;;  %4912 = vmatpush.bf16.msra.mxu2 %v8204_v54 }
 0x64e   :  { %4578 = vmatpush.bf16.msrb.mxu1 %v9807_v10  ;;  %4604 = vmatpush.bf16.msrb.mxu3 %v9808_v6 }
 0x650   :  { %4931 = vmatpush.bf16.msra.mxu0 %v8209_v9  ;;  %4957 = vmatpush.bf16.msrb.mxu2 %v8213_v21 }
 0x651   :  { %4579 = vmatmul.bf16.vlgmr.msrb.gmra.mxu1 %v8868_v33  ;;  %4605 = vmatmul.bf16.vlgmr.msrb.gmra.mxu3 %v8868_v33 }
 0x652   :  { %4892 = vmatpush.bf16.msra.mxu1 %v9664_v36  ;;  %4918 = vmatpush.bf16.msra.mxu3 %v9665_v35 }
 0x654   :  { %4932 = vmatpush.bf16.msra.mxu0 %v9766_v3  ;;  %4958 = vmatpush.bf16.msrb.mxu2 %v9767_v0 }
 0x656   :  { %4893 = vmatpush.bf16.msra.mxu1 %v9666_v49  ;;  %4919 = vmatpush.bf16.msra.mxu3 %v9768_v26 }
 0x658   :  { %4933 = vmatpush.bf16.msra.mxu0 %v9769_v50  ;;  %4959 = vmatpush.bf16.msrb.mxu2 %v9770_v22 }
 0x65a   :  { %4894 = vmatpush.bf16.msra.mxu1 %v9771_v1  ;;  %4920 = vmatpush.bf16.msra.mxu3 %v9772_v37  ;;  %v9810_v1 = vld [vmem:[#allocation45_spill] sm:$0xff] }
 0x65b   :  { %v4614_v37 = vadd.f32 %v4610_v27, %v9810_v1 }
 0x65c   :  { %4934 = vmatpush.bf16.msra.mxu0 %v9773_v17  ;;  %4960 = vmatpush.bf16.msrb.mxu2 %v9774_v34  ;;  %v9811_v17 = vld [vmem:[#allocation46_spill] sm:$0xff]  ;;  %v9812_v34 = vrot.slane %v9809_v5, 6 }
 0x65e   :  { %4895 = vmatpush.bf16.msra.mxu1 %v9775_v31  ;;  %4921 = vmatpush.bf16.msra.mxu3 %v9776_v19  ;;  %v4616_v31 = vadd.f32 %v9812_v34, %v9811_v17 }
 0x660   :  { %4935 = vmatpush.bf16.msra.mxu0 %v9777_v57  ;;  %4961 = vmatpush.bf16.msrb.mxu2 %v9778_v51 }
 0x662   :  { %4896 = vmatpush.bf16.msra.mxu1 %v9779_v60  ;;  %4922 = vmatpush.bf16.msra.mxu3 %v9780_v15 }
 0x664   :  { %4936 = vmatpush.bf16.msra.mxu0 %v9781_v7  ;;  %4962 = vmatpush.bf16.msrb.mxu2 %v9782_v63 }
 0x666   :  { %4897 = vmatpush.bf16.msra.mxu1 %v9783_v46  ;;  %4923 = vmatpush.bf16.msra.mxu3 %v9784_v32 }
 0x668   :  { %4937 = vmatpush.bf16.msra.mxu0 %v9785_v30  ;;  %4963 = vmatpush.bf16.msrb.mxu2 %v9786_v20 }
 0x66a   :  { %4898 = vmatpush.bf16.msra.mxu1 %v9787_v43  ;;  %4924 = vmatpush.bf16.msra.mxu3 %v9788_v8 }
 0x66c   :  { %4938 = vmatpush.bf16.msra.mxu0 %v9789_v28  ;;  %4964 = vmatpush.bf16.msrb.mxu2 %v9790_v53  ;;  %v4411_v9 = vpop.f32.mrf.mxu0 }
 0x66e   :  { %4899 = vmatpush.bf16.msra.mxu1 %v9791_v62  ;;  %4925 = vmatpush.bf16.msra.mxu3 %v9792_v14 }
 0x672   :  { %4944 = vmatpush.bf16.msrb.mxu1 %v9793_v59  ;;  %4970 = vmatpush.bf16.msrb.mxu3 %v9794_v38  ;;  %v4437_v25 = vpop.f32.mrf.mxu2 }
 0x674   :  { %v4413_v44 = vpop.f32.mrf.mxu0 }
 0x676   :  { %4945 = vmatpush.bf16.msrb.mxu1 %v9795_v56  ;;  %4971 = vmatpush.bf16.msrb.mxu3 %v9796_v2 }
 0x67a   :  { %4946 = vmatpush.bf16.msrb.mxu1 %v9797_v18  ;;  %4972 = vmatpush.bf16.msrb.mxu3 %v9798_v24  ;;  %v4439_v54 = vpop.f32.mrf.mxu2  ;;  %v9814_v18 = vld [vmem:[#allocation47_spill] sm:$0xff] }
 0x67b   :  { %v4611_v24 = vrot.slane %v9814_v18, 5 }
 0x67c   :  { %v4463_v21 = vpop.f32.mrf.mxu0 }
 0x67e   :  { %4947 = vmatpush.bf16.msrb.mxu1 %v9799_v48  ;;  %4973 = vmatpush.bf16.msrb.mxu3 %v9800_v23 }
 0x682   :  { %4948 = vmatpush.bf16.msrb.mxu1 %v9801_v13  ;;  %4974 = vmatpush.bf16.msrb.mxu3 %v9802_v58  ;;  %v4489_v52 = vpop.f32.mrf.mxu2 }
 0x684   :  { %v4465_v36 = vpop.f32.mrf.mxu0 }
 0x686   :  { %4949 = vmatpush.bf16.msrb.mxu1 %v9803_v40  ;;  %4975 = vmatpush.bf16.msrb.mxu3 %v9804_v47 }
 0x68a   :  { %4950 = vmatpush.bf16.msrb.mxu1 %v9805_v4  ;;  %4976 = vmatpush.bf16.msrb.mxu3 %v9806_v12  ;;  %v4491_v35 = vpop.f32.mrf.mxu2  ;;  %v9816_v12 = vld [vmem:[#allocation48_spill] sm:$0xff] }
 0x68c   :  { %v8996_v29 = vpop.f32.mrf.mxu0 }
 0x68e   :  { %4951 = vmatpush.bf16.msrb.mxu1 %v9807_v10  ;;  %4977 = vmatpush.bf16.msrb.mxu3 %v9808_v6  ;;  %v4424_v49 = vpop.f32.mrf.mxu1  ;;  %v4615_v10 = vadd.f32 %v4611_v24, %v9816_v12 }
 0x68f   :  { %v4425_v26 = vadd.f32 %v4424_v49, %v4411_v9  ;;  %v9817_v9 = vld [vmem:[#allocation49_spill] sm:$0xff] }
 0x692   :  { %v8999_v33 = vpop.f32.mrf.mxu2 }
 0x694   :  { %v4450_v41 = vpop.f32.mrf.mxu3  ;;  %v4517_v50 = vpop.f32.mrf.mxu0 }
 0x695   :  { %v4451_v3 = vadd.f32 %v4450_v41, %v4437_v25  ;;  %v9818_v25 = vrot.slane %v9814_v18, 6 }
 0x696   :  { %v4426_v0 = vpop.f32.mrf.mxu1 }
 0x697   :  { %v4622_v22 = vrot.slane %v4451_v3, 4  ;;  %v4617_v44 = vadd.f32 %v9818_v25, %v9817_v9  ;;  %v4772_v0 = vrot.slane %v8805_v55, 7 }
 0x699   :  { %v4624_v19 = vsel %vm9813_vm11, %v4425_v26, %v4622_v22 }
 0x69a   :  { %v4626_v57 = vrot.slane %v4624_v19, 5  ;;  %v4628_v51 = vrot.slane %v4624_v19, 6  ;;  %v4543_v63 = vpop.f32.mrf.mxu2 }
 0x69c   :  { %v4634_v60 = vadd.f32 %v4626_v57, %v4614_v37  ;;  %v4636_v15 = vadd.f32 %v4628_v51, %v4616_v31  ;;  %v4452_v7 = vpop.f32.mrf.mxu3 }
 0x69e   :  { %v6278_v46 = vmul.f32 -1.442695, %v4634_v60  ;;  %v6279_v32 = vmul.f32 -1.442695, %v4636_v15  ;;  %v4682_v30 = vrot.slane %v4634_v60, 4  ;;  %v4683_v20 = vrot.slane %v4636_v15, 4  ;;  %v4476_v43 = vpop.f32.mrf.mxu1 }
 0x69f   :  { %v4477_v2 = vadd.f32 %v4476_v43, %v4463_v21 }
 0x6a0   :  { %6720 = vpow2.f32 %v6278_v46  ;;  %v6280_v8 = vmul.f32 -1.442695, %v4682_v30  ;;  %v6281_v28 = vmul.f32 -1.442695, %v4683_v20 }
 0x6a1   :  { %6722 = vpow2.f32 %v6279_v32 }
 0x6a2   :  { %6724 = vpow2.f32 %v6280_v8 }
 0x6a3   :  { %6726 = vpow2.f32 %v6281_v28 }
 0x6a4   :  { %v4502_v53 = vpop.f32.mrf.mxu3 }
 0x6a5   :  { %v4503_v62 = vadd.f32 %v4502_v53, %v4489_v52 }
 0x6a6   :  { %v6721_v14 = vpop.eup %6720  ;;  %v4478_v59 = vpop.f32.mrf.mxu1 }
 0x6a7   :  { %v6723_v38 = vpop.eup %6722  ;;  %v9006_v56 = vadd.f32 1.0, %v6721_v14  ;;  %v4623_v48 = vrot.slane %v4503_v62, 4 }
 0x6a8   :  { %v6725_v23 = vpop.eup %6724  ;;  %v9009_v13 = vadd.f32 1.0, %v6723_v38 }
 0x6a9   :  { %v6727_v58 = vpop.eup %6726  ;;  %6728 = vrcp.f32 %v9006_v56  ;;  %v9012_v40 = vadd.f32 1.0, %v6725_v23  ;;  %v4625_v47 = vsel %vm9815_vm3, %v4477_v2, %v4623_v48  ;;  %v4659_v17 = vand.u32 2147483647, %v9006_v56 }
 0x6aa   :  { %6730 = vrcp.f32 %v9009_v13  ;;  %v9016_v4 = vadd.f32 1.0, %v6727_v58  ;;  %v4627_v6 = vrot.slane %v4625_v47, 5  ;;  %v4629_v54 = vrot.slane %v4625_v47, 6 }
 0x6ab   :  { %6732 = vrcp.f32 %v9012_v40  ;;  %v4705_v50 = vand.u32 2147483648, %v9012_v40  ;;  %vm4699_vm12 = vweird.f32 %v9012_v40  ;;  %vm4655_vm7 = vweird.f32 %v9006_v56 }
 0x6ac   :  { %6734 = vrcp.f32 %v9016_v4  ;;  %v9024_v21 = vpop.f32.mrf.mxu0  ;;  %v4504_v52 = vpop.f32.mrf.mxu3  ;;  %v4635_v35 = vadd.f32 %v4627_v6, %v4615_v10  ;;  %v9032_v5 = vadd.f32 %v4629_v54, %v4617_v44  ;;  %vm4714_vm9 = vweird.f32 %v9016_v4 }
 0x6ad   :  { %v4720_v60 = vand.u32 2147483648, %v9016_v4  ;;  %v4706_v46 = vor.u32 1.1754944e-38, %v4705_v50  ;;  %v4661_v30 = vand.u32 2147483648, %v9006_v56  ;;  %v4718_v47 = vand.u32 2147483647, %v9016_v4 }
 0x6ae   :  { %v4528_v27 = vpop.f32.mrf.mxu1  ;;  %v4728_v57 = vrot.slane %v4635_v35, 4  ;;  %v4729_v15 = vrot.slane %v9032_v5, 4  ;;  %vm4670_vm0 = vweird.f32 %v9009_v13  ;;  %vm4660_vm11 = vcmp.eq.f32.partialorder %v4659_v17, 8.507059e+37 }
 0x6af   :  { %v9026_v36 = vpop.eup %6728  ;;  %v4529_v7 = vadd.f32 %v4528_v27, %v8996_v29  ;;  %v4721_v24 = vor.u32 1.1754944e-38, %v4720_v60  ;;  %v4662_v52 = vor.u32 1.1754944e-38, %v4661_v30  ;;  %vm4719_vm15 = vcmp.eq.f32.partialorder %v4718_v47, 8.507059e+37 }
 0x6b0   :  { %v9028_v49 = vpop.eup %6730  ;;  %v4651_v41 = vmul.f32 %v9026_v36, %v9006_v56  ;;  %v6282_v20 = vmul.f32 -1.442695, %v4728_v57  ;;  %v6283_v28 = vmul.f32 -1.442695, %v4729_v15  ;;  %vm4656_vm14 = vweird.f32 %v9026_v36 }
 0x6b1   :  { %v9034_v3 = vpop.eup %6732  ;;  %v4666_v26 = vmul.f32 %v9028_v49, %v9009_v13  ;;  %v4638_v53 = vadd.f32 %v4529_v7, %v9751_v11  ;;  %vm4671_vm2 = vweird.f32 %v9028_v49  ;;  %vm9094_vm5 = vmor %vm4655_vm7, %vm4656_vm14  ;;  %v4773_v57 = vrot.slane %v8807_v39, 7 }
 0x6b2   :  { %v9040_v22 = vpop.eup %6734  ;;  %v4652_v1 = vsub.f32 1.0, %v4651_v41  ;;  %v4695_v37 = vmul.f32 %v9034_v3, %v9012_v40  ;;  %v9046_v34 = vpop.f32.mrf.mxu2  ;;  %6736 = vpow2.f32 %v6282_v20  ;;  %vm4700_vm10 = vweird.f32 %v9034_v3  ;;  %vm9107_vm13 = vmor %vm4670_vm0, %vm4671_vm2 }
 0x6b3   :  { %v4667_v31 = vsub.f32 1.0, %v4666_v26  ;;  %v4710_v19 = vmul.f32 %v9040_v22, %v9016_v4  ;;  %6738 = vpow2.f32 %v6283_v28  ;;  %v6284_v2 = vmul.f32 -1.442695, %v4638_v53  ;;  %vm9073_vm1 = vmor %vm4699_vm12, %vm4700_vm10 }
 0x6b4   :  { %v4696_v51 = vsub.f32 1.0, %v4695_v37  ;;  %v4569_v63 = vpop.f32.mrf.mxu0  ;;  %v4653_v8 = vmul.f32 %v9026_v36, %v4652_v1  ;;  %v4554_v62 = vpop.f32.mrf.mxu3  ;;  %vm4715_vm6 = vweird.f32 %v9040_v22  ;;  %v4674_v41 = vand.u32 2147483647, %v9009_v13 }
 0x6b5   :  { %v4711_v32 = vsub.f32 1.0, %v4710_v19  ;;  %v4668_v59 = vmul.f32 %v9028_v49, %v4667_v31  ;;  %v4555_v29 = vadd.f32 %v4554_v62, %v8999_v33  ;;  %v4703_v33 = vand.u32 2147483647, %v9012_v40  ;;  %vm9081_vm8 = vmor %vm4714_vm9, %vm4715_vm6 }
 0x6b6   :  { %v4697_v43 = vmul.f32 %v9034_v3, %v4696_v51  ;;  %v4530_v18 = vpop.f32.mrf.mxu1  ;;  %v4654_v58 = vadd.f32 %v9026_v36, %v4653_v8  ;;  %6740 = vpow2.f32 %v6284_v2  ;;  %v4676_v40 = vand.u32 2147483648, %v9009_v13 }
 0x6b7   :  { %v4712_v14 = vmul.f32 %v9040_v22, %v4711_v32  ;;  %v4639_v23 = vadd.f32 %v4555_v29, %v9752_v16  ;;  %v4669_v6 = vadd.f32 %v9028_v49, %v4668_v59  ;;  %6742 = vtanh.f32 %v4635_v35 }
 0x6b8   :  { %v4698_v38 = vadd.f32 %v9034_v3, %v4697_v43  ;;  %v6737_v54 = vpop.eup %6736  ;;  %v4658_v35 = vsel %vm9094_vm5, %v9026_v36, %v4654_v58  ;;  %vm4704_vm4 = vcmp.eq.f32.partialorder %v4703_v33, 8.507059e+37  ;;  %v4677_v36 = vor.u32 1.1754944e-38, %v4676_v40 }
 0x6b9   :  { %v4713_v48 = vadd.f32 %v9040_v22, %v4712_v14  ;;  %v6285_v9 = vmul.f32 -1.442695, %v4639_v23  ;;  %v6739_v26 = vpop.eup %6738  ;;  %v4738_v13 = vadd.f32 1.0, %v6737_v54  ;;  %v4663_v51 = vsel %vm4660_vm11, %v4662_v52, %v4658_v35 }
 0x6ba   :  { %v4595_v12 = vpop.f32.mrf.mxu2  ;;  %v4702_v44 = vsel %vm9073_vm1, %v9034_v3, %v4698_v38  ;;  %v4739_v37 = vadd.f32 1.0, %v6739_v26  ;;  %vm4675_vm3 = vcmp.eq.f32.partialorder %v4674_v41, 8.507059e+37 }
 0x6bb   :  { %v4717_v27 = vsel %vm9081_vm8, %v9040_v22, %v4713_v48  ;;  %6744 = vpow2.f32 %v6285_v9  ;;  %v4673_v22 = vsel %vm9107_vm13, %v9028_v49, %v4669_v6  ;;  %v4707_v1 = vsel %vm4704_vm4, %v4706_v46, %v4702_v44 }
 0x6bc   :  { %6746 = vtanh.f32 %v9032_v5  ;;  %v4556_v50 = vpop.f32.mrf.mxu3  ;;  %v4722_v31 = vsel %vm4719_vm15, %v4721_v24, %v4717_v27  ;;  %v6741_v19 = vpop.eup %6740  ;;  %v4678_v60 = vsel %vm4675_vm3, %v4677_v36, %v4673_v22  ;;  %v4776_v49 = vmul.f32 %v4772_v0, %v4707_v1 }
 0x6bd   :  { %6748 = vrcp.f32 %v4738_v13  ;;  %v6743_v5 = vpop.eup %6742  ;;  %v4777_v7 = vmul.f32 %v4773_v57, %v4722_v31  ;;  %v9120_v56 = vadd.f32 1.0, %v6741_v19  ;;  %v4751_v0 = vand.u32 2147483648, %v4738_v13 }
 0x6be   :  { %6750 = vrcp.f32 %v4739_v37  ;;  %v4778_v46 = vmul.f32 %v6743_v5, %v4663_v51  ;;  %v4749_v62 = vand.u32 2147483647, %v4738_v13  ;;  %v4766_v59 = vand.u32 2147483648, %v4739_v37 }
 0x6bf   :  { %v4764_v2 = vand.u32 2147483647, %v4739_v37  ;;  %vm4745_vm7 = vweird.f32 %v4738_v13  ;;  %v4752_v23 = vor.u32 1.1754944e-38, %v4751_v0  ;;  %vm4760_vm6 = vweird.f32 %v4739_v37 }
 0x6c0   :  { %v4780_v20 = vadd.f32 %v4778_v46, %v4776_v49  ;;  %v4767_v33 = vor.u32 1.1754944e-38, %v4766_v59  ;;  %vm4750_vm1 = vcmp.eq.f32.partialorder %v4749_v62, 8.507059e+37  ;;  %vm9827_vm8 = vcmask 1044484  }
 0x6c1   :  { %v6745_v15 = vpop.eup %6744  ;;  %vm4765_vm2 = vcmp.eq.f32.partialorder %v4764_v2, 8.507059e+37  ;;  %vm4795_vm15 = vweird.f32 %v9120_v56 }
 0x6c2   :  { %v6747_v63 = vpop.eup %6746  ;;  %v9122_v17 = vadd.f32 1.0, %v6745_v15 }
 0x6c3   :  { %v4779_v32 = vmul.f32 %v6747_v63, %v4678_v60  ;;  %v6749_v30 = vpop.eup %6748 }
 0x6c4   :  { %6752 = vrcp.f32 %v9122_v17  ;;  %v6751_v39 = vpop.eup %6750  ;;  %v4741_v43 = vmul.f32 %v6749_v30, %v4738_v13  ;;  %vm4746_vm12 = vweird.f32 %v6749_v30  ;;  %vm4814_vm5 = vweird.f32 %v9122_v17 }
 0x6c5   :  { %v4781_v8 = vadd.f32 %v4779_v32, %v4777_v7  ;;  %v4756_v28 = vmul.f32 %v6751_v39, %v4739_v37  ;;  %6754 = vrcp.f32 %v9120_v56  ;;  %vm4761_vm9 = vweird.f32 %v6751_v39  ;;  %vm4747_vm10 = vmor %vm4745_vm7, %vm4746_vm12 }
 0x6c6   :  { %v4742_v55 = vsub.f32 1.0, %v4741_v43  ;;  %6756 = vtanh.f32 %v4780_v20  ;;  %vm4762_vm14 = vmor %vm4760_vm6, %vm4761_vm9  ;;  %v4820_v15 = vand.u32 2147483648, %v9122_v17  ;;  %v4818_v63 = vand.u32 2147483647, %v9122_v17 }
 0x6c7   :  { %v4757_v53 = vsub.f32 1.0, %v4756_v28  ;;  %6758 = vtanh.f32 %v4781_v8  ;;  %v4799_v20 = vand.u32 2147483647, %v9120_v56 }
 0x6c8   :  { %v4743_v14 = vmul.f32 %v6749_v30, %v4742_v55  ;;  %v4821_v8 = vor.u32 1.1754944e-38, %v4820_v15  ;;  %vm4819_vm3 = vcmp.eq.f32.partialorder %v4818_v63, 8.507059e+37 }
 0x6c9   :  { %v4758_v38 = vmul.f32 %v6751_v39, %v4757_v53  ;;  %vm4800_vm12 = vcmp.eq.f32.partialorder %v4799_v20, 8.507059e+37 }
 0x6ca   :  { %v9126_v29 = vpop.eup %6752  ;;  %v4744_v24 = vadd.f32 %v6749_v30, %v4743_v14 }
 0x6cb   :  { %v9128_v48 = vpop.eup %6754  ;;  %v4759_v58 = vadd.f32 %v6751_v39, %v4758_v38  ;;  %v4810_v47 = vmul.f32 %v9126_v29, %v9122_v17  ;;  %vm4815_vm0 = vweird.f32 %v9126_v29 }
 0x6cc   :  { %v4748_v12 = vsel %vm4747_vm10, %v6749_v30, %v4744_v24  ;;  %v6757_v10 = vpop.eup %6756  ;;  %v4791_v40 = vmul.f32 %v9128_v48, %v9120_v56  ;;  %vm4796_vm13 = vweird.f32 %v9128_v48  ;;  %vm9148_vm4 = vmor %vm4814_vm5, %vm4815_vm0  ;;  %v4801_v30 = vand.u32 2147483648, %v9120_v56 }
 0x6cd   :  { %v4753_v6 = vsel %vm4750_vm1, %v4752_v23, %v4748_v12  ;;  %v4763_v9 = vsel %vm4762_vm14, %v6751_v39, %v4759_v58  ;;  %v6759_v25 = vpop.eup %6758  ;;  %v4811_v52 = vsub.f32 1.0, %v4810_v47  ;;  %vm4797_vm11 = vmor %vm4795_vm15, %vm4796_vm13 }
 0x6ce   :  { %v4580_v18 = vpop.f32.mrf.mxu1  ;;  %v4768_v44 = vsel %vm4765_vm2, %v4767_v33, %v4763_v9  ;;  %v4784_v54 = vmul.f32 %v6757_v10, %v4753_v6  ;;  %v4792_v13 = vsub.f32 1.0, %v4791_v40  ;;  %v4802_v0 = vor.u32 1.1754944e-38, %v4801_v30 }
 0x6cf   :  { %v4785_v4 = vmul.f32 %v6759_v25, %v4768_v44  ;;  %v4581_v26 = vadd.f32 %v4580_v18, %v9024_v21  ;;  %v4812_v37 = vmul.f32 %v9126_v29, %v4811_v52 }
 0x6d0   :  { %v4852_v27 = vperm.slane %v4784_v54, 3  ;;  %v4793_v57 = vmul.f32 %v9128_v48, %v4792_v13 }
 0x6d1   :  { %v4853_v3 = vperm.slane %v4785_v4, 3  ;;  %v4640_v31 = vadd.f32 %v4581_v26, %v8536_v42  ;;  %v4813_v21 = vadd.f32 %v9126_v29, %v4812_v37 }
 0x6d2   :  { %v4794_v7 = vadd.f32 %v9128_v48, %v4793_v57 }
 0x6d3   :  { %v4854_v1 = vsel %vm9827_vm8, %v4853_v3, %v4852_v27  ;;  %v4817_v39 = vsel %vm9148_vm4, %v9126_v29, %v4813_v21 }
 0x6d4   :  { %v4606_v41 = vpop.f32.mrf.mxu3  ;;  %v4859_v36 = vpack.c.bf16 %v4854_v1, %v4854_v1  ;;  %v4798_v17 = vsel %vm4797_vm11, %v9128_v48, %v4794_v7  ;;  %v4822_v53 = vsel %vm4819_vm3, %v4821_v8, %v4817_v39 }
 0x6d5   :  { %v4607_v35 = vadd.f32 %v4606_v41, %v9046_v34  ;;  %v4803_v62 = vsel %vm4800_vm12, %v4802_v0, %v4798_v17  ;;  %v4844_v56 = vmul.f32 %v4822_v53, %v8847_v45 }
 0x6d6   :  { %v4582_v50 = vpop.f32.mrf.mxu1  ;;  %v4862_v51 = vshrl.u32 %v4859_v36, 16  ;;  %v4865_v5 = vshll.u32 %v4859_v36, 16 }
 0x6d7   :  { %v4641_v22 = vadd.f32 %v4607_v35, %v8533_v61 }
 0x6d8   :  { %v4864_v60 = vrot.slane %v4862_v51, 1  ;;  %v4867_v49 = vrot.slane %v4865_v5, 2 }
 0x6d9   :  { %v6286_v19 = vmul.f32 -1.442695, %v4641_v22 }
 0x6da   :  { %v4868_v46 = vor.u32 %v4867_v49, %v4864_v60 }
 0x6db   :  { %6760 = vpow2.f32 %v6286_v19 }
 0x6dc   :  { %v4608_v34 = vpop.f32.mrf.mxu3  ;;  %6762 = vtanh.f32 %v4640_v31  ;;  %4887 = vmatmul.bf16.vlgmr.msrb.gmra.mxu0 %v4868_v46  ;;  %4913 = vmatmul.bf16.vlgmr.msra.gmra.mxu2 %v4868_v46 }
 0x6e1   :  { %v6761_v43 = vpop.eup %6760 }
 0x6e2   :  { %v4828_v28 = vadd.f32 1.0, %v6761_v43  ;;  %v6763_v55 = vpop.eup %6762 }
 0x6e3   :  { %v4845_v14 = vmul.f32 %v6763_v55, %v4803_v62 }
 0x6e4   :  { %6764 = vrcp.f32 %v4828_v28  ;;  %v4840_v18 = vand.u32 2147483648, %v4828_v28  ;;  %v4838_v48 = vand.u32 2147483647, %v4828_v28  ;;  %vm4834_vm7 = vweird.f32 %v4828_v28 }
 0x6e5   :  { %v9160_v29 = vadd.f32 %v4845_v14, %v4844_v56 }
 0x6e6   :  { %v4841_v58 = vor.u32 1.1754944e-38, %v4840_v18  ;;  %vm4839_vm6 = vcmp.eq.f32.partialorder %v4838_v48, 8.507059e+37 }
 0x6e7   :  { %6766 = vtanh.f32 %v9160_v29 }
 0x6ea   :  { %v6765_v59 = vpop.eup %6764 }
 0x6eb   :  { %v4830_v38 = vmul.f32 %v6765_v59, %v4828_v28  ;;  %vm4835_vm9 = vweird.f32 %v6765_v59 }
 0x6ec   :  { %4939 = vmatmul.bf16.vlgmr.msra.gmra.mxu0 %v4868_v46  ;;  %4965 = vmatmul.bf16.vlgmr.msrb.gmra.mxu2 %v4868_v46  ;;  %vm4836_vm10 = vmor %vm4834_vm7, %vm4835_vm9 }
 0x6ed   :  { %v4831_v2 = vsub.f32 1.0, %v4830_v38  ;;  %v6767_v45 = vpop.eup %6766 }
 0x6ef   :  { %v4832_v24 = vmul.f32 %v6765_v59, %v4831_v2 }
 0x6f1   :  { %v4833_v23 = vadd.f32 %v6765_v59, %v4832_v24 }
 0x6f3   :  { %v4837_v33 = vsel %vm4836_vm10, %v6765_v59, %v4833_v23 }
 0x6f4   :  { %v4842_v47 = vsel %vm4839_vm6, %v4841_v58, %v4837_v33 }
 0x6f5   :  { %v4848_v12 = vmul.f32 %v6767_v45, %v4842_v47 }
 0x6f7   :  { %4849 = vst [vmem:[#allocation5 + $0x4] sm:$0x3] %v4848_v12  ;;  %v4857_v10 = vrot.slane %v4848_v12, 5 }
 0x6f9   :  { %v4860_v6 = vpack.c.bf16 %v4857_v10, %v4857_v10 }
 0x6fb   :  { %v4870_v9 = vshrl.u32 %v4860_v6, 16  ;;  %v4873_v25 = vshll.u32 %v4860_v6, 16 }
 0x6fd   :  { %v4872_v40 = vrot.slane %v4870_v9, 1  ;;  %v4875_v44 = vrot.slane %v4873_v25, 2 }
 0x6ff   :  { %v4876_v54 = vor.u32 %v4875_v44, %v4872_v40 }
 0x701   :  { %4900 = vmatmul.bf16.vlgmr.msra.gmra.mxu1 %v4876_v54  ;;  %4926 = vmatmul.bf16.vlgmr.msra.gmra.mxu3 %v4876_v54 }
 0x711   :  { %4952 = vmatmul.bf16.vlgmr.msrb.gmra.mxu1 %v4876_v54  ;;  %4978 = vmatmul.bf16.vlgmr.msrb.gmra.mxu3 %v4876_v54 }
 0x759   :  { %v4888_v4 = vpop.f32.mrf.mxu0 }
 0x75f   :  { %v4914_v52 = vpop.f32.mrf.mxu2 }
 0x761   :  { %v4890_v41 = vpop.f32.mrf.mxu0 }
 0x767   :  { %v4916_v27 = vpop.f32.mrf.mxu2 }
 0x769   :  { %v4940_v26 = vpop.f32.mrf.mxu0 }
 0x76f   :  { %v4966_v35 = vpop.f32.mrf.mxu2 }
 0x771   :  { %v4942_v3 = vpop.f32.mrf.mxu0 }
 0x777   :  { %v4968_v13 = vpop.f32.mrf.mxu2 }
 0x77e   :  { %v4901_v50 = vpop.f32.mrf.mxu1 }
 0x77f   :  { %v4902_v22 = vadd.f32 %v4901_v50, %v4888_v4 }
 0x781   :  { %v4983_v1 = vadd.f32 %v4902_v22, %v9751_v11 }
 0x783   :  { %v6287_v37 = vmul.f32 -1.442695, %v4983_v1 }
 0x784   :  { %v4927_v36 = vpop.f32.mrf.mxu3 }
 0x785   :  { %6768 = vpow2.f32 %v6287_v37  ;;  %v4928_v31 = vadd.f32 %v4927_v36, %v4914_v52 }
 0x786   :  { %v4903_v19 = vpop.f32.mrf.mxu1 }
 0x787   :  { %v4984_v57 = vadd.f32 %v4928_v31, %v9752_v16 }
 0x789   :  { %v6288_v51 = vmul.f32 -1.442695, %v4984_v57 }
 0x78b   :  { %v6769_v5 = vpop.eup %6768  ;;  %6770 = vpow2.f32 %v6288_v51 }
 0x78c   :  { %v4990_v21 = vadd.f32 1.0, %v6769_v5  ;;  %v4929_v34 = vpop.f32.mrf.mxu3 }
 0x78e   :  { %6772 = vrcp.f32 %v4990_v21  ;;  %v4953_v60 = vpop.f32.mrf.mxu1  ;;  %v5002_v14 = vand.u32 2147483648, %v4990_v21  ;;  %vm4996_vm2 = vweird.f32 %v4990_v21  ;;  %v5000_v38 = vand.u32 2147483647, %v4990_v21 }
 0x78f   :  { %v4954_v39 = vadd.f32 %v4953_v60, %v4940_v26 }
 0x790   :  { %v5003_v23 = vor.u32 1.1754944e-38, %v5002_v14  ;;  %vm5001_vm4 = vcmp.eq.f32.partialorder %v5000_v38, 8.507059e+37 }
 0x791   :  { %v6771_v49 = vpop.eup %6770  ;;  %v4985_v0 = vadd.f32 %v4954_v39, %v8536_v42 }
 0x792   :  { %v5009_v15 = vadd.f32 1.0, %v6771_v49 }
 0x794   :  { %v6773_v7 = vpop.eup %6772  ;;  %6774 = vrcp.f32 %v5009_v15  ;;  %v4979_v63 = vpop.f32.mrf.mxu3  ;;  %v5021_v53 = vand.u32 2147483648, %v5009_v15  ;;  %v5019_v59 = vand.u32 2147483647, %v5009_v15  ;;  %vm5015_vm8 = vweird.f32 %v5009_v15 }
 0x795   :  { %v4992_v11 = vmul.f32 %v6773_v7, %v4990_v21  ;;  %v4980_v46 = vadd.f32 %v4979_v63, %v4966_v35  ;;  %vm4997_vm14 = vweird.f32 %v6773_v7 }
 0x796   :  { %v4955_v32 = vpop.f32.mrf.mxu1  ;;  %vm4998_vm0 = vmor %vm4996_vm2, %vm4997_vm14  ;;  %v5022_v18 = vor.u32 1.1754944e-38, %v5021_v53  ;;  %vm5020_vm13 = vcmp.eq.f32.partialorder %v5019_v59, 8.507059e+37 }
 0x797   :  { %v4993_v30 = vsub.f32 1.0, %v4992_v11  ;;  %v4986_v20 = vadd.f32 %v4980_v46, %v8533_v61 }
 0x799   :  { %v6289_v16 = vmul.f32 -1.442695, %v4986_v20  ;;  %v4994_v8 = vmul.f32 %v6773_v7, %v4993_v30 }
 0x79a   :  { %v6775_v43 = vpop.eup %6774 }
 0x79b   :  { %v5011_v17 = vmul.f32 %v6775_v43, %v5009_v15  ;;  %6776 = vpow2.f32 %v6289_v16  ;;  %v4995_v62 = vadd.f32 %v6773_v7, %v4994_v8  ;;  %vm5016_vm1 = vweird.f32 %v6775_v43 }
 0x79c   :  { %v4981_v28 = vpop.f32.mrf.mxu3  ;;  %6778 = vtanh.f32 %v4985_v0  ;;  %vm5017_vm5 = vmor %vm5015_vm8, %vm5016_vm1 }
 0x79d   :  { %v5012_v55 = vsub.f32 1.0, %v5011_v17  ;;  %v4999_v24 = vsel %vm4998_vm0, %v6773_v7, %v4995_v62 }
 0x79e   :  { %v5004_v33 = vsel %vm5001_vm4, %v5003_v23, %v4999_v24 }
 0x79f   :  { %v5013_v56 = vmul.f32 %v6775_v43, %v5012_v55 }
 0x7a1   :  { %v6777_v61 = vpop.eup %6776  ;;  %v5014_v2 = vadd.f32 %v6775_v43, %v5013_v56 }
 0x7a2   :  { %v5029_v48 = vadd.f32 1.0, %v6777_v61  ;;  %v6779_v47 = vpop.eup %6778 }
 0x7a3   :  { %v5018_v42 = vsel %vm5017_vm5, %v6775_v43, %v5014_v2  ;;  %v5046_v12 = vmul.f32 %v6779_v47, %v5004_v33 }
 0x7a4   :  { %v5023_v58 = vsel %vm5020_vm13, %v5022_v18, %v5018_v42  ;;  %6780 = vrcp.f32 %v5029_v48  ;;  %v5041_v40 = vand.u32 2147483648, %v5029_v48  ;;  %v5039_v54 = vand.u32 2147483647, %v5029_v48 }
 0x7a5   :  { %v5045_v45 = vmul.f32 %v5023_v58, %v9160_v29  ;;  %vm5035_vm11 = vweird.f32 %v5029_v48 }
 0x7a6   :  { %v5042_v52 = vor.u32 1.1754944e-38, %v5041_v40  ;;  %vm5040_vm12 = vcmp.eq.f32.partialorder %v5039_v54, 8.507059e+37 }
 0x7a7   :  { %v5047_v6 = vadd.f32 %v5046_v12, %v5045_v45 }
 0x7a9   :  { %6782 = vtanh.f32 %v5047_v6 }
 0x7aa   :  { %v6781_v10 = vpop.eup %6780 }
 0x7ab   :  { %v5031_v9 = vmul.f32 %v6781_v10, %v5029_v48  ;;  %vm5036_vm15 = vweird.f32 %v6781_v10 }
 0x7ac   :  { %vm5037_vm3 = vmor %vm5035_vm11, %vm5036_vm15 }
 0x7ad   :  { %v5032_v25 = vsub.f32 1.0, %v5031_v9 }
 0x7af   :  { %v5033_v44 = vmul.f32 %v6781_v10, %v5032_v25  ;;  %v6783_v27 = vpop.eup %6782 }
 0x7b1   :  { %v5034_v4 = vadd.f32 %v6781_v10, %v5033_v44 }
 0x7b3   :  { %v5038_v41 = vsel %vm5037_vm3, %v6781_v10, %v5034_v4 }
 0x7b4   :  { %v5043_v26 = vsel %vm5040_vm12, %v5042_v52, %v5038_v41 }
 0x7b5   :  { %v5049_v29 = vmul.f32 %v6783_v27, %v5043_v26 }
 0x7b7   :  { %5050 = vst [vmem:[#allocation5 + $0x6] sm:$0x3] %v5049_v29 }
 0x7b8   :  { %7057 = dma.done.wait [#allocation10 + $0x2], 1024 }
 0x7b9   :  { %7058 = vsyncadd [#allocation10 + $0x2], 4294966272  ;;  %v9830_v35 = vmov 0   ;;  %v6559_v3 = vld [vmem:[#allocation8 + $0x38] sm:$0xff]  ;;  %v6558_v13 = vld [vmem:[#allocation8 + $0x28] sm:$0xff]  ;;  %vm5150_vm9 = vcmask 7168   ;;  %v5165_v17 = vlaneseq }
 0x7ba   :  { %6784 = vset.pattern.permute.xlu1 %v9830_v35  ;;  %6785 = vset.pattern.permute.xlu0 %v9830_v35  ;;  %v6557_v50 = vld [vmem:[#allocation8 + $0x20] sm:$0xff]  ;;  %v6556_v22 = vld [vmem:[#allocation8 + $0x8] sm:$0xff]  ;;  %v6555_v1 = vld [vmem:[#allocation8 + $0x10] sm:$0xff]  ;;  %v7074_v14 = vmov 0.0   ;;  %vm5184_vm10 = vcmask 64512  }
 0x7bb   :  { %5124 = vmatpush.bf16.msrb.mxu0 %v6559_v3  ;;  %v6554_v37 = vld [vmem:[#allocation8 + $0x18] sm:$0xff]  ;;  %v6553_v36 = vld [vmem:[#allocation8] sm:$0xff]  ;;  %v6552_v31 = vld [vmem:[#allocation8 + $0x30] sm:$0xff]  ;;  %v5166_v28 = vand.u32 127, %v5165_v17  ;;  %v5180_v56 = vshrl.u32 %v5165_v17, 7 }
 0x7bc   :  { %v6786_v51 = vld [vmem:[%s9206_s17] ss:$0 sm:$0xff]  ;;  %v6788_v7 = vld [vmem:[#allocation11] ss:$0 sm:$0xff] }
 0x7bd   :  { %v6787_v34 = vld [vmem:[%s9207_s18] ss:$0 sm:$0xff]  ;;  %v5171_v62 = vand.u32 1, %v5166_v28 }
 0x7be   :  { %v5054_v19 = vld [vmem:[#allocation5] sm:$0xff] }
 0x7bf   :  { %5125 = vmatpush.bf16.msrb.mxu0 %v6558_v13  ;;  %v5055_v57 = vpack.c.bf16 %v5054_v19, %v5054_v19  ;;  %vm5181_vm7 = vcmp.eq.s32.totalorder %v5171_v62, %v5180_v56 }
 0x7c0   :  { %v6322_v59 = vsel %vm5181_vm7, 1.0, %v7074_v14 }
 0x7c3   :  { %5126 = vmatpush.bf16.msrb.mxu0 %v6557_v50 }
 0x7c7   :  { %5127 = vmatpush.bf16.msrb.mxu0 %v6556_v22 }
 0x7cb   :  { %5128 = vmatpush.bf16.msrb.mxu0 %v6555_v1 }
 0x7cf   :  { %5129 = vmatpush.bf16.msrb.mxu0 %v6554_v37 }
 0x7d3   :  { %5130 = vmatpush.bf16.msrb.mxu0 %v6553_v36 }
 0x7d7   :  { %5131 = vmatpush.bf16.msrb.mxu0 %v6552_v31 }
 0x7da   :  { %5132 = vmatmul.bf16.vlgmr.msrb.gmra.mxu0 %v5055_v57 }
 0x857   :  { %v5133_v5 = vpop.f32.mrf.mxu0 }
 0x858   :  { %v5134_v21 = vadd.f32 %v6786_v51, %v5133_v5 }
 0x85a   :  { %6789 = vtanh.f32 %v5134_v21 }
 0x85f   :  { %v5135_v60 = vpop.f32.mrf.mxu0 }
 0x860   :  { %v6790_v49 = vpop.eup %6789 }
 0x861   :  { %v5142_v15 = vmul.f32 %v6790_v49, %v6787_v34 }
 0x863   :  { %5143 = vadd.xlane.f32.xlu0 %v5142_v15 }
 0x8d6   :  { %v5144_v63 = vpop.xlane.xlu0 %5143 }
 0x8d7   :  { %v5149_v11 = vadd.f32 %v6788_v7, %v5144_v63 }
 0x8d9   :  { %v5151_v46 = vsel %vm5150_vm9, %v5149_v11, -inf }
 0x8da   :  { %5152 = vmax.xlane.f32.xlu0 %v5151_v46 }
 0x94d   :  { %v5153_v32 = vpop.xlane.xlu0 %5152 }
 0x94e   :  { %v5154_v30 = vrot.slane %v5153_v32, 4 }
 0x950   :  { %v5155_v20 = vmax.f32 %v5153_v32, %v5154_v30 }
 0x952   :  { %v5156_v39 = vrot.slane %v5155_v20, 2 }
 0x954   :  { %v5157_v16 = vmax.f32 %v5155_v20, %v5156_v39 }
 0x956   :  { %v5158_v43 = vrot.slane %v5157_v16, 1 }
 0x958   :  { %v5159_v8 = vmax.f32 %v5157_v16, %v5158_v43 }
 0x95a   :  { %6568 = vpush %v5159_v8 }
 0x98b   :  { %s6569_s17 = spop %6568 }
 0x98c   :  { %v5161_v55 = vstv %s6569_s17 }
 0x98d   :  { %v5162_v0 = vsub.f32 %v5149_v11, %v5161_v55 }
 0x98f   :  { %v5163_v53 = vmul.f32 1.442695, %v5162_v0 }
 0x991   :  { %6791 = vpow2.f32 %v5163_v53 }
 0x997   :  { %v6792_v38 = vpop.eup %6791 }
 0x998   :  { %5210 = vperm.xlu1 %6784, %v6792_v38   ;;  %5203 = vmatpush.msra.mxu1 %v6792_v38 }
 0x999   :  { %6323 = vmatmul.msk.f32.vlgmr.msra.gmra.mxu1 %vm5184_vm10, %v6322_v59 }
 0xa0a   :  { %v5211_v61 = vpop.permute.xlu1 %5210 }
 0xa0b   :  { %v5213_v2 = vmul.f32 %v5211_v61, %v5054_v19 }
 0xa0d   :  { %5229 = vmatpush.msra.mxu2 %v5213_v2 }
 0xa0e   :  { %6324 = vmatmul.msk.f32.vlgmr.msra.gmra.mxu2 %vm5184_vm10, %v6322_v59 }
 0xa16   :  { %v5205_v18 = vpop.f32.mrf.mxu1 }
 0xa17   :  { %5236 = vperm.xlu1 %6784, %v5205_v18  }
 0xa89   :  { %v5237_v24 = vpop.permute.xlu1 %5236 }
 0xa8a   :  { %6793 = vrcp.f32 %v5237_v24  ;;  %v5250_v58 = vand.u32 2147483648, %v5237_v24  ;;  %v5248_v45 = vand.u32 2147483647, %v5237_v24  ;;  %vm5244_vm14 = vweird.f32 %v5237_v24 }
 0xa8c   :  { %v5251_v10 = vor.u32 1.1754944e-38, %v5250_v58  ;;  %vm5249_vm2 = vcmp.eq.f32.partialorder %v5248_v45, 8.507059e+37 }
 0xa90   :  { %v6794_v48 = vpop.eup %6793 }
 0xa91   :  { %v5240_v23 = vmul.f32 %v6794_v48, %v5237_v24  ;;  %vm5245_vm6 = vweird.f32 %v6794_v48  ;;  %v5231_v12 = vpop.f32.mrf.mxu2 }
 0xa92   :  { %vm5246_vm1 = vmor %vm5244_vm14, %vm5245_vm6 }
 0xa93   :  { %v5241_v42 = vsub.f32 1.0, %v5240_v23 }
 0xa95   :  { %v5242_v33 = vmul.f32 %v6794_v48, %v5241_v42 }
 0xa97   :  { %v5243_v47 = vadd.f32 %v6794_v48, %v5242_v33 }
 0xa99   :  { %v5247_v6 = vsel %vm5246_vm1, %v6794_v48, %v5243_v47 }
 0xa9a   :  { %v5252_v9 = vsel %vm5249_vm2, %v5251_v10, %v5247_v6 }
 0xa9b   :  { %v5253_v25 = vmul.f32 %v5252_v9, %v5231_v12 }
 0xa9c   :  { %7059 = dma.done.wait [#allocation10 + $0x3], 1024 }
 0xa9d   :  { %7060 = vsyncadd [#allocation10 + $0x3], 4294966272  ;;  %v6567_v40 = vld [vmem:[#allocation9 + $0x38] sm:$0xff]  ;;  %v6566_v44 = vld [vmem:[#allocation9 + $0x30] sm:$0xff]  ;;  %v5256_v29 = vpack.c.bf16 %v5253_v25, %v5253_v25  ;;  %vm9831_vm8 = vcmask 517120   ;;  %vm5377_vm4 = vcmask 1024  }
 0xa9e   :  { %5321 = vmatpush.bf16.msra.mxu3 %v6567_v40  ;;  %v6565_v54 = vld [vmem:[#allocation9 + $0x8] sm:$0xff]  ;;  %v6563_v52 = vld [vmem:[#allocation9 + $0x20] sm:$0xff]  ;;  %v6562_v41 = vld [vmem:[#allocation9 + $0x10] sm:$0xff] }
 0xa9f   :  { %v6564_v4 = vld [vmem:[#allocation9 + $0x28] sm:$0xff]  ;;  %v6561_v27 = vld [vmem:[#allocation9 + $0x18] sm:$0xff]  ;;  %v6560_v26 = vld [vmem:[#allocation9] sm:$0xff] }
 0xaa0   :  { %v6795_v35 = vld [vmem:[%s9210_s21] ss:$0 sm:$0xff]  ;;  %v6798_v57 = vld [vmem:[#allocation12] ss:$0 sm:$0xff] }
 0xaa1   :  { %v6796_v3 = vld [vmem:[%s9211_s22] ss:$0 sm:$0xff] }
 0xaa2   :  { %5322 = vmatpush.bf16.msra.mxu3 %v6566_v44  ;;  %v6797_v1 = vld [vmem:[%s9212_s23] ss:$0 sm:$0xff]  ;;  %s9832_s23 = sld [smem:[#allocation166_spill]] }
 0xaa6   :  { %5323 = vmatpush.bf16.msra.mxu3 %v6565_v54 }
 0xaaa   :  { %5324 = vmatpush.bf16.msra.mxu3 %v6564_v4 }
 0xaae   :  { %5325 = vmatpush.bf16.msra.mxu3 %v6563_v52 }
 0xab2   :  { %5326 = vmatpush.bf16.msra.mxu3 %v6562_v41 }
 0xab6   :  { %5327 = vmatpush.bf16.msra.mxu3 %v6561_v27 }
 0xaba   :  { %5328 = vmatpush.bf16.msra.mxu3 %v6560_v26 }
 0xabd   :  { %5329 = vmatmul.bf16.vlgmr.msra.gmra.mxu3 %v5256_v29 }
 0xb40   :  { %v5330_v13 = vpop.f32.mrf.mxu3 }
 0xb41   :  { %v5338_v50 = vmul.f32 %v6795_v35, %v5330_v13 }
 0xb43   :  { %v5343_v22 = vadd.f32 %v6796_v3, %v5338_v50 }
 0xb45   :  { %v5344_v37 = vmax.f32 %v5343_v22, 0.0 }
 0xb47   :  { %v5349_v36 = vmul.f32 %v6797_v1, %v5344_v37 }
 0xb48   :  { %v5332_v31 = vpop.f32.mrf.mxu3 }
 0xb49   :  { %v5350_v19 = vsel %vm9831_vm8, %v5349_v36, 0.0 }
 0xb4a   :  { %5351 = vadd.xlane.f32.xlu0 %v5350_v19 }
 0xbbd   :  { %v5352_v51 = vpop.xlane.xlu0 %5351 }
 0xbbe   :  { %v5357_v5 = vadd.f32 %v6798_v57, %v5352_v51 }
 0xbc0   :  { %v6357_v21 = vmul.f32 -1.442695, %v5357_v5 }
 0xbc2   :  { %6799 = vpow2.f32 %v6357_v21 }
 0xbc8   :  { %v6800_v34 = vpop.eup %6799 }
 0xbc9   :  { %v5361_v60 = vadd.f32 1.0, %v6800_v34 }
 0xbcb   :  { %6801 = vrcp.f32 %v5361_v60  ;;  %v5373_v63 = vand.u32 2147483648, %v5361_v60  ;;  %v5371_v46 = vand.u32 2147483647, %v5361_v60  ;;  %vm5367_vm5 = vweird.f32 %v5361_v60 }
 0xbcd   :  { %v5374_v30 = vor.u32 1.1754944e-38, %v5373_v63  ;;  %vm5372_vm15 = vcmp.eq.f32.partialorder %v5371_v46, 8.507059e+37 }
 0xbd1   :  { %v6802_v49 = vpop.eup %6801 }
 0xbd2   :  { %v5363_v15 = vmul.f32 %v6802_v49, %v5361_v60  ;;  %vm5368_vm0 = vweird.f32 %v6802_v49 }
 0xbd3   :  { %vm5369_vm13 = vmor %vm5367_vm5, %vm5368_vm0 }
 0xbd4   :  { %v5364_v7 = vsub.f32 1.0, %v5363_v15 }
 0xbd6   :  { %v5365_v11 = vmul.f32 %v6802_v49, %v5364_v7 }
 0xbd8   :  { %v5366_v32 = vadd.f32 %v6802_v49, %v5365_v11 }
 0xbda   :  { %v5370_v20 = vsel %vm5369_vm13, %v6802_v49, %v5366_v32 }
 0xbdb   :  { %v5375_v39 = vsel %vm5372_vm15, %v5374_v30, %v5370_v20 }
 0xbdc   :  { %5378 = vst.msk [vmem:[%s9832_s23] sm:$0x3] %vm5377_vm4, %v5375_v39 }
 0xbdd   :  { %5383 = vsyncpa [#allocation14], 1 }
 0xbde   :  { %5384 = vsyncpa [#allocation16], 1 }
 0xbdf   :  { %5385 = vsyncpa [#allocation19], 1 }
 0xbe0   :  { %5386 = vsyncpa [#allocation22], 1 }
 0xbe1   :  { %5387 = vsyncpa [#allocation25], 1 }
 0xbe2   :  { %5388 = vsyncmov [#allocation10] }
 0xbe5   :  { %s5389_s3 = vpop.sfrf %5388 }
 0xbe6   :  { %p6358_p0 = scmp.ne.s32.totalorder %s5389_s3, 0 }
 0xbe8   :  { %5393 = shalt.err (%p6358_p0)  }
 0xbe9   :  { %5395 = vsyncmov [#allocation10 + $0x1] }
 0xbec   :  { %s5396_s16 = vpop.sfrf %5395 }
 0xbed   :  { %p6359_p1 = scmp.ne.s32.totalorder %s5396_s16, 0 }
 0xbef   :  { %5400 = shalt.err (%p6359_p1)  }
 0xbf0   :  { %5402 = vsyncmov [#allocation10 + $0x2] }
 0xbf3   :  { %s5403_s8 = vpop.sfrf %5402 }
 0xbf4   :  { %p6360_p2 = scmp.ne.s32.totalorder %s5403_s8, 0 }
 0xbf6   :  { %5407 = shalt.err (%p6360_p2)  }
 0xbf7   :  { %5409 = vsyncmov [#allocation10 + $0x3] }
 0xbfa   :  { %s5410_s12 = vpop.sfrf %5409 }
 0xbfb   :  { %p6361_p3 = scmp.ne.s32.totalorder %s5410_s12, 0 }
 0xbfd   :  { %5414 = shalt.err (%p6361_p3)  }

</bundles_post_ra>
